<compile_context>
chip_gen: v7x
topology: tpu7x:2x2x1
jax: 0.10.0
libtpu: 0.0.40
codegen_flags: <defaults>
</compile_context>

<pallas_src>
import functools

import jax
import jax.numpy as jnp
from jax.experimental import pallas as pl
from jax.experimental.pallas import tpu as pltpu

LANES = 128  # channel padding target (TPU lane width)


# ----------------------------------------------------------------------------
# Sizing helpers
# ----------------------------------------------------------------------------
def _vmem_limit_bytes():
    """Generation-aware scoped-VMEM limit (v5e/v6e: 128 MiB phys, v7x: 64 MiB)."""
    try:
        phys = int(pltpu.get_tpu_info().vmem_capacity_bytes)
    except Exception:
        return 48 * 1024 * 1024
    return int(min(96 * 1024 * 1024, max(32 * 1024 * 1024, phys - 16 * 1024 * 1024)))


def _pick_row_tile(H, W, cp, vmem_limit):
    """Largest divisor of H whose per-step working set fits the VMEM budget."""
    budget = min(vmem_limit // 3, 12 * 1024 * 1024)
    best = 1
    for th in range(1, H + 1):
        if H % th:
            continue
        if (th * W) % 8:
            continue
        in_b = 2 * 2 * (th + 2) * (W + 2) * cp * 2      # 2 samples x double buffer, bf16
        out_b = 2 * 2 * th * W * cp * 2                 # 2 samples x double buffer, bf16
        tmp_b = 3 * th * W * cp * 4                     # in-kernel f32 temporaries
        if in_b + out_b + tmp_b <= budget:
            best = th
    return best


def _sum_to_1x1(x):
    return jnp.sum(jnp.sum(x, axis=1, keepdims=True), axis=0, keepdims=True)


# ----------------------------------------------------------------------------
# Fused per-layer kernel: conv3x3 + ReLU + feature L1 + grams (+ pixel L1)
# ----------------------------------------------------------------------------
def _make_layer_kernel(TH, H, W, c_out_real, with_pixel):
    """Grid = (pair n, row tile t).  Refs (leading singleton dims squeezed):

      xin_ref, xtgt_ref : (TH+2, W+2, Cp) bf16   halo row tile of the layer input
      w_ref             : (9, Cp, Cp)    bf16    packed taps  w9[dy*3+dx, ci, co]
      b_ref             : (1, Cp)        f32
      feat_ref          : (2, TH, W, Cp) bf16    conv+ReLU tiles for {input, target}
      pix_ref/fl1_ref/gl1_ref : (1, 1)   f32     per-pair partial sums
      pacc, facc        : (8, Cp)   f32  scratch (pixel / feature |diff|)
      gin, gtgt         : (Cp, Cp)  f32  scratch (un-normalized gram accumulators)
    """
    L = TH * W
    assert L % 8 == 0, "row_tile * W must be a multiple of 8"
    inv_gram = 1.0 / float(c_out_real * H * W)

    def kernel(xin_ref, xtgt_ref, w_ref, b_ref,
               feat_ref, pix_ref, fl1_ref, gl1_ref,
               pacc, facc, gin, gtgt):
        t = pl.program_id(1)
        cp = w_ref.shape[-1]

        @pl.when(t == 0)
        def _():
            pacc[...] = jnp.zeros_like(pacc)
            facc[...] = jnp.zeros_like(facc)
            gin[...] = jnp.zeros_like(gin)
            gtgt[...] = jnp.zeros_like(gtgt)

        def conv(x_ref):
            acc = jnp.zeros((L, cp), jnp.float32)
            # 9 static window slices straight off the ref (no full-plane load).
            # W % 8 == 0 keeps the (TH, W) -> (L,) merge a pure relabel.
            for dy in range(3):
                for dx in range(3):
                    xs = x_ref[dy:dy + TH, dx:dx + W, :].reshape(L, cp)
                    acc = acc + jnp.dot(xs, w_ref[3 * dy + dx],
                                        preferred_element_type=jnp.float32)
            return jnp.maximum(acc + b_ref[...], 0.0)        # (L, Cp) f32

        f_in = conv(xin_ref)
        f_tgt = conv(xtgt_ref)

        # Conv outputs for the next layer: bf16, lane-dense (Cp == 128) stores.
        feat_ref[0] = f_in.reshape(TH, W, cp).astype(feat_ref.dtype)
        feat_ref[1] = f_tgt.reshape(TH, W, cp).astype(feat_ref.dtype)

        # Feature L1 partial (padded channels are zero in both -> contribute 0).
        facc[...] += jnp.abs(f_in - f_tgt).reshape(-1, 8, cp).sum(axis=0)

        if with_pixel:
            # Pixel L1 of the original inputs: interior rows/cols of the tile.
            din = (xin_ref[1:1 + TH, 1:1 + W, :].astype(jnp.float32)
                   - xtgt_ref[1:1 + TH, 1:1 + W, :].astype(jnp.float32))
            pacc[...] += jnp.abs(din).reshape(-1, 8, cp).sum(axis=0)

        # Row-tiled gram accumulation: contract only this tile's L rows per
        # matmul (bounds any transpose / K length), bf16 operands, f32 acc.
        dims = (((0,), (0,)), ((), ()))
        fb_in = f_in.astype(jnp.bfloat16)
        fb_tgt = f_tgt.astype(jnp.bfloat16)
        gin[...] += jax.lax.dot_general(fb_in, fb_in, dims,
                                        preferred_element_type=jnp.float32)
        gtgt[...] += jax.lax.dot_general(fb_tgt, fb_tgt, dims,
                                         preferred_element_type=jnp.float32)

        @pl.when(t == pl.num_programs(1) - 1)
        def _():
            if with_pixel:
                pix_ref[...] = _sum_to_1x1(pacc[...])
            else:
                pix_ref[...] = jnp.zeros_like(pix_ref)
            fl1_ref[...] = _sum_to_1x1(facc[...])
            gd = jnp.abs(gin[...] - gtgt[...]) * inv_gram
            gl1_ref[...] = _sum_to_1x1(gd)

    return kernel


def _halo_index_map(sample):
    def imap(n, t):
        return (n, sample, t, 0, 0, 0)
    return imap


def fused_conv_loss_layer(feat_pair, w9, bp, c_out_real, *, row_tile, with_pixel,
                          vmem_limit):
    """feat_pair: (N, 2, H, W, Cp) bf16, dim 1 = {input, target}."""
    N, two, H, W, Cp = feat_pair.shape
    assert two == 2
    TH = row_tile
    assert H % TH == 0 and (TH * W) % 8 == 0
    nT = H // TH

    # Single zero-padded slab + halo row-tile gather (duplication is only the
    # 2 halo rows per tile; replaces the old 3x column-shift stack).
    xp = jnp.pad(feat_pair, ((0, 0), (0, 0), (1, 1), (1, 1), (0, 0)))
    if nT == 1:
        tiles = xp[:, :, None]
    else:
        tiles = jnp.stack(
            [xp[:, :, t * TH:t * TH + TH + 2] for t in range(nT)], axis=2)
    # tiles: (N, 2, nT, TH+2, W+2, Cp)

    kernel = _make_layer_kernel(TH, H, W, c_out_real, with_pixel)

    feats, pix, fl1, gl1 = pl.pallas_call(
        kernel,
        out_shape=(
            jax.ShapeDtypeStruct((N, 2, H, W, Cp), jnp.bfloat16),
            jax.ShapeDtypeStruct((N, 1, 1), jnp.float32),
            jax.ShapeDtypeStruct((N, 1, 1), jnp.float32),
            jax.ShapeDtypeStruct((N, 1, 1), jnp.float32),
        ),
        grid=(N, nT),
        in_specs=[
            pl.BlockSpec((None, None, None, TH + 2, W + 2, Cp), _halo_index_map(0)),
            pl.BlockSpec((None, None, None, TH + 2, W + 2, Cp), _halo_index_map(1)),
            pl.BlockSpec((9, Cp, Cp), lambda n, t: (0, 0, 0)),
            pl.BlockSpec((1, Cp), lambda n, t: (0, 0)),
        ],
        out_specs=(
            pl.BlockSpec((None, 2, TH, W, Cp), lambda n, t: (n, 0, t, 0, 0)),
            pl.BlockSpec((None, 1, 1), lambda n, t: (n, 0, 0)),
            pl.BlockSpec((None, 1, 1), lambda n, t: (n, 0, 0)),
            pl.BlockSpec((None, 1, 1), lambda n, t: (n, 0, 0)),
        ),
        scratch_shapes=[
            pltpu.VMEM((8, Cp), jnp.float32),     # pixel L1 partial
            pltpu.VMEM((8, Cp), jnp.float32),     # feature L1 partial
            pltpu.VMEM((Cp, Cp), jnp.float32),    # gram(input) accumulator
            pltpu.VMEM((Cp, Cp), jnp.float32),    # gram(target) accumulator
        ],
        compiler_params=pltpu.CompilerParams(
            dimension_semantics=("parallel", "arbitrary"),
            vmem_limit_bytes=vmem_limit),
    )(tiles, tiles, w9, bp)
    return feats, pix, fl1, gl1


def _pack_conv_weights(w, b, cp_in, cp_out):
    """(Cout, Cin, 3, 3) torch-layout weights -> (9, Cp_in, Cp_out) bf16 + (1, Cp_out) f32."""
    cout, cin, kh, kw = w.shape
    assert kh == 3 and kw == 3 and cin <= cp_in and cout <= cp_out
    wt = jnp.transpose(w.astype(jnp.float32), (2, 3, 1, 0)).reshape(9, cin, cout)
    w9 = jnp.zeros((9, cp_in, cp_out), jnp.float32).at[:, :cin, :cout].set(wt)
    bp = jnp.zeros((1, cp_out), jnp.float32).at[0, :cout].set(b.astype(jnp.float32))
    return w9.astype(jnp.bfloat16), bp


# ----------------------------------------------------------------------------
# FeatureLoss
# ----------------------------------------------------------------------------
class FeatureLossPallas:
    """Mirror of the PyTorch FeatureLoss forward pass (m_feat = 3x3 conv+ReLU stack)."""

    def __init__(self, conv_params, layer_wgts, cp=LANES, row_tile=None):
        assert len(conv_params) == len(layer_wgts)
        self.wgts = [float(w) for w in layer_wgts]
        self.cp = cp
        self.row_tile = row_tile
        self.vmem_limit = _vmem_limit_bytes()
        self.layers = []
        for (w, b) in conv_params:
            cout = int(w.shape[0])
            w9, bp = _pack_conv_weights(w, b, cp, cp)
            self.layers.append((w9, bp, cout))
        n = len(layer_wgts)
        self.metric_names = (['pixel'] + [f'feat_{i}' for i in range(n)]
                             + [f'gram_{i}' for i in range(n)])

    def __call__(self, inp, tgt):
        N, C, H, W = inp.shape
        assert C <= self.cp
        TH = self.row_tile or _pick_row_tile(H, W, self.cp, self.vmem_limit)

        # (N, 2, H, W, Cp) bf16: channel-padded, lane-dense layout end to end.
        x = jnp.stack([inp, tgt], axis=1)                     # (N, 2, C, H, W)
        x = jnp.transpose(x, (0, 1, 3, 4, 2))                 # (N, 2, H, W, C)
        x = jnp.pad(x, ((0, 0),) * 4 + ((0, self.cp - C),))
        h = x.astype(jnp.bfloat16)

        pixel_loss = None
        feat_losses, gram_losses = [], []
        for li, ((w9, bp, cout), wgt) in enumerate(zip(self.layers, self.wgts)):
            h, pix, fl1, gl1 = fused_conv_loss_layer(
                h, w9, bp, cout, row_tile=TH, with_pixel=(li == 0),
                vmem_limit=self.vmem_limit)
            if li == 0:
                pixel_loss = jnp.sum(pix) / jnp.float32(N * C * H * W)
            feat_losses.append(jnp.sum(fl1) / jnp.float32(N * cout * H * W)
                               * jnp.float32(wgt))
            gram_losses.append(jnp.sum(gl1) / jnp.float32(N * cout * cout)
                               * jnp.float32(wgt ** 2 * 5000.0))

        losses = [pixel_loss] + feat_losses + gram_losses
        self.metrics = dict(zip(self.metric_names, losses))
        return functools.reduce(lambda a, b: a + b, losses)


# ----------------------------------------------------------------------------
# Pure-JAX reference (for validation only)
# ----------------------------------------------------------------------------
def _reference_loss(inp, tgt, params, wgts):
    hi = jax.lax.Precision.HIGHEST

    def conv(x, w, b):
        y = jax.lax.conv_general_dilated(
            x, w, window_strides=(1, 1), padding=((1, 1), (1, 1)),
            dimension_numbers=('NCHW', 'OIHW', 'NCHW'), precision=hi)
        return jnp.maximum(y + b.reshape(1, -1, 1, 1), 0.0)

    def feats(x):
        fs, h = [], x
        for w, b in params:
            h = conv(h, w, b)
            fs.append(h)
        return fs

    def gram(x):
        n, c, hh, ww = x.shape
        xm = x.reshape(n, c, hh * ww)
        return jnp.einsum('ncl,ndl->ncd', xm, xm, precision=hi) / (c * hh * ww)

    fi, fo = feats(inp), feats(tgt)
    losses = [jnp.mean(jnp.abs(inp - tgt))]
    losses += [jnp.mean(jnp.abs(a - b)) * w for a, b, w in zip(fi, fo, wgts)]
    losses += [jnp.mean(jnp.abs(gram(a) - gram(b))) * (w ** 2 * 5000.0)
               for a, b, w in zip(fi, fo, wgts)]
    return sum(losses)


# ----------------------------------------------------------------------------
# Main
# ----------------------------------------------------------------------------
if __name__ == "__main__":
    key = jax.random.PRNGKey(0)
    k_in, k_tgt, k_w1, k_w2 = jax.random.split(key, 4)

    # Small shapes: batch=2, channels=4, spatial=16x16 (NCHW, like PyTorch).
    N, C, H, W = 2, 4, 16, 16
    inp = jax.random.normal(k_in, (N, C, H, W), dtype=jnp.float32)
    tgt = jax.random.normal(k_tgt, (N, C, H, W), dtype=jnp.float32)

    # Deterministic synthetic m_feat: conv(4->8)+ReLU, conv(8->16)+ReLU.
    w1 = 0.1 * jax.random.normal(k_w1, (8, C, 3, 3), dtype=jnp.float32)
    b1 = jnp.zeros((8,), dtype=jnp.float32)
    w2 = 0.1 * jax.random.normal(k_w2, (16, 8, 3, 3), dtype=jnp.float32)
    b2 = jnp.zeros((16,), dtype=jnp.float32)

    # row_tile=8 -> two spatial tiles at H=16, exercising the cross-tile
    # gram / L1 accumulation path.
    loss_mod = FeatureLossPallas([(w1, b1), (w2, b2)], layer_wgts=[5.0, 15.0],
                                 row_tile=8)

    @jax.jit
    def forward(i, t):
        return loss_mod(i, t)

    out = forward(inp, tgt)
    jax.block_until_ready(out)

    ref = _reference_loss(inp, tgt, [(w1, b1), (w2, b2)], [5.0, 15.0])
    assert out.shape == () and jnp.isfinite(out)
    # bf16 matmul operands (with f32 accumulation) vs. f32 HIGHEST reference:
    # loosened tolerance accordingly.
    assert jnp.allclose(out, ref, rtol=5e-2, atol=2e-2), (out, ref)
    print("KERNEL_OK")
</pallas_src>

<mosaic_0001>
module attributes {stable_mosaic.version = 11 : i64} {
  func.func @kernel(%arg0: i32, %arg1: i32, %arg2: memref<1x1x1x10x18x128xbf16, #tpu.memory_space<vmem>>, %arg3: memref<1x1x1x10x18x128xbf16, #tpu.memory_space<vmem>>, %arg4: memref<9x128x128xbf16, #tpu.memory_space<vmem>>, %arg5: memref<1x128xf32, #tpu.memory_space<vmem>>, %arg6: memref<1x2x8x16x128xbf16, #tpu.memory_space<vmem>>, %arg7: memref<1x1x1xf32, #tpu.memory_space<vmem>>, %arg8: memref<1x1x1xf32, #tpu.memory_space<vmem>>, %arg9: memref<1x1x1xf32, #tpu.memory_space<vmem>>, %arg10: memref<8x128xf32, #tpu.memory_space<vmem>>, %arg11: memref<8x128xf32, #tpu.memory_space<vmem>>, %arg12: memref<128x128xf32, #tpu.memory_space<vmem>>, %arg13: memref<128x128xf32, #tpu.memory_space<vmem>>) attributes {dimension_semantics = [#tpu.dimension_semantics<parallel>, #tpu.dimension_semantics<arbitrary>], iteration_bounds = array<i64: 2, 2>, scalar_prefetch = 0 : i64, scratch_operands = 4 : i64, tpu.core_type = #tpu.core_type<tc>, window_params = [{transform_indices = @transform_0, window_bounds = array<i64: 1, 1, 1, 10, 18, 128>}, {transform_indices = @transform_1, window_bounds = array<i64: 1, 1, 1, 10, 18, 128>}, {pipeline_mode = #tpu.pipeline_mode<synchronous>, transform_indices = @transform_2, window_bounds = array<i64: 9, 128, 128>}, {pipeline_mode = #tpu.pipeline_mode<synchronous>, transform_indices = @transform_3, window_bounds = array<i64: 1, 128>}, {transform_indices = @transform_4, window_bounds = array<i64: 1, 2, 8, 16, 128>}, {transform_indices = @transform_5, window_bounds = array<i64: 1, 1, 1>}, {transform_indices = @transform_6, window_bounds = array<i64: 1, 1, 1>}, {transform_indices = @transform_7, window_bounds = array<i64: 1, 1, 1>}]} {
    %c0_i32 = arith.constant 0 : i32
    %0 = arith.cmpi eq, %arg1, %c0_i32 : i32
    %1 = arith.extui %0 : i1 to i32
    %c0_i32_0 = arith.constant 0 : i32
    %2 = arith.cmpi ne, %1, %c0_i32_0 : i32
    scf.if %2 {
      %cst_222 = arith.constant 0.000000e+00 : f32
      %184 = vector.broadcast %cst_222 : f32 to vector<8x128xf32>
      %c0_223 = arith.constant 0 : index
      %c0_224 = arith.constant 0 : index
      %185 = vector.load %arg10[%c0_223, %c0_224] : memref<8x128xf32, #tpu.memory_space<vmem>>, vector<8x128xf32>
      tpu.vector_store %arg10[%c0_223, %c0_224], %184 {strides = array<i32>} : memref<8x128xf32, #tpu.memory_space<vmem>>, vector<8x128xf32>,
      %cst_225 = arith.constant 0.000000e+00 : f32
      %186 = vector.broadcast %cst_225 : f32 to vector<8x128xf32>
      %c0_226 = arith.constant 0 : index
      %c0_227 = arith.constant 0 : index
      %187 = vector.load %arg11[%c0_226, %c0_227] : memref<8x128xf32, #tpu.memory_space<vmem>>, vector<8x128xf32>
      tpu.vector_store %arg11[%c0_226, %c0_227], %186 {strides = array<i32>} : memref<8x128xf32, #tpu.memory_space<vmem>>, vector<8x128xf32>,
      %cst_228 = arith.constant 0.000000e+00 : f32
      %188 = vector.broadcast %cst_228 : f32 to vector<128x128xf32>
      %c0_229 = arith.constant 0 : index
      %c0_230 = arith.constant 0 : index
      %189 = vector.load %arg12[%c0_229, %c0_230] : memref<128x128xf32, #tpu.memory_space<vmem>>, vector<128x128xf32>
      tpu.vector_store %arg12[%c0_229, %c0_230], %188 {strides = array<i32>} : memref<128x128xf32, #tpu.memory_space<vmem>>, vector<128x128xf32>,
      %cst_231 = arith.constant 0.000000e+00 : f32
      %190 = vector.broadcast %cst_231 : f32 to vector<128x128xf32>
      %c0_232 = arith.constant 0 : index
      %c0_233 = arith.constant 0 : index
      %191 = vector.load %arg13[%c0_232, %c0_233] : memref<128x128xf32, #tpu.memory_space<vmem>>, vector<128x128xf32>
      tpu.vector_store %arg13[%c0_232, %c0_233], %190 {strides = array<i32>} : memref<128x128xf32, #tpu.memory_space<vmem>>, vector<128x128xf32>,
    } else {
    }
    %cst = arith.constant 0.000000e+00 : f32
    %3 = vector.broadcast %cst : f32 to vector<128x128xf32>
    %c0 = arith.constant 0 : index
    %c0_1 = arith.constant 0 : index
    %c0_2 = arith.constant 0 : index
    %c0_3 = arith.constant 0 : index
    %c0_4 = arith.constant 0 : index
    %c0_5 = arith.constant 0 : index
    %4 = vector.load %arg2[%c0, %c0_1, %c0_2, %c0_3, %c0_4, %c0_5] : memref<1x1x1x10x18x128xbf16, #tpu.memory_space<vmem>>, vector<1x1x1x8x16x128xbf16>
    %5 = vector.shape_cast %4 : vector<1x1x1x8x16x128xbf16> to vector<8x16x128xbf16>
    %6 = vector.shape_cast %5 : vector<8x16x128xbf16> to vector<128x128xbf16>
    %c0_6 = arith.constant 0 : index
    %c0_7 = arith.constant 0 : index
    %c0_8 = arith.constant 0 : index
    %7 = vector.load %arg4[%c0_6, %c0_7, %c0_8] : memref<9x128x128xbf16, #tpu.memory_space<vmem>>, vector<1x128x128xbf16>
    %8 = vector.shape_cast %7 : vector<1x128x128xbf16> to vector<128x128xbf16>
    %cst_9 = arith.constant dense<0.000000e+00> : vector<128x128xf32>
    %9 = tpu.matmul %6, %8, %cst_9 {dimension_numbers = #tpu.dot_dimension_numbers<[1], [0], [0], [1], [0, 0, 1, 1], [], []>} : vector<128x128xbf16>, vector<128x128xbf16>, vector<128x128xf32> -> vector<128x128xf32>
    %10 = arith.addf %3, %9 : vector<128x128xf32>
    %c0_10 = arith.constant 0 : index
    %c0_11 = arith.constant 0 : index
    %c0_12 = arith.constant 0 : index
    %c0_13 = arith.constant 0 : index
    %c1 = arith.constant 1 : index
    %c0_14 = arith.constant 0 : index
    %11 = vector.load %arg2[%c0_10, %c0_11, %c0_12, %c0_13, %c1, %c0_14] : memref<1x1x1x10x18x128xbf16, #tpu.memory_space<vmem>>, vector<1x1x1x8x16x128xbf16>
    %12 = vector.shape_cast %11 : vector<1x1x1x8x16x128xbf16> to vector<8x16x128xbf16>
    %13 = vector.shape_cast %12 : vector<8x16x128xbf16> to vector<128x128xbf16>
    %c1_15 = arith.constant 1 : index
    %c0_16 = arith.constant 0 : index
    %c0_17 = arith.constant 0 : index
    %14 = vector.load %arg4[%c1_15, %c0_16, %c0_17] : memref<9x128x128xbf16, #tpu.memory_space<vmem>>, vector<1x128x128xbf16>
    %15 = vector.shape_cast %14 : vector<1x128x128xbf16> to vector<128x128xbf16>
    %cst_18 = arith.constant dense<0.000000e+00> : vector<128x128xf32>
    %16 = tpu.matmul %13, %15, %cst_18 {dimension_numbers = #tpu.dot_dimension_numbers<[1], [0], [0], [1], [0, 0, 1, 1], [], []>} : vector<128x128xbf16>, vector<128x128xbf16>, vector<128x128xf32> -> vector<128x128xf32>
    %17 = arith.addf %10, %16 : vector<128x128xf32>
    %c0_19 = arith.constant 0 : index
    %c0_20 = arith.constant 0 : index
    %c0_21 = arith.constant 0 : index
    %c0_22 = arith.constant 0 : index
    %c2 = arith.constant 2 : index
    %c0_23 = arith.constant 0 : index
    %18 = vector.load %arg2[%c0_19, %c0_20, %c0_21, %c0_22, %c2, %c0_23] : memref<1x1x1x10x18x128xbf16, #tpu.memory_space<vmem>>, vector<1x1x1x8x16x128xbf16>
    %19 = vector.shape_cast %18 : vector<1x1x1x8x16x128xbf16> to vector<8x16x128xbf16>
    %20 = vector.shape_cast %19 : vector<8x16x128xbf16> to vector<128x128xbf16>
    %c2_24 = arith.constant 2 : index
    %c0_25 = arith.constant 0 : index
    %c0_26 = arith.constant 0 : index
    %21 = vector.load %arg4[%c2_24, %c0_25, %c0_26] : memref<9x128x128xbf16, #tpu.memory_space<vmem>>, vector<1x128x128xbf16>
    %22 = vector.shape_cast %21 : vector<1x128x128xbf16> to vector<128x128xbf16>
    %cst_27 = arith.constant dense<0.000000e+00> : vector<128x128xf32>
    %23 = tpu.matmul %20, %22, %cst_27 {dimension_numbers = #tpu.dot_dimension_numbers<[1], [0], [0], [1], [0, 0, 1, 1], [], []>} : vector<128x128xbf16>, vector<128x128xbf16>, vector<128x128xf32> -> vector<128x128xf32>
    %24 = arith.addf %17, %23 : vector<128x128xf32>
    %c0_28 = arith.constant 0 : index
    %c0_29 = arith.constant 0 : index
    %c0_30 = arith.constant 0 : index
    %c1_31 = arith.constant 1 : index
    %c0_32 = arith.constant 0 : index
    %c0_33 = arith.constant 0 : index
    %25 = vector.load %arg2[%c0_28, %c0_29, %c0_30, %c1_31, %c0_32, %c0_33] : memref<1x1x1x10x18x128xbf16, #tpu.memory_space<vmem>>, vector<1x1x1x8x16x128xbf16>
    %26 = vector.shape_cast %25 : vector<1x1x1x8x16x128xbf16> to vector<8x16x128xbf16>
    %27 = vector.shape_cast %26 : vector<8x16x128xbf16> to vector<128x128xbf16>
    %c3 = arith.constant 3 : index
    %c0_34 = arith.constant 0 : index
    %c0_35 = arith.constant 0 : index
    %28 = vector.load %arg4[%c3, %c0_34, %c0_35] : memref<9x128x128xbf16, #tpu.memory_space<vmem>>, vector<1x128x128xbf16>
    %29 = vector.shape_cast %28 : vector<1x128x128xbf16> to vector<128x128xbf16>
    %cst_36 = arith.constant dense<0.000000e+00> : vector<128x128xf32>
    %30 = tpu.matmul %27, %29, %cst_36 {dimension_numbers = #tpu.dot_dimension_numbers<[1], [0], [0], [1], [0, 0, 1, 1], [], []>} : vector<128x128xbf16>, vector<128x128xbf16>, vector<128x128xf32> -> vector<128x128xf32>
    %31 = arith.addf %24, %30 : vector<128x128xf32>
    %c0_37 = arith.constant 0 : index
    %c0_38 = arith.constant 0 : index
    %c0_39 = arith.constant 0 : index
    %c1_40 = arith.constant 1 : index
    %c1_41 = arith.constant 1 : index
    %c0_42 = arith.constant 0 : index
    %32 = vector.load %arg2[%c0_37, %c0_38, %c0_39, %c1_40, %c1_41, %c0_42] : memref<1x1x1x10x18x128xbf16, #tpu.memory_space<vmem>>, vector<1x1x1x8x16x128xbf16>
    %33 = vector.shape_cast %32 : vector<1x1x1x8x16x128xbf16> to vector<8x16x128xbf16>
    %34 = vector.shape_cast %33 : vector<8x16x128xbf16> to vector<128x128xbf16>
    %c4 = arith.constant 4 : index
    %c0_43 = arith.constant 0 : index
    %c0_44 = arith.constant 0 : index
    %35 = vector.load %arg4[%c4, %c0_43, %c0_44] : memref<9x128x128xbf16, #tpu.memory_space<vmem>>, vector<1x128x128xbf16>
    %36 = vector.shape_cast %35 : vector<1x128x128xbf16> to vector<128x128xbf16>
    %cst_45 = arith.constant dense<0.000000e+00> : vector<128x128xf32>
    %37 = tpu.matmul %34, %36, %cst_45 {dimension_numbers = #tpu.dot_dimension_numbers<[1], [0], [0], [1], [0, 0, 1, 1], [], []>} : vector<128x128xbf16>, vector<128x128xbf16>, vector<128x128xf32> -> vector<128x128xf32>
    %38 = arith.addf %31, %37 : vector<128x128xf32>
    %c0_46 = arith.constant 0 : index
    %c0_47 = arith.constant 0 : index
    %c0_48 = arith.constant 0 : index
    %c1_49 = arith.constant 1 : index
    %c2_50 = arith.constant 2 : index
    %c0_51 = arith.constant 0 : index
    %39 = vector.load %arg2[%c0_46, %c0_47, %c0_48, %c1_49, %c2_50, %c0_51] : memref<1x1x1x10x18x128xbf16, #tpu.memory_space<vmem>>, vector<1x1x1x8x16x128xbf16>
    %40 = vector.shape_cast %39 : vector<1x1x1x8x16x128xbf16> to vector<8x16x128xbf16>
    %41 = vector.shape_cast %40 : vector<8x16x128xbf16> to vector<128x128xbf16>
    %c5 = arith.constant 5 : index
    %c0_52 = arith.constant 0 : index
    %c0_53 = arith.constant 0 : index
    %42 = vector.load %arg4[%c5, %c0_52, %c0_53] : memref<9x128x128xbf16, #tpu.memory_space<vmem>>, vector<1x128x128xbf16>
    %43 = vector.shape_cast %42 : vector<1x128x128xbf16> to vector<128x128xbf16>
    %cst_54 = arith.constant dense<0.000000e+00> : vector<128x128xf32>
    %44 = tpu.matmul %41, %43, %cst_54 {dimension_numbers = #tpu.dot_dimension_numbers<[1], [0], [0], [1], [0, 0, 1, 1], [], []>} : vector<128x128xbf16>, vector<128x128xbf16>, vector<128x128xf32> -> vector<128x128xf32>
    %45 = arith.addf %38, %44 : vector<128x128xf32>
    %c0_55 = arith.constant 0 : index
    %c0_56 = arith.constant 0 : index
    %c0_57 = arith.constant 0 : index
    %c2_58 = arith.constant 2 : index
    %c0_59 = arith.constant 0 : index
    %c0_60 = arith.constant 0 : index
    %46 = vector.load %arg2[%c0_55, %c0_56, %c0_57, %c2_58, %c0_59, %c0_60] : memref<1x1x1x10x18x128xbf16, #tpu.memory_space<vmem>>, vector<1x1x1x8x16x128xbf16>
    %47 = vector.shape_cast %46 : vector<1x1x1x8x16x128xbf16> to vector<8x16x128xbf16>
    %48 = vector.shape_cast %47 : vector<8x16x128xbf16> to vector<128x128xbf16>
    %c6 = arith.constant 6 : index
    %c0_61 = arith.constant 0 : index
    %c0_62 = arith.constant 0 : index
    %49 = vector.load %arg4[%c6, %c0_61, %c0_62] : memref<9x128x128xbf16, #tpu.memory_space<vmem>>, vector<1x128x128xbf16>
    %50 = vector.shape_cast %49 : vector<1x128x128xbf16> to vector<128x128xbf16>
    %cst_63 = arith.constant dense<0.000000e+00> : vector<128x128xf32>
    %51 = tpu.matmul %48, %50, %cst_63 {dimension_numbers = #tpu.dot_dimension_numbers<[1], [0], [0], [1], [0, 0, 1, 1], [], []>} : vector<128x128xbf16>, vector<128x128xbf16>, vector<128x128xf32> -> vector<128x128xf32>
    %52 = arith.addf %45, %51 : vector<128x128xf32>
    %c0_64 = arith.constant 0 : index
    %c0_65 = arith.constant 0 : index
    %c0_66 = arith.constant 0 : index
    %c2_67 = arith.constant 2 : index
    %c1_68 = arith.constant 1 : index
    %c0_69 = arith.constant 0 : index
    %53 = vector.load %arg2[%c0_64, %c0_65, %c0_66, %c2_67, %c1_68, %c0_69] : memref<1x1x1x10x18x128xbf16, #tpu.memory_space<vmem>>, vector<1x1x1x8x16x128xbf16>
    %54 = vector.shape_cast %53 : vector<1x1x1x8x16x128xbf16> to vector<8x16x128xbf16>
    %55 = vector.shape_cast %54 : vector<8x16x128xbf16> to vector<128x128xbf16>
    %c7 = arith.constant 7 : index
    %c0_70 = arith.constant 0 : index
    %c0_71 = arith.constant 0 : index
    %56 = vector.load %arg4[%c7, %c0_70, %c0_71] : memref<9x128x128xbf16, #tpu.memory_space<vmem>>, vector<1x128x128xbf16>
    %57 = vector.shape_cast %56 : vector<1x128x128xbf16> to vector<128x128xbf16>
    %cst_72 = arith.constant dense<0.000000e+00> : vector<128x128xf32>
    %58 = tpu.matmul %55, %57, %cst_72 {dimension_numbers = #tpu.dot_dimension_numbers<[1], [0], [0], [1], [0, 0, 1, 1], [], []>} : vector<128x128xbf16>, vector<128x128xbf16>, vector<128x128xf32> -> vector<128x128xf32>
    %59 = arith.addf %52, %58 : vector<128x128xf32>
    %c0_73 = arith.constant 0 : index
    %c0_74 = arith.constant 0 : index
    %c0_75 = arith.constant 0 : index
    %c2_76 = arith.constant 2 : index
    %c2_77 = arith.constant 2 : index
    %c0_78 = arith.constant 0 : index
    %60 = vector.load %arg2[%c0_73, %c0_74, %c0_75, %c2_76, %c2_77, %c0_78] : memref<1x1x1x10x18x128xbf16, #tpu.memory_space<vmem>>, vector<1x1x1x8x16x128xbf16>
    %61 = vector.shape_cast %60 : vector<1x1x1x8x16x128xbf16> to vector<8x16x128xbf16>
    %62 = vector.shape_cast %61 : vector<8x16x128xbf16> to vector<128x128xbf16>
    %c8 = arith.constant 8 : index
    %c0_79 = arith.constant 0 : index
    %c0_80 = arith.constant 0 : index
    %63 = vector.load %arg4[%c8, %c0_79, %c0_80] : memref<9x128x128xbf16, #tpu.memory_space<vmem>>, vector<1x128x128xbf16>
    %64 = vector.shape_cast %63 : vector<1x128x128xbf16> to vector<128x128xbf16>
    %cst_81 = arith.constant dense<0.000000e+00> : vector<128x128xf32>
    %65 = tpu.matmul %62, %64, %cst_81 {dimension_numbers = #tpu.dot_dimension_numbers<[1], [0], [0], [1], [0, 0, 1, 1], [], []>} : vector<128x128xbf16>, vector<128x128xbf16>, vector<128x128xf32> -> vector<128x128xf32>
    %66 = arith.addf %59, %65 : vector<128x128xf32>
    %c0_82 = arith.constant 0 : index
    %c0_83 = arith.constant 0 : index
    %67 = vector.load %arg5[%c0_82, %c0_83] : memref<1x128xf32, #tpu.memory_space<vmem>>, vector<1x128xf32>
    %68 = vector.broadcast %67 : vector<1x128xf32> to vector<128x128xf32>
    %69 = arith.addf %66, %68 : vector<128x128xf32>
    %cst_84 = arith.constant 0.000000e+00 : f32
    %70 = vector.broadcast %cst_84 : f32 to vector<128x128xf32>
    %71 = arith.maximumf %69, %70 : vector<128x128xf32>
    %cst_85 = arith.constant 0.000000e+00 : f32
    %72 = vector.broadcast %cst_85 : f32 to vector<128x128xf32>
    %c0_86 = arith.constant 0 : index
    %c0_87 = arith.constant 0 : index
    %c0_88 = arith.constant 0 : index
    %c0_89 = arith.constant 0 : index
    %c0_90 = arith.constant 0 : index
    %c0_91 = arith.constant 0 : index
    %73 = vector.load %arg3[%c0_86, %c0_87, %c0_88, %c0_89, %c0_90, %c0_91] : memref<1x1x1x10x18x128xbf16, #tpu.memory_space<vmem>>, vector<1x1x1x8x16x128xbf16>
    %74 = vector.shape_cast %73 : vector<1x1x1x8x16x128xbf16> to vector<8x16x128xbf16>
    %75 = vector.shape_cast %74 : vector<8x16x128xbf16> to vector<128x128xbf16>
    %c0_92 = arith.constant 0 : index
    %c0_93 = arith.constant 0 : index
    %c0_94 = arith.constant 0 : index
    %76 = vector.load %arg4[%c0_92, %c0_93, %c0_94] : memref<9x128x128xbf16, #tpu.memory_space<vmem>>, vector<1x128x128xbf16>
    %77 = vector.shape_cast %76 : vector<1x128x128xbf16> to vector<128x128xbf16>
    %cst_95 = arith.constant dense<0.000000e+00> : vector<128x128xf32>
    %78 = tpu.matmul %75, %77, %cst_95 {dimension_numbers = #tpu.dot_dimension_numbers<[1], [0], [0], [1], [0, 0, 1, 1], [], []>} : vector<128x128xbf16>, vector<128x128xbf16>, vector<128x128xf32> -> vector<128x128xf32>
    %79 = arith.addf %72, %78 : vector<128x128xf32>
    %c0_96 = arith.constant 0 : index
    %c0_97 = arith.constant 0 : index
    %c0_98 = arith.constant 0 : index
    %c0_99 = arith.constant 0 : index
    %c1_100 = arith.constant 1 : index
    %c0_101 = arith.constant 0 : index
    %80 = vector.load %arg3[%c0_96, %c0_97, %c0_98, %c0_99, %c1_100, %c0_101] : memref<1x1x1x10x18x128xbf16, #tpu.memory_space<vmem>>, vector<1x1x1x8x16x128xbf16>
    %81 = vector.shape_cast %80 : vector<1x1x1x8x16x128xbf16> to vector<8x16x128xbf16>
    %82 = vector.shape_cast %81 : vector<8x16x128xbf16> to vector<128x128xbf16>
    %c1_102 = arith.constant 1 : index
    %c0_103 = arith.constant 0 : index
    %c0_104 = arith.constant 0 : index
    %83 = vector.load %arg4[%c1_102, %c0_103, %c0_104] : memref<9x128x128xbf16, #tpu.memory_space<vmem>>, vector<1x128x128xbf16>
    %84 = vector.shape_cast %83 : vector<1x128x128xbf16> to vector<128x128xbf16>
    %cst_105 = arith.constant dense<0.000000e+00> : vector<128x128xf32>
    %85 = tpu.matmul %82, %84, %cst_105 {dimension_numbers = #tpu.dot_dimension_numbers<[1], [0], [0], [1], [0, 0, 1, 1], [], []>} : vector<128x128xbf16>, vector<128x128xbf16>, vector<128x128xf32> -> vector<128x128xf32>
    %86 = arith.addf %79, %85 : vector<128x128xf32>
    %c0_106 = arith.constant 0 : index
    %c0_107 = arith.constant 0 : index
    %c0_108 = arith.constant 0 : index
    %c0_109 = arith.constant 0 : index
    %c2_110 = arith.constant 2 : index
    %c0_111 = arith.constant 0 : index
    %87 = vector.load %arg3[%c0_106, %c0_107, %c0_108, %c0_109, %c2_110, %c0_111] : memref<1x1x1x10x18x128xbf16, #tpu.memory_space<vmem>>, vector<1x1x1x8x16x128xbf16>
    %88 = vector.shape_cast %87 : vector<1x1x1x8x16x128xbf16> to vector<8x16x128xbf16>
    %89 = vector.shape_cast %88 : vector<8x16x128xbf16> to vector<128x128xbf16>
    %c2_112 = arith.constant 2 : index
    %c0_113 = arith.constant 0 : index
    %c0_114 = arith.constant 0 : index
    %90 = vector.load %arg4[%c2_112, %c0_113, %c0_114] : memref<9x128x128xbf16, #tpu.memory_space<vmem>>, vector<1x128x128xbf16>
    %91 = vector.shape_cast %90 : vector<1x128x128xbf16> to vector<128x128xbf16>
    %cst_115 = arith.constant dense<0.000000e+00> : vector<128x128xf32>
    %92 = tpu.matmul %89, %91, %cst_115 {dimension_numbers = #tpu.dot_dimension_numbers<[1], [0], [0], [1], [0, 0, 1, 1], [], []>} : vector<128x128xbf16>, vector<128x128xbf16>, vector<128x128xf32> -> vector<128x128xf32>
    %93 = arith.addf %86, %92 : vector<128x128xf32>
    %c0_116 = arith.constant 0 : index
    %c0_117 = arith.constant 0 : index
    %c0_118 = arith.constant 0 : index
    %c1_119 = arith.constant 1 : index
    %c0_120 = arith.constant 0 : index
    %c0_121 = arith.constant 0 : index
    %94 = vector.load %arg3[%c0_116, %c0_117, %c0_118, %c1_119, %c0_120, %c0_121] : memref<1x1x1x10x18x128xbf16, #tpu.memory_space<vmem>>, vector<1x1x1x8x16x128xbf16>
    %95 = vector.shape_cast %94 : vector<1x1x1x8x16x128xbf16> to vector<8x16x128xbf16>
    %96 = vector.shape_cast %95 : vector<8x16x128xbf16> to vector<128x128xbf16>
    %c3_122 = arith.constant 3 : index
    %c0_123 = arith.constant 0 : index
    %c0_124 = arith.constant 0 : index
    %97 = vector.load %arg4[%c3_122, %c0_123, %c0_124] : memref<9x128x128xbf16, #tpu.memory_space<vmem>>, vector<1x128x128xbf16>
    %98 = vector.shape_cast %97 : vector<1x128x128xbf16> to vector<128x128xbf16>
    %cst_125 = arith.constant dense<0.000000e+00> : vector<128x128xf32>
    %99 = tpu.matmul %96, %98, %cst_125 {dimension_numbers = #tpu.dot_dimension_numbers<[1], [0], [0], [1], [0, 0, 1, 1], [], []>} : vector<128x128xbf16>, vector<128x128xbf16>, vector<128x128xf32> -> vector<128x128xf32>
    %100 = arith.addf %93, %99 : vector<128x128xf32>
    %c0_126 = arith.constant 0 : index
    %c0_127 = arith.constant 0 : index
    %c0_128 = arith.constant 0 : index
    %c1_129 = arith.constant 1 : index
    %c1_130 = arith.constant 1 : index
    %c0_131 = arith.constant 0 : index
    %101 = vector.load %arg3[%c0_126, %c0_127, %c0_128, %c1_129, %c1_130, %c0_131] : memref<1x1x1x10x18x128xbf16, #tpu.memory_space<vmem>>, vector<1x1x1x8x16x128xbf16>
    %102 = vector.shape_cast %101 : vector<1x1x1x8x16x128xbf16> to vector<8x16x128xbf16>
    %103 = vector.shape_cast %102 : vector<8x16x128xbf16> to vector<128x128xbf16>
    %c4_132 = arith.constant 4 : index
    %c0_133 = arith.constant 0 : index
    %c0_134 = arith.constant 0 : index
    %104 = vector.load %arg4[%c4_132, %c0_133, %c0_134] : memref<9x128x128xbf16, #tpu.memory_space<vmem>>, vector<1x128x128xbf16>
    %105 = vector.shape_cast %104 : vector<1x128x128xbf16> to vector<128x128xbf16>
    %cst_135 = arith.constant dense<0.000000e+00> : vector<128x128xf32>
    %106 = tpu.matmul %103, %105, %cst_135 {dimension_numbers = #tpu.dot_dimension_numbers<[1], [0], [0], [1], [0, 0, 1, 1], [], []>} : vector<128x128xbf16>, vector<128x128xbf16>, vector<128x128xf32> -> vector<128x128xf32>
    %107 = arith.addf %100, %106 : vector<128x128xf32>
    %c0_136 = arith.constant 0 : index
    %c0_137 = arith.constant 0 : index
    %c0_138 = arith.constant 0 : index
    %c1_139 = arith.constant 1 : index
    %c2_140 = arith.constant 2 : index
    %c0_141 = arith.constant 0 : index
    %108 = vector.load %arg3[%c0_136, %c0_137, %c0_138, %c1_139, %c2_140, %c0_141] : memref<1x1x1x10x18x128xbf16, #tpu.memory_space<vmem>>, vector<1x1x1x8x16x128xbf16>
    %109 = vector.shape_cast %108 : vector<1x1x1x8x16x128xbf16> to vector<8x16x128xbf16>
    %110 = vector.shape_cast %109 : vector<8x16x128xbf16> to vector<128x128xbf16>
    %c5_142 = arith.constant 5 : index
    %c0_143 = arith.constant 0 : index
    %c0_144 = arith.constant 0 : index
    %111 = vector.load %arg4[%c5_142, %c0_143, %c0_144] : memref<9x128x128xbf16, #tpu.memory_space<vmem>>, vector<1x128x128xbf16>
    %112 = vector.shape_cast %111 : vector<1x128x128xbf16> to vector<128x128xbf16>
    %cst_145 = arith.constant dense<0.000000e+00> : vector<128x128xf32>
    %113 = tpu.matmul %110, %112, %cst_145 {dimension_numbers = #tpu.dot_dimension_numbers<[1], [0], [0], [1], [0, 0, 1, 1], [], []>} : vector<128x128xbf16>, vector<128x128xbf16>, vector<128x128xf32> -> vector<128x128xf32>
    %114 = arith.addf %107, %113 : vector<128x128xf32>
    %c0_146 = arith.constant 0 : index
    %c0_147 = arith.constant 0 : index
    %c0_148 = arith.constant 0 : index
    %c2_149 = arith.constant 2 : index
    %c0_150 = arith.constant 0 : index
    %c0_151 = arith.constant 0 : index
    %115 = vector.load %arg3[%c0_146, %c0_147, %c0_148, %c2_149, %c0_150, %c0_151] : memref<1x1x1x10x18x128xbf16, #tpu.memory_space<vmem>>, vector<1x1x1x8x16x128xbf16>
    %116 = vector.shape_cast %115 : vector<1x1x1x8x16x128xbf16> to vector<8x16x128xbf16>
    %117 = vector.shape_cast %116 : vector<8x16x128xbf16> to vector<128x128xbf16>
    %c6_152 = arith.constant 6 : index
    %c0_153 = arith.constant 0 : index
    %c0_154 = arith.constant 0 : index
    %118 = vector.load %arg4[%c6_152, %c0_153, %c0_154] : memref<9x128x128xbf16, #tpu.memory_space<vmem>>, vector<1x128x128xbf16>
    %119 = vector.shape_cast %118 : vector<1x128x128xbf16> to vector<128x128xbf16>
    %cst_155 = arith.constant dense<0.000000e+00> : vector<128x128xf32>
    %120 = tpu.matmul %117, %119, %cst_155 {dimension_numbers = #tpu.dot_dimension_numbers<[1], [0], [0], [1], [0, 0, 1, 1], [], []>} : vector<128x128xbf16>, vector<128x128xbf16>, vector<128x128xf32> -> vector<128x128xf32>
    %121 = arith.addf %114, %120 : vector<128x128xf32>
    %c0_156 = arith.constant 0 : index
    %c0_157 = arith.constant 0 : index
    %c0_158 = arith.constant 0 : index
    %c2_159 = arith.constant 2 : index
    %c1_160 = arith.constant 1 : index
    %c0_161 = arith.constant 0 : index
    %122 = vector.load %arg3[%c0_156, %c0_157, %c0_158, %c2_159, %c1_160, %c0_161] : memref<1x1x1x10x18x128xbf16, #tpu.memory_space<vmem>>, vector<1x1x1x8x16x128xbf16>
    %123 = vector.shape_cast %122 : vector<1x1x1x8x16x128xbf16> to vector<8x16x128xbf16>
    %124 = vector.shape_cast %123 : vector<8x16x128xbf16> to vector<128x128xbf16>
    %c7_162 = arith.constant 7 : index
    %c0_163 = arith.constant 0 : index
    %c0_164 = arith.constant 0 : index
    %125 = vector.load %arg4[%c7_162, %c0_163, %c0_164] : memref<9x128x128xbf16, #tpu.memory_space<vmem>>, vector<1x128x128xbf16>
    %126 = vector.shape_cast %125 : vector<1x128x128xbf16> to vector<128x128xbf16>
    %cst_165 = arith.constant dense<0.000000e+00> : vector<128x128xf32>
    %127 = tpu.matmul %124, %126, %cst_165 {dimension_numbers = #tpu.dot_dimension_numbers<[1], [0], [0], [1], [0, 0, 1, 1], [], []>} : vector<128x128xbf16>, vector<128x128xbf16>, vector<128x128xf32> -> vector<128x128xf32>
    %128 = arith.addf %121, %127 : vector<128x128xf32>
    %c0_166 = arith.constant 0 : index
    %c0_167 = arith.constant 0 : index
    %c0_168 = arith.constant 0 : index
    %c2_169 = arith.constant 2 : index
    %c2_170 = arith.constant 2 : index
    %c0_171 = arith.constant 0 : index
    %129 = vector.load %arg3[%c0_166, %c0_167, %c0_168, %c2_169, %c2_170, %c0_171] : memref<1x1x1x10x18x128xbf16, #tpu.memory_space<vmem>>, vector<1x1x1x8x16x128xbf16>
    %130 = vector.shape_cast %129 : vector<1x1x1x8x16x128xbf16> to vector<8x16x128xbf16>
    %131 = vector.shape_cast %130 : vector<8x16x128xbf16> to vector<128x128xbf16>
    %c8_172 = arith.constant 8 : index
    %c0_173 = arith.constant 0 : index
    %c0_174 = arith.constant 0 : index
    %132 = vector.load %arg4[%c8_172, %c0_173, %c0_174] : memref<9x128x128xbf16, #tpu.memory_space<vmem>>, vector<1x128x128xbf16>
    %133 = vector.shape_cast %132 : vector<1x128x128xbf16> to vector<128x128xbf16>
    %cst_175 = arith.constant dense<0.000000e+00> : vector<128x128xf32>
    %134 = tpu.matmul %131, %133, %cst_175 {dimension_numbers = #tpu.dot_dimension_numbers<[1], [0], [0], [1], [0, 0, 1, 1], [], []>} : vector<128x128xbf16>, vector<128x128xbf16>, vector<128x128xf32> -> vector<128x128xf32>
    %135 = arith.addf %128, %134 : vector<128x128xf32>
    %c0_176 = arith.constant 0 : index
    %c0_177 = arith.constant 0 : index
    %136 = vector.load %arg5[%c0_176, %c0_177] : memref<1x128xf32, #tpu.memory_space<vmem>>, vector<1x128xf32>
    %137 = vector.broadcast %136 : vector<1x128xf32> to vector<128x128xf32>
    %138 = arith.addf %135, %137 : vector<128x128xf32>
    %cst_178 = arith.constant 0.000000e+00 : f32
    %139 = vector.broadcast %cst_178 : f32 to vector<128x128xf32>
    %140 = arith.maximumf %138, %139 : vector<128x128xf32>
    %141 = vector.shape_cast %71 : vector<128x128xf32> to vector<8x16x128xf32>
    %142 = arith.truncf %141 : vector<8x16x128xf32> to vector<8x16x128xbf16>
    %c0_179 = arith.constant 0 : index
    %c0_180 = arith.constant 0 : index
    %c0_181 = arith.constant 0 : index
    %c0_182 = arith.constant 0 : index
    %c0_183 = arith.constant 0 : index
    %143 = vector.load %arg6[%c0_179, %c0_180, %c0_181, %c0_182, %c0_183] : memref<1x2x8x16x128xbf16, #tpu.memory_space<vmem>>, vector<1x1x8x16x128xbf16>
    %144 = vector.shape_cast %143 : vector<1x1x8x16x128xbf16> to vector<8x16x128xbf16>
    %145 = vector.shape_cast %142 : vector<8x16x128xbf16> to vector<1x1x8x16x128xbf16>
    tpu.vector_store %arg6[%c0_179, %c0_180, %c0_181, %c0_182, %c0_183], %145 {strides = array<i32>} : memref<1x2x8x16x128xbf16, #tpu.memory_space<vmem>>, vector<1x1x8x16x128xbf16>,
    %146 = vector.shape_cast %140 : vector<128x128xf32> to vector<8x16x128xf32>
    %147 = arith.truncf %146 : vector<8x16x128xf32> to vector<8x16x128xbf16>
    %c0_184 = arith.constant 0 : index
    %c1_185 = arith.constant 1 : index
    %c0_186 = arith.constant 0 : index
    %c0_187 = arith.constant 0 : index
    %c0_188 = arith.constant 0 : index
    %148 = vector.load %arg6[%c0_184, %c1_185, %c0_186, %c0_187, %c0_188] : memref<1x2x8x16x128xbf16, #tpu.memory_space<vmem>>, vector<1x1x8x16x128xbf16>
    %149 = vector.shape_cast %148 : vector<1x1x8x16x128xbf16> to vector<8x16x128xbf16>
    %150 = vector.shape_cast %147 : vector<8x16x128xbf16> to vector<1x1x8x16x128xbf16>
    tpu.vector_store %arg6[%c0_184, %c1_185, %c0_186, %c0_187, %c0_188], %150 {strides = array<i32>} : memref<1x2x8x16x128xbf16, #tpu.memory_space<vmem>>, vector<1x1x8x16x128xbf16>,
    %c0_189 = arith.constant 0 : index
    %c0_190 = arith.constant 0 : index
    %151 = vector.load %arg11[%c0_189, %c0_190] : memref<8x128xf32, #tpu.memory_space<vmem>>, vector<8x128xf32>
    %152 = arith.subf %71, %140 : vector<128x128xf32>
    %153 = math.absf %152 : vector<128x128xf32>
    %154 = vector.shape_cast %153 : vector<128x128xf32> to vector<16x8x128xf32>
    %cst_191 = arith.constant dense<0.000000e+00> : vector<8x128xf32>
    %155 = vector.multi_reduction <add>, %154, %cst_191 [0] : vector<16x8x128xf32> to vector<8x128xf32>
    %156 = arith.addf %151, %155 : vector<8x128xf32>
    %c0_192 = arith.constant 0 : index
    %c0_193 = arith.constant 0 : index
    %157 = vector.load %arg11[%c0_192, %c0_193] : memref<8x128xf32, #tpu.memory_space<vmem>>, vector<8x128xf32>
    tpu.vector_store %arg11[%c0_192, %c0_193], %156 {strides = array<i32>} : memref<8x128xf32, #tpu.memory_space<vmem>>, vector<8x128xf32>,
    %c0_194 = arith.constant 0 : index
    %c0_195 = arith.constant 0 : index
    %c0_196 = arith.constant 0 : index
    %c1_197 = arith.constant 1 : index
    %c1_198 = arith.constant 1 : index
    %c0_199 = arith.constant 0 : index
    %158 = vector.load %arg2[%c0_194, %c0_195, %c0_196, %c1_197, %c1_198, %c0_199] : memref<1x1x1x10x18x128xbf16, #tpu.memory_space<vmem>>, vector<1x1x1x8x16x128xbf16>
    %159 = vector.shape_cast %158 : vector<1x1x1x8x16x128xbf16> to vector<8x16x128xbf16>
    %160 = arith.extf %159 : vector<8x16x128xbf16> to vector<8x16x128xf32>
    %c0_200 = arith.constant 0 : index
    %c0_201 = arith.constant 0 : index
    %c0_202 = arith.constant 0 : index
    %c1_203 = arith.constant 1 : index
    %c1_204 = arith.constant 1 : index
    %c0_205 = arith.constant 0 : index
    %161 = vector.load %arg3[%c0_200, %c0_201, %c0_202, %c1_203, %c1_204, %c0_205] : memref<1x1x1x10x18x128xbf16, #tpu.memory_space<vmem>>, vector<1x1x1x8x16x128xbf16>
    %162 = vector.shape_cast %161 : vector<1x1x1x8x16x128xbf16> to vector<8x16x128xbf16>
    %163 = arith.extf %162 : vector<8x16x128xbf16> to vector<8x16x128xf32>
    %164 = arith.subf %160, %163 : vector<8x16x128xf32>
    %c0_206 = arith.constant 0 : index
    %c0_207 = arith.constant 0 : index
    %165 = vector.load %arg10[%c0_206, %c0_207] : memref<8x128xf32, #tpu.memory_space<vmem>>, vector<8x128xf32>
    %166 = math.absf %164 : vector<8x16x128xf32>
    %167 = vector.shape_cast %166 : vector<8x16x128xf32> to vector<16x8x128xf32>
    %cst_208 = arith.constant dense<0.000000e+00> : vector<8x128xf32>
    %168 = vector.multi_reduction <add>, %167, %cst_208 [0] : vector<16x8x128xf32> to vector<8x128xf32>
    %169 = arith.addf %165, %168 : vector<8x128xf32>
    %c0_209 = arith.constant 0 : index
    %c0_210 = arith.constant 0 : index
    %170 = vector.load %arg10[%c0_209, %c0_210] : memref<8x128xf32, #tpu.memory_space<vmem>>, vector<8x128xf32>
    tpu.vector_store %arg10[%c0_209, %c0_210], %169 {strides = array<i32>} : memref<8x128xf32, #tpu.memory_space<vmem>>, vector<8x128xf32>,
    %171 = arith.truncf %71 : vector<128x128xf32> to vector<128x128xbf16>
    %172 = arith.truncf %140 : vector<128x128xf32> to vector<128x128xbf16>
    %c0_211 = arith.constant 0 : index
    %c0_212 = arith.constant 0 : index
    %173 = vector.load %arg12[%c0_211, %c0_212] : memref<128x128xf32, #tpu.memory_space<vmem>>, vector<128x128xf32>
    %cst_213 = arith.constant dense<0.000000e+00> : vector<128x128xf32>
    %174 = tpu.matmul %171, %171, %cst_213 {dimension_numbers = #tpu.dot_dimension_numbers<[0], [0], [1], [1], [0, 1, 1, 1], [], []>} : vector<128x128xbf16>, vector<128x128xbf16>, vector<128x128xf32> -> vector<128x128xf32>
    %175 = arith.addf %173, %174 : vector<128x128xf32>
    %c0_214 = arith.constant 0 : index
    %c0_215 = arith.constant 0 : index
    %176 = vector.load %arg12[%c0_214, %c0_215] : memref<128x128xf32, #tpu.memory_space<vmem>>, vector<128x128xf32>
    tpu.vector_store %arg12[%c0_214, %c0_215], %175 {strides = array<i32>} : memref<128x128xf32, #tpu.memory_space<vmem>>, vector<128x128xf32>,
    %c0_216 = arith.constant 0 : index
    %c0_217 = arith.constant 0 : index
    %177 = vector.load %arg13[%c0_216, %c0_217] : memref<128x128xf32, #tpu.memory_space<vmem>>, vector<128x128xf32>
    %cst_218 = arith.constant dense<0.000000e+00> : vector<128x128xf32>
    %178 = tpu.matmul %172, %172, %cst_218 {dimension_numbers = #tpu.dot_dimension_numbers<[0], [0], [1], [1], [0, 1, 1, 1], [], []>} : vector<128x128xbf16>, vector<128x128xbf16>, vector<128x128xf32> -> vector<128x128xf32>
    %179 = arith.addf %177, %178 : vector<128x128xf32>
    %c0_219 = arith.constant 0 : index
    %c0_220 = arith.constant 0 : index
    %180 = vector.load %arg13[%c0_219, %c0_220] : memref<128x128xf32, #tpu.memory_space<vmem>>, vector<128x128xf32>
    tpu.vector_store %arg13[%c0_219, %c0_220], %179 {strides = array<i32>} : memref<128x128xf32, #tpu.memory_space<vmem>>, vector<128x128xf32>,
    %c1_i32 = arith.constant 1 : i32
    %181 = arith.cmpi eq, %arg1, %c1_i32 : i32
    %182 = arith.extui %181 : i1 to i32
    %c0_i32_221 = arith.constant 0 : i32
    %183 = arith.cmpi ne, %182, %c0_i32_221 : i32
    scf.if %183 {
      %c0_222 = arith.constant 0 : index
      %c0_223 = arith.constant 0 : index
      %184 = vector.load %arg10[%c0_222, %c0_223] : memref<8x128xf32, #tpu.memory_space<vmem>>, vector<8x128xf32>
      %cst_224 = arith.constant dense<0.000000e+00> : vector<8xf32>
      %185 = vector.multi_reduction <add>, %184, %cst_224 [1] : vector<8x128xf32> to vector<8xf32>
      %186 = vector.shape_cast %185 : vector<8xf32> to vector<8x1xf32>
      %cst_225 = arith.constant dense<0.000000e+00> : vector<1xf32>
      %187 = vector.multi_reduction <add>, %186, %cst_225 [0] : vector<8x1xf32> to vector<1xf32>
      %188 = vector.shape_cast %187 : vector<1xf32> to vector<1x1xf32>
      %c0_226 = arith.constant 0 : index
      %c0_227 = arith.constant 0 : index
      %c0_228 = arith.constant 0 : index
      %189 = vector.load %arg7[%c0_226, %c0_227, %c0_228] : memref<1x1x1xf32, #tpu.memory_space<vmem>>, vector<1x1x1xf32>
      %190 = vector.shape_cast %189 : vector<1x1x1xf32> to vector<1x1xf32>
      %191 = vector.shape_cast %188 : vector<1x1xf32> to vector<1x1x1xf32>
      tpu.vector_store %arg7[%c0_226, %c0_227, %c0_228], %191 {strides = array<i32>} : memref<1x1x1xf32, #tpu.memory_space<vmem>>, vector<1x1x1xf32>,
      %c0_229 = arith.constant 0 : index
      %c0_230 = arith.constant 0 : index
      %192 = vector.load %arg11[%c0_229, %c0_230] : memref<8x128xf32, #tpu.memory_space<vmem>>, vector<8x128xf32>
      %cst_231 = arith.constant dense<0.000000e+00> : vector<8xf32>
      %193 = vector.multi_reduction <add>, %192, %cst_231 [1] : vector<8x128xf32> to vector<8xf32>
      %194 = vector.shape_cast %193 : vector<8xf32> to vector<8x1xf32>
      %cst_232 = arith.constant dense<0.000000e+00> : vector<1xf32>
      %195 = vector.multi_reduction <add>, %194, %cst_232 [0] : vector<8x1xf32> to vector<1xf32>
      %196 = vector.shape_cast %195 : vector<1xf32> to vector<1x1xf32>
      %c0_233 = arith.constant 0 : index
      %c0_234 = arith.constant 0 : index
      %c0_235 = arith.constant 0 : index
      %197 = vector.load %arg8[%c0_233, %c0_234, %c0_235] : memref<1x1x1xf32, #tpu.memory_space<vmem>>, vector<1x1x1xf32>
      %198 = vector.shape_cast %197 : vector<1x1x1xf32> to vector<1x1xf32>
      %199 = vector.shape_cast %196 : vector<1x1xf32> to vector<1x1x1xf32>
      tpu.vector_store %arg8[%c0_233, %c0_234, %c0_235], %199 {strides = array<i32>} : memref<1x1x1xf32, #tpu.memory_space<vmem>>, vector<1x1x1xf32>,
      %c0_236 = arith.constant 0 : index
      %c0_237 = arith.constant 0 : index
      %200 = vector.load %arg12[%c0_236, %c0_237] : memref<128x128xf32, #tpu.memory_space<vmem>>, vector<128x128xf32>
      %c0_238 = arith.constant 0 : index
      %c0_239 = arith.constant 0 : index
      %201 = vector.load %arg13[%c0_238, %c0_239] : memref<128x128xf32, #tpu.memory_space<vmem>>, vector<128x128xf32>
      %202 = arith.subf %200, %201 : vector<128x128xf32>
      %203 = math.absf %202 : vector<128x128xf32>
      %cst_240 = arith.constant 4.8828125E-4 : f32
      %204 = vector.broadcast %cst_240 : f32 to vector<128x128xf32>
      %205 = arith.mulf %203, %204 : vector<128x128xf32>
      %cst_241 = arith.constant dense<0.000000e+00> : vector<128xf32>
      %206 = vector.multi_reduction <add>, %205, %cst_241 [1] : vector<128x128xf32> to vector<128xf32>
      %207 = vector.shape_cast %206 : vector<128xf32> to vector<128x1xf32>
      %cst_242 = arith.constant dense<0.000000e+00> : vector<1xf32>
      %208 = vector.multi_reduction <add>, %207, %cst_242 [0] : vector<128x1xf32> to vector<1xf32>
      %209 = vector.shape_cast %208 : vector<1xf32> to vector<1x1xf32>
      %c0_243 = arith.constant 0 : index
      %c0_244 = arith.constant 0 : index
      %c0_245 = arith.constant 0 : index
      %210 = vector.load %arg9[%c0_243, %c0_244, %c0_245] : memref<1x1x1xf32, #tpu.memory_space<vmem>>, vector<1x1x1xf32>
      %211 = vector.shape_cast %210 : vector<1x1x1xf32> to vector<1x1xf32>
      %212 = vector.shape_cast %209 : vector<1x1xf32> to vector<1x1x1xf32>
      tpu.vector_store %arg9[%c0_243, %c0_244, %c0_245], %212 {strides = array<i32>} : memref<1x1x1xf32, #tpu.memory_space<vmem>>, vector<1x1x1xf32>,
    } else {
    }
    return
  }
  func.func @transform_0(%arg0: i32, %arg1: i32) -> (i32, i32, i32, i32, i32, i32) {
    %c0_i32 = arith.constant 0 : i32
    %c0_i32_0 = arith.constant 0 : i32
    %c0_i32_1 = arith.constant 0 : i32
    %c0_i32_2 = arith.constant 0 : i32
    %c0_i32_3 = arith.constant 0 : i32
    return %arg0, %c0_i32, %arg1, %c0_i32_0, %c0_i32_1, %c0_i32_2 : i32, i32, i32, i32, i32, i32
  }
  func.func @transform_1(%arg0: i32, %arg1: i32) -> (i32, i32, i32, i32, i32, i32) {
    %c1_i32 = arith.constant 1 : i32
    %c0_i32 = arith.constant 0 : i32
    %c0_i32_0 = arith.constant 0 : i32
    %c0_i32_1 = arith.constant 0 : i32
    %c0_i32_2 = arith.constant 0 : i32
    return %arg0, %c1_i32, %arg1, %c0_i32, %c0_i32_0, %c0_i32_1 : i32, i32, i32, i32, i32, i32
  }
  func.func @transform_2(%arg0: i32, %arg1: i32) -> (i32, i32, i32) {
    %c0_i32 = arith.constant 0 : i32
    %c0_i32_0 = arith.constant 0 : i32
    %c0_i32_1 = arith.constant 0 : i32
    %c0_i32_2 = arith.constant 0 : i32
    return %c0_i32, %c0_i32_0, %c0_i32_1 : i32, i32, i32
  }
  func.func @transform_3(%arg0: i32, %arg1: i32) -> (i32, i32) {
    %c0_i32 = arith.constant 0 : i32
    %c0_i32_0 = arith.constant 0 : i32
    %c0_i32_1 = arith.constant 0 : i32
    return %c0_i32, %c0_i32_0 : i32, i32
  }
  func.func @transform_4(%arg0: i32, %arg1: i32) -> (i32, i32, i32, i32, i32) {
    %c0_i32 = arith.constant 0 : i32
    %c0_i32_0 = arith.constant 0 : i32
    %c0_i32_1 = arith.constant 0 : i32
    %c0_i32_2 = arith.constant 0 : i32
    return %arg0, %c0_i32, %arg1, %c0_i32_0, %c0_i32_1 : i32, i32, i32, i32, i32
  }
  func.func @transform_5(%arg0: i32, %arg1: i32) -> (i32, i32, i32) {
    %c0_i32 = arith.constant 0 : i32
    %c0_i32_0 = arith.constant 0 : i32
    %c0_i32_1 = arith.constant 0 : i32
    return %arg0, %c0_i32, %c0_i32_0 : i32, i32, i32
  }
  func.func @transform_6(%arg0: i32, %arg1: i32) -> (i32, i32, i32) {
    %c0_i32 = arith.constant 0 : i32
    %c0_i32_0 = arith.constant 0 : i32
    %c0_i32_1 = arith.constant 0 : i32
    return %arg0, %c0_i32, %c0_i32_0 : i32, i32, i32
  }
  func.func @transform_7(%arg0: i32, %arg1: i32) -> (i32, i32, i32) {
    %c0_i32 = arith.constant 0 : i32
    %c0_i32_0 = arith.constant 0 : i32
    %c0_i32_1 = arith.constant 0 : i32
    return %arg0, %c0_i32, %c0_i32_0 : i32, i32, i32
  }
}

module attributes {stable_mosaic.version = 11 : i64} {
  func.func @kernel(%arg0: i32, %arg1: i32, %arg2: memref<1x1x1x10x18x128xbf16, #tpu.memory_space<vmem>>, %arg3: memref<1x1x1x10x18x128xbf16, #tpu.memory_space<vmem>>, %arg4: memref<9x128x128xbf16, #tpu.memory_space<vmem>>, %arg5: memref<1x128xf32, #tpu.memory_space<vmem>>, %arg6: memref<1x2x8x16x128xbf16, #tpu.memory_space<vmem>>, %arg7: memref<1x1x1xf32, #tpu.memory_space<vmem>>, %arg8: memref<1x1x1xf32, #tpu.memory_space<vmem>>, %arg9: memref<1x1x1xf32, #tpu.memory_space<vmem>>, %arg10: memref<8x128xf32, #tpu.memory_space<vmem>>, %arg11: memref<8x128xf32, #tpu.memory_space<vmem>>, %arg12: memref<128x128xf32, #tpu.memory_space<vmem>>, %arg13: memref<128x128xf32, #tpu.memory_space<vmem>>) attributes {dimension_semantics = [#tpu.dimension_semantics<parallel>, #tpu.dimension_semantics<arbitrary>], iteration_bounds = array<i64: 2, 2>, scalar_prefetch = 0 : i64, scratch_operands = 4 : i64, tpu.core_type = #tpu.core_type<tc>, window_params = [{transform_indices = @transform_0, window_bounds = array<i64: 1, 1, 1, 10, 18, 128>}, {transform_indices = @transform_1, window_bounds = array<i64: 1, 1, 1, 10, 18, 128>}, {pipeline_mode = #tpu.pipeline_mode<synchronous>, transform_indices = @transform_2, window_bounds = array<i64: 9, 128, 128>}, {pipeline_mode = #tpu.pipeline_mode<synchronous>, transform_indices = @transform_3, window_bounds = array<i64: 1, 128>}, {transform_indices = @transform_4, window_bounds = array<i64: 1, 2, 8, 16, 128>}, {transform_indices = @transform_5, window_bounds = array<i64: 1, 1, 1>}, {transform_indices = @transform_6, window_bounds = array<i64: 1, 1, 1>}, {transform_indices = @transform_7, window_bounds = array<i64: 1, 1, 1>}]} {
    %c0_i32 = arith.constant 0 : i32
    %0 = arith.cmpi eq, %arg1, %c0_i32 : i32
    %1 = arith.extui %0 : i1 to i32
    %c0_i32_0 = arith.constant 0 : i32
    %2 = arith.cmpi ne, %1, %c0_i32_0 : i32
    scf.if %2 {
      %cst_205 = arith.constant 0.000000e+00 : f32
      %171 = vector.broadcast %cst_205 : f32 to vector<8x128xf32>
      %c0_206 = arith.constant 0 : index
      %c0_207 = arith.constant 0 : index
      %172 = vector.load %arg10[%c0_206, %c0_207] : memref<8x128xf32, #tpu.memory_space<vmem>>, vector<8x128xf32>
      tpu.vector_store %arg10[%c0_206, %c0_207], %171 {strides = array<i32>} : memref<8x128xf32, #tpu.memory_space<vmem>>, vector<8x128xf32>,
      %cst_208 = arith.constant 0.000000e+00 : f32
      %173 = vector.broadcast %cst_208 : f32 to vector<8x128xf32>
      %c0_209 = arith.constant 0 : index
      %c0_210 = arith.constant 0 : index
      %174 = vector.load %arg11[%c0_209, %c0_210] : memref<8x128xf32, #tpu.memory_space<vmem>>, vector<8x128xf32>
      tpu.vector_store %arg11[%c0_209, %c0_210], %173 {strides = array<i32>} : memref<8x128xf32, #tpu.memory_space<vmem>>, vector<8x128xf32>,
      %cst_211 = arith.constant 0.000000e+00 : f32
      %175 = vector.broadcast %cst_211 : f32 to vector<128x128xf32>
      %c0_212 = arith.constant 0 : index
      %c0_213 = arith.constant 0 : index
      %176 = vector.load %arg12[%c0_212, %c0_213] : memref<128x128xf32, #tpu.memory_space<vmem>>, vector<128x128xf32>
      tpu.vector_store %arg12[%c0_212, %c0_213], %175 {strides = array<i32>} : memref<128x128xf32, #tpu.memory_space<vmem>>, vector<128x128xf32>,
      %cst_214 = arith.constant 0.000000e+00 : f32
      %177 = vector.broadcast %cst_214 : f32 to vector<128x128xf32>
      %c0_215 = arith.constant 0 : index
      %c0_216 = arith.constant 0 : index
      %178 = vector.load %arg13[%c0_215, %c0_216] : memref<128x128xf32, #tpu.memory_space<vmem>>, vector<128x128xf32>
      tpu.vector_store %arg13[%c0_215, %c0_216], %177 {strides = array<i32>} : memref<128x128xf32, #tpu.memory_space<vmem>>, vector<128x128xf32>,
    } else {
    }
    %cst = arith.constant 0.000000e+00 : f32
    %3 = vector.broadcast %cst : f32 to vector<128x128xf32>
    %c0 = arith.constant 0 : index
    %c0_1 = arith.constant 0 : index
    %c0_2 = arith.constant 0 : index
    %c0_3 = arith.constant 0 : index
    %c0_4 = arith.constant 0 : index
    %c0_5 = arith.constant 0 : index
    %4 = vector.load %arg2[%c0, %c0_1, %c0_2, %c0_3, %c0_4, %c0_5] : memref<1x1x1x10x18x128xbf16, #tpu.memory_space<vmem>>, vector<1x1x1x8x16x128xbf16>
    %5 = vector.shape_cast %4 : vector<1x1x1x8x16x128xbf16> to vector<8x16x128xbf16>
    %6 = vector.shape_cast %5 : vector<8x16x128xbf16> to vector<128x128xbf16>
    %c0_6 = arith.constant 0 : index
    %c0_7 = arith.constant 0 : index
    %c0_8 = arith.constant 0 : index
    %7 = vector.load %arg4[%c0_6, %c0_7, %c0_8] : memref<9x128x128xbf16, #tpu.memory_space<vmem>>, vector<1x128x128xbf16>
    %8 = vector.shape_cast %7 : vector<1x128x128xbf16> to vector<128x128xbf16>
    %cst_9 = arith.constant dense<0.000000e+00> : vector<128x128xf32>
    %9 = tpu.matmul %6, %8, %cst_9 {dimension_numbers = #tpu.dot_dimension_numbers<[1], [0], [0], [1], [0, 0, 1, 1], [], []>} : vector<128x128xbf16>, vector<128x128xbf16>, vector<128x128xf32> -> vector<128x128xf32>
    %10 = arith.addf %3, %9 : vector<128x128xf32>
    %c0_10 = arith.constant 0 : index
    %c0_11 = arith.constant 0 : index
    %c0_12 = arith.constant 0 : index
    %c0_13 = arith.constant 0 : index
    %c1 = arith.constant 1 : index
    %c0_14 = arith.constant 0 : index
    %11 = vector.load %arg2[%c0_10, %c0_11, %c0_12, %c0_13, %c1, %c0_14] : memref<1x1x1x10x18x128xbf16, #tpu.memory_space<vmem>>, vector<1x1x1x8x16x128xbf16>
    %12 = vector.shape_cast %11 : vector<1x1x1x8x16x128xbf16> to vector<8x16x128xbf16>
    %13 = vector.shape_cast %12 : vector<8x16x128xbf16> to vector<128x128xbf16>
    %c1_15 = arith.constant 1 : index
    %c0_16 = arith.constant 0 : index
    %c0_17 = arith.constant 0 : index
    %14 = vector.load %arg4[%c1_15, %c0_16, %c0_17] : memref<9x128x128xbf16, #tpu.memory_space<vmem>>, vector<1x128x128xbf16>
    %15 = vector.shape_cast %14 : vector<1x128x128xbf16> to vector<128x128xbf16>
    %cst_18 = arith.constant dense<0.000000e+00> : vector<128x128xf32>
    %16 = tpu.matmul %13, %15, %cst_18 {dimension_numbers = #tpu.dot_dimension_numbers<[1], [0], [0], [1], [0, 0, 1, 1], [], []>} : vector<128x128xbf16>, vector<128x128xbf16>, vector<128x128xf32> -> vector<128x128xf32>
    %17 = arith.addf %10, %16 : vector<128x128xf32>
    %c0_19 = arith.constant 0 : index
    %c0_20 = arith.constant 0 : index
    %c0_21 = arith.constant 0 : index
    %c0_22 = arith.constant 0 : index
    %c2 = arith.constant 2 : index
    %c0_23 = arith.constant 0 : index
    %18 = vector.load %arg2[%c0_19, %c0_20, %c0_21, %c0_22, %c2, %c0_23] : memref<1x1x1x10x18x128xbf16, #tpu.memory_space<vmem>>, vector<1x1x1x8x16x128xbf16>
    %19 = vector.shape_cast %18 : vector<1x1x1x8x16x128xbf16> to vector<8x16x128xbf16>
    %20 = vector.shape_cast %19 : vector<8x16x128xbf16> to vector<128x128xbf16>
    %c2_24 = arith.constant 2 : index
    %c0_25 = arith.constant 0 : index
    %c0_26 = arith.constant 0 : index
    %21 = vector.load %arg4[%c2_24, %c0_25, %c0_26] : memref<9x128x128xbf16, #tpu.memory_space<vmem>>, vector<1x128x128xbf16>
    %22 = vector.shape_cast %21 : vector<1x128x128xbf16> to vector<128x128xbf16>
    %cst_27 = arith.constant dense<0.000000e+00> : vector<128x128xf32>
    %23 = tpu.matmul %20, %22, %cst_27 {dimension_numbers = #tpu.dot_dimension_numbers<[1], [0], [0], [1], [0, 0, 1, 1], [], []>} : vector<128x128xbf16>, vector<128x128xbf16>, vector<128x128xf32> -> vector<128x128xf32>
    %24 = arith.addf %17, %23 : vector<128x128xf32>
    %c0_28 = arith.constant 0 : index
    %c0_29 = arith.constant 0 : index
    %c0_30 = arith.constant 0 : index
    %c1_31 = arith.constant 1 : index
    %c0_32 = arith.constant 0 : index
    %c0_33 = arith.constant 0 : index
    %25 = vector.load %arg2[%c0_28, %c0_29, %c0_30, %c1_31, %c0_32, %c0_33] : memref<1x1x1x10x18x128xbf16, #tpu.memory_space<vmem>>, vector<1x1x1x8x16x128xbf16>
    %26 = vector.shape_cast %25 : vector<1x1x1x8x16x128xbf16> to vector<8x16x128xbf16>
    %27 = vector.shape_cast %26 : vector<8x16x128xbf16> to vector<128x128xbf16>
    %c3 = arith.constant 3 : index
    %c0_34 = arith.constant 0 : index
    %c0_35 = arith.constant 0 : index
    %28 = vector.load %arg4[%c3, %c0_34, %c0_35] : memref<9x128x128xbf16, #tpu.memory_space<vmem>>, vector<1x128x128xbf16>
    %29 = vector.shape_cast %28 : vector<1x128x128xbf16> to vector<128x128xbf16>
    %cst_36 = arith.constant dense<0.000000e+00> : vector<128x128xf32>
    %30 = tpu.matmul %27, %29, %cst_36 {dimension_numbers = #tpu.dot_dimension_numbers<[1], [0], [0], [1], [0, 0, 1, 1], [], []>} : vector<128x128xbf16>, vector<128x128xbf16>, vector<128x128xf32> -> vector<128x128xf32>
    %31 = arith.addf %24, %30 : vector<128x128xf32>
    %c0_37 = arith.constant 0 : index
    %c0_38 = arith.constant 0 : index
    %c0_39 = arith.constant 0 : index
    %c1_40 = arith.constant 1 : index
    %c1_41 = arith.constant 1 : index
    %c0_42 = arith.constant 0 : index
    %32 = vector.load %arg2[%c0_37, %c0_38, %c0_39, %c1_40, %c1_41, %c0_42] : memref<1x1x1x10x18x128xbf16, #tpu.memory_space<vmem>>, vector<1x1x1x8x16x128xbf16>
    %33 = vector.shape_cast %32 : vector<1x1x1x8x16x128xbf16> to vector<8x16x128xbf16>
    %34 = vector.shape_cast %33 : vector<8x16x128xbf16> to vector<128x128xbf16>
    %c4 = arith.constant 4 : index
    %c0_43 = arith.constant 0 : index
    %c0_44 = arith.constant 0 : index
    %35 = vector.load %arg4[%c4, %c0_43, %c0_44] : memref<9x128x128xbf16, #tpu.memory_space<vmem>>, vector<1x128x128xbf16>
    %36 = vector.shape_cast %35 : vector<1x128x128xbf16> to vector<128x128xbf16>
    %cst_45 = arith.constant dense<0.000000e+00> : vector<128x128xf32>
    %37 = tpu.matmul %34, %36, %cst_45 {dimension_numbers = #tpu.dot_dimension_numbers<[1], [0], [0], [1], [0, 0, 1, 1], [], []>} : vector<128x128xbf16>, vector<128x128xbf16>, vector<128x128xf32> -> vector<128x128xf32>
    %38 = arith.addf %31, %37 : vector<128x128xf32>
    %c0_46 = arith.constant 0 : index
    %c0_47 = arith.constant 0 : index
    %c0_48 = arith.constant 0 : index
    %c1_49 = arith.constant 1 : index
    %c2_50 = arith.constant 2 : index
    %c0_51 = arith.constant 0 : index
    %39 = vector.load %arg2[%c0_46, %c0_47, %c0_48, %c1_49, %c2_50, %c0_51] : memref<1x1x1x10x18x128xbf16, #tpu.memory_space<vmem>>, vector<1x1x1x8x16x128xbf16>
    %40 = vector.shape_cast %39 : vector<1x1x1x8x16x128xbf16> to vector<8x16x128xbf16>
    %41 = vector.shape_cast %40 : vector<8x16x128xbf16> to vector<128x128xbf16>
    %c5 = arith.constant 5 : index
    %c0_52 = arith.constant 0 : index
    %c0_53 = arith.constant 0 : index
    %42 = vector.load %arg4[%c5, %c0_52, %c0_53] : memref<9x128x128xbf16, #tpu.memory_space<vmem>>, vector<1x128x128xbf16>
    %43 = vector.shape_cast %42 : vector<1x128x128xbf16> to vector<128x128xbf16>
    %cst_54 = arith.constant dense<0.000000e+00> : vector<128x128xf32>
    %44 = tpu.matmul %41, %43, %cst_54 {dimension_numbers = #tpu.dot_dimension_numbers<[1], [0], [0], [1], [0, 0, 1, 1], [], []>} : vector<128x128xbf16>, vector<128x128xbf16>, vector<128x128xf32> -> vector<128x128xf32>
    %45 = arith.addf %38, %44 : vector<128x128xf32>
    %c0_55 = arith.constant 0 : index
    %c0_56 = arith.constant 0 : index
    %c0_57 = arith.constant 0 : index
    %c2_58 = arith.constant 2 : index
    %c0_59 = arith.constant 0 : index
    %c0_60 = arith.constant 0 : index
    %46 = vector.load %arg2[%c0_55, %c0_56, %c0_57, %c2_58, %c0_59, %c0_60] : memref<1x1x1x10x18x128xbf16, #tpu.memory_space<vmem>>, vector<1x1x1x8x16x128xbf16>
    %47 = vector.shape_cast %46 : vector<1x1x1x8x16x128xbf16> to vector<8x16x128xbf16>
    %48 = vector.shape_cast %47 : vector<8x16x128xbf16> to vector<128x128xbf16>
    %c6 = arith.constant 6 : index
    %c0_61 = arith.constant 0 : index
    %c0_62 = arith.constant 0 : index
    %49 = vector.load %arg4[%c6, %c0_61, %c0_62] : memref<9x128x128xbf16, #tpu.memory_space<vmem>>, vector<1x128x128xbf16>
    %50 = vector.shape_cast %49 : vector<1x128x128xbf16> to vector<128x128xbf16>
    %cst_63 = arith.constant dense<0.000000e+00> : vector<128x128xf32>
    %51 = tpu.matmul %48, %50, %cst_63 {dimension_numbers = #tpu.dot_dimension_numbers<[1], [0], [0], [1], [0, 0, 1, 1], [], []>} : vector<128x128xbf16>, vector<128x128xbf16>, vector<128x128xf32> -> vector<128x128xf32>
    %52 = arith.addf %45, %51 : vector<128x128xf32>
    %c0_64 = arith.constant 0 : index
    %c0_65 = arith.constant 0 : index
    %c0_66 = arith.constant 0 : index
    %c2_67 = arith.constant 2 : index
    %c1_68 = arith.constant 1 : index
    %c0_69 = arith.constant 0 : index
    %53 = vector.load %arg2[%c0_64, %c0_65, %c0_66, %c2_67, %c1_68, %c0_69] : memref<1x1x1x10x18x128xbf16, #tpu.memory_space<vmem>>, vector<1x1x1x8x16x128xbf16>
    %54 = vector.shape_cast %53 : vector<1x1x1x8x16x128xbf16> to vector<8x16x128xbf16>
    %55 = vector.shape_cast %54 : vector<8x16x128xbf16> to vector<128x128xbf16>
    %c7 = arith.constant 7 : index
    %c0_70 = arith.constant 0 : index
    %c0_71 = arith.constant 0 : index
    %56 = vector.load %arg4[%c7, %c0_70, %c0_71] : memref<9x128x128xbf16, #tpu.memory_space<vmem>>, vector<1x128x128xbf16>
    %57 = vector.shape_cast %56 : vector<1x128x128xbf16> to vector<128x128xbf16>
    %cst_72 = arith.constant dense<0.000000e+00> : vector<128x128xf32>
    %58 = tpu.matmul %55, %57, %cst_72 {dimension_numbers = #tpu.dot_dimension_numbers<[1], [0], [0], [1], [0, 0, 1, 1], [], []>} : vector<128x128xbf16>, vector<128x128xbf16>, vector<128x128xf32> -> vector<128x128xf32>
    %59 = arith.addf %52, %58 : vector<128x128xf32>
    %c0_73 = arith.constant 0 : index
    %c0_74 = arith.constant 0 : index
    %c0_75 = arith.constant 0 : index
    %c2_76 = arith.constant 2 : index
    %c2_77 = arith.constant 2 : index
    %c0_78 = arith.constant 0 : index
    %60 = vector.load %arg2[%c0_73, %c0_74, %c0_75, %c2_76, %c2_77, %c0_78] : memref<1x1x1x10x18x128xbf16, #tpu.memory_space<vmem>>, vector<1x1x1x8x16x128xbf16>
    %61 = vector.shape_cast %60 : vector<1x1x1x8x16x128xbf16> to vector<8x16x128xbf16>
    %62 = vector.shape_cast %61 : vector<8x16x128xbf16> to vector<128x128xbf16>
    %c8 = arith.constant 8 : index
    %c0_79 = arith.constant 0 : index
    %c0_80 = arith.constant 0 : index
    %63 = vector.load %arg4[%c8, %c0_79, %c0_80] : memref<9x128x128xbf16, #tpu.memory_space<vmem>>, vector<1x128x128xbf16>
    %64 = vector.shape_cast %63 : vector<1x128x128xbf16> to vector<128x128xbf16>
    %cst_81 = arith.constant dense<0.000000e+00> : vector<128x128xf32>
    %65 = tpu.matmul %62, %64, %cst_81 {dimension_numbers = #tpu.dot_dimension_numbers<[1], [0], [0], [1], [0, 0, 1, 1], [], []>} : vector<128x128xbf16>, vector<128x128xbf16>, vector<128x128xf32> -> vector<128x128xf32>
    %66 = arith.addf %59, %65 : vector<128x128xf32>
    %c0_82 = arith.constant 0 : index
    %c0_83 = arith.constant 0 : index
    %67 = vector.load %arg5[%c0_82, %c0_83] : memref<1x128xf32, #tpu.memory_space<vmem>>, vector<1x128xf32>
    %68 = vector.broadcast %67 : vector<1x128xf32> to vector<128x128xf32>
    %69 = arith.addf %66, %68 : vector<128x128xf32>
    %cst_84 = arith.constant 0.000000e+00 : f32
    %70 = vector.broadcast %cst_84 : f32 to vector<128x128xf32>
    %71 = arith.maximumf %69, %70 : vector<128x128xf32>
    %cst_85 = arith.constant 0.000000e+00 : f32
    %72 = vector.broadcast %cst_85 : f32 to vector<128x128xf32>
    %c0_86 = arith.constant 0 : index
    %c0_87 = arith.constant 0 : index
    %c0_88 = arith.constant 0 : index
    %c0_89 = arith.constant 0 : index
    %c0_90 = arith.constant 0 : index
    %c0_91 = arith.constant 0 : index
    %73 = vector.load %arg3[%c0_86, %c0_87, %c0_88, %c0_89, %c0_90, %c0_91] : memref<1x1x1x10x18x128xbf16, #tpu.memory_space<vmem>>, vector<1x1x1x8x16x128xbf16>
    %74 = vector.shape_cast %73 : vector<1x1x1x8x16x128xbf16> to vector<8x16x128xbf16>
    %75 = vector.shape_cast %74 : vector<8x16x128xbf16> to vector<128x128xbf16>
    %c0_92 = arith.constant 0 : index
    %c0_93 = arith.constant 0 : index
    %c0_94 = arith.constant 0 : index
    %76 = vector.load %arg4[%c0_92, %c0_93, %c0_94] : memref<9x128x128xbf16, #tpu.memory_space<vmem>>, vector<1x128x128xbf16>
    %77 = vector.shape_cast %76 : vector<1x128x128xbf16> to vector<128x128xbf16>
    %cst_95 = arith.constant dense<0.000000e+00> : vector<128x128xf32>
    %78 = tpu.matmul %75, %77, %cst_95 {dimension_numbers = #tpu.dot_dimension_numbers<[1], [0], [0], [1], [0, 0, 1, 1], [], []>} : vector<128x128xbf16>, vector<128x128xbf16>, vector<128x128xf32> -> vector<128x128xf32>
    %79 = arith.addf %72, %78 : vector<128x128xf32>
    %c0_96 = arith.constant 0 : index
    %c0_97 = arith.constant 0 : index
    %c0_98 = arith.constant 0 : index
    %c0_99 = arith.constant 0 : index
    %c1_100 = arith.constant 1 : index
    %c0_101 = arith.constant 0 : index
    %80 = vector.load %arg3[%c0_96, %c0_97, %c0_98, %c0_99, %c1_100, %c0_101] : memref<1x1x1x10x18x128xbf16, #tpu.memory_space<vmem>>, vector<1x1x1x8x16x128xbf16>
    %81 = vector.shape_cast %80 : vector<1x1x1x8x16x128xbf16> to vector<8x16x128xbf16>
    %82 = vector.shape_cast %81 : vector<8x16x128xbf16> to vector<128x128xbf16>
    %c1_102 = arith.constant 1 : index
    %c0_103 = arith.constant 0 : index
    %c0_104 = arith.constant 0 : index
    %83 = vector.load %arg4[%c1_102, %c0_103, %c0_104] : memref<9x128x128xbf16, #tpu.memory_space<vmem>>, vector<1x128x128xbf16>
    %84 = vector.shape_cast %83 : vector<1x128x128xbf16> to vector<128x128xbf16>
    %cst_105 = arith.constant dense<0.000000e+00> : vector<128x128xf32>
    %85 = tpu.matmul %82, %84, %cst_105 {dimension_numbers = #tpu.dot_dimension_numbers<[1], [0], [0], [1], [0, 0, 1, 1], [], []>} : vector<128x128xbf16>, vector<128x128xbf16>, vector<128x128xf32> -> vector<128x128xf32>
    %86 = arith.addf %79, %85 : vector<128x128xf32>
    %c0_106 = arith.constant 0 : index
    %c0_107 = arith.constant 0 : index
    %c0_108 = arith.constant 0 : index
    %c0_109 = arith.constant 0 : index
    %c2_110 = arith.constant 2 : index
    %c0_111 = arith.constant 0 : index
    %87 = vector.load %arg3[%c0_106, %c0_107, %c0_108, %c0_109, %c2_110, %c0_111] : memref<1x1x1x10x18x128xbf16, #tpu.memory_space<vmem>>, vector<1x1x1x8x16x128xbf16>
    %88 = vector.shape_cast %87 : vector<1x1x1x8x16x128xbf16> to vector<8x16x128xbf16>
    %89 = vector.shape_cast %88 : vector<8x16x128xbf16> to vector<128x128xbf16>
    %c2_112 = arith.constant 2 : index
    %c0_113 = arith.constant 0 : index
    %c0_114 = arith.constant 0 : index
    %90 = vector.load %arg4[%c2_112, %c0_113, %c0_114] : memref<9x128x128xbf16, #tpu.memory_space<vmem>>, vector<1x128x128xbf16>
    %91 = vector.shape_cast %90 : vector<1x128x128xbf16> to vector<128x128xbf16>
    %cst_115 = arith.constant dense<0.000000e+00> : vector<128x128xf32>
    %92 = tpu.matmul %89, %91, %cst_115 {dimension_numbers = #tpu.dot_dimension_numbers<[1], [0], [0], [1], [0, 0, 1, 1], [], []>} : vector<128x128xbf16>, vector<128x128xbf16>, vector<128x128xf32> -> vector<128x128xf32>
    %93 = arith.addf %86, %92 : vector<128x128xf32>
    %c0_116 = arith.constant 0 : index
    %c0_117 = arith.constant 0 : index
    %c0_118 = arith.constant 0 : index
    %c1_119 = arith.constant 1 : index
    %c0_120 = arith.constant 0 : index
    %c0_121 = arith.constant 0 : index
    %94 = vector.load %arg3[%c0_116, %c0_117, %c0_118, %c1_119, %c0_120, %c0_121] : memref<1x1x1x10x18x128xbf16, #tpu.memory_space<vmem>>, vector<1x1x1x8x16x128xbf16>
    %95 = vector.shape_cast %94 : vector<1x1x1x8x16x128xbf16> to vector<8x16x128xbf16>
    %96 = vector.shape_cast %95 : vector<8x16x128xbf16> to vector<128x128xbf16>
    %c3_122 = arith.constant 3 : index
    %c0_123 = arith.constant 0 : index
    %c0_124 = arith.constant 0 : index
    %97 = vector.load %arg4[%c3_122, %c0_123, %c0_124] : memref<9x128x128xbf16, #tpu.memory_space<vmem>>, vector<1x128x128xbf16>
    %98 = vector.shape_cast %97 : vector<1x128x128xbf16> to vector<128x128xbf16>
    %cst_125 = arith.constant dense<0.000000e+00> : vector<128x128xf32>
    %99 = tpu.matmul %96, %98, %cst_125 {dimension_numbers = #tpu.dot_dimension_numbers<[1], [0], [0], [1], [0, 0, 1, 1], [], []>} : vector<128x128xbf16>, vector<128x128xbf16>, vector<128x128xf32> -> vector<128x128xf32>
    %100 = arith.addf %93, %99 : vector<128x128xf32>
    %c0_126 = arith.constant 0 : index
    %c0_127 = arith.constant 0 : index
    %c0_128 = arith.constant 0 : index
    %c1_129 = arith.constant 1 : index
    %c1_130 = arith.constant 1 : index
    %c0_131 = arith.constant 0 : index
    %101 = vector.load %arg3[%c0_126, %c0_127, %c0_128, %c1_129, %c1_130, %c0_131] : memref<1x1x1x10x18x128xbf16, #tpu.memory_space<vmem>>, vector<1x1x1x8x16x128xbf16>
    %102 = vector.shape_cast %101 : vector<1x1x1x8x16x128xbf16> to vector<8x16x128xbf16>
    %103 = vector.shape_cast %102 : vector<8x16x128xbf16> to vector<128x128xbf16>
    %c4_132 = arith.constant 4 : index
    %c0_133 = arith.constant 0 : index
    %c0_134 = arith.constant 0 : index
    %104 = vector.load %arg4[%c4_132, %c0_133, %c0_134] : memref<9x128x128xbf16, #tpu.memory_space<vmem>>, vector<1x128x128xbf16>
    %105 = vector.shape_cast %104 : vector<1x128x128xbf16> to vector<128x128xbf16>
    %cst_135 = arith.constant dense<0.000000e+00> : vector<128x128xf32>
    %106 = tpu.matmul %103, %105, %cst_135 {dimension_numbers = #tpu.dot_dimension_numbers<[1], [0], [0], [1], [0, 0, 1, 1], [], []>} : vector<128x128xbf16>, vector<128x128xbf16>, vector<128x128xf32> -> vector<128x128xf32>
    %107 = arith.addf %100, %106 : vector<128x128xf32>
    %c0_136 = arith.constant 0 : index
    %c0_137 = arith.constant 0 : index
    %c0_138 = arith.constant 0 : index
    %c1_139 = arith.constant 1 : index
    %c2_140 = arith.constant 2 : index
    %c0_141 = arith.constant 0 : index
    %108 = vector.load %arg3[%c0_136, %c0_137, %c0_138, %c1_139, %c2_140, %c0_141] : memref<1x1x1x10x18x128xbf16, #tpu.memory_space<vmem>>, vector<1x1x1x8x16x128xbf16>
    %109 = vector.shape_cast %108 : vector<1x1x1x8x16x128xbf16> to vector<8x16x128xbf16>
    %110 = vector.shape_cast %109 : vector<8x16x128xbf16> to vector<128x128xbf16>
    %c5_142 = arith.constant 5 : index
    %c0_143 = arith.constant 0 : index
    %c0_144 = arith.constant 0 : index
    %111 = vector.load %arg4[%c5_142, %c0_143, %c0_144] : memref<9x128x128xbf16, #tpu.memory_space<vmem>>, vector<1x128x128xbf16>
    %112 = vector.shape_cast %111 : vector<1x128x128xbf16> to vector<128x128xbf16>
    %cst_145 = arith.constant dense<0.000000e+00> : vector<128x128xf32>
    %113 = tpu.matmul %110, %112, %cst_145 {dimension_numbers = #tpu.dot_dimension_numbers<[1], [0], [0], [1], [0, 0, 1, 1], [], []>} : vector<128x128xbf16>, vector<128x128xbf16>, vector<128x128xf32> -> vector<128x128xf32>
    %114 = arith.addf %107, %113 : vector<128x128xf32>
    %c0_146 = arith.constant 0 : index
    %c0_147 = arith.constant 0 : index
    %c0_148 = arith.constant 0 : index
    %c2_149 = arith.constant 2 : index
    %c0_150 = arith.constant 0 : index
    %c0_151 = arith.constant 0 : index
    %115 = vector.load %arg3[%c0_146, %c0_147, %c0_148, %c2_149, %c0_150, %c0_151] : memref<1x1x1x10x18x128xbf16, #tpu.memory_space<vmem>>, vector<1x1x1x8x16x128xbf16>
    %116 = vector.shape_cast %115 : vector<1x1x1x8x16x128xbf16> to vector<8x16x128xbf16>
    %117 = vector.shape_cast %116 : vector<8x16x128xbf16> to vector<128x128xbf16>
    %c6_152 = arith.constant 6 : index
    %c0_153 = arith.constant 0 : index
    %c0_154 = arith.constant 0 : index
    %118 = vector.load %arg4[%c6_152, %c0_153, %c0_154] : memref<9x128x128xbf16, #tpu.memory_space<vmem>>, vector<1x128x128xbf16>
    %119 = vector.shape_cast %118 : vector<1x128x128xbf16> to vector<128x128xbf16>
    %cst_155 = arith.constant dense<0.000000e+00> : vector<128x128xf32>
    %120 = tpu.matmul %117, %119, %cst_155 {dimension_numbers = #tpu.dot_dimension_numbers<[1], [0], [0], [1], [0, 0, 1, 1], [], []>} : vector<128x128xbf16>, vector<128x128xbf16>, vector<128x128xf32> -> vector<128x128xf32>
    %121 = arith.addf %114, %120 : vector<128x128xf32>
    %c0_156 = arith.constant 0 : index
    %c0_157 = arith.constant 0 : index
    %c0_158 = arith.constant 0 : index
    %c2_159 = arith.constant 2 : index
    %c1_160 = arith.constant 1 : index
    %c0_161 = arith.constant 0 : index
    %122 = vector.load %arg3[%c0_156, %c0_157, %c0_158, %c2_159, %c1_160, %c0_161] : memref<1x1x1x10x18x128xbf16, #tpu.memory_space<vmem>>, vector<1x1x1x8x16x128xbf16>
    %123 = vector.shape_cast %122 : vector<1x1x1x8x16x128xbf16> to vector<8x16x128xbf16>
    %124 = vector.shape_cast %123 : vector<8x16x128xbf16> to vector<128x128xbf16>
    %c7_162 = arith.constant 7 : index
    %c0_163 = arith.constant 0 : index
    %c0_164 = arith.constant 0 : index
    %125 = vector.load %arg4[%c7_162, %c0_163, %c0_164] : memref<9x128x128xbf16, #tpu.memory_space<vmem>>, vector<1x128x128xbf16>
    %126 = vector.shape_cast %125 : vector<1x128x128xbf16> to vector<128x128xbf16>
    %cst_165 = arith.constant dense<0.000000e+00> : vector<128x128xf32>
    %127 = tpu.matmul %124, %126, %cst_165 {dimension_numbers = #tpu.dot_dimension_numbers<[1], [0], [0], [1], [0, 0, 1, 1], [], []>} : vector<128x128xbf16>, vector<128x128xbf16>, vector<128x128xf32> -> vector<128x128xf32>
    %128 = arith.addf %121, %127 : vector<128x128xf32>
    %c0_166 = arith.constant 0 : index
    %c0_167 = arith.constant 0 : index
    %c0_168 = arith.constant 0 : index
    %c2_169 = arith.constant 2 : index
    %c2_170 = arith.constant 2 : index
    %c0_171 = arith.constant 0 : index
    %129 = vector.load %arg3[%c0_166, %c0_167, %c0_168, %c2_169, %c2_170, %c0_171] : memref<1x1x1x10x18x128xbf16, #tpu.memory_space<vmem>>, vector<1x1x1x8x16x128xbf16>
    %130 = vector.shape_cast %129 : vector<1x1x1x8x16x128xbf16> to vector<8x16x128xbf16>
    %131 = vector.shape_cast %130 : vector<8x16x128xbf16> to vector<128x128xbf16>
    %c8_172 = arith.constant 8 : index
    %c0_173 = arith.constant 0 : index
    %c0_174 = arith.constant 0 : index
    %132 = vector.load %arg4[%c8_172, %c0_173, %c0_174] : memref<9x128x128xbf16, #tpu.memory_space<vmem>>, vector<1x128x128xbf16>
    %133 = vector.shape_cast %132 : vector<1x128x128xbf16> to vector<128x128xbf16>
    %cst_175 = arith.constant dense<0.000000e+00> : vector<128x128xf32>
    %134 = tpu.matmul %131, %133, %cst_175 {dimension_numbers = #tpu.dot_dimension_numbers<[1], [0], [0], [1], [0, 0, 1, 1], [], []>} : vector<128x128xbf16>, vector<128x128xbf16>, vector<128x128xf32> -> vector<128x128xf32>
    %135 = arith.addf %128, %134 : vector<128x128xf32>
    %c0_176 = arith.constant 0 : index
    %c0_177 = arith.constant 0 : index
    %136 = vector.load %arg5[%c0_176, %c0_177] : memref<1x128xf32, #tpu.memory_space<vmem>>, vector<1x128xf32>
    %137 = vector.broadcast %136 : vector<1x128xf32> to vector<128x128xf32>
    %138 = arith.addf %135, %137 : vector<128x128xf32>
    %cst_178 = arith.constant 0.000000e+00 : f32
    %139 = vector.broadcast %cst_178 : f32 to vector<128x128xf32>
    %140 = arith.maximumf %138, %139 : vector<128x128xf32>
    %141 = vector.shape_cast %71 : vector<128x128xf32> to vector<8x16x128xf32>
    %142 = arith.truncf %141 : vector<8x16x128xf32> to vector<8x16x128xbf16>
    %c0_179 = arith.constant 0 : index
    %c0_180 = arith.constant 0 : index
    %c0_181 = arith.constant 0 : index
    %c0_182 = arith.constant 0 : index
    %c0_183 = arith.constant 0 : index
    %143 = vector.load %arg6[%c0_179, %c0_180, %c0_181, %c0_182, %c0_183] : memref<1x2x8x16x128xbf16, #tpu.memory_space<vmem>>, vector<1x1x8x16x128xbf16>
    %144 = vector.shape_cast %143 : vector<1x1x8x16x128xbf16> to vector<8x16x128xbf16>
    %145 = vector.shape_cast %142 : vector<8x16x128xbf16> to vector<1x1x8x16x128xbf16>
    tpu.vector_store %arg6[%c0_179, %c0_180, %c0_181, %c0_182, %c0_183], %145 {strides = array<i32>} : memref<1x2x8x16x128xbf16, #tpu.memory_space<vmem>>, vector<1x1x8x16x128xbf16>,
    %146 = vector.shape_cast %140 : vector<128x128xf32> to vector<8x16x128xf32>
    %147 = arith.truncf %146 : vector<8x16x128xf32> to vector<8x16x128xbf16>
    %c0_184 = arith.constant 0 : index
    %c1_185 = arith.constant 1 : index
    %c0_186 = arith.constant 0 : index
    %c0_187 = arith.constant 0 : index
    %c0_188 = arith.constant 0 : index
    %148 = vector.load %arg6[%c0_184, %c1_185, %c0_186, %c0_187, %c0_188] : memref<1x2x8x16x128xbf16, #tpu.memory_space<vmem>>, vector<1x1x8x16x128xbf16>
    %149 = vector.shape_cast %148 : vector<1x1x8x16x128xbf16> to vector<8x16x128xbf16>
    %150 = vector.shape_cast %147 : vector<8x16x128xbf16> to vector<1x1x8x16x128xbf16>
    tpu.vector_store %arg6[%c0_184, %c1_185, %c0_186, %c0_187, %c0_188], %150 {strides = array<i32>} : memref<1x2x8x16x128xbf16, #tpu.memory_space<vmem>>, vector<1x1x8x16x128xbf16>,
    %c0_189 = arith.constant 0 : index
    %c0_190 = arith.constant 0 : index
    %151 = vector.load %arg11[%c0_189, %c0_190] : memref<8x128xf32, #tpu.memory_space<vmem>>, vector<8x128xf32>
    %152 = arith.subf %71, %140 : vector<128x128xf32>
    %153 = math.absf %152 : vector<128x128xf32>
    %154 = vector.shape_cast %153 : vector<128x128xf32> to vector<16x8x128xf32>
    %cst_191 = arith.constant dense<0.000000e+00> : vector<8x128xf32>
    %155 = vector.multi_reduction <add>, %154, %cst_191 [0] : vector<16x8x128xf32> to vector<8x128xf32>
    %156 = arith.addf %151, %155 : vector<8x128xf32>
    %c0_192 = arith.constant 0 : index
    %c0_193 = arith.constant 0 : index
    %157 = vector.load %arg11[%c0_192, %c0_193] : memref<8x128xf32, #tpu.memory_space<vmem>>, vector<8x128xf32>
    tpu.vector_store %arg11[%c0_192, %c0_193], %156 {strides = array<i32>} : memref<8x128xf32, #tpu.memory_space<vmem>>, vector<8x128xf32>,
    %158 = arith.truncf %71 : vector<128x128xf32> to vector<128x128xbf16>
    %159 = arith.truncf %140 : vector<128x128xf32> to vector<128x128xbf16>
    %c0_194 = arith.constant 0 : index
    %c0_195 = arith.constant 0 : index
    %160 = vector.load %arg12[%c0_194, %c0_195] : memref<128x128xf32, #tpu.memory_space<vmem>>, vector<128x128xf32>
    %cst_196 = arith.constant dense<0.000000e+00> : vector<128x128xf32>
    %161 = tpu.matmul %158, %158, %cst_196 {dimension_numbers = #tpu.dot_dimension_numbers<[0], [0], [1], [1], [0, 1, 1, 1], [], []>} : vector<128x128xbf16>, vector<128x128xbf16>, vector<128x128xf32> -> vector<128x128xf32>
    %162 = arith.addf %160, %161 : vector<128x128xf32>
    %c0_197 = arith.constant 0 : index
    %c0_198 = arith.constant 0 : index
    %163 = vector.load %arg12[%c0_197, %c0_198] : memref<128x128xf32, #tpu.memory_space<vmem>>, vector<128x128xf32>
    tpu.vector_store %arg12[%c0_197, %c0_198], %162 {strides = array<i32>} : memref<128x128xf32, #tpu.memory_space<vmem>>, vector<128x128xf32>,
    %c0_199 = arith.constant 0 : index
    %c0_200 = arith.constant 0 : index
    %164 = vector.load %arg13[%c0_199, %c0_200] : memref<128x128xf32, #tpu.memory_space<vmem>>, vector<128x128xf32>
    %cst_201 = arith.constant dense<0.000000e+00> : vector<128x128xf32>
    %165 = tpu.matmul %159, %159, %cst_201 {dimension_numbers = #tpu.dot_dimension_numbers<[0], [0], [1], [1], [0, 1, 1, 1], [], []>} : vector<128x128xbf16>, vector<128x128xbf16>, vector<128x128xf32> -> vector<128x128xf32>
    %166 = arith.addf %164, %165 : vector<128x128xf32>
    %c0_202 = arith.constant 0 : index
    %c0_203 = arith.constant 0 : index
    %167 = vector.load %arg13[%c0_202, %c0_203] : memref<128x128xf32, #tpu.memory_space<vmem>>, vector<128x128xf32>
    tpu.vector_store %arg13[%c0_202, %c0_203], %166 {strides = array<i32>} : memref<128x128xf32, #tpu.memory_space<vmem>>, vector<128x128xf32>,
    %c1_i32 = arith.constant 1 : i32
    %168 = arith.cmpi eq, %arg1, %c1_i32 : i32
    %169 = arith.extui %168 : i1 to i32
    %c0_i32_204 = arith.constant 0 : i32
    %170 = arith.cmpi ne, %169, %c0_i32_204 : i32
    scf.if %170 {
      %cst_205 = arith.constant 0.000000e+00 : f32
      %171 = vector.broadcast %cst_205 : f32 to vector<1x1xf32>
      %c0_206 = arith.constant 0 : index
      %c0_207 = arith.constant 0 : index
      %c0_208 = arith.constant 0 : index
      %172 = vector.load %arg7[%c0_206, %c0_207, %c0_208] : memref<1x1x1xf32, #tpu.memory_space<vmem>>, vector<1x1x1xf32>
      %173 = vector.shape_cast %172 : vector<1x1x1xf32> to vector<1x1xf32>
      %174 = vector.shape_cast %171 : vector<1x1xf32> to vector<1x1x1xf32>
      tpu.vector_store %arg7[%c0_206, %c0_207, %c0_208], %174 {strides = array<i32>} : memref<1x1x1xf32, #tpu.memory_space<vmem>>, vector<1x1x1xf32>,
      %c0_209 = arith.constant 0 : index
      %c0_210 = arith.constant 0 : index
      %175 = vector.load %arg11[%c0_209, %c0_210] : memref<8x128xf32, #tpu.memory_space<vmem>>, vector<8x128xf32>
      %cst_211 = arith.constant dense<0.000000e+00> : vector<8xf32>
      %176 = vector.multi_reduction <add>, %175, %cst_211 [1] : vector<8x128xf32> to vector<8xf32>
      %177 = vector.shape_cast %176 : vector<8xf32> to vector<8x1xf32>
      %cst_212 = arith.constant dense<0.000000e+00> : vector<1xf32>
      %178 = vector.multi_reduction <add>, %177, %cst_212 [0] : vector<8x1xf32> to vector<1xf32>
      %179 = vector.shape_cast %178 : vector<1xf32> to vector<1x1xf32>
      %c0_213 = arith.constant 0 : index
      %c0_214 = arith.constant 0 : index
      %c0_215 = arith.constant 0 : index
      %180 = vector.load %arg8[%c0_213, %c0_214, %c0_215] : memref<1x1x1xf32, #tpu.memory_space<vmem>>, vector<1x1x1xf32>
      %181 = vector.shape_cast %180 : vector<1x1x1xf32> to vector<1x1xf32>
      %182 = vector.shape_cast %179 : vector<1x1xf32> to vector<1x1x1xf32>
      tpu.vector_store %arg8[%c0_213, %c0_214, %c0_215], %182 {strides = array<i32>} : memref<1x1x1xf32, #tpu.memory_space<vmem>>, vector<1x1x1xf32>,
      %c0_216 = arith.constant 0 : index
      %c0_217 = arith.constant 0 : index
      %183 = vector.load %arg12[%c0_216, %c0_217] : memref<128x128xf32, #tpu.memory_space<vmem>>, vector<128x128xf32>
      %c0_218 = arith.constant 0 : index
      %c0_219 = arith.constant 0 : index
      %184 = vector.load %arg13[%c0_218, %c0_219] : memref<128x128xf32, #tpu.memory_space<vmem>>, vector<128x128xf32>
      %185 = arith.subf %183, %184 : vector<128x128xf32>
      %186 = math.absf %185 : vector<128x128xf32>
      %cst_220 = arith.constant 2.44140625E-4 : f32
      %187 = vector.broadcast %cst_220 : f32 to vector<128x128xf32>
      %188 = arith.mulf %186, %187 : vector<128x128xf32>
      %cst_221 = arith.constant dense<0.000000e+00> : vector<128xf32>
      %189 = vector.multi_reduction <add>, %188, %cst_221 [1] : vector<128x128xf32> to vector<128xf32>
      %190 = vector.shape_cast %189 : vector<128xf32> to vector<128x1xf32>
      %cst_222 = arith.constant dense<0.000000e+00> : vector<1xf32>
      %191 = vector.multi_reduction <add>, %190, %cst_222 [0] : vector<128x1xf32> to vector<1xf32>
      %192 = vector.shape_cast %191 : vector<1xf32> to vector<1x1xf32>
      %c0_223 = arith.constant 0 : index
      %c0_224 = arith.constant 0 : index
      %c0_225 = arith.constant 0 : index
      %193 = vector.load %arg9[%c0_223, %c0_224, %c0_225] : memref<1x1x1xf32, #tpu.memory_space<vmem>>, vector<1x1x1xf32>
      %194 = vector.shape_cast %193 : vector<1x1x1xf32> to vector<1x1xf32>
      %195 = vector.shape_cast %192 : vector<1x1xf32> to vector<1x1x1xf32>
      tpu.vector_store %arg9[%c0_223, %c0_224, %c0_225], %195 {strides = array<i32>} : memref<1x1x1xf32, #tpu.memory_space<vmem>>, vector<1x1x1xf32>,
    } else {
    }
    return
  }
  func.func @transform_0(%arg0: i32, %arg1: i32) -> (i32, i32, i32, i32, i32, i32) {
    %c0_i32 = arith.constant 0 : i32
    %c0_i32_0 = arith.constant 0 : i32
    %c0_i32_1 = arith.constant 0 : i32
    %c0_i32_2 = arith.constant 0 : i32
    %c0_i32_3 = arith.constant 0 : i32
    return %arg0, %c0_i32, %arg1, %c0_i32_0, %c0_i32_1, %c0_i32_2 : i32, i32, i32, i32, i32, i32
  }
  func.func @transform_1(%arg0: i32, %arg1: i32) -> (i32, i32, i32, i32, i32, i32) {
    %c1_i32 = arith.constant 1 : i32
    %c0_i32 = arith.constant 0 : i32
    %c0_i32_0 = arith.constant 0 : i32
    %c0_i32_1 = arith.constant 0 : i32
    %c0_i32_2 = arith.constant 0 : i32
    return %arg0, %c1_i32, %arg1, %c0_i32, %c0_i32_0, %c0_i32_1 : i32, i32, i32, i32, i32, i32
  }
  func.func @transform_2(%arg0: i32, %arg1: i32) -> (i32, i32, i32) {
    %c0_i32 = arith.constant 0 : i32
    %c0_i32_0 = arith.constant 0 : i32
    %c0_i32_1 = arith.constant 0 : i32
    %c0_i32_2 = arith.constant 0 : i32
    return %c0_i32, %c0_i32_0, %c0_i32_1 : i32, i32, i32
  }
  func.func @transform_3(%arg0: i32, %arg1: i32) -> (i32, i32) {
    %c0_i32 = arith.constant 0 : i32
    %c0_i32_0 = arith.constant 0 : i32
    %c0_i32_1 = arith.constant 0 : i32
    return %c0_i32, %c0_i32_0 : i32, i32
  }
  func.func @transform_4(%arg0: i32, %arg1: i32) -> (i32, i32, i32, i32, i32) {
    %c0_i32 = arith.constant 0 : i32
    %c0_i32_0 = arith.constant 0 : i32
    %c0_i32_1 = arith.constant 0 : i32
    %c0_i32_2 = arith.constant 0 : i32
    return %arg0, %c0_i32, %arg1, %c0_i32_0, %c0_i32_1 : i32, i32, i32, i32, i32
  }
  func.func @transform_5(%arg0: i32, %arg1: i32) -> (i32, i32, i32) {
    %c0_i32 = arith.constant 0 : i32
    %c0_i32_0 = arith.constant 0 : i32
    %c0_i32_1 = arith.constant 0 : i32
    return %arg0, %c0_i32, %c0_i32_0 : i32, i32, i32
  }
  func.func @transform_6(%arg0: i32, %arg1: i32) -> (i32, i32, i32) {
    %c0_i32 = arith.constant 0 : i32
    %c0_i32_0 = arith.constant 0 : i32
    %c0_i32_1 = arith.constant 0 : i32
    return %arg0, %c0_i32, %c0_i32_0 : i32, i32, i32
  }
  func.func @transform_7(%arg0: i32, %arg1: i32) -> (i32, i32, i32) {
    %c0_i32 = arith.constant 0 : i32
    %c0_i32_0 = arith.constant 0 : i32
    %c0_i32_1 = arith.constant 0 : i32
    return %arg0, %c0_i32, %c0_i32_0 : i32, i32, i32
  }
}

</mosaic_0001>

<bundles_post_ra>
// kernel: forward.2
= control target key start
LH: loop header
LB: loop body
LE: loop exit
PB: predicated region body
PF: predicated region fallthrough
CT: control target
= control target key end

     0   :  { %s11830_s0 = inlined_call_operand.vmem [shape: bf16[2,2,2,10,18,128], index: 0, kind: input, shape index: {}, may-alias: {0,1}]   ;;  %s11831_s1 = inlined_call_operand.vmem [shape: bf16[2,2,2,10,18,128], index: 1, kind: input, shape index: {}, may-alias: {0,1}]   ;;  %s11832_s2 = inlined_call_operand.vmem [shape: bf16[9,128,128], index: 2, kind: input, shape index: {}]   ;;  %s11833_s3 = inlined_call_operand.vmem [shape: f32[1,128], index: 3, kind: input, shape index: {}]   ;;  %s11834_s4 = inlined_call_operand.vmem [shape: bf16[2,2,16,16,128], index: 4, kind: output, shape index: {0}]   ;;  %s11835_s5 = inlined_call_operand.vmem [shape: f32[2,1,1], index: 5, kind: output, shape index: {1}]   ;;  %s11836_s6 = inlined_call_operand.vmem [shape: f32[2,1,1], index: 6, kind: output, shape index: {2}]   ;;  %s11837_s7 = inlined_call_operand.vmem [shape: f32[2,1,1], index: 7, kind: output, shape index: {3}]  }
   0x1   :  { %11891 = sst [smem:[#allocation35_spill]] %s11834_s4 }
   0x2   :  { %s9258_s24 = smov 0   ;;  %s9260_s25 = smov 0  }
   0x3   :  { %s9262_s26 = smov 0   ;;  %s9264_s27 = smov 0  }
   0x4   :  { %s9266_s28 = smov 0   ;;  %s9268_s29 = smov 0  }
   0x5   :  { %s9270_s30 = smov 0  }
   0x6 LB: > { %11892 = sst [smem:[#allocation7_spill]] %s9195_s25  ;;  %s27_s8 = sadd.s32 1, %s9207_s28  ;;  %s9215_s30 = sphi %s9270_s30, %s18_s30   ;;  %s9211_s29 = sphi %s9268_s29, %s12033_s29   ;;  %s9207_s28 = sphi %s9266_s28, %s12032_s28   ;;  %s9203_s27 = sphi %s9264_s27, %s12031_s27   ;;  %s9199_s26 = sphi %s9262_s26, %s12030_s26   ;;  %s9195_s25 = sphi %s9260_s25, %s12029_s25   ;;  %s9191_s24 = sphi %s9258_s24, %s12028_s24  }
   0x7   : > { %11893 = sst [smem:[#allocation8_spill]] %s9207_s28  ;;  %p28_p0 = scmp.ge.s32.totalorder %s27_s8, 2 }
   0x8   : > { %11894 = sst [smem:[#allocation9_spill]] %s9211_s29  ;;  %s30_s9 = sadd.s32 1, %s9211_s29 }
   0x9   : > { %11895 = sst [smem:[#allocation10_spill]] %s9215_s30  ;;  %s6868_s10 = sadd.s32 4294967295, %s9215_s30  }
   0xa   : > { %p147_p1 = scmp.ne.s32.totalorder %s9195_s25, %s9191_s24  ;;  %s12035_s8 = smov (%p28_p0, %s27_s8), 0 }
   0xb   : > { %11896 = sst [smem:[#allocation11_spill]] %s12035_s8  ;;  %s12037_s9 = smov (!%p28_p0, %s30_s9), %s9211_s29 }
   0xc   : > { %s133_s11 = ssub.s32 %s9207_s28, %s12035_s8  ;;  %p148_p2 = scmp.eq.s32.totalorder %s6868_s10, 3 }
   0xd   : > { %p32_p3 = scmp.ge.s32.totalorder %s12037_s9, 2  ;;  %p6872_p4 = scmp.ge.s32.totalorder %s9215_s30, 1 }
   0xe   : > { %p9304_p5 = por %p148_p2, %p147_p1  ;;  %p281_p6 = scmp.lt.s32.totalorder %s9215_s30, 5 }
   0xf   : > { %s12039_s9 = smov (%p32_p3, %s12037_s9), 0  ;;  %s137_s15 = sadd.s32 1, %s9195_s25 }
  0x10   : > { %11898 = sst [smem:[#allocation12_spill]] %s12039_s9  ;;  %p282_p7 = pnand %p6872_p4, %p281_p6 }
  0x11   : > { %s132_s13 = ssub.s32 %s9211_s29, %s12039_s9 }
  0x12   : > { %s134_s14 = sor.u32 %s133_s11, %s132_s13  ;;  %285 = sbr.rel (%p282_p7) target bundleno = 1127 (0x467), region = 36 }
  0x13   : > { %p135_p8 = scmp.eq.s32.totalorder %s134_s14, 0 }
  0x15   : > { %s9315_s16 = scalar_select %p135_p8, %s9195_s25, %s137_s15  }
  0x17   : > { %11899 = sst [smem:[#allocation13_spill]] %s9315_s16 }
  0x19   : > { %s317_s17 = sand.u32 1, %s9191_s24   ;;  %p335_p9 = scmp.lt.s32.totalorder %s9203_s27, 1 }
  0x1a   : > { %s6873_s18 = sshll.u32 %s317_s17, 7  ;;  %p337_p10 = scmp.lt.s32.totalorder %s9199_s26, 1 }
  0x1b   : > { %s9321_s19 = scalar_select %p335_p9, %s9203_s27, 1 }
  0x1c   : > { %s338_s20 = scalar_select %p337_p10, %s9199_s26, 1 }
  0x1d   : > { %s8983_s21 = smul.u32 120, %s9321_s19  ;;  %s357_s10 = scalar_lea.vmem %s11835_s5, %s9321_s19 }
  0x1e   : > { %s8982_s11 = smul.u32 30, %s338_s20  ;;  %s360_s24 = scalar_lea.vmem %s11836_s6, %s9321_s19 }
  0x1f   : > { %s363_s9 = scalar_lea.vmem %s11837_s7, %s9321_s19  ;;  %s9347_s20 = scalar_lea.vmem [#allocation6], %s6873_s18 }
  0x20   : > { %s341_s8 = sadd.s32 %s8983_s21, %s8982_s11  ;;  %p6876_p11 = scmp.ne.s32.totalorder %s9199_s26, 0 }
  0x21   : > { %s6874_s29 = sshll.u32 %s341_s8, 2  ;;  %v9217_v0 = vmov (!%p6876_p11), 0.0  }
  0x22   : > { %s9340_s25 = scalar_lea.vmem %s11830_s0, %s6874_s29  ;;  %s9345_s22 = scalar_lea.vmem %s11831_s1, %s6874_s29  ;;  %369 = vst [vmem:[#allocation2] sm:$0xff] (!%p6876_p11), %v9217_v0  ;;  %370 = vst [vmem:[#allocation3] sm:$0xff] (!%p6876_p11), %v9217_v0 }
  0x23   : > { %368 = sbr.rel (%p6876_p11) target bundleno = 51 (0x33), region = 40  ;;  %371 = vst [vmem:[#allocation4] sm:$0xff] (!%p6876_p11), %v9217_v0  ;;  %372 = vst [vmem:[#allocation4 + $0x8] sm:$0xff] (!%p6876_p11), %v9217_v0 }
  0x24   : > { %373 = vst [vmem:[#allocation4 + $0x10] sm:$0xff] (!%p6876_p11), %v9217_v0  ;;  %374 = vst [vmem:[#allocation4 + $0x18] sm:$0xff] (!%p6876_p11), %v9217_v0 }
  0x25   : > { %375 = vst [vmem:[#allocation4 + $0x20] sm:$0xff] (!%p6876_p11), %v9217_v0  ;;  %376 = vst [vmem:[#allocation4 + $0x28] sm:$0xff] (!%p6876_p11), %v9217_v0 }
  0x26   : > { %377 = vst [vmem:[#allocation4 + $0x30] sm:$0xff] (!%p6876_p11), %v9217_v0  ;;  %378 = vst [vmem:[#allocation4 + $0x38] sm:$0xff] (!%p6876_p11), %v9217_v0 }
  0x27   : > { %379 = vst [vmem:[#allocation4 + $0x40] sm:$0xff] (!%p6876_p11), %v9217_v0  ;;  %380 = vst [vmem:[#allocation4 + $0x48] sm:$0xff] (!%p6876_p11), %v9217_v0 }
  0x28   : > { %381 = vst [vmem:[#allocation4 + $0x50] sm:$0xff] (!%p6876_p11), %v9217_v0  ;;  %382 = vst [vmem:[#allocation4 + $0x58] sm:$0xff] (!%p6876_p11), %v9217_v0 }
  0x29   : > { %383 = vst [vmem:[#allocation4 + $0x60] sm:$0xff] (!%p6876_p11), %v9217_v0  ;;  %384 = vst [vmem:[#allocation4 + $0x68] sm:$0xff] (!%p6876_p11), %v9217_v0 }
  0x2a   : > { %385 = vst [vmem:[#allocation4 + $0x70] sm:$0xff] %v9217_v0  ;;  %386 = vst [vmem:[#allocation4 + $0x78] sm:$0xff] %v9217_v0 }
  0x2b   : > { %387 = vst [vmem:[#allocation5] sm:$0xff] %v9217_v0  ;;  %388 = vst [vmem:[#allocation5 + $0x8] sm:$0xff] %v9217_v0 }
  0x2c   : > { %389 = vst [vmem:[#allocation5 + $0x10] sm:$0xff] %v9217_v0  ;;  %390 = vst [vmem:[#allocation5 + $0x18] sm:$0xff] %v9217_v0 }
  0x2d   : > { %391 = vst [vmem:[#allocation5 + $0x20] sm:$0xff] %v9217_v0  ;;  %392 = vst [vmem:[#allocation5 + $0x28] sm:$0xff] %v9217_v0 }
  0x2e   : > { %393 = vst [vmem:[#allocation5 + $0x30] sm:$0xff] %v9217_v0  ;;  %394 = vst [vmem:[#allocation5 + $0x38] sm:$0xff] %v9217_v0 }
  0x2f   : > { %395 = vst [vmem:[#allocation5 + $0x40] sm:$0xff] %v9217_v0  ;;  %396 = vst [vmem:[#allocation5 + $0x48] sm:$0xff] %v9217_v0 }
  0x30   : > { %397 = vst [vmem:[#allocation5 + $0x50] sm:$0xff] %v9217_v0  ;;  %398 = vst [vmem:[#allocation5 + $0x58] sm:$0xff] %v9217_v0 }
  0x31   : > { %399 = vst [vmem:[#allocation5 + $0x60] sm:$0xff] %v9217_v0  ;;  %400 = vst [vmem:[#allocation5 + $0x68] sm:$0xff] %v9217_v0 }
  0x32   : > { %401 = vst [vmem:[#allocation5 + $0x70] sm:$0xff] %v9217_v0  ;;  %402 = vst [vmem:[#allocation5 + $0x78] sm:$0xff] %v9217_v0 }
  0x33 PF: > { %v9041_v1 = vld [vmem:[%s11832_s2 + $0x40] sm:$0xff]   ;;  %v9042_v2 = vld [vmem:[%s11832_s2 + $0x48] sm:$0xff]   ;;  %v9043_v3 = vld [vmem:[%s11832_s2 + $0x50] sm:$0xff]   ;;  %vm443_vm0 = vsmask.f32 3328  ;;  %v11900_v28 = vmov 0 }
  0x34   : > { %8086 = vmatprep.subr.bf16.mxu0 %v9041_v1  ;;  %8374 = vmatprep.subr.bf16.mxu1 %v9041_v1  ;;  %v9044_v4 = vld [vmem:[%s11832_s2 + $0x58] sm:$0xff]   ;;  %v9363_v5 = vld [vmem:[%s9340_s25] sm:$0xf]  ;;  %v9366_v6 = vld [vmem:[%s9340_s25 + $0x4] sm:$0xf]  ;;  %vm1049_vm3 = vcmask 1042432  }
  0x35   : > { %8087 = vmatpush3.bf16.msra.mxu0 %v9041_v1  ;;  %8375 = vmatpush3.bf16.msra.mxu1 %v9041_v1  ;;  %v9369_v7 = vld [vmem:[%s9340_s25 + $0x8] sm:$0x1]  ;;  %vm444_vm1 = vsmask.f32 7440  ;;  %v447_v8 = vshrl.u32 %v9363_v5, 16  ;;  %v450_v9 = vshll.u32 %v9363_v5, 16 }
  0x36   : > { %8088 = vmatprep.subr.bf16.mxu0 %v9042_v2  ;;  %8376 = vmatprep.subr.bf16.mxu1 %v9042_v2  ;;  %v456_v10 = vshll.u32 %v9366_v6, 16  ;;  %v460_v11 = vshrl.u32 %v9366_v6, 16  ;;  %v466_v12 = vshll.u32 %v9369_v7, 16  ;;  %v9377_v13 = vld [vmem:[%s9345_s22 + $0xf0] sm:$0xf]  ;;  %v9045_v18 = vld [vmem:[%s11832_s2 + $0x60] sm:$0xff]   ;;  %vm9400_vm2 = vmor %vm443_vm0, %vm444_vm1 }
  0x37   : > { %v449_v14 = vrot.slane %v447_v8, 4  ;;  %v452_v15 = vrot.slane %v450_v9, 5  ;;  %v9380_v16 = vld [vmem:[%s9345_s22 + $0xf4] sm:$0xf]  ;;  %v9383_v17 = vld [vmem:[%s9345_s22 + $0xf8] sm:$0x1] }
  0x38   : > { %v458_v19 = vrot.slane %v456_v10, 5  ;;  %v462_v20 = vrot.slane %v460_v11, 4  ;;  %v3316_v21 = vshrl.u32 %v9377_v13, 16  ;;  %v3319_v23 = vshll.u32 %v9377_v13, 16  ;;  %v9393_v26 = vld [vmem:[%s9340_s25 + $0xc] sm:$0xf] }
  0x39   : > { %8089 = vmatpush3.bf16.msra.mxu0 %v9042_v2  ;;  %8377 = vmatpush3.bf16.msra.mxu1 %v9042_v2  ;;  %v453_v22 = vor.u32 %v452_v15, %v449_v14  ;;  %v3325_v24 = vshll.u32 %v9380_v16, 16  ;;  %v3329_v25 = vshrl.u32 %v9380_v16, 16  ;;  %v9046_v27 = vld [vmem:[%s11832_s2 + $0x68] sm:$0xff]   ;;  %v11901_v28 = vsel %vm9400_vm2, 4294967295, %v11900_v28  ;;  %v9406_v33 = vld [vmem:[%s9340_s25 + $0x10] sm:$0xf] }
  0x3a   : > { %8090 = vmatprep.subr.bf16.mxu0 %v9043_v3  ;;  %8378 = vmatprep.subr.bf16.mxu1 %v9043_v3  ;;  %11902 = vst [vmem:[#allocation14_spill] sm:$0xff] %v11901_v28  ;;  %v463_v29 = vor.u32 %v462_v20, %v458_v19  ;;  %v468_v30 = vrot.slane %v466_v12, 5  ;;  %v3318_v31 = vrot.slane %v3316_v21, 4  ;;  %v3335_v32 = vshll.u32 %v9383_v17, 16  ;;  %v9413_v45 = vld [vmem:[%s9340_s25 + $0x14] sm:$0x1] }
  0x3b   : > { %v454_v34 = vrot.slane %v453_v22, 4  ;;  %v3321_v35 = vrot.slane %v3319_v23, 5  ;;  %v3327_v36 = vrot.slane %v3325_v24, 5  ;;  %v3331_v37 = vrot.slane %v3329_v25, 4  ;;  %v9420_v51 = vld [vmem:[%s9345_s22 + $0xfc] sm:$0xf] }
  0x3c   : > { %v464_v38 = vrot.slane %v463_v29, 4  ;;  %v3337_v39 = vrot.slane %v3335_v32, 5  ;;  %v471_v40 = vshrl.u32 %v9393_v26, 16  ;;  %v474_v41 = vshll.u32 %v9393_v26, 16  ;;  %v9047_v52 = vld [vmem:[%s11832_s2 + $0x70] sm:$0xff]   ;;  %p7590_p12 = scmp.ne.s32.totalorder %s9199_s26, 1 }
  0x3d   : > { %8091 = vmatpush3.bf16.msra.mxu0 %v9043_v3  ;;  %8379 = vmatpush3.bf16.msra.mxu1 %v9043_v3  ;;  %v459_v42 = vsel %vm9400_vm2, %v454_v34, %v458_v19  ;;  %v3322_v43 = vor.u32 %v3321_v35, %v3318_v31  ;;  %v3332_v44 = vor.u32 %v3331_v37, %v3327_v36  ;;  %v480_v46 = vshll.u32 %v9406_v33, 16  ;;  %v9427_v60 = vld [vmem:[%s9345_s22 + $0x100] sm:$0xf]  ;;  %v9434_v63 = vld [vmem:[%s9345_s22 + $0x104] sm:$0x1] }
  0x3e   : > { %8092 = vmatprep.subr.bf16.mxu0 %v9044_v4  ;;  %8380 = vmatprep.subr.bf16.mxu1 %v9044_v4  ;;  %v469_v47 = vsel %vm9400_vm2, %v464_v38, %v468_v30  ;;  %v473_v48 = vrot.slane %v471_v40, 4  ;;  %v476_v49 = vrot.slane %v474_v41, 5  ;;  %v484_v50 = vshrl.u32 %v9406_v33, 16  ;;  %v9439_v9 = vld [vmem:[%s9340_s25 + $0x18] sm:$0xf]  ;;  %v9049_v30 = vld [vmem:[%s11832_s2] sm:$0xff]  }
  0x3f   : > { %v6893_v53 = vcombine.low %v459_v42, %v469_v47  ;;  %v3323_v54 = vrot.slane %v3322_v43, 4  ;;  %v3333_v55 = vrot.slane %v3332_v44, 4  ;;  %v482_v56 = vrot.slane %v480_v46, 5  ;;  %v9444_v15 = vld [vmem:[%s9340_s25 + $0x1c] sm:$0xf] }
  0x40   : > { %v477_v57 = vor.u32 %v476_v49, %v473_v48  ;;  %v486_v58 = vrot.slane %v484_v50, 4  ;;  %v490_v59 = vshll.u32 %v9413_v45, 16  ;;  %v3340_v0 = vshrl.u32 %v9420_v51, 16  ;;  %v9453_v25 = vld [vmem:[%s9340_s25 + $0x20] sm:$0x1] }
  0x41   : > { %8093 = vmatpush3.bf16.msra.mxu0 %v9044_v4  ;;  %8381 = vmatpush3.bf16.msra.mxu1 %v9044_v4  ;;  %v3328_v61 = vsel %vm9400_vm2, %v3323_v54, %v3327_v36  ;;  %v3338_v62 = vsel %vm9400_vm2, %v3333_v55, %v3337_v39  ;;  %v3343_v1 = vshll.u32 %v9420_v51, 16  ;;  %v3349_v12 = vshll.u32 %v9427_v60, 16  ;;  %v9464_v35 = vld [vmem:[%s9345_s22 + $0x108] sm:$0xf]  ;;  %v9467_v40 = vld [vmem:[%s9345_s22 + $0x10c] sm:$0xf] }
  0x42   : > { %8094 = vmatprep.subr.bf16.mxu0 %v9045_v18  ;;  %8382 = vmatprep.subr.bf16.mxu1 %v9045_v18  ;;  %v7294_v2 = vcombine.low %v3328_v61, %v3338_v62  ;;  %v478_v3 = vrot.slane %v477_v57, 4  ;;  %v487_v4 = vor.u32 %v486_v58, %v482_v56  ;;  %v492_v8 = vrot.slane %v490_v59, 5  ;;  %v9474_v48 = vld [vmem:[%s9345_s22 + $0x110] sm:$0x1]  ;;  %v9050_v58 = vld [vmem:[%s11832_s2 + $0x8] sm:$0xff]  }
  0x43   : > { %8102 = vmatprep.mubr.bf16.mxu0 %v6893_v53  ;;  %v3342_v10 = vrot.slane %v3340_v0, 4  ;;  %v3345_v11 = vrot.slane %v3343_v1, 5  ;;  %v3353_v14 = vshrl.u32 %v9427_v60, 16  ;;  %v3359_v21 = vshll.u32 %v9434_v63, 16  ;;  %11903 = vst [vmem:[#allocation15_spill] sm:$0xff] %v9474_v48 }
  0x44   : > { %v483_v19 = vsel %vm9400_vm2, %v478_v3, %v482_v56  ;;  %v488_v20 = vrot.slane %v487_v4, 4  ;;  %8390 = vmatprep.mubr.bf16.mxu1 %v7294_v2  ;;  %v3351_v23 = vrot.slane %v3349_v12, 5  ;;  %v498_v32 = vshll.u32 %v9439_v9, 16  ;;  %v9480_v56 = vld [vmem:[%s9340_s25 + $0x24] sm:$0xf] }
  0x45   : > { %8095 = vmatpush3.bf16.msra.mxu0 %v9045_v18  ;;  %8383 = vmatpush3.bf16.msra.mxu1 %v9045_v18  ;;  %v9048_v18 = vld [vmem:[%s11832_s2 + $0x78] sm:$0xff]   ;;  %v3346_v22 = vor.u32 %v3345_v11, %v3342_v10  ;;  %v3355_v24 = vrot.slane %v3353_v14, 4  ;;  %v3361_v31 = vrot.slane %v3359_v21, 5  ;;  %v504_v34 = vshll.u32 %v9444_v15, 16  ;;  %v9489_v0 = vld [vmem:[%s9340_s25 + $0x28] sm:$0xf] }
  0x46   : > { %8096 = vmatprep.subr.bf16.mxu0 %v9046_v27  ;;  %8384 = vmatprep.subr.bf16.mxu1 %v9046_v27  ;;  %v493_v29 = vsel %vm9400_vm2, %v488_v20, %v492_v8  ;;  %v500_v41 = vrot.slane %v498_v32, 5  ;;  %v508_v43 = vshrl.u32 %v9444_v15, 16  ;;  %v514_v44 = vshll.u32 %v9453_v25, 16 }
  0x47   : > { %v6894_v36 = vcombine.low %v483_v19, %v493_v29  ;;  %v3347_v37 = vrot.slane %v3346_v22, 4  ;;  %v3356_v38 = vor.u32 %v3355_v24, %v3351_v23  ;;  %v506_v42 = vrot.slane %v504_v34, 5  ;;  %v9496_v19 = vld [vmem:[%s9340_s25 + $0x2c] sm:$0x1]  ;;  %v9501_v29 = vld [vmem:[%s9345_s22 + $0x114] sm:$0xf] }
  0x48   : > { %v3364_v49 = vshrl.u32 %v9464_v35, 16  ;;  %v3367_v50 = vshll.u32 %v9464_v35, 16  ;;  %v510_v53 = vrot.slane %v508_v43, 4  ;;  %v516_v54 = vrot.slane %v514_v44, 5  ;;  %11904 = vst [vmem:[#allocation16_spill] sm:$0xff] %v9496_v19 }
  0x49   : > { %8097 = vmatpush3.bf16.msra.mxu0 %v9046_v27  ;;  %8385 = vmatpush3.bf16.msra.mxu1 %v9046_v27  ;;  %v495_v27 = vshrl.u32 %v9439_v9, 16  ;;  %v3352_v46 = vsel %vm9400_vm2, %v3347_v37, %v3351_v23  ;;  %v3357_v47 = vrot.slane %v3356_v38, 4  ;;  %v3373_v55 = vshll.u32 %v9467_v40, 16  ;;  %v9510_v37 = vld [vmem:[%s9345_s22 + $0x118] sm:$0xf] }
  0x4a   : > { %8098 = vmatprep.subr.bf16.mxu0 %v9047_v52  ;;  %8386 = vmatprep.subr.bf16.mxu1 %v9047_v52  ;;  %v3366_v59 = vrot.slane %v3364_v49, 4  ;;  %v3369_v61 = vrot.slane %v3367_v50, 5  ;;  %v3377_v62 = vshrl.u32 %v9467_v40, 16  ;;  %v511_v3 = vor.u32 %v510_v53, %v506_v42 }
  0x4b   : > { %v497_v39 = vrot.slane %v495_v27, 4  ;;  %v3362_v57 = vsel %vm9400_vm2, %v3357_v47, %v3361_v31  ;;  %v3375_v4 = vrot.slane %v3373_v55, 5  ;;  %v3383_v11 = vshll.u32 %v9474_v48, 16  ;;  %v9052_v55 = vld [vmem:[%s11832_s2 + $0x18] sm:$0xff]  }
  0x4c   : > { %v7295_v1 = vcombine.low %v3352_v46, %v3362_v57  ;;  %v3370_v8 = vor.u32 %v3369_v61, %v3366_v59  ;;  %v3379_v10 = vrot.slane %v3377_v62, 4  ;;  %v519_v12 = vshrl.u32 %v9480_v56, 16  ;;  %v9516_v46 = vld [vmem:[%s9345_s22 + $0x11c] sm:$0x1]  ;;  %v9528_v57 = vld [vmem:[%s9340_s25 + $0x30] sm:$0xf] }
  0x4d   : > { %8099 = vmatpush3.bf16.msra.mxu0 %v9047_v52  ;;  %8387 = vmatpush3.bf16.msra.mxu1 %v9047_v52  ;;  %v501_v52 = vor.u32 %v500_v41, %v497_v39  ;;  %v522_v20 = vshll.u32 %v9480_v56, 16  ;;  %v528_v21 = vshll.u32 %v9489_v0, 16  ;;  %v3385_v24 = vrot.slane %v3383_v11, 5  ;;  %11905 = vst [vmem:[#allocation17_spill] sm:$0xff] %v9516_v46 }
  0x4e   : > { %8100 = vmatprep.subr.bf16.mxu0 %v9048_v18  ;;  %8388 = vmatprep.subr.bf16.mxu1 %v9048_v18  ;;  %v3371_v22 = vrot.slane %v3370_v8, 4  ;;  %v3380_v23 = vor.u32 %v3379_v10, %v3375_v4  ;;  %v521_v27 = vrot.slane %v519_v12, 4  ;;  %v3388_v47 = vshrl.u32 %v9501_v29, 16  ;;  %v9537_v12 = vld [vmem:[%s9340_s25 + $0x38] sm:$0x1] }
  0x4f   : > { %v502_v2 = vrot.slane %v501_v52, 4  ;;  %v524_v32 = vrot.slane %v522_v20, 5  ;;  %v530_v34 = vrot.slane %v528_v21, 5  ;;  %v3391_v49 = vshll.u32 %v9501_v29, 16  ;;  %11906 = vst [vmem:[#allocation18_spill] sm:$0xff] %v9537_v12 }
  0x50   : > { %v3376_v39 = vsel %vm9400_vm2, %v3371_v22, %v3375_v4  ;;  %v3381_v41 = vrot.slane %v3380_v23, 4  ;;  %v3397_v53 = vshll.u32 %v9510_v37, 16  ;;  %v3407_v8 = vshll.u32 %v9516_v46, 16 }
  0x51   : > { %8101 = vmatpush3.bf16.msra.mxu0 %v9048_v18  ;;  %8389 = vmatpush3.bf16.msra.mxu1 %v9048_v18  ;;  %v507_v14 = vsel %vm9400_vm2, %v502_v2, %v506_v42  ;;  %v512_v18 = vrot.slane %v511_v3, 4  ;;  %v538_v42 = vshll.u32 %v9496_v19, 16  ;;  %v525_v43 = vor.u32 %v524_v32, %v521_v27  ;;  %v9546_v27 = vld [vmem:[%s9345_s22 + $0x124] sm:$0xf] }
  0x52   : > { %8118 = vmatprep.subr.bf16.mxu0 %v9049_v30  ;;  %8406 = vmatprep.subr.bf16.mxu1 %v9049_v30  ;;  %v3386_v50 = vsel %vm9400_vm2, %v3381_v41, %v3385_v24  ;;  %v3393_v2 = vrot.slane %v3391_v49, 5  ;;  %v3399_v3 = vrot.slane %v3397_v53, 5  ;;  %v3409_v22 = vrot.slane %v3407_v8, 5  ;;  %v9543_v24 = vld [vmem:[%s9345_s22 + $0x120] sm:$0xf] }
  0x53   : > { %v517_v31 = vsel %vm9400_vm2, %v512_v18, %v516_v54  ;;  %v540_v52 = vrot.slane %v538_v42, 5  ;;  %v3401_v54 = vshrl.u32 %v9510_v37, 16  ;;  %v7296_v59 = vcombine.low %v3376_v39, %v3386_v50  ;;  %v9561_v53 = vld [vmem:[%s9345_s22 + $0x128] sm:$0x1]  ;;  %v9569_v8 = vld [vmem:[%s9340_s25 + $0x40] sm:$0xf] }
  0x54   : > { %8103 = vmatmul.mubr.bf16.vlgmr.msra.gmra.mrb[0].mxu0 %v6894_v36  ;;  %8391 = vmatmul.mubr.bf16.vlgmr.msra.gmra.mrb[0].mxu1 %v7295_v1  ;;  %v532_v36 = vshrl.u32 %v9489_v0, 16  ;;  %v6895_v38 = vcombine.low %v507_v14, %v517_v31  ;;  %v526_v61 = vrot.slane %v525_v43, 4  ;;  %v9531_v1 = vld [vmem:[%s9340_s25 + $0x34] sm:$0xf]  ;;  %v543_v14 = vshrl.u32 %v9528_v57, 16  ;;  %11907 = vst [vmem:[#allocation19_spill] sm:$0xff] %v9561_v53 }
  0x55   : > { %8119 = vmatpush3.bf16.msra.mxu0 %v9049_v30  ;;  %8407 = vmatpush3.bf16.msra.mxu1 %v9049_v30  ;;  %v9051_v30 = vld [vmem:[%s11832_s2 + $0x10] sm:$0xff]   ;;  %v3403_v4 = vrot.slane %v3401_v54, 4  ;;  %v546_v18 = vshll.u32 %v9528_v57, 16  ;;  %v552_v23 = vshll.u32 %v9531_v1, 16  ;;  %v3412_v49 = vshrl.u32 %v9543_v24, 16 }
  0x56   : > { %8120 = vmatprep.subr.bf16.mxu0 %v9050_v58  ;;  %8408 = vmatprep.subr.bf16.mxu1 %v9050_v58  ;;  %v534_v44 = vrot.slane %v532_v36, 4  ;;  %v531_v10 = vsel %vm9400_vm2, %v526_v61, %v530_v34  ;;  %v545_v32 = vrot.slane %v543_v14, 4  ;;  %v556_v36 = vshrl.u32 %v9531_v1, 16  ;;  %v9566_v61 = vld [vmem:[%s9340_s25 + $0x3c] sm:$0xf] }
  0x57   : > { %8106 = vmatprep.mubr.bf16.mxu0 %v6895_v38  ;;  %8394 = vmatprep.mubr.bf16.mxu1 %v7296_v59  ;;  %v3404_v21 = vor.u32 %v3403_v4, %v3399_v3  ;;  %v554_v42 = vrot.slane %v552_v23, 5  ;;  %v3415_v54 = vshll.u32 %v9543_v24, 16  ;;  %v3421_v59 = vshll.u32 %v9546_v27, 16 }
  0x58   : > { %v535_v62 = vor.u32 %v534_v44, %v530_v34  ;;  %v548_v34 = vrot.slane %v546_v18, 5  ;;  %v558_v44 = vrot.slane %v556_v36, 4  ;;  %v3425_v18 = vshrl.u32 %v9546_v27, 16 }
  0x59   : > { %8121 = vmatpush3.bf16.msra.mxu0 %v9050_v58  ;;  %8409 = vmatpush3.bf16.msra.mxu1 %v9050_v58  ;;  %v3390_v58 = vrot.slane %v3388_v47, 4  ;;  %v3405_v41 = vrot.slane %v3404_v21, 4  ;;  %v562_v47 = vshll.u32 %v9537_v12, 16  ;;  %v3423_v14 = vrot.slane %v3421_v59, 5 }
  0x5a   : > { %8122 = vmatprep.subr.bf16.mxu0 %v9051_v30  ;;  %8410 = vmatprep.subr.bf16.mxu1 %v9051_v30  ;;  %v536_v11 = vrot.slane %v535_v62, 4  ;;  %v549_v43 = vor.u32 %v548_v34, %v545_v32  ;;  %v3431_v21 = vshll.u32 %v9561_v53, 16  ;;  %v567_v23 = vshrl.u32 %v9566_v61, 16 }
  0x5b   : > { %v3394_v20 = vor.u32 %v3393_v2, %v3390_v58  ;;  %v559_v2 = vor.u32 %v558_v44, %v554_v42  ;;  %v564_v4 = vrot.slane %v562_v47, 5  ;;  %v3427_v32 = vrot.slane %v3425_v18, 4  ;;  %v9591_v44 = vld [vmem:[%s9345_s22 + $0x130] sm:$0xf] }
  0x5c   : > { %v541_v31 = vsel %vm9400_vm2, %v536_v11, %v540_v52  ;;  %v3410_v52 = vsel %vm9400_vm2, %v3405_v41, %v3409_v22  ;;  %v550_v58 = vrot.slane %v549_v43, 4  ;;  %v3417_v11 = vrot.slane %v3415_v54, 5  ;;  %v9579_v22 = vld [vmem:[%s9340_s25 + $0x44] sm:$0x1]  ;;  %v9055_v47 = vld [vmem:[%s11832_s2 + $0x30] sm:$0xff]  }
  0x5d   : > { %8123 = vmatpush3.bf16.msra.mxu0 %v9051_v30  ;;  %8411 = vmatpush3.bf16.msra.mxu1 %v9051_v30  ;;  %v9053_v30 = vld [vmem:[%s11832_s2 + $0x20] sm:$0xff]   ;;  %v6896_v38 = vcombine.low %v531_v10, %v541_v31  ;;  %v3395_v39 = vrot.slane %v3394_v20, 4  ;;  %v3414_v10 = vrot.slane %v3412_v49, 4  ;;  %v560_v20 = vrot.slane %v559_v2, 4  ;;  %11908 = vst [vmem:[#allocation20_spill] sm:$0xff] %v9579_v22 }
  0x5e   : > { %8124 = vmatprep.subr.bf16.mxu0 %v9052_v55  ;;  %8412 = vmatprep.subr.bf16.mxu1 %v9052_v55  ;;  %v570_v34 = vshll.u32 %v9566_v61, 16  ;;  %v576_v36 = vshll.u32 %v9569_v8, 16  ;;  %v3433_v41 = vrot.slane %v3431_v21, 5  ;;  %v580_v43 = vshrl.u32 %v9569_v8, 16  ;;  %v9598_v2 = vld [vmem:[%s9345_s22 + $0x134] sm:$0x1] }
  0x5f   : > { %8107 = vmatmul.mubr.bf16.gmra.mrb[4].mxu0 %v6896_v38  ;;  %v3400_v50 = vsel %vm9400_vm2, %v3395_v39, %v3399_v3  ;;  %v9054_v3 = vld [vmem:[%s11832_s2 + $0x28] sm:$0xff]   ;;  %v3418_v31 = vor.u32 %v3417_v11, %v3414_v10  ;;  %v565_v39 = vsel %vm9400_vm2, %v560_v20, %v564_v4  ;;  %11909 = vst [vmem:[#allocation21_spill] sm:$0xff] %v9598_v2  ;;  %vm1050_vm4 = vcmask 1046532  }
  0x60   : > { %v7297_v62 = vcombine.low %v3400_v50, %v3410_v52  ;;  %v9585_v38 = vld [vmem:[%s9345_s22 + $0x12c] sm:$0xf]  ;;  %v3428_v52 = vor.u32 %v3427_v32, %v3423_v14  ;;  %v572_v54 = vrot.slane %v570_v34, 5  ;;  %v578_v59 = vrot.slane %v576_v36, 5  ;;  %vm9734_vm5 = vmor %vm1049_vm3, %vm1050_vm4 }
  0x61   : > { %8413 = vmatpush3.bf16.msra.mxu1 %v9052_v55  ;;  %8125 = vmatpush3.bf16.msra.mxu0 %v9052_v55  ;;  %v555_v55 = vsel %vm9400_vm2, %v550_v58, %v554_v42  ;;  %v569_v42 = vrot.slane %v567_v23, 4  ;;  %v3419_v50 = vrot.slane %v3418_v31, 4  ;;  %v586_v58 = vshll.u32 %v9579_v22, 16  ;;  %v9608_v20 = vld [vmem:[%s9340_s25 + $0x4c] sm:$0xf] }
  0x62   : > { %8414 = vmatprep.subr.bf16.mxu1 %v9053_v30  ;;  %8126 = vmatprep.subr.bf16.mxu0 %v9053_v30  ;;  %v6897_v49 = vcombine.low %v555_v55, %v565_v39  ;;  %v3429_v10 = vrot.slane %v3428_v52, 4  ;;  %v3439_v18 = vshll.u32 %v9585_v38, 16  ;;  %v9605_v55 = vld [vmem:[%s9340_s25 + $0x48] sm:$0xf]  ;;  %v3445_v32 = vshll.u32 %v9591_v44, 16 }
  0x63   : > { %8395 = vmatmul.mubr.bf16.gmra.mrb[4].mxu1 %v7297_v62  ;;  %v582_v62 = vrot.slane %v580_v43, 4  ;;  %v3424_v4 = vsel %vm9400_vm2, %v3419_v50, %v3423_v14  ;;  %v573_v11 = vor.u32 %v572_v54, %v569_v42  ;;  %v588_v23 = vrot.slane %v586_v58, 5  ;;  %v9615_v42 = vld [vmem:[%s9340_s25 + $0x50] sm:$0x1]  ;;  %v9056_v43 = vld [vmem:[%s11832_s2 + $0x38] sm:$0xff]  }
  0x64   : > { %8110 = vmatprep.mubr.bf16.mxu0 %v6897_v49  ;;  %v3434_v14 = vsel %vm9400_vm2, %v3429_v10, %v3433_v41  ;;  %v3441_v36 = vrot.slane %v3439_v18, 5  ;;  %v3449_v39 = vshrl.u32 %v9591_v44, 16  ;;  %11910 = vst [vmem:[#allocation22_spill] sm:$0xff] %v9615_v42  ;;  %v3447_v52 = vrot.slane %v3445_v32, 5  ;;  %v9622_v54 = vld [vmem:[%s9345_s22 + $0x138] sm:$0xf] }
  0x65   : > { %8415 = vmatpush3.bf16.msra.mxu1 %v9053_v30  ;;  %8127 = vmatpush3.bf16.msra.mxu0 %v9053_v30  ;;  %v3436_v30 = vshrl.u32 %v9585_v38, 16  ;;  %v583_v21 = vor.u32 %v582_v62, %v578_v59  ;;  %v574_v34 = vrot.slane %v573_v11, 4  ;;  %v7298_v49 = vcombine.low %v3424_v4, %v3434_v14  ;;  %v9628_v10 = vld [vmem:[%s9345_s22 + $0x13c] sm:$0xf] }
  0x66   : > { %8416 = vmatprep.subr.bf16.mxu1 %v9054_v3  ;;  %8128 = vmatprep.subr.bf16.mxu0 %v9054_v3  ;;  %v3451_v58 = vrot.slane %v3449_v39, 4  ;;  %v594_v18 = vshll.u32 %v9605_v55, 16  ;;  %v604_v39 = vshrl.u32 %v9608_v20, 16  ;;  %vm5962_vm6 = vcmask 1046528  }
  0x67   : > { %v3438_v31 = vrot.slane %v3436_v30, 4  ;;  %v584_v50 = vrot.slane %v583_v21, 4  ;;  %v579_v41 = vsel %vm9400_vm2, %v574_v34, %v578_v59  ;;  %v591_v30 = vshrl.u32 %v9605_v55, 16  ;;  %8398 = vmatprep.mubr.bf16.mxu1 %v7298_v49  ;;  %v9637_v59 = vld [vmem:[%s11832_s2 + $0x80] sm:$0xff]  }
  0x68   : > { %v600_v21 = vshll.u32 %v9608_v20, 16  ;;  %v3452_v14 = vor.u32 %v3451_v58, %v3447_v52  ;;  %v610_v49 = vshll.u32 %v9615_v42, 16  ;;  %v3463_v58 = vshll.u32 %v9622_v54, 16 }
  0x69   : > { %8417 = vmatpush3.bf16.msra.mxu1 %v9054_v3  ;;  %8129 = vmatpush3.bf16.msra.mxu0 %v9054_v3  ;;  %v3455_v3 = vshll.u32 %v9598_v2, 16  ;;  %v3442_v62 = vor.u32 %v3441_v36, %v3438_v31  ;;  %v589_v4 = vsel %vm9400_vm2, %v584_v50, %v588_v23  ;;  %v593_v34 = vrot.slane %v591_v30, 4  ;;  %v9642_v50 = vld [vmem:[%s9345_s22 + $0x140] sm:$0x1]  ;;  %v9652_v30 = vld [vmem:[%s9340_s25 + $0x58] sm:$0xf] }
  0x6a   : > { %8418 = vmatprep.subr.bf16.mxu1 %v9055_v47  ;;  %8130 = vmatprep.subr.bf16.mxu0 %v9055_v47  ;;  %v6898_v31 = vcombine.low %v579_v41, %v589_v4  ;;  %v596_v23 = vrot.slane %v594_v18, 5  ;;  %v602_v36 = vrot.slane %v600_v21, 5  ;;  %11911 = vst [vmem:[#allocation23_spill] sm:$0xff] %v9642_v50  ;;  %v3453_v41 = vrot.slane %v3452_v14, 4 }
  0x6b   : > { %v3457_v11 = vrot.slane %v3455_v3, 5  ;;  %v3443_v32 = vrot.slane %v3442_v62, 4  ;;  %v3460_v62 = vshrl.u32 %v9622_v54, 16  ;;  %v606_v18 = vrot.slane %v604_v39, 4 }
  0x6c   : > { %8111 = vmatmul.mubr.bf16.gmra.mrb[8].mxu0 %v6898_v31  ;;  %v597_v4 = vor.u32 %v596_v23, %v593_v34  ;;  %v612_v21 = vrot.slane %v610_v49, 5  ;;  %v3469_v42 = vshll.u32 %v9628_v10, 16  ;;  %v3473_v14 = vshrl.u32 %v9628_v10, 16  ;;  %v9661_v49 = vld [vmem:[%s9340_s25 + $0x5c] sm:$0x1] }
  0x6d   : > { %8419 = vmatpush3.bf16.msra.mxu1 %v9055_v47  ;;  %8131 = vmatpush3.bf16.msra.mxu0 %v9055_v47  ;;  %v9645_v47 = vld [vmem:[%s9340_s25 + $0x54] sm:$0xf]  ;;  %v3448_v3 = vsel %vm9400_vm2, %v3443_v32, %v3447_v52  ;;  %v3458_v52 = vsel %vm9400_vm2, %v3453_v41, %v3457_v11  ;;  %v3462_v31 = vrot.slane %v3460_v62, 4  ;;  %v3465_v32 = vrot.slane %v3463_v58, 5  ;;  %v9666_v11 = vld [vmem:[%s9345_s22 + $0x144] sm:$0xf] }
  0x6e   : > { %8132 = vmatprep.subr.bf16.mxu0 %v9056_v43  ;;  %8420 = vmatprep.subr.bf16.mxu1 %v9056_v43  ;;  %v7299_v2 = vcombine.low %v3448_v3, %v3458_v52  ;;  %v598_v34 = vrot.slane %v597_v4, 4  ;;  %v607_v23 = vor.u32 %v606_v18, %v602_v36  ;;  %v3471_v39 = vrot.slane %v3469_v42, 5  ;;  %v9673_v42 = vld [vmem:[%s9345_s22 + $0x148] sm:$0xf] }
  0x6f   : > { %v3475_v22 = vrot.slane %v3473_v14, 4  ;;  %v3479_v53 = vshll.u32 %v9642_v50, 16  ;;  %v615_v12 = vshrl.u32 %v9645_v47, 16  ;;  %v618_v3 = vshll.u32 %v9645_v47, 16 }
  0x70   : > { %8399 = vmatmul.mubr.bf16.gmra.mrb[8].mxu1 %v7299_v2  ;;  %v603_v41 = vsel %vm9400_vm2, %v598_v34, %v602_v36  ;;  %v608_v62 = vrot.slane %v607_v23, 4  ;;  %v624_v58 = vshll.u32 %v9652_v30, 16  ;;  %v628_v50 = vshrl.u32 %v9652_v30, 16 }
  0x71   : > { %8421 = vmatpush3.bf16.msra.mxu1 %v9056_v43  ;;  %8133 = vmatpush3.bf16.msra.mxu0 %v9056_v43  ;;  %v3466_v43 = vor.u32 %v3465_v32, %v3462_v31  ;;  %v3476_v18 = vor.u32 %v3475_v22, %v3471_v39  ;;  %v3481_v52 = vrot.slane %v3479_v53, 5  ;;  %v617_v31 = vrot.slane %v615_v12, 4 }
  0x72   : > { %8438 = vmatprep.subr.bf16.mxu1 %v9637_v59  ;;  %8150 = vmatprep.subr.bf16.mxu0 %v9637_v59  ;;  %v613_v32 = vsel %vm9400_vm2, %v608_v62, %v612_v21  ;;  %v620_v14 = vrot.slane %v618_v3, 5  ;;  %v626_v2 = vrot.slane %v624_v58, 5  ;;  %v634_v46 = vshll.u32 %v9661_v49, 16 }
  0x73   : > { %v3467_v4 = vrot.slane %v3466_v43, 4  ;;  %v6899_v36 = vcombine.low %v603_v41, %v613_v32  ;;  %v3477_v23 = vrot.slane %v3476_v18, 4  ;;  %v630_v48 = vrot.slane %v628_v50, 4  ;;  %v9682_v43 = vld [vmem:[%s9345_s22 + $0x14c] sm:$0x1] }
  0x74   : > { %v621_v19 = vor.u32 %v620_v14, %v617_v31  ;;  %v3484_v12 = vshrl.u32 %v9666_v11, 16  ;;  %v3487_v53 = vshll.u32 %v9666_v11, 16  ;;  %v636_v21 = vrot.slane %v634_v46, 5 }
  0x75   : > { %v3472_v34 = vsel %vm9400_vm2, %v3467_v4, %v3471_v39  ;;  %8114 = vmatprep.mubr.bf16.mxu0 %v6899_v36  ;;  %v3482_v22 = vsel %vm9400_vm2, %v3477_v23, %v3481_v52  ;;  %v3493_v39 = vshll.u32 %v9673_v42, 16  ;;  %v3497_v41 = vshrl.u32 %v9673_v42, 16  ;;  %v9752_v36 = vld [vmem:[%s11832_s2 + $0x88] sm:$0xff]  }
  0x76   : > { %v7300_v62 = vcombine.low %v3472_v34, %v3482_v22  ;;  %v622_v3 = vrot.slane %v621_v19, 4  ;;  %v631_v50 = vor.u32 %v630_v48, %v626_v2  ;;  %v3486_v58 = vrot.slane %v3484_v12, 4  ;;  %v7312_v12 = vld [vmem:[%s9345_s22 + $0x108] sm:$0xe] }
  0x77   : > { %v3489_v4 = vrot.slane %v3487_v53, 5  ;;  %v3495_v18 = vrot.slane %v3493_v39, 5  ;;  %v3499_v31 = vrot.slane %v3497_v41, 4  ;;  %v3503_v32 = vshll.u32 %v9682_v43, 16 }
  0x78   : > { %8402 = vmatprep.mubr.bf16.mxu1 %v7300_v62  ;;  %v627_v46 = vsel %vm9400_vm2, %v622_v3, %v626_v2  ;;  %v632_v52 = vrot.slane %v631_v50, 4  ;;  %v7303_v23 = vcombine.low %v9420_v51, %v9427_v60  ;;  %v3817_v53 = vrot.slane %v9434_v63, 5  ;;  %v9704_v3 = vld [vmem:[%s9340_s25] sm:$0xe]  ;;  %v9707_v50 = vld [vmem:[%s9345_s22 + $0xf0] sm:$0xe] }
  0x79   : > { %v3490_v19 = vor.u32 %v3489_v4, %v3486_v58  ;;  %v3500_v48 = vor.u32 %v3499_v31, %v3495_v18  ;;  %v3505_v34 = vrot.slane %v3503_v32, 5  ;;  %v6909_v39 = vcombine.low %v9363_v5, %v9366_v6  ;;  %v9710_v58 = vld [vmem:[%s9340_s25 + $0xc] sm:$0xe]  ;;  %v7311_v31 = vld [vmem:[%s9345_s22 + $0xfc] sm:$0xe] }
  0x7a   : > { %v637_v22 = vsel %vm9400_vm2, %v632_v52, %v636_v21  ;;  %v7302_v5 = vcombine.low %v9377_v13, %v9380_v16  ;;  %v6910_v4 = vcombine.low %v9393_v26, %v9406_v33  ;;  %v7304_v52 = vcombine.low %v9464_v35, %v9467_v40  ;;  %v1029_v13 = vld [vmem:[%s9340_s25 + $0x30] sm:$0xe] }
  0x7b   : > { %v6900_v41 = vcombine.low %v627_v46, %v637_v22  ;;  %v3491_v2 = vrot.slane %v3490_v19, 4  ;;  %v3501_v62 = vrot.slane %v3500_v48, 4  ;;  %v6911_v46 = vcombine.low %v9439_v9, %v9444_v15  ;;  %v1027_v19 = vld [vmem:[%s9340_s25 + $0x18] sm:$0xe]  ;;  %v11629_v48 = vld [vmem:[%s9340_s25 + $0x2c] sm:$0x1] }
  0x7c   : > { %v11853_v9 = vrot.slane %v9366_v6, 5  ;;  %v11854_v35 = vrot.slane %v9380_v16, 5  ;;  %vm6371_vm7 = vcmask (!%p7590_p12), 0  }
  0x7d   : > { %8115 = vmatmul.mubr.bf16.gmra.mrb[12].mxu0 %v6900_v41  ;;  %v3496_v63 = vsel %vm9400_vm2, %v3491_v2, %v3495_v18  ;;  %v3506_v21 = vsel %vm9400_vm2, %v3501_v62, %v3505_v34  ;;  %v3814_v41 = vrot.slane %v9427_v60, 5  ;;  %v7313_v2 = vld [vmem:[%s9345_s22 + $0x114] sm:$0xe]  ;;  %v1068_v34 = vrot.slane %v9444_v15, 5 }
  0x7e   : > { %v7301_v32 = vcombine.low %v3496_v63, %v3506_v21  ;;  %8134 = vmatprep.mubr.bf16.mxu0 %v6909_v39  ;;  %v7319_v39 = vrot.slane %v7311_v31, 9  ;;  %v11855_v63 = vrot.slane %v9406_v33, 5  ;;  %v6927_v21 = vrot.slane %v1027_v19, 9 }
  0x7f   : > { %v9756_v31 = vrot.slane %v11853_v9, 4  ;;  %v3816_v19 = vrot.slane %v3814_v41, 4  ;;  %v1071_v9 = vrot.slane %v9453_v25, 5  ;;  %v9066_v25 = vld [vmem:[%s11832_s2 + $0x90] sm:$0xff]  }
  0x80   : > { %8403 = vmatmul.mubr.bf16.gmra.mrb[12].mxu1 %v7301_v32  ;;  %v1028_v32 = vld [vmem:[%s9340_s25 + $0x24] sm:$0xe]  ;;  %v9764_v62 = vsel %vm9734_vm5, %v7319_v39, %v3814_v41  ;;  %v9786_v15 = vrot.slane %v11855_v63, 4  ;;  %v9792_v22 = vsel %vm9734_vm5, %v6927_v21, %v1068_v34  ;;  %v1070_v39 = vrot.slane %v1068_v34, 4  ;;  %v7314_v63 = vld [vmem:[%s9345_s22 + $0x120] sm:$0xe] }
  0x81   : > { %8422 = vmatprep.mubr.bf16.mxu1 %v7302_v5  ;;  %v9760_v5 = vrot.slane %v11854_v35, 4  ;;  %v9781_v14 = vsel %vm9734_vm5, %v3816_v19, %v3817_v53  ;;  %v7320_v41 = vrot.slane %v7312_v12, 9  ;;  %v3821_v53 = vrot.slane %v9467_v40, 5  ;;  %v11915_v12 = vld [vmem:[#allocation16_spill] sm:$0xff] }
  0x82   : > { %v6928_v35 = vrot.slane %v1028_v32, 9  ;;  %v9804_v34 = vsel %vm9734_vm5, %v1070_v39, %v1071_v9  ;;  %v1078_v21 = vrot.slane %v11915_v12, 5  ;;  %v7321_v40 = vrot.slane %v7313_v2, 9  ;;  %v1030_v39 = vld [vmem:[%s9340_s25 + $0x3c] sm:$0xe] }
  0x83   : > { %v3823_v26 = vrot.slane %v3821_v53, 4  ;;  %v3828_v9 = vrot.slane %v9510_v37, 5  ;;  %v9823_v2 = vld [vmem:[%s11832_s2 + $0x98] sm:$0xff]   ;;  %v7315_v12 = vld [vmem:[%s9345_s22 + $0x12c] sm:$0xe]  ;;  %v1082_v32 = vrot.slane %v9531_v1, 5 }
  0x85   : > { %8135 = vmatmul.mubr.bf16.vlgmr.msra.gmra.mrb[0].mxu0 %v6910_v4  ;;  %v11914_v4 = vld [vmem:[#allocation15_spill] sm:$0xff] }
  0x86   : > { %8151 = vmatpush3.bf16.msra.mxu0 %v9637_v59  ;;  %8138 = vmatprep.mubr.bf16.mxu0 %v6911_v46  ;;  %v3824_v19 = vrot.slane %v11914_v4, 5  ;;  %v1075_v46 = vrot.slane %v9489_v0, 5  ;;  %v9815_v4 = vsel %vm9734_vm5, %v7320_v41, %v3821_v53  ;;  %v6929_v53 = vrot.slane %v1029_v13, 9 }
  0x87   : > { %8152 = vmatprep.subr.bf16.mxu0 %v9752_v36  ;;  %v1084_v13 = vrot.slane %v1082_v32, 4 }
  0x88   : > { %8423 = vmatmul.mubr.bf16.vlgmr.msra.gmra.mrb[0].mxu1 %v7303_v23  ;;  %v9827_v51 = vsel %vm9734_vm5, %v6928_v35, %v1075_v46  ;;  %v1077_v60 = vrot.slane %v1075_v46, 4  ;;  %v11916_v23 = vld [vmem:[#allocation17_spill] sm:$0xff]  ;;  %v3830_v35 = vrot.slane %v3828_v9, 4  ;;  %v9858_v28 = vsel %vm9734_vm5, %v6929_v53, %v1082_v32  ;;  %v11922_v32 = vld [vmem:[#allocation20_spill] sm:$0xff] }
  0x89   : > { %8439 = vmatpush3.bf16.msra.mxu1 %v9637_v59  ;;  %8426 = vmatprep.mubr.bf16.mxu1 %v7304_v52  ;;  %v3831_v41 = vrot.slane %v11916_v23, 5  ;;  %v9835_v59 = vsel %vm9734_vm5, %v3823_v26, %v3824_v19  ;;  %v9839_v52 = vsel %vm9734_vm5, %v7321_v40, %v3828_v9  ;;  %v11918_v23 = vld [vmem:[#allocation18_spill] sm:$0xff]  ;;  %v7322_v26 = vrot.slane %v7314_v63, 9  ;;  %v1031_v19 = vld [vmem:[%s9340_s25 + $0x48] sm:$0xe] }
  0x8a   : > { %8440 = vmatprep.subr.bf16.mxu1 %v9752_v36  ;;  %8153 = vmatpush3.bf16.msra.mxu0 %v9752_v36  ;;  %11917 = vst [vmem:[#allocation15_spill] sm:$0xff] %v9839_v52  ;;  %v9846_v46 = vsel %vm9734_vm5, %v1077_v60, %v1078_v21  ;;  %v1085_v18 = vrot.slane %v11918_v23, 5  ;;  %v11920_v21 = vcombine.low %v9480_v56, %v9489_v0  ;;  %v3835_v60 = vrot.slane %v9546_v27, 5  ;;  %v11921_v23 = vld [vmem:[#allocation19_spill] sm:$0xff]  ;;  %v7317_v52 = vld [vmem:[%s9345_s22 + $0x144] sm:$0xe] }
  0x8b   : > { %8154 = vmatprep.subr.bf16.mxu0 %v9066_v25  ;;  %v9854_v9 = vsel %vm9734_vm5, %v3830_v35, %v3831_v41  ;;  %v3838_v40 = vrot.slane %v11921_v23, 5  ;;  %v6930_v41 = vrot.slane %v1030_v39, 9  ;;  %v7316_v35 = vld [vmem:[%s9345_s22 + $0x138] sm:$0xe]  ;;  %v1089_v0 = vrot.slane %v9569_v8, 5 }
  0x8c   : > { %11919 = vst [vmem:[#allocation16_spill] sm:$0xff] %v9854_v9  ;;  %v9876_v56 = vsel %vm9734_vm5, %v1084_v13, %v1085_v18  ;;  %v1092_v53 = vrot.slane %v11922_v32, 5  ;;  %v11923_v39 = vcombine.low %v9528_v57, %v9531_v1  ;;  %v9888_v63 = vsel %vm9734_vm5, %v7322_v26, %v3835_v60  ;;  %v1032_v9 = vld [vmem:[%s9340_s25 + $0x54] sm:$0xe]  ;;  %v11925_v1 = vld [vmem:[#allocation21_spill] sm:$0xff] }
  0x8d   : > { %8441 = vmatpush3.bf16.msra.mxu1 %v9752_v36  ;;  %8139 = vmatmul.mubr.bf16.gmra.mrb[4].mxu0 %v11920_v21  ;;  %v9872_v36 = vld [vmem:[%s11832_s2 + $0xa0] sm:$0xff]   ;;  %v7323_v21 = vrot.slane %v7315_v12, 9  ;;  %v3837_v18 = vrot.slane %v3835_v60, 4  ;;  %v3842_v13 = vrot.slane %v9591_v44, 5  ;;  %v11924_v12 = vcombine.low %v9501_v29, %v9510_v37 }
  0x8e   : > { %8442 = vmatprep.subr.bf16.mxu1 %v9066_v25  ;;  %8155 = vmatpush3.bf16.msra.mxu0 %v9066_v25  ;;  %v9897_v32 = vsel %vm9734_vm5, %v6930_v41, %v1089_v0  ;;  %v1091_v57 = vrot.slane %v1089_v0, 4  ;;  %v6931_v23 = vrot.slane %v1031_v19, 9  ;;  %v11926_v26 = vcombine.low %v9543_v24, %v9546_v27  ;;  %v11927_v27 = vld [vmem:[#allocation22_spill] sm:$0xff]  ;;  %v9074_v0 = vld [vmem:[%s11832_s2 + $0xa8] sm:$0xff]  }
  0x8f   : > { %8156 = vmatprep.subr.bf16.mxu0 %v9823_v2  ;;  %8142 = vmatprep.mubr.bf16.mxu0 %v11923_v39  ;;  %v3845_v39 = vrot.slane %v11925_v1, 5  ;;  %v9906_v60 = vsel %vm9734_vm5, %v3837_v18, %v3838_v40  ;;  %v9910_v29 = vsel %vm9734_vm5, %v7323_v21, %v3842_v13  ;;  %v3844_v37 = vrot.slane %v3842_v13, 4 }
  0x90   : > { %8427 = vmatmul.mubr.bf16.gmra.mrb[4].mxu1 %v11924_v12  ;;  %v1096_v41 = vrot.slane %v9608_v20, 5  ;;  %v9919_v24 = vsel %vm9734_vm5, %v1091_v57, %v1092_v53  ;;  %v1099_v19 = vrot.slane %v11927_v27, 5  ;;  %v7324_v40 = vrot.slane %v7316_v35, 9  ;;  %v11928_v57 = vld [vmem:[#allocation23_spill] sm:$0xff] }
  0x91   : > { %8443 = vmatpush3.bf16.msra.mxu1 %v9066_v25  ;;  %8430 = vmatprep.mubr.bf16.mxu1 %v11926_v26  ;;  %v7330_v25 = vcombine.low %v9888_v63, %v9906_v60  ;;  %v6954_v21 = vcombine.low %v9897_v32, %v9919_v24  ;;  %v9930_v18 = vsel %vm9734_vm5, %v3844_v37, %v3845_v39  ;;  %v3849_v12 = vrot.slane %v9628_v10, 5  ;;  %v9087_v32 = vld [vmem:[%s11832_s2 + $0xf0] sm:$0xff]  }
  0x92   : > { %8444 = vmatprep.subr.bf16.mxu1 %v9823_v2  ;;  %8157 = vmatpush3.bf16.msra.mxu0 %v9823_v2  ;;  %v9934_v53 = vsel %vm9734_vm5, %v6931_v23, %v1096_v41  ;;  %v1098_v13 = vrot.slane %v1096_v41, 4  ;;  %v3852_v1 = vrot.slane %v11928_v57, 5  ;;  %v6932_v26 = vrot.slane %v1032_v9, 9  ;;  %v9078_v23 = vld [vmem:[%s11832_s2 + $0xb0] sm:$0xff]  }
  0x93   : > { %8158 = vmatprep.subr.bf16.mxu0 %v9872_v36  ;;  %v11929_v27 = vcombine.low %v9566_v61, %v9569_v8  ;;  %v1103_v37 = vrot.slane %v9652_v30, 5  ;;  %v1106_v41 = vrot.slane %v9661_v49, 5  ;;  %v7325_v57 = vrot.slane %v7317_v52, 9 }
  0x94   : > { %v9949_v39 = vsel %vm9734_vm5, %v1098_v13, %v1099_v19  ;;  %v9959_v8 = vsel %vm9734_vm5, %v7324_v40, %v3849_v12  ;;  %v3856_v9 = vrot.slane %v9673_v42, 5  ;;  %v11930_v19 = vcombine.low %v9605_v55, %v9608_v20 }
  0x95   : > { %8445 = vmatpush3.bf16.msra.mxu1 %v9823_v2  ;;  %8143 = vmatmul.mubr.bf16.gmra.mrb[8].mxu0 %v11929_v27  ;;  %v6955_v61 = vcombine.low %v9934_v53, %v9949_v39  ;;  %v3851_v2 = vrot.slane %v3849_v12, 4  ;;  %v11931_v49 = vrot.slane %v9366_v6, 5  ;;  %v11932_v52 = vrot.slane %v9704_v3, 9 }
  0x96   : > { %8446 = vmatprep.subr.bf16.mxu1 %v9872_v36  ;;  %8159 = vmatpush3.bf16.msra.mxu0 %v9872_v36  ;;  %v9973_v27 = vsel %vm9734_vm5, %v6932_v26, %v1103_v37  ;;  %v1105_v40 = vrot.slane %v1103_v37, 4  ;;  %v3859_v12 = vrot.slane %v9682_v43, 5  ;;  %v11933_v35 = vcombine.low %v9585_v38, %v9591_v44 }
  0x97   : > { %8160 = vmatprep.subr.bf16.mxu0 %v9074_v0  ;;  %8146 = vmatprep.mubr.bf16.mxu0 %v11930_v19  ;;  %v1055_v13 = vsel %vm9734_vm5, %v11932_v52, %v11931_v49  ;;  %v11934_v55 = vrot.slane %v9369_v7, 5  ;;  %v9986_v20 = vsel %vm9734_vm5, %v3851_v2, %v3852_v1  ;;  %v9990_v3 = vsel %vm9734_vm5, %v7325_v57, %v3856_v9  ;;  %v9080_v7 = vld [vmem:[%s11832_s2 + $0xb8] sm:$0xff]   ;;  %v9083_v52 = vld [vmem:[%s11832_s2 + $0xd0] sm:$0xff]  }
  0x98   : > { %8431 = vmatmul.mubr.bf16.gmra.mrb[8].mxu1 %v11933_v35  ;;  %v3858_v26 = vrot.slane %v3856_v9, 4  ;;  %v11935_v38 = vcombine.low %v9622_v54, %v9628_v10  ;;  %v11936_v44 = vrot.slane %v9380_v16, 5  ;;  %v11937_v43 = vrot.slane %v9707_v50, 9 }
  0x99   : > { %v1058_v6 = vsel %vm9734_vm5, %v9756_v31, %v11934_v55  ;;  %8447 = vmatpush3.bf16.msra.mxu1 %v9872_v36  ;;  %v7332_v35 = vcombine.low %v9959_v8, %v9986_v20  ;;  %v10009_v36 = vsel %vm9734_vm5, %v1105_v40, %v1106_v41  ;;  %v11938_v54 = vrot.slane %v9383_v17, 5  ;;  %v10060_v40 = vld [vmem:[%s9340_s25 + $0x14] sm:$0x1] }
  0x9a   : > { %8434 = vmatprep.mubr.bf16.mxu1 %v11935_v38  ;;  %v3808_v31 = vsel %vm9734_vm5, %v11937_v43, %v11936_v44  ;;  %8448 = vmatprep.subr.bf16.mxu1 %v9074_v0  ;;  %v6956_v10 = vcombine.low %v9973_v27, %v10009_v36  ;;  %v10020_v50 = vsel %vm9734_vm5, %v3858_v26, %v3859_v12  ;;  %v11940_v57 = vrot.slane %v9406_v33, 5  ;;  %v7013_v33 = vld [vmem:[%s9340_s25 + $0xc] sm:$0xf] }
  0x9b   : > { %8161 = vmatpush3.bf16.msra.mxu0 %v9074_v0  ;;  %v3811_v16 = vsel %vm9734_vm5, %v9760_v5, %v11938_v54  ;;  %v6949_v1 = vcombine.low %v1055_v13, %v1058_v6  ;;  %v7333_v37 = vcombine.low %v9990_v3, %v10020_v50  ;;  %v7309_v17 = vcombine.low %v9666_v11, %v9673_v42  ;;  %v10045_v42 = vld [vmem:[%s9340_s25 + $0x10] sm:$0xf]  ;;  %v9093_v50 = vld [vmem:[%s9345_s22 + $0x108] sm:$0xff]  }
  0x9c   : > { %8162 = vmatprep.subr.bf16.mxu0 %v9078_v23  ;;  %v11939_v5 = vcombine.low %v9645_v47, %v9652_v30  ;;  %v7326_v41 = vcombine.low %v3808_v31, %v3811_v16  ;;  %v11941_v2 = vrot.slane %v9710_v58, 9  ;;  %v11942_v19 = vrot.slane %v9413_v45, 5  ;;  %v9081_v47 = vld [vmem:[%s11832_s2 + $0xc0] sm:$0xff]   ;;  %v9082_v45 = vld [vmem:[%s11832_s2 + $0xc8] sm:$0xff]   ;;  %v10077_v31 = vld [vmem:[%s9340_s25 + $0x18] sm:$0xf] }
  0x9d   : > { %8449 = vmatpush3.bf16.msra.mxu1 %v9074_v0  ;;  %v1586_v58 = vshrl.u32 %v7013_v33, 16  ;;  %v1595_v0 = vshll.u32 %v10045_v42, 16  ;;  %v1599_v49 = vshrl.u32 %v10045_v42, 16  ;;  %v11943_v13 = vcombine.low %v9792_v22, %v9804_v34  ;;  %v10071_v22 = vld [vmem:[%s9345_s22 + $0x100] sm:$0xf] }
  0x9e   : > { %8147 = vmatmul.mubr.bf16.gmra.mrb[12].mxu0 %v11939_v5  ;;  %8450 = vmatprep.subr.bf16.mxu1 %v9078_v23  ;;  %v1062_v9 = vsel %vm9734_vm5, %v11941_v2, %v11940_v57  ;;  %v1065_v11 = vsel %vm9734_vm5, %v9786_v15, %v11942_v19  ;;  %v1589_v15 = vshll.u32 %v7013_v33, 16  ;;  %v11944_v6 = vcombine.low %v9764_v62, %v9781_v14  ;;  %v10074_v34 = vld [vmem:[%s9345_s22 + $0x104] sm:$0x1]  ;;  %v9084_v14 = vld [vmem:[%s11832_s2 + $0xd8] sm:$0xff]  }
  0x9f   : > { %8163 = vmatpush3.bf16.msra.mxu0 %v9078_v23  ;;  %8166 = vmatprep.mubr.bf16.mxu0 %v6949_v1  ;;  %v6950_v30 = vcombine.low %v1062_v9, %v1065_v11  ;;  %v1588_v12 = vrot.slane %v1586_v58, 4  ;;  %v10065_v26 = vrot.slane %v1595_v0, 5  ;;  %v1601_v38 = vrot.slane %v1599_v49, 4  ;;  %v11948_v9 = vld [vmem:[#allocation15_spill] sm:$0xff]  ;;  %v11949_v19 = vld [vmem:[#allocation16_spill] sm:$0xff] }
  0xa0   : > { %8164 = vmatprep.subr.bf16.mxu0 %v9080_v7  ;;  %8435 = vmatmul.mubr.bf16.gmra.mrb[12].mxu1 %v7309_v17  ;;  %v1591_v55 = vrot.slane %v1589_v15, 5  ;;  %v11945_v43 = vcombine.low %v9815_v4, %v9835_v59  ;;  %v1605_v62 = vshll.u32 %v10060_v40, 16  ;;  %v11946_v1 = vcombine.low %v9827_v51, %v9846_v46  ;;  %v9085_v51 = vld [vmem:[%s11832_s2 + $0xe0] sm:$0xff]   ;;  %v10098_v46 = vld [vmem:[%s9340_s25 + $0x1c] sm:$0xf] }
  0xa1   : > { %8451 = vmatpush3.bf16.msra.mxu1 %v9078_v23  ;;  %8454 = vmatprep.mubr.bf16.mxu1 %v7326_v41  ;;  %v7358_v23 = vld [vmem:[%s9345_s22 + $0xfc] sm:$0xf]  ;;  %v1602_v4 = vor.u32 %v1601_v38, %v10065_v26  ;;  %v4218_v17 = vshll.u32 %v10071_v22, 16  ;;  %v4222_v5 = vshrl.u32 %v10071_v22, 16  ;;  %v4228_v41 = vshll.u32 %v10074_v34, 16 }
  0xa2   : > { %8452 = vmatprep.subr.bf16.mxu1 %v9080_v7  ;;  %v4212_v44 = vshll.u32 %v7358_v23, 16  ;;  %v1592_v54 = vor.u32 %v1591_v55, %v1588_v12  ;;  %v1610_v57 = vshrl.u32 %v10077_v31, 16  ;;  %v11947_v2 = vcombine.low %v9858_v28, %v9876_v56  ;;  %v10115_v56 = vld [vmem:[%s11832_s2 + $0xe8] sm:$0xff]   ;;  %v9160_v12 = vld [vmem:[%s11832_s2 + $0x238] sm:$0xff]  }
  0xa3   : > { %8165 = vmatpush3.bf16.msra.mxu0 %v9080_v7  ;;  %v11950_v11 = vcombine.low %v11948_v9, %v11949_v19  ;;  %v10105_v33 = vrot.slane %v1602_v4, 4  ;;  %v10119_v58 = vrot.slane %v4222_v5, 4  ;;  %v10121_v15 = vrot.slane %v4228_v41, 5  ;;  %v10129_v49 = vld [vmem:[%s9345_s22 + $0x10c] sm:$0xf] }
  0xa4   : > { %8182 = vmatprep.subr.bf16.mxu0 %v9081_v47  ;;  %v4214_v16 = vrot.slane %v4212_v44, 5  ;;  %v10123_v0 = vrot.slane %v1610_v57, 4  ;;  %v1613_v63 = vshll.u32 %v10077_v31, 16  ;;  %v1619_v60 = vshll.u32 %v10098_v46, 16  ;;  %v7364_v44 = vld [vmem:[%s9345_s22 + $0x114] sm:$0xf] }
  0xa5   : > { %8453 = vmatpush3.bf16.msra.mxu1 %v9080_v7  ;;  %v4209_v7 = vshrl.u32 %v7358_v23, 16  ;;  %v10132_v23 = vld [vmem:[%s9340_s25 + $0x20] sm:$0x1]  ;;  %v11954_v5 = vcombine.low %v9910_v29, %v9930_v18  ;;  %v9089_v29 = vld [vmem:[%s9340_s25 + $0xc] sm:$0xff]  }
  0xa6   : > { %8167 = vmatmul.mubr.bf16.vlgmr.msra.gmra.mrb[0].mxu0 %v6950_v30  ;;  %8470 = vmatprep.subr.bf16.mxu1 %v9081_v47  ;;  %v10107_v30 = vrot.slane %v1605_v62, 5  ;;  %11951 = vst [vmem:[#allocation17_spill] sm:$0xff] %v10132_v23  ;;  %v4242_v62 = vshll.u32 %v10129_v49, 16  ;;  %v10167_v24 = vrot.slane %v1613_v63, 5  ;;  %v1629_v57 = vshll.u32 %v10132_v23, 16 }
  0xa7   : > { %8183 = vmatpush3.bf16.msra.mxu0 %v9081_v47  ;;  %8170 = vmatprep.mubr.bf16.mxu0 %v11943_v13  ;;  %v4211_v59 = vrot.slane %v4209_v7, 4  ;;  %v10136_v13 = vld [vmem:[%s9340_s25 + $0x28] sm:$0xf]  ;;  %v1623_v7 = vshrl.u32 %v10098_v46, 16 }
  0xa8   : > { %8184 = vmatprep.subr.bf16.mxu0 %v9082_v45  ;;  %8455 = vmatmul.mubr.bf16.vlgmr.msra.gmra.mrb[0].mxu1 %v11944_v6  ;;  %v1608_v6 = vsel %vm9400_vm2, %v10105_v33, %v10107_v30  ;;  %v10186_v9 = vrot.slane %v4242_v62, 5  ;;  %v10198_v33 = vld [vmem:[%s9340_s25 + $0x2c] sm:$0x1]  ;;  %v10546_v23 = vld [vmem:[%s9340_s25 + $0x68] sm:$0x1] }
  0xa9   : > { %8471 = vmatpush3.bf16.msra.mxu1 %v9081_v47  ;;  %8458 = vmatprep.mubr.bf16.mxu1 %v11945_v43  ;;  %v10103_v47 = vrot.slane %v1592_v54, 4  ;;  %v4215_v28 = vor.u32 %v4214_v16, %v4211_v59  ;;  %v10156_v54 = vld [vmem:[%s9345_s22 + $0x118] sm:$0xf]  ;;  %v1643_v16 = vshll.u32 %v10136_v13, 16  ;;  %v1625_v41 = vrot.slane %v1623_v7, 4  ;;  %11956 = vst [vmem:[#allocation20_spill] sm:$0xff] %v10198_v33 }
  0xaa   : > { %8472 = vmatprep.subr.bf16.mxu1 %v9082_v45  ;;  %11953 = vst [vmem:[#allocation18_spill] sm:$0xff] %v10156_v54  ;;  %v4266_v53 = vshll.u32 %v10156_v54, 16  ;;  %v4270_v39 = vshrl.u32 %v10156_v54, 16  ;;  %v9090_v7 = vld [vmem:[%s9345_s22 + $0xfc] sm:$0xff]  }
  0xab   : > { %8185 = vmatpush3.bf16.msra.mxu0 %v9082_v45  ;;  %v1598_v55 = vsel %vm9400_vm2, %v10103_v47, %v10065_v26  ;;  %v10146_v38 = vrot.slane %v4215_v28, 4  ;;  %v4246_v26 = vshrl.u32 %v10129_v49, 16 }
  0xac   : > { %8186 = vmatprep.subr.bf16.mxu0 %v9083_v52  ;;  %v10200_v63 = vcombine.low %v1598_v55, %v1608_v6  ;;  %v7022_v6 = vld [vmem:[%s9340_s25 + $0x30] sm:$0xf] }
  0xad   : > { %8473 = vmatpush3.bf16.msra.mxu1 %v9082_v45  ;;  %v10117_v45 = vrot.slane %v4218_v17, 5  ;;  %v4260_v17 = vshll.u32 %v7364_v44, 16  ;;  %v4248_v19 = vrot.slane %v4246_v26, 4 }
  0xae   : > { %8171 = vmatmul.mubr.bf16.gmra.mrb[4].mxu0 %v11946_v1  ;;  %8474 = vmatprep.subr.bf16.mxu1 %v9083_v52  ;;  %v4257_v1 = vshrl.u32 %v7364_v44, 16 }
  0xaf   : > { %8187 = vmatpush3.bf16.msra.mxu0 %v9083_v52  ;;  %8174 = vmatprep.mubr.bf16.mxu0 %v11947_v2  ;;  %v4225_v47 = vor.u32 %v10119_v58, %v10117_v45  ;;  %v4262_v28 = vrot.slane %v4260_v17, 5  ;;  %v1616_v58 = vor.u32 %v10167_v24, %v10123_v0  ;;  %v4249_v27 = vor.u32 %v4248_v19, %v10186_v9  ;;  %v9091_v17 = vld [vmem:[%s9340_s25 + $0x18] sm:$0xff]  }
  0xb0   : > { %8188 = vmatprep.subr.bf16.mxu0 %v9084_v14  ;;  %8459 = vmatmul.mubr.bf16.gmra.mrb[4].mxu1 %v11950_v11  ;;  %v4259_v30 = vrot.slane %v4257_v1, 4  ;;  %v1653_v0 = vshll.u32 %v10198_v33, 16  ;;  %v1658_v24 = vshrl.u32 %v7022_v6, 16  ;;  %v1661_v1 = vshll.u32 %v7022_v6, 16  ;;  %v10287_v6 = vld [vmem:[%s9345_s22 + $0x124] sm:$0xf] }
  0xb1   : > { %8475 = vmatpush3.bf16.msra.mxu1 %v9083_v52  ;;  %8462 = vmatprep.mubr.bf16.mxu1 %v7330_v25  ;;  %v7361_v25 = vld [vmem:[%s9345_s22 + $0x108] sm:$0xf]  ;;  %v7019_v52 = vld [vmem:[%s9340_s25 + $0x24] sm:$0xf]  ;;  %v10230_v62 = vrot.slane %v4225_v47, 4  ;;  %11960 = vst [vmem:[#allocation15_spill] sm:$0xff] %v10287_v6 }
  0xb2   : > { %8476 = vmatprep.subr.bf16.mxu1 %v9084_v14  ;;  %v4233_v43 = vshrl.u32 %v7361_v25, 16  ;;  %v4236_v31 = vshll.u32 %v7361_v25, 16  ;;  %v1634_v4 = vshrl.u32 %v7019_v52, 16  ;;  %v1637_v59 = vshll.u32 %v7019_v52, 16 }
  0xb3   : > { %8189 = vmatpush3.bf16.msra.mxu0 %v9084_v14  ;;  %v10205_v25 = vrot.slane %v4266_v53, 5  ;;  %v4272_v52 = vrot.slane %v4270_v39, 4  ;;  %v4263_v26 = vor.u32 %v4262_v28, %v4259_v30  ;;  %v1660_v30 = vrot.slane %v1658_v24, 4  ;;  %v9101_v24 = vld [vmem:[%s9340_s25 + $0x3c] sm:$0xff]  }
  0xb4   : > { %8190 = vmatprep.subr.bf16.mxu0 %v9085_v51  ;;  %v4235_v18 = vrot.slane %v4233_v43, 4  ;;  %v4238_v2 = vrot.slane %v4236_v31, 5  ;;  %v1636_v8 = vrot.slane %v1634_v4, 4  ;;  %v1639_v20 = vrot.slane %v1637_v59, 5 }
  0xb5   : > { %8477 = vmatpush3.bf16.msra.mxu1 %v9084_v14  ;;  %v1647_v14 = vshrl.u32 %v10136_v13, 16  ;;  %v4221_v31 = vsel %vm9400_vm2, %v10146_v38, %v10117_v45  ;;  %v10236_v59 = vrot.slane %v1629_v57, 5  ;;  %v4264_v19 = vrot.slane %v4263_v26, 4  ;;  %v7028_v38 = vld [vmem:[%s9340_s25 + $0x48] sm:$0xf] }
  0xb6   : > { %8175 = vmatmul.mubr.bf16.gmra.mrb[8].mxu0 %v6954_v21  ;;  %8478 = vmatprep.subr.bf16.mxu1 %v9085_v51  ;;  %v10169_v21 = vrot.slane %v1619_v60, 5  ;;  %v10203_v60 = vld [vmem:[%s9345_s22 + $0x11c] sm:$0x1]  ;;  %v4239_v43 = vor.u32 %v4238_v2, %v4235_v18  ;;  %v1640_v36 = vor.u32 %v1639_v20, %v1636_v8  ;;  %v9095_v18 = vld [vmem:[%s9340_s25 + $0x24] sm:$0xff]   ;;  %v4231_v2 = vsel %vm9400_vm2, %v10230_v62, %v10121_v15  ;;  %v10260_v20 = vld [vmem:[%s9340_s25 + $0x38] sm:$0x1] }
  0xb7   : > { %8191 = vmatpush3.bf16.msra.mxu0 %v9085_v51  ;;  %8178 = vmatprep.mubr.bf16.mxu0 %v6955_v61  ;;  %v10183_v61 = vld [vmem:[%s11832_s2 + $0xf8] sm:$0xff]   ;;  %v1649_v11 = vrot.slane %v1647_v14, 4  ;;  %11957 = vst [vmem:[#allocation21_spill] sm:$0xff] %v10203_v60  ;;  %v4276_v4 = vshll.u32 %v10203_v60, 16  ;;  %v10240_v14 = vld [vmem:[%s9340_s25 + $0x34] sm:$0xf] }
  0xb8   : > { %8192 = vmatprep.subr.bf16.mxu0 %v10115_v56  ;;  %8463 = vmatmul.mubr.bf16.gmra.mrb[8].mxu1 %v11954_v5  ;;  %v1626_v44 = vor.u32 %v1625_v41, %v10169_v21  ;;  %11958 = vst [vmem:[#allocation22_spill] sm:$0xff] %v10240_v14  ;;  %v10243_v5 = vrot.slane %v1616_v58, 4  ;;  %v4240_v53 = vrot.slane %v4239_v43, 4  ;;  %v1641_v57 = vrot.slane %v1640_v36, 4  ;;  %11959 = vst [vmem:[#allocation23_spill] sm:$0xff] %v10260_v20  ;;  %v9096_v58 = vld [vmem:[%s9345_s22 + $0x114] sm:$0xff]  }
  0xb9   : > { %8479 = vmatpush3.bf16.msra.mxu1 %v9085_v51  ;;  %8466 = vmatprep.mubr.bf16.mxu1 %v7332_v35  ;;  %v10191_v51 = vld [vmem:[%s9345_s22 + $0x110] sm:$0x1]  ;;  %v10193_v35 = vrot.slane %v1643_v16, 5  ;;  %v4273_v16 = vor.u32 %v4272_v52, %v10205_v25  ;;  %v4278_v8 = vrot.slane %v4276_v4, 5  ;;  %v1663_v28 = vrot.slane %v1661_v1, 5 }
  0xba   : > { %8480 = vmatprep.subr.bf16.mxu1 %v10115_v56  ;;  %11955 = vst [vmem:[#allocation19_spill] sm:$0xff] %v10191_v51  ;;  %v4252_v55 = vshll.u32 %v10191_v51, 16  ;;  %v1627_v41 = vrot.slane %v1626_v44, 4  ;;  %v1671_v52 = vshrl.u32 %v10240_v14, 16  ;;  %v1622_v15 = vsel %vm9400_vm2, %v10243_v5, %v10169_v21  ;;  %v9097_v62 = vld [vmem:[%s9340_s25 + $0x30] sm:$0xff]  }
  0xbb   : > { %8193 = vmatpush3.bf16.msra.mxu0 %v10115_v56  ;;  %v4274_v47 = vrot.slane %v4273_v16, 4  ;;  %v4245_v43 = vsel %vm9400_vm2, %v4240_v53, %v10186_v9  ;;  %v1646_v21 = vsel %vm9400_vm2, %v1641_v57, %v10193_v35  ;;  %v10294_v9 = vld [vmem:[%s11832_s2 + $0x110] sm:$0xff]   ;;  %v1664_v4 = vor.u32 %v1663_v28, %v1660_v30  ;;  %v10313_v1 = vld [vmem:[%s9345_s22 + $0x128] sm:$0x1]  ;;  %v7370_v57 = vld [vmem:[%s9345_s22 + $0x12c] sm:$0xf] }
  0xbc   : > { %8194 = vmatprep.subr.bf16.mxu0 %v9087_v32  ;;  %v4254_v3 = vrot.slane %v4252_v55, 5  ;;  %v1632_v44 = vsel %vm9400_vm2, %v1627_v41, %v10236_v59  ;;  %v1673_v59 = vrot.slane %v1671_v52, 4  ;;  %11961 = vst [vmem:[#allocation16_spill] sm:$0xff] %v10313_v1  ;;  %v4294_v5 = vshrl.u32 %v10287_v6, 16  ;;  %v9102_v30 = vld [vmem:[%s9345_s22 + $0x12c] sm:$0xff]   ;;  %v10355_v28 = vld [vmem:[%s11832_s2 + $0x120] sm:$0xff]  }
  0xbd   : > { %8481 = vmatpush3.bf16.msra.mxu1 %v10115_v56  ;;  %v10220_v56 = vld [vmem:[%s11832_s2 + $0x100] sm:$0xff]   ;;  %v4279_v26 = vsel %vm9400_vm2, %v4274_v47, %v4278_v8  ;;  %v4300_v47 = vshll.u32 %v10313_v1, 16  ;;  %v10411_v1 = vld [vmem:[%s9340_s25 + $0x50] sm:$0x1] }
  0xbe   : > { %8179 = vmatmul.mubr.bf16.gmra.mrb[12].mxu0 %v6956_v10  ;;  %8482 = vmatprep.subr.bf16.mxu1 %v9087_v32  ;;  %v1650_v10 = vor.u32 %v1649_v11, %v10193_v35  ;;  %v1667_v11 = vshll.u32 %v10240_v14, 16  ;;  %v4269_v35 = vsel %vm9400_vm2, %v4264_v19, %v10205_v25  ;;  %v10309_v25 = vld [vmem:[%s11832_s2 + $0x118] sm:$0xff]   ;;  %11968 = vst [vmem:[#allocation29_spill] sm:$0xff] %v10411_v1  ;;  %v10501_v51 = vld [vmem:[%s9340_s25 + $0x64] sm:$0xf] }
  0xbf   : > { %8195 = vmatpush3.bf16.msra.mxu0 %v9087_v32  ;;  %8198 = vmatprep.mubr.bf16.mxu0 %v9089_v29  ;;  %v1655_v29 = vrot.slane %v1653_v0, 5  ;;  %11973 = vst [vmem:[#allocation34_spill] sm:$0xff] %v10501_v51 }
  0xc0   : > { %8196 = vmatprep.subr.bf16.mxu0 %v10183_v61  ;;  %8467 = vmatmul.mubr.bf16.gmra.mrb[12].mxu1 %v7333_v37  ;;  %v10251_v37 = vld [vmem:[%s11832_s2 + $0x108] sm:$0xff]   ;;  %v1651_v39 = vrot.slane %v1650_v10, 4  ;;  %v10299_v36 = vrot.slane %v1667_v11, 5  ;;  %v1677_v10 = vshll.u32 %v10260_v20, 16 }
  0xc1   : > { %8483 = vmatpush3.bf16.msra.mxu1 %v9087_v32  ;;  %8486 = vmatprep.mubr.bf16.mxu1 %v9090_v7  ;;  %v4250_v32 = vrot.slane %v4249_v27, 4  ;;  %v7367_v7 = vld [vmem:[%s9345_s22 + $0x120] sm:$0xf]  ;;  %v7025_v27 = vld [vmem:[%s9340_s25 + $0x3c] sm:$0xf] }
  0xc2   : > { %8484 = vmatprep.subr.bf16.mxu1 %v10183_v61  ;;  %v1656_v55 = vsel %vm9400_vm2, %v1651_v39, %v1655_v29  ;;  %v4281_v0 = vshrl.u32 %v7367_v7, 16  ;;  %v4284_v16 = vshll.u32 %v7367_v7, 16  ;;  %v1682_v41 = vshrl.u32 %v7025_v27, 16  ;;  %v10335_v39 = vld [vmem:[%s9345_s22 + $0x130] sm:$0xf] }
  0xc3   : > { %8197 = vmatpush3.bf16.msra.mxu0 %v10183_v61  ;;  %v1685_v53 = vshll.u32 %v7025_v27, 16  ;;  %11963 = vst [vmem:[#allocation24_spill] sm:$0xff] %v10335_v39  ;;  %v10338_v29 = vcombine.low %v1646_v21, %v1656_v55  ;;  %v10342_v19 = vrot.slane %v1677_v10, 5  ;;  %v1674_v8 = vor.u32 %v1673_v59, %v10299_v36  ;;  %v10364_v21 = vld [vmem:[%s9340_s25 + $0x4c] sm:$0xf] }
  0xc4   : > { %8214 = vmatprep.subr.bf16.mxu0 %v10220_v56  ;;  %v4283_v45 = vrot.slane %v4281_v0, 4  ;;  %v4286_v11 = vrot.slane %v4284_v16, 5  ;;  %v4296_v7 = vrot.slane %v4294_v5, 4  ;;  %11964 = vst [vmem:[#allocation25_spill] sm:$0xff] %v10364_v21  ;;  %v9103_v55 = vld [vmem:[%s9340_s25 + $0x48] sm:$0xff]   ;;  %v4314_v27 = vshll.u32 %v10335_v39, 16 }
  0xc5   : > { %8485 = vmatpush3.bf16.msra.mxu1 %v10183_v61  ;;  %v4255_v61 = vsel %vm9400_vm2, %v4250_v32, %v4254_v3  ;;  %v10326_v3 = vcombine.low %v1622_v15, %v1632_v44  ;;  %v10331_v32 = vld [vmem:[%s9340_s25 + $0x40] sm:$0xf]  ;;  %v1687_v15 = vrot.slane %v1685_v53, 5  ;;  %v1706_v10 = vshrl.u32 %v7028_v38, 16  ;;  %v10379_v16 = vld [vmem:[%s9340_s25 + $0x44] sm:$0x1] }
  0xc6   : > { %8199 = vmatmul.mubr.bf16.vlgmr.msra.gmra.mrb[0].mxu0 %v9091_v17  ;;  %8502 = vmatprep.subr.bf16.mxu1 %v10220_v56  ;;  %v4290_v17 = vshll.u32 %v10287_v6, 16  ;;  %11962 = vst [vmem:[#allocation14_spill] sm:$0xff] %v10331_v32  ;;  %v1691_v44 = vshll.u32 %v10331_v32, 16  ;;  %v1709_v0 = vshll.u32 %v7028_v38, 16  ;;  %v10376_v59 = vrot.slane %v4300_v47, 5  ;;  %11965 = vst [vmem:[#allocation26_spill] sm:$0xff] %v10379_v16 }
  0xc7   : > { %8215 = vmatpush3.bf16.msra.mxu0 %v10220_v56  ;;  %8202 = vmatprep.mubr.bf16.mxu0 %v9095_v18  ;;  %v10340_v18 = vcombine.low %v4269_v35, %v4279_v26  ;;  %v4318_v35 = vshrl.u32 %v10335_v39, 16  ;;  %v10374_v26 = vrot.slane %v1674_v8, 4  ;;  %v10390_v53 = vld [vmem:[%s9345_s22 + $0x134] sm:$0x1]  ;;  %v7373_v38 = vld [vmem:[%s9345_s22 + $0x138] sm:$0xf] }
  0xc8   : > { %8216 = vmatprep.subr.bf16.mxu0 %v10251_v37  ;;  %8487 = vmatmul.mubr.bf16.vlgmr.msra.gmra.mrb[0].mxu1 %v9093_v50  ;;  %v10328_v50 = vcombine.low %v4245_v43, %v4255_v61  ;;  %v10357_v52 = vrot.slane %v4290_v17, 5  ;;  %v4305_v43 = vshrl.u32 %v7370_v57, 16  ;;  %v4308_v61 = vshll.u32 %v7370_v57, 16  ;;  %v9107_v17 = vld [vmem:[%s9340_s25 + $0x54] sm:$0xff]   ;;  %11966 = vst [vmem:[#allocation27_spill] sm:$0xff] %v10390_v53 }
  0xc9   : > { %8503 = vmatpush3.bf16.msra.mxu1 %v10220_v56  ;;  %8490 = vmatprep.mubr.bf16.mxu1 %v9096_v58  ;;  %v10324_v56 = vcombine.low %v4221_v31, %v4231_v2  ;;  %v9099_v31 = vld [vmem:[%s9345_s22 + $0x120] sm:$0xff]   ;;  %v10346_v2 = vrot.slane %v1664_v4, 4  ;;  %v1684_v58 = vrot.slane %v1682_v41, 4  ;;  %v4287_v4 = vor.u32 %v4286_v11, %v4283_v45 }
  0xca   : > { %8504 = vmatprep.subr.bf16.mxu1 %v10251_v37  ;;  %v4297_v5 = vor.u32 %v4296_v7, %v10357_v52  ;;  %v1715_v57 = vshll.u32 %v10364_v21, 16  ;;  %v1719_v45 = vshrl.u32 %v10364_v21, 16  ;;  %v4307_v11 = vrot.slane %v4305_v43, 4  ;;  %v10405_v21 = vld [vmem:[%s9345_s22 + $0x13c] sm:$0xf] }
  0xcb   : > { %8217 = vmatpush3.bf16.msra.mxu0 %v10251_v37  ;;  %v1688_v41 = vor.u32 %v1687_v15, %v1684_v58  ;;  %v4310_v47 = vrot.slane %v4308_v61, 5  ;;  %v10402_v7 = vrot.slane %v4314_v27, 5  ;;  %v4320_v58 = vrot.slane %v4318_v35, 4  ;;  %11967 = vst [vmem:[#allocation28_spill] sm:$0xff] %v10405_v21 }
  0xcc   : > { %8218 = vmatprep.subr.bf16.mxu0 %v10294_v9  ;;  %v1708_v15 = vrot.slane %v1706_v10, 4  ;;  %v10407_v39 = vrot.slane %v4287_v4, 4  ;;  %v10414_v43 = vrot.slane %v4297_v5, 4  ;;  %v10418_v27 = vrot.slane %v1715_v57, 5  ;;  %v9109_v4 = vld [vmem:[%s9340_s25 + $0x60] sm:$0xff]   ;;  %v10431_v5 = vld [vmem:[%s11832_s2 + $0x130] sm:$0xff]  }
  0xcd   : > { %8505 = vmatpush3.bf16.msra.mxu1 %v10251_v37  ;;  %v1695_v37 = vshrl.u32 %v10331_v32, 16  ;;  %v1701_v32 = vshll.u32 %v10379_v16, 16  ;;  %v10416_v61 = vrot.slane %v1688_v41, 4  ;;  %v1721_v35 = vrot.slane %v1719_v45, 4 }
  0xce   : > { %8203 = vmatmul.mubr.bf16.gmra.mrb[4].mxu0 %v9097_v62  ;;  %8506 = vmatprep.subr.bf16.mxu1 %v10294_v9  ;;  %v1711_v62 = vrot.slane %v1709_v0, 5  ;;  %v4324_v0 = vshll.u32 %v10390_v53, 16  ;;  %v4311_v41 = vor.u32 %v4310_v47, %v4307_v11  ;;  %v4321_v57 = vor.u32 %v4320_v58, %v10402_v7  ;;  %v7031_v53 = vld [vmem:[%s9340_s25 + $0x54] sm:$0xf]  ;;  %v10448_v58 = vld [vmem:[%s9340_s25 + $0x58] sm:$0xf] }
  0xcf   : > { %8219 = vmatpush3.bf16.msra.mxu0 %v10294_v9  ;;  %8206 = vmatprep.mubr.bf16.mxu0 %v9101_v24  ;;  %v10385_v24 = vld [vmem:[%s11832_s2 + $0x128] sm:$0xff]   ;;  %v1697_v8 = vrot.slane %v1695_v37, 4  ;;  %v4332_v37 = vshll.u32 %v7373_v38, 16  ;;  %11970 = vst [vmem:[#allocation31_spill] sm:$0xff] %v10448_v58  ;;  %v7376_v11 = vld [vmem:[%s9345_s22 + $0x144] sm:$0xf] }
  0xd0   : > { %8220 = vmatprep.subr.bf16.mxu0 %v10309_v25  ;;  %8491 = vmatmul.mubr.bf16.gmra.mrb[4].mxu1 %v9099_v31  ;;  %v10398_v31 = vrot.slane %v1691_v44, 5  ;;  %v4329_v44 = vshrl.u32 %v7373_v38, 16  ;;  %v1712_v45 = vor.u32 %v1711_v62, %v1708_v15  ;;  %v1725_v38 = vshll.u32 %v10411_v1, 16 }
  0xd1   : > { %8507 = vmatpush3.bf16.msra.mxu1 %v10294_v9  ;;  %8494 = vmatprep.mubr.bf16.mxu1 %v9102_v30  ;;  %v9105_v9 = vld [vmem:[%s9345_s22 + $0x138] sm:$0xff]   ;;  %v9108_v30 = vld [vmem:[%s9345_s22 + $0x144] sm:$0xff]   ;;  %v4334_v62 = vrot.slane %v4332_v37, 5  ;;  %v10464_v37 = vrot.slane %v1701_v32, 5  ;;  %v10475_v15 = vrot.slane %v4324_v0, 5  ;;  %v1730_v60 = vshrl.u32 %v7031_v53, 16 }
  0xd2   : > { %8508 = vmatprep.subr.bf16.mxu1 %v10309_v25  ;;  %v1698_v10 = vor.u32 %v1697_v8, %v10398_v31  ;;  %v10436_v8 = vld [vmem:[%s9345_s22 + $0x140] sm:$0x1]  ;;  %v4331_v47 = vrot.slane %v4329_v44, 4  ;;  %v10480_v44 = vld [vmem:[%s9345_s22 + $0x148] sm:$0xf]  ;;  %v10488_v6 = vrot.slane %v1712_v45, 4 }
  0xd3   : > { %8221 = vmatpush3.bf16.msra.mxu0 %v10309_v25  ;;  %11969 = vst [vmem:[#allocation30_spill] sm:$0xff] %v10436_v8  ;;  %11972 = vst [vmem:[#allocation33_spill] sm:$0xff] %v10480_v44  ;;  %v7034_v32 = vld [vmem:[%s9340_s25 + $0x60] sm:$0xf]  ;;  %v10490_v20 = vrot.slane %v1725_v38, 5  ;;  %v4356_v38 = vshll.u32 %v7376_v11, 16 }
  0xd4   : > { %8222 = vmatprep.subr.bf16.mxu0 %v10355_v28  ;;  %v4335_v0 = vor.u32 %v4334_v62, %v4331_v47  ;;  %v9113_v47 = vld [vmem:[%s11832_s2 + $0x140] sm:$0xff]   ;;  %v4362_v62 = vshll.u32 %v10480_v44, 16 }
  0xd5   : > { %8509 = vmatpush3.bf16.msra.mxu1 %v10309_v25  ;;  %v4338_v25 = vshll.u32 %v10405_v21, 16 }
  0xd6   : > { %8207 = vmatmul.mubr.bf16.gmra.mrb[8].mxu0 %v9103_v55  ;;  %8510 = vmatprep.subr.bf16.mxu1 %v10355_v28  ;;  %v4342_v55 = vshrl.u32 %v10405_v21, 16  ;;  %v10486_v21 = vrot.slane %v4321_v57, 4  ;;  %v1743_v57 = vshrl.u32 %v10448_v58, 16 }
  0xd7   : > { %8223 = vmatpush3.bf16.msra.mxu0 %v10355_v28  ;;  %8210 = vmatprep.mubr.bf16.mxu0 %v9107_v17  ;;  %v10473_v17 = vrot.slane %v1698_v10, 4  ;;  %v10477_v1 = vrot.slane %v4338_v25, 5  ;;  %v9111_v10 = vld [vmem:[%s9345_s22 + $0x150] sm:$0xff]   ;;  %v4348_v25 = vshll.u32 %v10436_v8, 16 }
  0xd8   : > { %8224 = vmatprep.subr.bf16.mxu0 %v10385_v24  ;;  %8495 = vmatmul.mubr.bf16.gmra.mrb[8].mxu1 %v9105_v9  ;;  %v10454_v9 = vld [vmem:[%s11832_s2 + $0x138] sm:$0xff]   ;;  %v4344_v16 = vrot.slane %v4342_v55, 4  ;;  %v1733_v55 = vshll.u32 %v7031_v53, 16 }
  0xd9   : > { %8511 = vmatpush3.bf16.msra.mxu1 %v10355_v28  ;;  %8498 = vmatprep.mubr.bf16.mxu1 %v9108_v30  ;;  %v1722_v28 = vor.u32 %v1721_v35, %v10418_v27  ;;  %v10468_v30 = vld [vmem:[%s9340_s25 + $0x5c] sm:$0x1]  ;;  %v10484_v35 = vrot.slane %v4311_v41, 4  ;;  %v1739_v41 = vshll.u32 %v10448_v58, 16 }
  0xda   : > { %11971 = vst [vmem:[#allocation32_spill] sm:$0xff] %v10468_v30  ;;  %8512 = vmatprep.subr.bf16.mxu1 %v10385_v24  ;;  %v1749_v45 = vshll.u32 %v10468_v30, 16  ;;  %v4345_v53 = vor.u32 %v4344_v16, %v10477_v1  ;;  %v1754_v30 = vshrl.u32 %v7034_v32, 16  ;;  %v10519_v16 = vrot.slane %v4348_v25, 5 }
  0xdb   : > { %8225 = vmatpush3.bf16.msra.mxu0 %v10385_v24  ;;  %v10495_v33 = vrot.slane %v1722_v28, 4  ;;  %v4366_v28 = vshrl.u32 %v10480_v44, 16  ;;  %v1735_v8 = vrot.slane %v1733_v55, 5  ;;  %v10527_v44 = vld [vmem:[%s11832_s2 + $0x148] sm:$0xff]   ;;  %v1767_v25 = vshrl.u32 %v10501_v51, 16 }
  0xdc   : > { %8226 = vmatprep.subr.bf16.mxu0 %v10431_v5  ;;  %v10543_v55 = vld [vmem:[%s9345_s22 + $0x14c] sm:$0x1]  ;;  %v1756_v14 = vrot.slane %v1754_v30, 4 }
  0xdd   : > { %8513 = vmatpush3.bf16.msra.mxu1 %v10385_v24  ;;  %v1704_v24 = vsel %vm9400_vm2, %v10473_v17, %v10464_v37  ;;  %v1757_v17 = vshll.u32 %v7034_v32, 16  ;;  %v10517_v37 = vrot.slane %v4335_v0, 4  ;;  %v10529_v32 = vrot.slane %v1739_v41, 5 }
  0xde   : > { %8211 = vmatmul.mubr.bf16.gmra.mrb[12].mxu0 %v9109_v4  ;;  %8514 = vmatprep.subr.bf16.mxu1 %v10431_v5  ;;  %v4353_v4 = vshrl.u32 %v7376_v11, 16  ;;  %v1732_v11 = vrot.slane %v1730_v60, 4  ;;  %v1763_v0 = vshll.u32 %v10501_v51, 16  ;;  %v10534_v60 = vld [vmem:[%s9345_s22 + $0x154] sm:$0xf]  ;;  %v4358_v41 = vrot.slane %v4356_v38, 5 }
  0xdf   : > { %8227 = vmatpush3.bf16.msra.mxu0 %v10431_v5  ;;  %8230 = vmatprep.mubr.bf16.mxu0 %v10200_v63  ;;  %v7379_v63 = vld [vmem:[%s9345_s22 + $0x150] sm:$0xf]  ;;  %v4368_v51 = vrot.slane %v4366_v28, 4  ;;  %v1759_v54 = vrot.slane %v1757_v17, 5  ;;  %v1769_v17 = vrot.slane %v1767_v25, 4 }
  0xe0   : > { %8228 = vmatprep.subr.bf16.mxu0 %v10454_v9  ;;  %8499 = vmatmul.mubr.bf16.gmra.mrb[12].mxu1 %v9111_v10  ;;  %v1745_v10 = vrot.slane %v1743_v57, 4  ;;  %v4355_v58 = vrot.slane %v4353_v4, 4  ;;  %v10548_v57 = vrot.slane %v4362_v62, 5  ;;  %v4377_v4 = vshrl.u32 %v7379_v63, 16  ;;  %v10607_v25 = vld [vmem:[%s9345_s22 + $0x158] sm:$0x1] }
  0xe1   : > { %8515 = vmatpush3.bf16.msra.mxu1 %v10431_v5  ;;  %8518 = vmatprep.mubr.bf16.mxu1 %v10324_v56  ;;  %v10538_v5 = vrot.slane %v4345_v53, 4  ;;  %v10540_v56 = vrot.slane %v1749_v45, 5  ;;  %v4317_v53 = vsel %vm9400_vm2, %v10484_v35, %v10402_v7  ;;  %v4327_v45 = vsel %vm9400_vm2, %v10486_v21, %v10475_v15 }
  0xe2   : > { %8516 = vmatprep.subr.bf16.mxu1 %v10454_v9  ;;  %v4380_v38 = vshll.u32 %v7379_v63, 16  ;;  %v1736_v62 = vor.u32 %v1735_v8, %v1732_v11  ;;  %v1746_v30 = vor.u32 %v1745_v10, %v10529_v32  ;;  %v10561_v28 = vrot.slane %v1763_v0, 5 }
  0xe3   : > { %8229 = vmatpush3.bf16.msra.mxu0 %v10454_v9  ;;  %v11974_v7 = vsel %vm9400_vm2, %v10374_v26, %v10342_v19  ;;  %v11975_v21 = vsel %vm9400_vm2, %v10346_v2, %v10299_v36  ;;  %v11977_v8 = vsel %vm9400_vm2, %v10407_v39, %v10357_v52  ;;  %v4386_v35 = vshll.u32 %v10534_v60, 16  ;;  %v9115_v36 = vld [vmem:[%s11832_s2 + $0x150] sm:$0xff]  }
  0xe4   : > { %8246 = vmatprep.subr.bf16.mxu0 %v9113_v47  ;;  %v4390_v19 = vshrl.u32 %v10534_v60, 16  ;;  %v4359_v2 = vor.u32 %v4358_v41, %v4355_v58  ;;  %v4369_v26 = vor.u32 %v4368_v51, %v10548_v57  ;;  %v1773_v39 = vshll.u32 %v10546_v23, 16  ;;  %v10603_v51 = vld [vmem:[%s11832_s2 + $0x158] sm:$0xff]  }
  0xe5   : > { %8517 = vmatpush3.bf16.msra.mxu1 %v10454_v9  ;;  %v7056_v9 = vcombine.low %v11975_v21, %v11974_v7  ;;  %v11978_v52 = vsel %vm9400_vm2, %v10416_v61, %v10398_v31  ;;  %v4379_v11 = vrot.slane %v4377_v4, 4  ;;  %v4382_v63 = vrot.slane %v4380_v38, 5 }
  0xe6   : > { %8231 = vmatmul.mubr.bf16.vlgmr.msra.gmra.mrb[0].mxu0 %v10326_v3  ;;  %8534 = vmatprep.subr.bf16.mxu1 %v9113_v47  ;;  %v11976_v3 = vsel %vm9400_vm2, %v10414_v43, %v10376_v59  ;;  %v4372_v59 = vshll.u32 %v10543_v55, 16  ;;  %v7386_v43 = vcombine.low %v4317_v53, %v4327_v45  ;;  %v1737_v58 = vrot.slane %v1736_v62, 4 }
  0xe7   : > { %8247 = vmatpush3.bf16.msra.mxu0 %v9113_v47  ;;  %v7385_v15 = vcombine.low %v11977_v8, %v11976_v3  ;;  %8234 = vmatprep.mubr.bf16.mxu0 %v10338_v29  ;;  %v7057_v29 = vcombine.low %v11978_v52, %v1704_v24  ;;  %v1760_v10 = vor.u32 %v1759_v54, %v1756_v14  ;;  %v10619_v61 = vrot.slane %v4386_v35, 5  ;;  %v7069_v14 = vld [vmem:[%s9340_s25 + $0xc] sm:$0xe] }
  0xe8   : > { %8248 = vmatprep.subr.bf16.mxu0 %v10527_v44  ;;  %8519 = vmatmul.mubr.bf16.vlgmr.msra.gmra.mrb[0].mxu1 %v10328_v50  ;;  %v1747_v50 = vrot.slane %v1746_v30, 4  ;;  %v1770_v0 = vor.u32 %v1769_v17, %v10561_v28  ;;  %v1728_v31 = vsel %vm9400_vm2, %v10495_v33, %v10490_v20  ;;  %v4392_v54 = vrot.slane %v4390_v19, 4  ;;  %v10673_v35 = vld [vmem:[%s11832_s2 + $0x168] sm:$0xff]  }
  0xe9   : > { %8535 = vmatpush3.bf16.msra.mxu1 %v9113_v47  ;;  %8522 = vmatprep.mubr.bf16.mxu1 %v10340_v18  ;;  %v1718_v18 = vsel %vm9400_vm2, %v10488_v6, %v10418_v27  ;;  %v4360_v24 = vrot.slane %v4359_v2, 4  ;;  %v4370_v47 = vrot.slane %v4369_v26, 4  ;;  %v4374_v41 = vrot.slane %v4372_v59, 5  ;;  %v7071_v26 = vld [vmem:[%s9340_s25 + $0x24] sm:$0xe] }
  0xea   : > { %8536 = vmatprep.subr.bf16.mxu1 %v10527_v44  ;;  %v2021_v53 = vrot.slane %v10045_v42, 5  ;;  %v4341_v6 = vsel %vm9400_vm2, %v10517_v37, %v10477_v1  ;;  %v4351_v33 = vsel %vm9400_vm2, %v10538_v5, %v10519_v16  ;;  %v1775_v20 = vrot.slane %v1773_v39, 5  ;;  %v7390_v37 = vld [vmem:[%s9345_s22 + $0xfc] sm:$0xe]  ;;  %v10642_v16 = vld [vmem:[%s11832_s2 + $0x160] sm:$0xff]  }
  0xeb   : > { %8249 = vmatpush3.bf16.msra.mxu0 %v10527_v44  ;;  %v4383_v27 = vor.u32 %v4382_v63, %v4379_v11  ;;  %v1742_v45 = vsel %vm9400_vm2, %v1737_v58, %v10529_v32  ;;  %v1752_v42 = vsel %vm9400_vm2, %v1747_v50, %v10540_v56  ;;  %v1761_v4 = vrot.slane %v1760_v10, 4  ;;  %v7072_v50 = vld [vmem:[%s9340_s25 + $0x30] sm:$0xe] }
  0xec   : > { %8250 = vmatprep.subr.bf16.mxu0 %v9115_v36  ;;  %v1771_v1 = vrot.slane %v1770_v0, 4  ;;  %v4396_v5 = vshll.u32 %v10607_v25, 16  ;;  %v7077_v32 = vrot.slane %v7069_v14, 9  ;;  %v2024_v38 = vrot.slane %v10060_v40, 5  ;;  %v10657_v40 = vld [vmem:[%s9340_s25 + $0x18] sm:$0xe] }
  0xed   : > { %8537 = vmatpush3.bf16.msra.mxu1 %v10527_v44  ;;  %v4393_v44 = vor.u32 %v4392_v54, %v10619_v61  ;;  %v4365_v56 = vsel %vm9400_vm2, %v4360_v24, %v10548_v57  ;;  %v4375_v62 = vsel %vm9400_vm2, %v4370_v47, %v4374_v41  ;;  %v2023_v30 = vrot.slane %v2021_v53, 4  ;;  %v10698_v10 = vld [vmem:[%s11832_s2 + $0x170] sm:$0xff]  }
  0xee   : > { %8235 = vmatmul.mubr.bf16.gmra.mrb[4].mxu0 %v7056_v9  ;;  %8538 = vmatprep.subr.bf16.mxu1 %v9115_v36  ;;  %v4579_v17 = vrot.slane %v10071_v22, 5  ;;  %v7058_v7 = vcombine.low %v1718_v18, %v1728_v31  ;;  %v7387_v21 = vcombine.low %v4341_v6, %v4351_v33  ;;  %v10654_v9 = vrot.slane %v4383_v27, 4  ;;  %v11979_v18 = vld [vmem:[#allocation18_spill] sm:$0xff] }
  0xef   : > { %8251 = vmatpush3.bf16.msra.mxu0 %v9115_v36  ;;  %8238 = vmatprep.mubr.bf16.mxu0 %v7057_v29  ;;  %v7059_v3 = vcombine.low %v1742_v45, %v1752_v42  ;;  %v1766_v57 = vsel %vm9400_vm2, %v1761_v4, %v10561_v28  ;;  %v1776_v8 = vsel %vm9400_vm2, %v1771_v1, %v1775_v20  ;;  %v2028_v22 = vrot.slane %v10098_v46, 5  ;;  %v7392_v29 = vld [vmem:[%s9345_s22 + $0x114] sm:$0xe]  ;;  %v7393_v20 = vld [vmem:[%s9345_s22 + $0x120] sm:$0xe] }
  0xf0   : > { %8252 = vmatprep.subr.bf16.mxu0 %v10603_v51  ;;  %8523 = vmatmul.mubr.bf16.gmra.mrb[4].mxu1 %v7385_v15  ;;  %v10666_v15 = vld [vmem:[%s9345_s22 + $0x108] sm:$0xe]  ;;  %v7388_v19 = vcombine.low %v4365_v56, %v4375_v62  ;;  %v4394_v28 = vrot.slane %v4393_v44, 4  ;;  %v7398_v2 = vrot.slane %v7390_v37, 9  ;;  %v10679_v46 = vsel %vm9734_vm5, %v7077_v32, %v2021_v53  ;;  %v11982_v53 = vld [vmem:[#allocation19_spill] sm:$0xff]  ;;  %v11983_v42 = vld [vmem:[#allocation20_spill] sm:$0xff] }
  0xf1   : > { %8539 = vmatpush3.bf16.msra.mxu1 %v9115_v36  ;;  %8526 = vmatprep.mubr.bf16.mxu1 %v7386_v43  ;;  %v4398_v36 = vrot.slane %v4396_v5, 5  ;;  %v10683_v59 = vsel %vm9734_vm5, %v2023_v30, %v2024_v38  ;;  %v4581_v39 = vrot.slane %v4579_v17, 4  ;;  %v4582_v52 = vrot.slane %v10074_v34, 5  ;;  %v10723_v37 = vld [vmem:[%s11832_s2 + $0x178] sm:$0xff]   ;;  %v11984_v5 = vld [vmem:[#allocation21_spill] sm:$0xff] }
  0xf2   : > { %8540 = vmatprep.subr.bf16.mxu1 %v10603_v51  ;;  %v7060_v43 = vcombine.low %v1766_v57, %v1776_v8  ;;  %v4389_v11 = vsel %vm9400_vm2, %v10654_v9, %v10619_v61  ;;  %v4586_v63 = vrot.slane %v10129_v49, 5  ;;  %v2035_v58 = vrot.slane %v10136_v13, 5  ;;  %v11980_v61 = vld [vmem:[#allocation22_spill] sm:$0xff]  ;;  %v11985_v30 = vld [vmem:[#allocation23_spill] sm:$0xff] }
  0xf3   : > { %8253 = vmatpush3.bf16.msra.mxu0 %v10603_v51  ;;  %v7078_v34 = vrot.slane %v10657_v40, 9  ;;  %v2030_v0 = vrot.slane %v2028_v22, 4  ;;  %v4593_v31 = vrot.slane %v11979_v18, 5  ;;  %v2042_v54 = vrot.slane %v11980_v61, 5  ;;  %v7073_v8 = vld [vmem:[%s9340_s25 + $0x3c] sm:$0xe] }
  0xf4   : > { %8254 = vmatprep.subr.bf16.mxu0 %v10642_v16  ;;  %v4399_v49 = vsel %vm9400_vm2, %v4394_v28, %v4398_v36  ;;  %v7101_v13 = vcombine.low %v10679_v46, %v10683_v59  ;;  %v7399_v24 = vrot.slane %v10666_v15, 9  ;;  %v4580_v47 = vsel %vm9734_vm5, %v7398_v2, %v4579_v17  ;;  %v11988_v36 = vld [vmem:[#allocation14_spill] sm:$0xff]  ;;  %v7074_v18 = vld [vmem:[%s9340_s25 + $0x48] sm:$0xe] }
  0xf5   : > { %8541 = vmatpush3.bf16.msra.mxu1 %v10603_v51  ;;  %v11981_v51 = vld [vmem:[#allocation17_spill] sm:$0xff]  ;;  %v4583_v41 = vsel %vm9734_vm5, %v4581_v39, %v4582_v52  ;;  %v4589_v6 = vrot.slane %v11982_v53, 5  ;;  %v7079_v33 = vrot.slane %v7071_v26, 9  ;;  %v4588_v27 = vrot.slane %v4586_v63, 4  ;;  %v10754_v26 = vld [vmem:[%s11832_s2 + $0x180] sm:$0xff]   ;;  %v11992_v53 = vld [vmem:[#allocation26_spill] sm:$0xff] }
  0xf6   : > { %8239 = vmatmul.mubr.bf16.gmra.mrb[8].mxu0 %v7058_v7  ;;  %8542 = vmatprep.subr.bf16.mxu1 %v10642_v16  ;;  %v2031_v14 = vrot.slane %v11981_v51, 5  ;;  %v2037_v45 = vrot.slane %v2035_v58, 4  ;;  %v2038_v4 = vrot.slane %v11983_v42, 5  ;;  %v7400_v1 = vrot.slane %v7392_v29, 9  ;;  %v11986_v7 = vld [vmem:[#allocation15_spill] sm:$0xff] }
  0xf7   : > { %8255 = vmatpush3.bf16.msra.mxu0 %v10642_v16  ;;  %8242 = vmatprep.mubr.bf16.mxu0 %v7059_v3  ;;  %v4595_v44 = vrot.slane %v4593_v31, 4  ;;  %v4596_v32 = vrot.slane %v11984_v5, 5  ;;  %v7080_v38 = vrot.slane %v7072_v50, 9  ;;  %v2044_v56 = vrot.slane %v2042_v54, 4  ;;  %v7394_v52 = vld [vmem:[%s9345_s22 + $0x12c] sm:$0xe] }
  0xf8   : > { %8256 = vmatprep.subr.bf16.mxu0 %v10673_v35  ;;  %8527 = vmatmul.mubr.bf16.gmra.mrb[8].mxu1 %v7387_v21  ;;  %v7389_v62 = vcombine.low %v4389_v11, %v4399_v49  ;;  %v2045_v17 = vrot.slane %v11985_v30, 5  ;;  %v4600_v21 = vrot.slane %v11986_v7, 5  ;;  %v7406_v9 = vcombine.low %v4580_v47, %v4583_v41  ;;  %v11989_v11 = vld [vmem:[#allocation24_spill] sm:$0xff]  ;;  %v7395_v51 = vld [vmem:[%s9345_s22 + $0x138] sm:$0xe]  ;;  %v11996_v7 = vld [vmem:[#allocation30_spill] sm:$0xff] }
  0xf9   : > { %8543 = vmatpush3.bf16.msra.mxu1 %v10642_v16  ;;  %8530 = vmatprep.mubr.bf16.mxu1 %v7388_v19  ;;  %v2029_v16 = vsel %vm9734_vm5, %v7078_v34, %v2028_v22  ;;  %v2032_v40 = vsel %vm9734_vm5, %v2030_v0, %v2031_v14  ;;  %v10737_v3 = vsel %vm9734_vm5, %v7399_v24, %v4586_v63  ;;  %v7401_v15 = vrot.slane %v7393_v20, 9  ;;  %v11987_v19 = vld [vmem:[#allocation16_spill] sm:$0xff] }
  0xfa   : > { %8544 = vmatprep.subr.bf16.mxu1 %v10673_v35  ;;  %v10741_v57 = vsel %vm9734_vm5, %v7079_v33, %v2035_v58  ;;  %v10746_v22 = vsel %vm9734_vm5, %v4588_v27, %v4589_v6  ;;  %v4603_v28 = vrot.slane %v11987_v19, 5  ;;  %v2049_v2 = vrot.slane %v11988_v36, 5  ;;  %v11991_v14 = vld [vmem:[#allocation28_spill] sm:$0xff]  ;;  %v11993_v27 = vld [vmem:[#allocation27_spill] sm:$0xff] }
  0xfb   : > { %8257 = vmatpush3.bf16.msra.mxu0 %v10673_v35  ;;  %v2039_v46 = vsel %vm9734_vm5, %v2037_v45, %v2038_v4  ;;  %v10760_v59 = vsel %vm9734_vm5, %v7400_v1, %v4593_v31  ;;  %v10764_v39 = vsel %vm9734_vm5, %v7080_v38, %v2042_v54  ;;  %v10775_v29 = vsel %vm9734_vm5, %v2044_v56, %v2045_v17  ;;  %v11990_v31 = vld [vmem:[#allocation25_spill] sm:$0xff]  ;;  %v7075_v4 = vld [vmem:[%s9340_s25 + $0x54] sm:$0xe]  ;;  %v11994_v1 = vld [vmem:[#allocation31_spill] sm:$0xff] }
  0xfc   : > { %8258 = vmatprep.subr.bf16.mxu0 %v10698_v10  ;;  %v4607_v63 = vrot.slane %v11989_v11, 5  ;;  %v7102_v58 = vcombine.low %v2029_v16, %v2032_v40  ;;  %v7407_v50 = vcombine.low %v10737_v3, %v10746_v22  ;;  %v7103_v34 = vcombine.low %v10741_v57, %v2039_v46  ;;  %v11995_v38 = vld [vmem:[#allocation29_spill] sm:$0xff]  ;;  %v10820_v16 = vld [vmem:[%s11832_s2 + $0x190] sm:$0xff]   ;;  %v7076_v22 = vld [vmem:[%s9340_s25 + $0x60] sm:$0xe] }
  0xfd   : > { %8545 = vmatpush3.bf16.msra.mxu1 %v10673_v35  ;;  %v10771_v35 = vsel %vm9734_vm5, %v4595_v44, %v4596_v32  ;;  %v7081_v0 = vrot.slane %v7073_v8, 9  ;;  %v2056_v61 = vrot.slane %v11990_v31, 5  ;;  %v7104_v49 = vcombine.low %v10764_v39, %v10775_v29  ;;  %v11997_v40 = vld [vmem:[#allocation33_spill] sm:$0xff] }
  0xfe   : > { %8243 = vmatmul.mubr.bf16.gmra.mrb[12].mxu0 %v7060_v43  ;;  %8546 = vmatprep.subr.bf16.mxu1 %v10698_v10  ;;  %v4602_v43 = vrot.slane %v4600_v21, 4  ;;  %v7408_v54 = vcombine.low %v10760_v59, %v10771_v35  ;;  %v4614_v24 = vrot.slane %v11991_v14, 5  ;;  %v2051_v41 = vrot.slane %v2049_v2, 4  ;;  %v11999_v59 = vld [vmem:[#allocation32_spill] sm:$0xff]  ;;  %v7165_v35 = vld [vmem:[%s9340_s25 + $0x18] sm:$0xf] }
  0xff   : > { %8259 = vmatpush3.bf16.msra.mxu0 %v10698_v10  ;;  %8262 = vmatprep.mubr.bf16.mxu0 %v7101_v13  ;;  %v10791_v13 = vsel %vm9734_vm5, %v7401_v15, %v4600_v21  ;;  %v2052_v6 = vrot.slane %v11992_v53, 5  ;;  %v7402_v33 = vrot.slane %v7394_v52, 9  ;;  %v4609_v20 = vrot.slane %v4607_v63, 4  ;;  %v11998_v15 = vld [vmem:[#allocation34_spill] sm:$0xff]  ;;  %v10912_v29 = vld [vmem:[%s9345_s22 + $0x10c] sm:$0xf] }
 0x100   : > { %8260 = vmatprep.subr.bf16.mxu0 %v10723_v37  ;;  %8531 = vmatmul.mubr.bf16.gmra.mrb[12].mxu1 %v7389_v62  ;;  %v10804_v47 = vsel %vm9734_vm5, %v4602_v43, %v4603_v28  ;;  %v4610_v45 = vrot.slane %v11993_v27, 5  ;;  %v7082_v42 = vrot.slane %v7074_v18, 9  ;;  %v2063_v44 = vrot.slane %v11994_v1, 5  ;;  %v7397_v28 = vld [vmem:[%s9345_s22 + $0x150] sm:$0xe] }
 0x101   : > { %8547 = vmatpush3.bf16.msra.mxu1 %v10698_v10  ;;  %8550 = vmatprep.mubr.bf16.mxu1 %v7406_v9  ;;  %v10800_v10 = vld [vmem:[%s11832_s2 + $0x188] sm:$0xff]   ;;  %v10813_v5 = vsel %vm9734_vm5, %v7081_v0, %v2049_v2  ;;  %v2058_v32 = vrot.slane %v2056_v61, 4  ;;  %v2059_v56 = vrot.slane %v11995_v38, 5  ;;  %v7403_v62 = vrot.slane %v7395_v51, 9  ;;  %v7396_v9 = vld [vmem:[%s9345_s22 + $0x144] sm:$0xe] }
 0x102   : > { %8548 = vmatprep.subr.bf16.mxu1 %v10723_v37  ;;  %v7409_v30 = vcombine.low %v10791_v13, %v10804_v47  ;;  %v4616_v17 = vrot.slane %v4614_v24, 4  ;;  %v4617_v21 = vrot.slane %v11996_v7, 5  ;;  %v4621_v3 = vrot.slane %v11997_v40, 5  ;;  %v10876_v51 = vld [vmem:[%s9340_s25 + $0x20] sm:$0x1]  ;;  %v10958_v13 = vld [vmem:[%s11832_s2 + $0x1a8] sm:$0xff]  }
 0x103   : > { %8261 = vmatpush3.bf16.msra.mxu0 %v10723_v37  ;;  %v10833_v57 = vsel %vm9734_vm5, %v7402_v33, %v4607_v63  ;;  %v7083_v8 = vrot.slane %v7075_v4, 9  ;;  %v2070_v19 = vrot.slane %v11998_v15, 5  ;;  %v10841_v36 = vsel %vm9734_vm5, %v4609_v20, %v4610_v45  ;;  %v10951_v40 = vld [vmem:[%s9340_s25 + $0x28] sm:$0xf] }
 0x104   : > { %8278 = vmatprep.subr.bf16.mxu0 %v10754_v26  ;;  %v10845_v2 = vsel %vm9734_vm5, %v7082_v42, %v2056_v61  ;;  %v2065_v46 = vrot.slane %v2063_v44, 4  ;;  %v2066_v52 = vrot.slane %v11999_v59, 5  ;;  %v10851_v43 = vsel %vm9734_vm5, %v2058_v32, %v2059_v56  ;;  %v10870_v61 = vld [vmem:[%s9340_s25 + $0x1c] sm:$0xf] }
 0x105   : > { %8549 = vmatpush3.bf16.msra.mxu1 %v10723_v37  ;;  %v2053_v37 = vsel %vm9734_vm5, %v2051_v41, %v2052_v6  ;;  %v10855_v11 = vsel %vm9734_vm5, %v7403_v62, %v4614_v24  ;;  %v7404_v63 = vrot.slane %v7396_v9, 9  ;;  %v4623_v0 = vrot.slane %v4621_v3, 4  ;;  %v7168_v62 = vld [vmem:[%s9340_s25 + $0x24] sm:$0xf] }
 0x106   : > { %8263 = vmatmul.mubr.bf16.vlgmr.msra.gmra.mrb[0].mxu0 %v7102_v58  ;;  %8566 = vmatprep.subr.bf16.mxu1 %v10754_v26  ;;  %v4628_v58 = vrot.slane %v10534_v60, 5  ;;  %v4624_v18 = vrot.slane %v10543_v55, 5  ;;  %v7084_v31 = vrot.slane %v7076_v22, 9  ;;  %v2072_v60 = vrot.slane %v2070_v19, 4 }
 0x107   : > { %8279 = vmatpush3.bf16.msra.mxu0 %v10754_v26  ;;  %8266 = vmatprep.mubr.bf16.mxu0 %v7103_v34  ;;  %v10862_v34 = vld [vmem:[%s11832_s2 + $0x198] sm:$0xff]   ;;  %v2553_v14 = vshrl.u32 %v7165_v35, 16  ;;  %v7105_v24 = vcombine.low %v10813_v5, %v2053_v37  ;;  %v7410_v55 = vcombine.low %v10833_v57, %v10841_v36  ;;  %v10884_v41 = vsel %vm9734_vm5, %v7083_v8, %v2063_v44  ;;  %v10918_v44 = vld [vmem:[%s11832_s2 + $0x1a0] sm:$0xff]   ;;  %v10963_v37 = vld [vmem:[%s9345_s22 + $0x110] sm:$0x1] }
 0x108   : > { %8280 = vmatprep.subr.bf16.mxu0 %v10800_v10  ;;  %8551 = vmatmul.mubr.bf16.vlgmr.msra.gmra.mrb[0].mxu1 %v7407_v50  ;;  %v10866_v50 = vsel %vm9734_vm5, %v4616_v17, %v4617_v21  ;;  %v10888_v53 = vsel %vm9734_vm5, %v2065_v46, %v2066_v52  ;;  %v4630_v6 = vrot.slane %v4628_v58, 4  ;;  %v4631_v33 = vrot.slane %v10607_v25, 5 }
 0x109   : > { %8567 = vmatpush3.bf16.msra.mxu1 %v10754_v26  ;;  %8554 = vmatprep.mubr.bf16.mxu1 %v7408_v54  ;;  %v2073_v26 = vrot.slane %v10546_v23, 5  ;;  %v7405_v54 = vrot.slane %v7397_v28, 9  ;;  %v7438_v23 = vld [vmem:[%s9345_s22 + $0x108] sm:$0xf]  ;;  %v2556_v20 = vshll.u32 %v7165_v35, 16  ;;  %v2562_v27 = vshll.u32 %v10870_v61, 16 }
 0x10a   : > { %8568 = vmatprep.subr.bf16.mxu1 %v10800_v10  ;;  %v7106_v45 = vcombine.low %v10845_v2, %v10851_v43  ;;  %v7411_v42 = vcombine.low %v10855_v11, %v10866_v50  ;;  %v2566_v4 = vshrl.u32 %v10870_v61, 16  ;;  %v2572_v25 = vshll.u32 %v10876_v51, 16  ;;  %v10974_v28 = vld [vmem:[%s9345_s22 + $0x118] sm:$0xf]  ;;  %v11027_v50 = vld [vmem:[%s9345_s22 + $0x11c] sm:$0x1] }
 0x10b   : > { %8281 = vmatpush3.bf16.msra.mxu0 %v10800_v10  ;;  %v10909_v39 = vsel %vm9734_vm5, %v7404_v63, %v4621_v3  ;;  %v4984_v1 = vshll.u32 %v7438_v23, 16  ;;  %v10922_v5 = vsel %vm9734_vm5, %v4623_v0, %v4624_v18  ;;  %v10926_v32 = vsel %vm9734_vm5, %v7084_v31, %v2070_v19  ;;  %v7441_v3 = vld [vmem:[%s9345_s22 + $0x114] sm:$0xf]  ;;  %12000 = vst [vmem:[#allocation18_spill] sm:$0xff] %v11027_v50 }
 0x10c   : > { %8282 = vmatprep.subr.bf16.mxu0 %v10820_v16  ;;  %v10930_v38 = vsel %vm9734_vm5, %v2072_v60, %v2073_v26  ;;  %v10932_v56 = vrot.slane %v2553_v14, 4  ;;  %v10940_v17 = vsel %vm9734_vm5, %v7405_v54, %v4628_v58  ;;  %v10944_v7 = vsel %vm9734_vm5, %v4630_v6, %v4631_v33  ;;  %v7171_v58 = vld [vmem:[%s9340_s25 + $0x30] sm:$0xf]  ;;  %v10989_v0 = vld [vmem:[%s9340_s25 + $0x34] sm:$0xf] }
 0x10d   : > { %8569 = vmatpush3.bf16.msra.mxu1 %v10800_v10  ;;  %v7107_v10 = vcombine.low %v10884_v41, %v10888_v53  ;;  %v10946_v21 = vrot.slane %v2556_v20, 5  ;;  %v10948_v9 = vrot.slane %v2562_v27, 5  ;;  %v2568_v47 = vrot.slane %v2566_v4, 4  ;;  %v11001_v54 = vld [vmem:[%s11832_s2 + $0x1b0] sm:$0xff]  }
 0x10e   : > { %8267 = vmatmul.mubr.bf16.gmra.mrb[4].mxu0 %v7104_v49  ;;  %8570 = vmatprep.subr.bf16.mxu1 %v10820_v16  ;;  %v4981_v49 = vshrl.u32 %v7438_v23, 16  ;;  %v4990_v57 = vshll.u32 %v10912_v29, 16  ;;  %v4994_v8 = vshrl.u32 %v10912_v29, 16  ;;  %v10971_v22 = vrot.slane %v4984_v1, 5 }
 0x10f   : > { %8283 = vmatpush3.bf16.msra.mxu0 %v10820_v16  ;;  %8270 = vmatprep.mubr.bf16.mxu0 %v7105_v24  ;;  %v2577_v15 = vshrl.u32 %v7168_v62, 16  ;;  %v2580_v19 = vshll.u32 %v7168_v62, 16  ;;  %v2586_v36 = vshll.u32 %v10951_v40, 16  ;;  %v2590_v2 = vshrl.u32 %v10951_v40, 16  ;;  %v11006_v24 = vld [vmem:[%s9340_s25 + $0x2c] sm:$0x1] }
 0x110   : > { %8284 = vmatprep.subr.bf16.mxu0 %v10862_v34  ;;  %8555 = vmatmul.mubr.bf16.gmra.mrb[4].mxu1 %v7409_v30  ;;  %v10960_v30 = vrot.slane %v2572_v25, 5  ;;  %v5005_v46 = vshrl.u32 %v7441_v3, 16  ;;  %v5008_v59 = vshll.u32 %v7441_v3, 16  ;;  %v7412_v52 = vcombine.low %v10909_v39, %v10922_v5  ;;  %v11020_v25 = vld [vmem:[%s11832_s2 + $0x1b8] sm:$0xff]  }
 0x111   : > { %8571 = vmatpush3.bf16.msra.mxu1 %v10820_v16  ;;  %8558 = vmatprep.mubr.bf16.mxu1 %v7410_v55  ;;  %v10969_v16 = vrot.slane %v4981_v49, 4  ;;  %v7108_v35 = vcombine.low %v10926_v32, %v10930_v38  ;;  %v7413_v43 = vcombine.low %v10940_v17, %v10944_v7  ;;  %v2559_v63 = vor.u32 %v10946_v21, %v10932_v56  ;;  %v11037_v38 = vld [vmem:[%s9340_s25 + $0x38] sm:$0x1]  ;;  %v9135_v17 = vld [vmem:[%s9340_s25 + $0x30] sm:$0xff]  }
 0x112   : > { %8572 = vmatprep.subr.bf16.mxu1 %v10862_v34  ;;  %v10992_v18 = vrot.slane %v4990_v57, 5  ;;  %v4996_v31 = vrot.slane %v4994_v8, 4  ;;  %v5014_v60 = vshll.u32 %v10974_v28, 16  ;;  %v5018_v26 = vshrl.u32 %v10974_v28, 16 }
 0x113   : > { %8285 = vmatpush3.bf16.msra.mxu0 %v10862_v34  ;;  %v2569_v14 = vor.u32 %v2568_v47, %v10948_v9  ;;  %v2579_v55 = vrot.slane %v2577_v15, 4  ;;  %v2582_v41 = vrot.slane %v2580_v19, 5  ;;  %v2601_v53 = vshrl.u32 %v7171_v58, 16  ;;  %v7444_v47 = vld [vmem:[%s9345_s22 + $0x120] sm:$0xf]  ;;  %v9130_v15 = vld [vmem:[%s9345_s22 + $0x108] sm:$0xff]  }
 0x114   : > { %8286 = vmatprep.subr.bf16.mxu0 %v10918_v44  ;;  %v2604_v23 = vshll.u32 %v7171_v58, 16  ;;  %v2610_v6 = vshll.u32 %v10989_v0, 16  ;;  %v2614_v33 = vshrl.u32 %v10989_v0, 16  ;;  %v11014_v20 = vrot.slane %v2586_v36, 5 }
 0x115   : > { %8573 = vmatpush3.bf16.msra.mxu1 %v10862_v34  ;;  %v5000_v34 = vshll.u32 %v10963_v37, 16  ;;  %v2592_v27 = vrot.slane %v2590_v2, 4  ;;  %v5010_v4 = vrot.slane %v5008_v59, 5  ;;  %v4987_v39 = vor.u32 %v10971_v22, %v10969_v16  ;;  %v11054_v59 = vld [vmem:[%s11832_s2 + $0x1c0] sm:$0xff]  }
 0x116   : > { %8271 = vmatmul.mubr.bf16.gmra.mrb[8].mxu0 %v7106_v45  ;;  %8574 = vmatprep.subr.bf16.mxu1 %v10918_v44  ;;  %v5007_v45 = vrot.slane %v5005_v46, 4  ;;  %v4997_v11 = vor.u32 %v4996_v31, %v10992_v18  ;;  %v5020_v49 = vrot.slane %v5018_v26, 4  ;;  %v2560_v1 = vrot.slane %v2559_v63, 4  ;;  %v9131_v63 = vld [vmem:[%s9340_s25 + $0x24] sm:$0xff]  }
 0x117   : > { %8287 = vmatpush3.bf16.msra.mxu0 %v10918_v44  ;;  %8274 = vmatprep.mubr.bf16.mxu0 %v7107_v10  ;;  %v9129_v10 = vld [vmem:[%s9340_s25 + $0x18] sm:$0xff]   ;;  %v11033_v5 = vrot.slane %v5000_v34, 5  ;;  %v2596_v32 = vshll.u32 %v11006_v24, 16  ;;  %v2603_v56 = vrot.slane %v2601_v53, 4  ;;  %v2606_v62 = vrot.slane %v2604_v23, 5 }
 0x118   : > { %8288 = vmatprep.subr.bf16.mxu0 %v10958_v13  ;;  %8559 = vmatmul.mubr.bf16.gmra.mrb[8].mxu1 %v7411_v42  ;;  %v11029_v42 = vrot.slane %v5014_v60, 5  ;;  %v11040_v21 = vrot.slane %v2610_v6, 5  ;;  %v2616_v3 = vrot.slane %v2614_v33, 4  ;;  %v2583_v57 = vor.u32 %v2582_v41, %v2579_v55  ;;  %v11068_v26 = vld [vmem:[%s9345_s22 + $0x124] sm:$0xf]  ;;  %v11085_v41 = vld [vmem:[%s11832_s2 + $0x1c8] sm:$0xff]  }
 0x119   : > { %8575 = vmatpush3.bf16.msra.mxu1 %v10918_v44  ;;  %8562 = vmatprep.mubr.bf16.mxu1 %v7412_v52  ;;  %v2570_v44 = vrot.slane %v2569_v14, 4  ;;  %v2593_v8 = vor.u32 %v2592_v27, %v11014_v20  ;;  %v5011_v16 = vor.u32 %v5010_v4, %v5007_v45  ;;  %v5024_v22 = vshll.u32 %v11027_v50, 16  ;;  %v7174_v23 = vld [vmem:[%s9340_s25 + $0x3c] sm:$0xf]  ;;  %v11100_v6 = vld [vmem:[%s9340_s25 + $0x40] sm:$0xf] }
 0x11a   : > { %8576 = vmatprep.subr.bf16.mxu1 %v10958_v13  ;;  %v4988_v19 = vrot.slane %v4987_v39, 4  ;;  %v4998_v36 = vrot.slane %v4997_v11, 4  ;;  %v5021_v2 = vor.u32 %v5020_v49, %v11029_v42  ;;  %v2620_v46 = vshll.u32 %v11037_v38, 16  ;;  %12001 = vst [vmem:[#allocation22_spill] sm:$0xff] %v11100_v6  ;;  %v9133_v33 = vld [vmem:[%s9345_s22 + $0x114] sm:$0xff]   ;;  %v9136_v39 = vld [vmem:[%s9345_s22 + $0x120] sm:$0xff]  }
 0x11b   : > { %8289 = vmatpush3.bf16.msra.mxu0 %v10958_v13  ;;  %v2575_v52 = vsel %vm9400_vm2, %v2570_v44, %v10960_v30  ;;  %v11064_v58 = vrot.slane %v2596_v32, 5  ;;  %v2607_v31 = vor.u32 %v2606_v62, %v2603_v56  ;;  %v2617_v60 = vor.u32 %v2616_v3, %v11040_v21  ;;  %v7447_v4 = vld [vmem:[%s9345_s22 + $0x12c] sm:$0xf]  ;;  %v7177_v3 = vld [vmem:[%s9340_s25 + $0x48] sm:$0xf]  ;;  %v9148_v50 = vld [vmem:[%s9345_s22 + $0x150] sm:$0xff]  }
 0x11c   : > { %8290 = vmatprep.subr.bf16.mxu0 %v11001_v54  ;;  %v11073_v30 = vrot.slane %v2583_v57, 4  ;;  %v11075_v14 = vrot.slane %v2593_v8, 4  ;;  %v11077_v34 = vrot.slane %v5011_v16, 4  ;;  %v11079_v55 = vrot.slane %v5024_v22, 5  ;;  %v11143_v57 = vld [vmem:[%s9345_s22 + $0x128] sm:$0x1] }
 0x11d   : > { %8577 = vmatpush3.bf16.msra.mxu1 %v10958_v13  ;;  %v2565_v13 = vsel %vm9400_vm2, %v2560_v1, %v10948_v9  ;;  %v5032_v9 = vshll.u32 %v7444_v47, 16  ;;  %v4993_v7 = vsel %vm9400_vm2, %v4988_v19, %v10992_v18  ;;  %v11094_v53 = vrot.slane %v5021_v2, 4  ;;  %12004 = vst [vmem:[#allocation20_spill] sm:$0xff] %v11143_v57 }
 0x11e   : > { %8275 = vmatmul.mubr.bf16.gmra.mrb[12].mxu0 %v7108_v35  ;;  %8578 = vmatprep.subr.bf16.mxu1 %v11001_v54  ;;  %v5029_v35 = vshrl.u32 %v7444_v47, 16  ;;  %v11105_v27 = vcombine.low %v2565_v13, %v2575_v52  ;;  %v5038_v45 = vshll.u32 %v11068_v26, 16  ;;  %v11116_v11 = vrot.slane %v2607_v31, 4  ;;  %v11139_v47 = vld [vmem:[%s9340_s25 + $0x4c] sm:$0xf]  ;;  %v9137_v31 = vld [vmem:[%s9340_s25 + $0x3c] sm:$0xff]  }
 0x11f   : > { %8291 = vmatpush3.bf16.msra.mxu0 %v11001_v54  ;;  %8294 = vmatprep.mubr.bf16.mxu0 %v9129_v10  ;;  %v11112_v10 = vld [vmem:[%s9345_s22 + $0x130] sm:$0xf]  ;;  %v11118_v49 = vrot.slane %v2617_v60, 4  ;;  %v11120_v1 = vrot.slane %v5032_v9, 5  ;;  %v5042_v44 = vshrl.u32 %v11068_v26, 16  ;;  %12003 = vst [vmem:[#allocation19_spill] sm:$0xff] %v11139_v47 }
 0x120   : > { %8292 = vmatprep.subr.bf16.mxu0 %v11020_v25  ;;  %8563 = vmatmul.mubr.bf16.gmra.mrb[12].mxu1 %v7413_v43  ;;  %v5003_v43 = vsel %vm9400_vm2, %v4998_v36, %v11033_v5  ;;  %v11107_v18 = vrot.slane %v5029_v35, 4  ;;  %12002 = vst [vmem:[#allocation17_spill] sm:$0xff] %v11112_v10  ;;  %v2625_v8 = vshrl.u32 %v7174_v23, 16  ;;  %v2628_v16 = vshll.u32 %v7174_v23, 16  ;;  %v11172_v23 = vld [vmem:[%s11832_s2 + $0x1d8] sm:$0xff]  }
 0x121   : > { %8579 = vmatpush3.bf16.msra.mxu1 %v11001_v54  ;;  %8582 = vmatprep.mubr.bf16.mxu1 %v9130_v15  ;;  %v11096_v54 = vrot.slane %v2620_v46, 5  ;;  %v11123_v5 = vcombine.low %v4993_v7, %v5003_v43  ;;  %v2634_v22 = vshll.u32 %v11100_v6, 16  ;;  %v2638_v15 = vshrl.u32 %v11100_v6, 16  ;;  %v11155_v46 = vld [vmem:[%s11832_s2 + $0x1d0] sm:$0xff]   ;;  %v11166_v43 = vld [vmem:[%s9340_s25 + $0x44] sm:$0x1] }
 0x122   : > { %8580 = vmatprep.subr.bf16.mxu1 %v11020_v25  ;;  %v5053_v19 = vshrl.u32 %v7447_v4, 16  ;;  %v5056_v36 = vshll.u32 %v7447_v4, 16  ;;  %v5062_v2 = vshll.u32 %v11112_v10, 16  ;;  %v2649_v13 = vshrl.u32 %v7177_v3, 16  ;;  %12005 = vst [vmem:[#allocation21_spill] sm:$0xff] %v11166_v43 }
 0x123   : > { %8293 = vmatpush3.bf16.msra.mxu0 %v11020_v25  ;;  %v2652_v52 = vshll.u32 %v7177_v3, 16  ;;  %v2658_v35 = vshll.u32 %v11139_v47, 16  ;;  %v5035_v60 = vor.u32 %v11120_v1, %v11107_v18  ;;  %v11162_v9 = vrot.slane %v5038_v45, 5  ;;  %v7450_v3 = vld [vmem:[%s9345_s22 + $0x138] sm:$0xf] }
 0x124   : > { %8310 = vmatprep.subr.bf16.mxu0 %v11054_v59  ;;  %v5048_v7 = vshll.u32 %v11143_v57, 16  ;;  %v2627_v4 = vrot.slane %v2625_v8, 4  ;;  %v2630_v18 = vrot.slane %v2628_v16, 5  ;;  %v11175_v45 = vrot.slane %v2634_v22, 5  ;;  %v11187_v8 = vld [vmem:[%s9340_s25 + $0x50] sm:$0x1] }
 0x125   : > { %8581 = vmatpush3.bf16.msra.mxu1 %v11020_v25  ;;  %v5066_v25 = vshrl.u32 %v11112_v10, 16  ;;  %v2640_v1 = vrot.slane %v2638_v15, 4  ;;  %v5058_v62 = vrot.slane %v5056_v36, 5  ;;  %v11184_v32 = vrot.slane %v5062_v2, 5  ;;  %12007 = vst [vmem:[#allocation15_spill] sm:$0xff] %v11187_v8 }
 0x126   : > { %8295 = vmatmul.mubr.bf16.vlgmr.msra.gmra.mrb[0].mxu0 %v9131_v63  ;;  %8598 = vmatprep.subr.bf16.mxu1 %v11054_v59  ;;  %v2662_v63 = vshrl.u32 %v11139_v47, 16  ;;  %v2651_v16 = vrot.slane %v2649_v13, 4  ;;  %v2654_v22 = vrot.slane %v2652_v52, 5  ;;  %v11190_v15 = vrot.slane %v2658_v35, 5  ;;  %v11193_v47 = vld [vmem:[%s9345_s22 + $0x13c] sm:$0xf] }
 0x127   : > { %8311 = vmatpush3.bf16.msra.mxu0 %v11054_v59  ;;  %8298 = vmatprep.mubr.bf16.mxu0 %v9135_v17  ;;  %v5044_v17 = vrot.slane %v5042_v44, 4  ;;  %v11178_v44 = vld [vmem:[%s9345_s22 + $0x134] sm:$0x1]  ;;  %v5068_v56 = vrot.slane %v5066_v25, 4  ;;  %12008 = vst [vmem:[#allocation16_spill] sm:$0xff] %v11193_v47  ;;  %v5077_v2 = vshrl.u32 %v7450_v3, 16 }
 0x128   : > { %8312 = vmatprep.subr.bf16.mxu0 %v11085_v41  ;;  %8583 = vmatmul.mubr.bf16.vlgmr.msra.gmra.mrb[0].mxu1 %v9133_v33  ;;  %v9141_v33 = vld [vmem:[%s9340_s25 + $0x48] sm:$0xff]   ;;  %12006 = vst [vmem:[#allocation23_spill] sm:$0xff] %v11178_v44  ;;  %v2664_v10 = vrot.slane %v2662_v63, 4  ;;  %v5080_v25 = vshll.u32 %v7450_v3, 16  ;;  %v9142_v13 = vld [vmem:[%s9345_s22 + $0x138] sm:$0xff]   ;;  %v2631_v63 = vor.u32 %v2630_v18, %v2627_v4  ;;  %v5072_v36 = vshll.u32 %v11178_v44, 16 }
 0x129   : > { %8599 = vmatpush3.bf16.msra.mxu1 %v11054_v59  ;;  %8586 = vmatprep.mubr.bf16.mxu1 %v9136_v39  ;;  %v9139_v59 = vld [vmem:[%s9345_s22 + $0x12c] sm:$0xff]   ;;  %v5055_v39 = vrot.slane %v5053_v19, 4  ;;  %v5045_v35 = vor.u32 %v5044_v17, %v11162_v9  ;;  %v2644_v19 = vshll.u32 %v11166_v43, 16  ;;  %v5069_v3 = vor.u32 %v5068_v56, %v11184_v32  ;;  %v11220_v17 = vld [vmem:[%s11832_s2 + $0x1e0] sm:$0xff]   ;;  %v9143_v56 = vld [vmem:[%s9340_s25 + $0x54] sm:$0xff]  }
 0x12a   : > { %8600 = vmatprep.subr.bf16.mxu1 %v11085_v41  ;;  %v11222_v4 = vrot.slane %v5035_v60, 4  ;;  %v2655_v18 = vor.u32 %v2654_v22, %v2651_v16  ;;  %v2668_v52 = vshll.u32 %v11187_v8, 16  ;;  %v5079_v44 = vrot.slane %v5077_v2, 4  ;;  %v11234_v57 = vld [vmem:[%s9340_s25 + $0x58] sm:$0xf] }
 0x12b   : > { %8313 = vmatpush3.bf16.msra.mxu0 %v11085_v41  ;;  %v5090_v43 = vshrl.u32 %v11193_v47, 16  ;;  %v5046_v60 = vrot.slane %v5045_v35, 4  ;;  %v5050_v16 = vrot.slane %v5048_v7, 5  ;;  %v2632_v22 = vrot.slane %v2631_v63, 4  ;;  %v9147_v7 = vld [vmem:[%s9340_s25 + $0x60] sm:$0xff]  }
 0x12c   : > { %8314 = vmatprep.subr.bf16.mxu0 %v11155_v46  ;;  %v2646_v8 = vrot.slane %v2644_v19, 5  ;;  %v5070_v2 = vrot.slane %v5069_v3, 4  ;;  %v2656_v19 = vrot.slane %v2655_v18, 4  ;;  %v5041_v18 = vsel %vm9400_vm2, %v11222_v4, %v11162_v9  ;;  %v11273_v4 = vld [vmem:[%s11832_s2 + $0x1f0] sm:$0xff]  }
 0x12d   : > { %8601 = vmatpush3.bf16.msra.mxu1 %v11085_v41  ;;  %v2641_v41 = vor.u32 %v2640_v1, %v11175_v45  ;;  %v5086_v1 = vshll.u32 %v11193_v47, 16  ;;  %v9145_v47 = vld [vmem:[%s9345_s22 + $0x144] sm:$0xff]   ;;  %v5092_v6 = vrot.slane %v5090_v43, 4  ;;  %v2637_v43 = vsel %vm9400_vm2, %v2632_v22, %v11175_v45 }
 0x12e   : > { %8299 = vmatmul.mubr.bf16.gmra.mrb[4].mxu0 %v9137_v31  ;;  %8602 = vmatprep.subr.bf16.mxu1 %v11155_v46  ;;  %v5059_v31 = vor.u32 %v5058_v62, %v5055_v39  ;;  %v7180_v62 = vld [vmem:[%s9340_s25 + $0x54] sm:$0xf]  ;;  %v2665_v39 = vor.u32 %v2664_v10, %v11190_v15 }
 0x12f   : > { %8315 = vmatpush3.bf16.msra.mxu0 %v11155_v46  ;;  %8302 = vmatprep.mubr.bf16.mxu0 %v9141_v33  ;;  %v5082_v33 = vrot.slane %v5080_v25, 5  ;;  %v2642_v10 = vrot.slane %v2641_v41, 4  ;;  %v5074_v25 = vrot.slane %v5072_v36, 5  ;;  %v2673_v35 = vshrl.u32 %v7180_v62, 16 }
 0x130   : > { %8316 = vmatprep.subr.bf16.mxu0 %v11172_v23  ;;  %8587 = vmatmul.mubr.bf16.gmra.mrb[4].mxu1 %v9139_v59  ;;  %v5060_v59 = vrot.slane %v5059_v31, 4  ;;  %v2676_v63 = vshll.u32 %v7180_v62, 16  ;;  %v2666_v41 = vrot.slane %v2665_v39, 4  ;;  %v11245_v31 = vld [vmem:[%s9345_s22 + $0x140] sm:$0x1]  ;;  %v11247_v3 = vrot.slane %v5086_v1, 5 }
 0x131   : > { %8603 = vmatpush3.bf16.msra.mxu1 %v11155_v46  ;;  %8590 = vmatprep.mubr.bf16.mxu1 %v9142_v13  ;;  %v11240_v46 = vld [vmem:[%s11832_s2 + $0x1e8] sm:$0xff]   ;;  %v2670_v13 = vrot.slane %v2668_v52, 5  ;;  %v5083_v36 = vor.u32 %v5082_v33, %v5079_v44  ;;  %v5051_v52 = vsel %vm9400_vm2, %v5046_v60, %v5050_v16  ;;  %v2682_v62 = vshll.u32 %v11234_v57, 16 }
 0x132   : > { %8604 = vmatprep.subr.bf16.mxu1 %v11172_v23  ;;  %v2686_v44 = vshrl.u32 %v11234_v57, 16  ;;  %v5065_v9 = vsel %vm9400_vm2, %v5060_v59, %v11184_v32  ;;  %v5075_v1 = vsel %vm9400_vm2, %v5070_v2, %v5074_v25  ;;  %v5096_v45 = vshll.u32 %v11245_v31, 16  ;;  %v9149_v39 = vld [vmem:[%s9340_s25 + $0x6c] sm:$0xff]   ;;  %v11337_v59 = vld [vmem:[%s9345_s22 + $0x148] sm:$0xf] }
 0x133   : > { %8317 = vmatpush3.bf16.msra.mxu0 %v11172_v23  ;;  %v2661_v32 = vsel %vm9400_vm2, %v2656_v19, %v11190_v15  ;;  %v2671_v33 = vsel %vm9400_vm2, %v2666_v41, %v2670_v13  ;;  %v11284_v60 = vrot.slane %v5083_v36, 4  ;;  %v5093_v16 = vor.u32 %v5092_v6, %v11247_v3  ;;  %v7183_v2 = vld [vmem:[%s9340_s25 + $0x60] sm:$0xf]  ;;  %v7456_v19 = vld [vmem:[%s9345_s22 + $0x150] sm:$0xf] }
 0x134   : > { %8318 = vmatprep.subr.bf16.mxu0 %v11220_v17  ;;  %v12010_v15 = vsel %vm9400_vm2, %v11073_v30, %v11014_v20  ;;  %v12011_v6 = vsel %vm9400_vm2, %v11094_v53, %v11079_v55  ;;  %v2688_v20 = vrot.slane %v2686_v44, 4  ;;  %v7453_v30 = vld [vmem:[%s9345_s22 + $0x144] sm:$0xf]  ;;  %v11332_v53 = vcombine.low %v5041_v18, %v5051_v52  ;;  %v9151_v13 = vld [vmem:[%s9345_s22 + $0x15c] sm:$0xff]   ;;  %v11361_v18 = vld [vmem:[%s9345_s22 + $0x154] sm:$0xf] }
 0x135   : > { %8605 = vmatpush3.bf16.msra.mxu1 %v11172_v23  ;;  %v2647_v23 = vsel %vm9400_vm2, %v2642_v10, %v2646_v8  ;;  %v2675_v8 = vrot.slane %v2673_v35, 4  ;;  %v5089_v35 = vsel %vm9400_vm2, %v11284_v60, %v11247_v3  ;;  %v5101_v36 = vshrl.u32 %v7453_v30, 16 }
 0x136   : > { %8303 = vmatmul.mubr.bf16.gmra.mrb[8].mxu0 %v9143_v56  ;;  %8606 = vmatprep.subr.bf16.mxu1 %v11220_v17  ;;  %v2678_v56 = vrot.slane %v2676_v63, 5  ;;  %v11334_v10 = vcombine.low %v2637_v43, %v2647_v23  ;;  %v5094_v63 = vrot.slane %v5093_v16, 4  ;;  %v5110_v44 = vshll.u32 %v11337_v59, 16 }
 0x137   : > { %8319 = vmatpush3.bf16.msra.mxu0 %v11220_v17  ;;  %8306 = vmatprep.mubr.bf16.mxu0 %v9147_v7  ;;  %v11351_v7 = vld [vmem:[%s9340_s25 + $0x64] sm:$0xf]  ;;  %v5114_v43 = vshrl.u32 %v11337_v59, 16  ;;  %v2697_v3 = vshrl.u32 %v7183_v2, 16  ;;  %v2700_v23 = vshll.u32 %v7183_v2, 16  ;;  %v5103_v16 = vrot.slane %v5101_v36, 4 }
 0x138   : > { %8320 = vmatprep.subr.bf16.mxu0 %v11240_v46  ;;  %8591 = vmatmul.mubr.bf16.gmra.mrb[8].mxu1 %v9145_v47  ;;  %v12009_v47 = vsel %vm9400_vm2, %v11075_v14, %v11064_v58  ;;  %v11313_v58 = vld [vmem:[%s9340_s25 + $0x5c] sm:$0x1]  ;;  %v11315_v14 = vrot.slane %v2682_v62, 5  ;;  %v2679_v25 = vor.u32 %v2678_v56, %v2675_v8  ;;  %v5104_v62 = vshll.u32 %v7453_v30, 16  ;;  %v7186_v30 = vld [vmem:[%s9340_s25 + $0x6c] sm:$0xf] }
 0x139   : > { %8607 = vmatpush3.bf16.msra.mxu1 %v11220_v17  ;;  %8594 = vmatprep.mubr.bf16.mxu1 %v9148_v50  ;;  %v11298_v22 = vcombine.low %v12010_v15, %v12009_v47  ;;  %v12012_v50 = vsel %vm9400_vm2, %v11077_v34, %v11029_v42  ;;  %v12013_v42 = vsel %vm9400_vm2, %v11118_v49, %v11096_v54  ;;  %v11344_v54 = vld [vmem:[%s11832_s2 + $0x1f8] sm:$0xff]   ;;  %v2692_v41 = vshll.u32 %v11313_v58, 16  ;;  %v11392_v47 = vld [vmem:[%s11832_s2 + $0x208] sm:$0xff]   ;;  %v11404_v2 = vld [vmem:[%s9340_s25 + $0x70] sm:$0xf] }
 0x13a   : > { %v11310_v17 = vcombine.low %v12012_v50, %v12011_v6  ;;  %8608 = vmatprep.subr.bf16.mxu1 %v11240_v46  ;;  %v12014_v34 = vsel %vm9400_vm2, %v11116_v11, %v11040_v21  ;;  %v11346_v49 = vcombine.low %v5065_v9, %v5075_v1  ;;  %v11348_v21 = vcombine.low %v2661_v32, %v2671_v33 }
 0x13b   : > { %8321 = vmatpush3.bf16.msra.mxu0 %v11240_v46  ;;  %v11330_v55 = vcombine.low %v12014_v34, %v12013_v42  ;;  %v5098_v11 = vrot.slane %v5096_v45, 5  ;;  %v2689_v52 = vor.u32 %v2688_v20, %v11315_v14  ;;  %v2706_v9 = vshll.u32 %v11351_v7, 16 }
 0x13c   : > { %8322 = vmatprep.subr.bf16.mxu0 %v11273_v4  ;;  %v2710_v1 = vshrl.u32 %v11351_v7, 16  ;;  %v5125_v45 = vshrl.u32 %v7456_v19, 16  ;;  %v5128_v8 = vshll.u32 %v7456_v19, 16  ;;  %v5134_v56 = vshll.u32 %v11361_v18, 16 }
 0x13d   : > { %8609 = vmatpush3.bf16.msra.mxu1 %v11240_v46  ;;  %v9153_v46 = vld [vmem:[%s11832_s2 + $0x200] sm:$0xff]   ;;  %v5099_v32 = vsel %vm9400_vm2, %v5094_v63, %v5098_v11  ;;  %v11380_v33 = vrot.slane %v2679_v25, 4  ;;  %v11382_v60 = vrot.slane %v2692_v41, 5  ;;  %v11394_v15 = vrot.slane %v2689_v52, 4  ;;  %v11407_v11 = vld [vmem:[%s9340_s25 + $0x68] sm:$0x1] }
 0x13e   : > { %8307 = vmatmul.mubr.bf16.gmra.mrb[12].mxu0 %v9149_v39  ;;  %8610 = vmatprep.subr.bf16.mxu1 %v11273_v4  ;;  %v5138_v39 = vshrl.u32 %v11361_v18, 16  ;;  %v5106_v6 = vrot.slane %v5104_v62, 5  ;;  %v11396_v50 = vrot.slane %v5110_v44, 5  ;;  %v5116_v20 = vrot.slane %v5114_v43, 4  ;;  %v11418_v52 = vld [vmem:[%s9345_s22 + $0x158] sm:$0x1] }
 0x13f   : > { %8323 = vmatpush3.bf16.msra.mxu0 %v11273_v4  ;;  %8326 = vmatprep.mubr.bf16.mxu0 %v11105_v27  ;;  %v11385_v27 = vld [vmem:[%s9345_s22 + $0x14c] sm:$0x1]  ;;  %v2702_v42 = vrot.slane %v2700_v23, 5  ;;  %v2712_v34 = vrot.slane %v2710_v1, 4  ;;  %v5127_v25 = vrot.slane %v5125_v45, 4  ;;  %v5130_v19 = vrot.slane %v5128_v8, 5 }
 0x140   : > { %8324 = vmatprep.subr.bf16.mxu0 %v11344_v54  ;;  %8595 = vmatmul.mubr.bf16.gmra.mrb[12].mxu1 %v9151_v13  ;;  %v11409_v13 = vrot.slane %v5134_v56, 5  ;;  %v5140_v63 = vrot.slane %v5138_v39, 4  ;;  %v11411_v41 = vcombine.low %v5089_v35, %v5099_v32  ;;  %v2685_v36 = vsel %vm9400_vm2, %v11380_v33, %v11315_v14  ;;  %v11433_v45 = vld [vmem:[%s9345_s22 + $0x160] sm:$0xf]  ;;  %v9155_v8 = vld [vmem:[%s11832_s2 + $0x210] sm:$0xff]  }
 0x141   : > { %8611 = vmatpush3.bf16.msra.mxu1 %v11273_v4  ;;  %8614 = vmatprep.mubr.bf16.mxu1 %v11123_v5  ;;  %v2699_v4 = vrot.slane %v2697_v3, 4  ;;  %v11401_v5 = vrot.slane %v2706_v9, 5  ;;  %v2721_v62 = vshrl.u32 %v7186_v30, 16  ;;  %v2724_v44 = vshll.u32 %v7186_v30, 16  ;;  %v7459_v9 = vld [vmem:[%s9345_s22 + $0x15c] sm:$0xf] }
 0x142   : > { %8612 = vmatprep.subr.bf16.mxu1 %v11344_v54  ;;  %v5107_v43 = vor.u32 %v5106_v6, %v5103_v16  ;;  %v5120_v3 = vshll.u32 %v11385_v27, 16  ;;  %v2730_v35 = vshll.u32 %v11404_v2, 16  ;;  %v2734_v23 = vshrl.u32 %v11404_v2, 16  ;;  %12015 = vst [vmem:[#allocation14_spill] sm:$0xff] %v11433_v45 }
 0x143   : > { %8325 = vmatpush3.bf16.msra.mxu0 %v11344_v54  ;;  %v2695_v14 = vsel %vm9400_vm2, %v11394_v15, %v11382_v60  ;;  %v5117_v1 = vor.u32 %v5116_v20, %v11396_v50  ;;  %v2713_v56 = vor.u32 %v2712_v34, %v11401_v5  ;;  %v5131_v39 = vor.u32 %v5130_v19, %v5127_v25  ;;  %v11452_v19 = vld [vmem:[%s9340_s25 + $0x74] sm:$0x1] }
 0x144   : > { %8342 = vmatprep.subr.bf16.mxu0 %v9153_v46  ;;  %v5141_v32 = vor.u32 %v5140_v63, %v11409_v13  ;;  %v5144_v33 = vshll.u32 %v11418_v52, 16  ;;  %v2723_v60 = vrot.slane %v2721_v62, 4  ;;  %v2726_v16 = vrot.slane %v2724_v44, 5 }
 0x145   : > { %8613 = vmatpush3.bf16.msra.mxu1 %v11344_v54  ;;  %v2703_v54 = vor.u32 %v2702_v42, %v2699_v4  ;;  %v5149_v15 = vshrl.u32 %v7459_v9, 16  ;;  %v5152_v6 = vshll.u32 %v7459_v9, 16  ;;  %v2736_v20 = vrot.slane %v2734_v23, 4 }
 0x146   : > { %8327 = vmatmul.mubr.bf16.vlgmr.msra.gmra.mrb[0].mxu0 %v11298_v22  ;;  %8630 = vmatprep.subr.bf16.mxu1 %v9153_v46  ;;  %v2716_v22 = vshll.u32 %v11407_v11, 16  ;;  %v5158_v30 = vshll.u32 %v11433_v45, 16  ;;  %v5162_v4 = vshrl.u32 %v11433_v45, 16  ;;  %v5118_v42 = vrot.slane %v5117_v1, 4 }
 0x147   : > { %8343 = vmatpush3.bf16.msra.mxu0 %v9153_v46  ;;  %8330 = vmatprep.mubr.bf16.mxu0 %v11330_v55  ;;  %v11445_v55 = vrot.slane %v2730_v35, 5  ;;  %v5122_v34 = vrot.slane %v5120_v3, 5  ;;  %v2714_v63 = vrot.slane %v2713_v56, 4  ;;  %v5132_v62 = vrot.slane %v5131_v39, 4  ;;  %v11469_v39 = vld [vmem:[%s9345_s22 + $0x164] sm:$0x1] }
 0x148   : > { %8344 = vmatprep.subr.bf16.mxu0 %v11392_v47  ;;  %8615 = vmatmul.mubr.bf16.vlgmr.msra.gmra.mrb[0].mxu1 %v11310_v17  ;;  %v5108_v17 = vrot.slane %v5107_v43, 4  ;;  %v2718_v25 = vrot.slane %v2716_v22, 5  ;;  %v5146_v44 = vrot.slane %v5144_v33, 5  ;;  %v5142_v35 = vrot.slane %v5141_v32, 4 }
 0x149   : > { %8631 = vmatpush3.bf16.msra.mxu1 %v9153_v46  ;;  %8618 = vmatprep.mubr.bf16.mxu1 %v11332_v53  ;;  %v9156_v53 = vld [vmem:[%s11832_s2 + $0x218] sm:$0xff]   ;;  %v2704_v46 = vrot.slane %v2703_v54, 4  ;;  %v2727_v23 = vor.u32 %v2726_v16, %v2723_v60  ;;  %v5151_v9 = vrot.slane %v5149_v15, 4  ;;  %v5154_v45 = vrot.slane %v5152_v6, 5 }
 0x14a   : > { %8632 = vmatprep.subr.bf16.mxu1 %v11392_v47  ;;  %v2737_v43 = vor.u32 %v2736_v20, %v11445_v55  ;;  %v2740_v3 = vshll.u32 %v11452_v19, 16  ;;  %v11461_v1 = vrot.slane %v5158_v30, 5  ;;  %v5164_v22 = vrot.slane %v5162_v4, 4  ;;  %v7221_v60 = vld [vmem:[%s9340_s25 + $0x18] sm:$0xe] }
 0x14b   : > { %8345 = vmatpush3.bf16.msra.mxu0 %v11392_v47  ;;  %v7210_v54 = vcombine.low %v2685_v36, %v2695_v14  ;;  %v5113_v56 = vsel %vm9400_vm2, %v5108_v17, %v11396_v50  ;;  %v2709_v36 = vsel %vm9400_vm2, %v2704_v46, %v11401_v5  ;;  %v2719_v14 = vsel %vm9400_vm2, %v2714_v63, %v2718_v25  ;;  %v7470_v30 = vld [vmem:[%s9345_s22 + $0x108] sm:$0xe]  ;;  %v7222_v63 = vld [vmem:[%s9340_s25 + $0x24] sm:$0xe] }
 0x14c   : > { %8346 = vmatprep.subr.bf16.mxu0 %v9155_v8  ;;  %v5137_v50 = vsel %vm9400_vm2, %v5132_v62, %v11409_v13  ;;  %v2728_v32 = vrot.slane %v2727_v23, 4  ;;  %v5155_v33 = vor.u32 %v5154_v45, %v5151_v9  ;;  %v2988_v16 = vrot.slane %v10870_v61, 5  ;;  %v9158_v61 = vld [vmem:[%s11832_s2 + $0x228] sm:$0xff]  }
 0x14d   : > { %8633 = vmatpush3.bf16.msra.mxu1 %v11392_v47  ;;  %v5123_v47 = vsel %vm9400_vm2, %v5118_v42, %v5122_v34  ;;  %v2738_v5 = vrot.slane %v2737_v43, 4  ;;  %v2742_v15 = vrot.slane %v2740_v3, 5  ;;  %v5165_v6 = vor.u32 %v5164_v22, %v11461_v1  ;;  %v7223_v3 = vld [vmem:[%s9340_s25 + $0x30] sm:$0xe] }
 0x14e   : > { %8331 = vmatmul.mubr.bf16.gmra.mrb[4].mxu0 %v11334_v10  ;;  %8634 = vmatprep.subr.bf16.mxu1 %v9155_v8  ;;  %v9157_v10 = vld [vmem:[%s11832_s2 + $0x220] sm:$0xff]   ;;  %v5168_v13 = vshll.u32 %v11469_v39, 16  ;;  %v7467_v45 = vcombine.low %v5113_v56, %v5123_v47  ;;  %v2733_v4 = vsel %vm9400_vm2, %v2728_v32, %v11445_v55  ;;  %v5156_v17 = vrot.slane %v5155_v33, 4  ;;  %v7471_v56 = vld [vmem:[%s9345_s22 + $0x114] sm:$0xe] }
 0x14f   : > { %8347 = vmatpush3.bf16.msra.mxu0 %v9155_v8  ;;  %8334 = vmatprep.mubr.bf16.mxu0 %v11348_v21  ;;  %v5147_v21 = vsel %vm9400_vm2, %v5142_v35, %v5146_v44  ;;  %v2990_v42 = vrot.slane %v2988_v16, 4  ;;  %v2991_v34 = vrot.slane %v10876_v51, 5  ;;  %v5166_v25 = vrot.slane %v5165_v6, 4  ;;  %v9159_v51 = vld [vmem:[%s11832_s2 + $0x230] sm:$0xff]  }
 0x150   : > { %8348 = vmatprep.subr.bf16.mxu0 %v9156_v53  ;;  %8619 = vmatmul.mubr.bf16.gmra.mrb[4].mxu1 %v11346_v49  ;;  %v5351_v49 = vrot.slane %v10912_v29, 5  ;;  %v7468_v20 = vcombine.low %v5137_v50, %v5147_v21  ;;  %v2743_v29 = vsel %vm9400_vm2, %v2738_v5, %v2742_v15  ;;  %v5170_v46 = vrot.slane %v5168_v13, 5  ;;  %v7472_v21 = vld [vmem:[%s9345_s22 + $0x120] sm:$0xe]  ;;  %v7224_v13 = vld [vmem:[%s9340_s25 + $0x3c] sm:$0xe] }
 0x151   : > { %8635 = vmatpush3.bf16.msra.mxu1 %v9155_v8  ;;  %8622 = vmatprep.mubr.bf16.mxu1 %v11411_v41  ;;  %v7211_v8 = vcombine.low %v2709_v36, %v2719_v14  ;;  %v7229_v41 = vrot.slane %v7221_v60, 9  ;;  %v2995_v62 = vrot.slane %v10951_v40, 5  ;;  %v7478_v44 = vrot.slane %v7470_v30, 9 }
 0x152   : > { %8636 = vmatprep.subr.bf16.mxu1 %v9156_v53  ;;  %v5353_v35 = vrot.slane %v5351_v49, 4  ;;  %v5354_v55 = vrot.slane %v10963_v37, 5  ;;  %v3002_v23 = vrot.slane %v10989_v0, 5  ;;  %v7212_v40 = vcombine.low %v2733_v4, %v2743_v29  ;;  %v12019_v4 = vld [vmem:[#allocation19_spill] sm:$0xff] }
 0x153   : > { %8349 = vmatpush3.bf16.msra.mxu0 %v9156_v53  ;;  %v5161_v9 = vsel %vm9400_vm2, %v5156_v17, %v11461_v1  ;;  %v2992_v37 = vsel %vm9734_vm5, %v2990_v42, %v2991_v34  ;;  %v7230_v43 = vrot.slane %v7222_v63, 9  ;;  %v5171_v22 = vsel %vm9400_vm2, %v5166_v25, %v5170_v46  ;;  %v7225_v25 = vld [vmem:[%s9340_s25 + $0x48] sm:$0xe] }
 0x154   : > { %8350 = vmatprep.subr.bf16.mxu0 %v9157_v10  ;;  %v2998_v0 = vrot.slane %v11006_v24, 5  ;;  %v5358_v47 = vrot.slane %v10974_v28, 5  ;;  %v5352_v1 = vsel %vm9734_vm5, %v7478_v44, %v5351_v49  ;;  %v5355_v36 = vsel %vm9734_vm5, %v5353_v35, %v5354_v55  ;;  %v12017_v49 = vld [vmem:[#allocation22_spill] sm:$0xff]  ;;  %v7473_v35 = vld [vmem:[%s9345_s22 + $0x12c] sm:$0xe] }
 0x155   : > { %8637 = vmatpush3.bf16.msra.mxu1 %v9156_v53  ;;  %v2989_v53 = vsel %vm9734_vm5, %v7229_v41, %v2988_v16  ;;  %v7231_v14 = vrot.slane %v7223_v3, 9  ;;  %v3004_v50 = vrot.slane %v3002_v23, 4  ;;  %v3005_v28 = vrot.slane %v11037_v38, 5  ;;  %v12016_v16 = vld [vmem:[#allocation18_spill] sm:$0xff]  ;;  %v12021_v55 = vld [vmem:[#allocation17_spill] sm:$0xff] }
 0x156   : > { %8335 = vmatmul.mubr.bf16.gmra.mrb[8].mxu0 %v7210_v54  ;;  %8638 = vmatprep.subr.bf16.mxu1 %v9157_v10  ;;  %v2997_v54 = vrot.slane %v2995_v62, 4  ;;  %v7253_v24 = vcombine.low %v2989_v53, %v2992_v37  ;;  %v7469_v32 = vcombine.low %v5161_v9, %v5171_v22  ;;  %v2996_v33 = vsel %vm9734_vm5, %v7230_v43, %v2995_v62  ;;  %v12020_v62 = vld [vmem:[#allocation21_spill] sm:$0xff]  ;;  %v12022_v9 = vld [vmem:[#allocation16_spill] sm:$0xff]  ;;  %v12023_v22 = vld [vmem:[#allocation15_spill] sm:$0xff] }
 0x157   : > { %8351 = vmatpush3.bf16.msra.mxu0 %v9157_v10  ;;  %8338 = vmatprep.mubr.bf16.mxu0 %v7211_v8  ;;  %v7479_v60 = vrot.slane %v7471_v56, 9  ;;  %v5361_v5 = vrot.slane %v12016_v16, 5  ;;  %v5360_v6 = vrot.slane %v5358_v47, 4  ;;  %v7480_v38 = vrot.slane %v7472_v21, 9 }
 0x158   : > { %8352 = vmatprep.subr.bf16.mxu0 %v9158_v61  ;;  %8623 = vmatmul.mubr.bf16.gmra.mrb[8].mxu1 %v7467_v45  ;;  %v2999_v15 = vsel %vm9734_vm5, %v2997_v54, %v2998_v0  ;;  %v3009_v45 = vrot.slane %v12017_v49, 5  ;;  %v3006_v30 = vsel %vm9734_vm5, %v3004_v50, %v3005_v28  ;;  %v3016_v17 = vrot.slane %v12019_v4, 5  ;;  %v7474_v0 = vld [vmem:[%s9345_s22 + $0x138] sm:$0xe]  ;;  %v7226_v28 = vld [vmem:[%s9340_s25 + $0x54] sm:$0xe] }
 0x159   : > { %8639 = vmatpush3.bf16.msra.mxu1 %v9157_v10  ;;  %8626 = vmatprep.mubr.bf16.mxu1 %v7468_v20  ;;  %v5365_v10 = vrot.slane %v11068_v26, 5  ;;  %v7486_v26 = vcombine.low %v5352_v1, %v5355_v36  ;;  %v12018_v20 = vld [vmem:[#allocation20_spill] sm:$0xff]  ;;  %v7254_v42 = vcombine.low %v2996_v33, %v2999_v15  ;;  %v5359_v34 = vsel %vm9734_vm5, %v7479_v60, %v5358_v47  ;;  %v12024_v36 = vld [vmem:[#allocation23_spill] sm:$0xff] }
 0x15a   : > { %8640 = vmatprep.subr.bf16.mxu1 %v9158_v61  ;;  %v5368_v41 = vrot.slane %v12018_v20, 5  ;;  %v7232_v29 = vrot.slane %v7224_v13, 9  ;;  %v5362_v46 = vsel %vm9734_vm5, %v5360_v6, %v5361_v5  ;;  %v3011_v63 = vrot.slane %v3009_v45, 4  ;;  %v7227_v6 = vld [vmem:[%s9340_s25 + $0x60] sm:$0xe] }
 0x15b   : > { %8353 = vmatpush3.bf16.msra.mxu0 %v9158_v61  ;;  %v5367_v8 = vrot.slane %v5365_v10, 4  ;;  %v3012_v44 = vrot.slane %v12020_v62, 5  ;;  %v5372_v53 = vrot.slane %v12021_v55, 5  ;;  %v5379_v37 = vrot.slane %v12022_v9, 5 }
 0x15c   : > { %8354 = vmatprep.subr.bf16.mxu0 %v9159_v51  ;;  %v7233_v43 = vrot.slane %v7225_v25, 9  ;;  %v3018_v3 = vrot.slane %v3016_v17, 4  ;;  %v3019_v54 = vrot.slane %v12023_v22, 5  ;;  %v7487_v56 = vcombine.low %v5359_v34, %v5362_v46  ;;  %v7477_v22 = vld [vmem:[%s9345_s22 + $0x15c] sm:$0xe] }
 0x15d   : > { %8641 = vmatpush3.bf16.msra.mxu1 %v9158_v61  ;;  %v3003_v61 = vsel %vm9734_vm5, %v7231_v14, %v3002_v23  ;;  %v3010_v47 = vsel %vm9734_vm5, %v7232_v29, %v3009_v45  ;;  %v7481_v1 = vrot.slane %v7473_v35, 9  ;;  %v3013_v14 = vsel %vm9734_vm5, %v3011_v63, %v3012_v44  ;;  %v7475_v45 = vld [vmem:[%s9345_s22 + $0x144] sm:$0xe]  ;;  %v7228_v44 = vld [vmem:[%s9340_s25 + $0x6c] sm:$0xe] }
 0x15e   : > { %8339 = vmatmul.mubr.bf16.gmra.mrb[12].mxu0 %v7212_v40  ;;  %8642 = vmatprep.subr.bf16.mxu1 %v9159_v51  ;;  %v7255_v23 = vcombine.low %v3003_v61, %v3006_v30  ;;  %v5366_v40 = vsel %vm9734_vm5, %v7480_v38, %v5365_v10  ;;  %v5374_v50 = vrot.slane %v5372_v53, 4  ;;  %v3023_v21 = vrot.slane %v11234_v57, 5 }
 0x15f   : > { %8355 = vmatpush3.bf16.msra.mxu0 %v9159_v51  ;;  %8358 = vmatprep.mubr.bf16.mxu0 %v7253_v24  ;;  %v5375_v24 = vrot.slane %v12024_v36, 5  ;;  %v5381_v33 = vrot.slane %v5379_v37, 4  ;;  %v5382_v60 = vrot.slane %v11245_v31, 5  ;;  %v3017_v16 = vsel %vm9734_vm5, %v7233_v43, %v3016_v17 }
 0x160   : > { %8356 = vmatprep.subr.bf16.mxu0 %v9160_v12  ;;  %8627 = vmatmul.mubr.bf16.gmra.mrb[12].mxu1 %v7469_v32  ;;  %v7482_v32 = vrot.slane %v7474_v0, 9  ;;  %v3030_v5 = vrot.slane %v11351_v7, 5  ;;  %v5373_v57 = vsel %vm9734_vm5, %v7481_v1, %v5372_v53  ;;  %v7234_v15 = vrot.slane %v7226_v28, 9  ;;  %v7544_v28 = vld [vmem:[%s9340_s25 + $0x14] sm:$0x1] }
 0x161   : > { %8643 = vmatpush3.bf16.msra.mxu1 %v9159_v51  ;;  %8646 = vmatprep.mubr.bf16.mxu1 %v7486_v26  ;;  %v5369_v51 = vsel %vm9734_vm5, %v5367_v8, %v5368_v41  ;;  %v7256_v26 = vcombine.low %v3010_v47, %v3013_v14  ;;  %v5376_v31 = vsel %vm9734_vm5, %v5374_v50, %v5375_v24  ;;  %v3025_v13 = vrot.slane %v3023_v21, 4  ;;  %v7476_v41 = vld [vmem:[%s9345_s22 + $0x150] sm:$0xe] }
 0x162   : > { %8644 = vmatprep.subr.bf16.mxu1 %v9160_v12  ;;  %v7488_v10 = vcombine.low %v5366_v40, %v5369_v51  ;;  %v3026_v49 = vrot.slane %v11313_v58, 5  ;;  %v5386_v38 = vrot.slane %v11337_v59, 5  ;;  %v5380_v7 = vsel %vm9734_vm5, %v7482_v32, %v5379_v37  ;;  %v7542_v50 = vld [vmem:[%s9340_s25 + $0xc] sm:$0xff]   ;;  %v7568_v32 = vld [vmem:[%s9345_s22 + $0x104] sm:$0x1] }
 0x163   : > { %8357 = vmatpush3.bf16.msra.mxu0 %v9160_v12  ;;  %v5383_v20 = vsel %vm9734_vm5, %v5381_v33, %v5382_v60  ;;  %v5393_v61 = vrot.slane %v11361_v18, 5  ;;  %v7235_v30 = vrot.slane %v7227_v6, 9  ;;  %v3032_v4 = vrot.slane %v3030_v5, 4  ;;  %v7758_v33 = vld [vmem:[%s9340_s25 + $0x18] sm:$0xff]   ;;  %v7547_v60 = vld [vmem:[%s9340_s25 + $0x20] sm:$0x1] }
 0x164   : > { %v3033_v17 = vrot.slane %v11407_v11, 5  ;;  %v3024_v58 = vsel %vm9734_vm5, %v7234_v15, %v3023_v21  ;;  %v7483_v59 = vrot.slane %v7475_v45, 9  ;;  %v5389_v34 = vrot.slane %v11385_v27, 5  ;;  %v7566_v21 = vld [vmem:[%s9345_s22 + $0xfc] sm:$0xff]  }
 0x165   : > { %8645 = vmatpush3.bf16.msra.mxu1 %v9160_v12  ;;  %v3020_v12 = vsel %vm9734_vm5, %v3018_v3, %v3019_v54  ;;  %v7490_v29 = vcombine.low %v5380_v7, %v5383_v20  ;;  %v3027_v25 = vsel %vm9734_vm5, %v3025_v13, %v3026_v49  ;;  %v5388_v46 = vrot.slane %v5386_v38, 4  ;;  %v11639_v7 = vld [vmem:[%s9340_s25 + $0x3c] sm:$0xff]   ;;  %v11642_v20 = vld [vmem:[%s9340_s25 + $0x48] sm:$0xff]  }
 0x166   : > { %8359 = vmatmul.mubr.bf16.vlgmr.msra.gmra.mrb[0].mxu0 %v7254_v42  ;;  %v7257_v8 = vcombine.low %v3017_v16, %v3020_v12  ;;  %v7489_v42 = vcombine.low %v5373_v57, %v5376_v31  ;;  %v7484_v63 = vrot.slane %v7476_v41, 9  ;;  %v5395_v18 = vrot.slane %v5393_v61, 4  ;;  %v7548_v16 = vld [vmem:[%s9340_s25 + $0x24] sm:$0xff]   ;;  %v11632_v57 = vld [vmem:[%s9340_s25 + $0x30] sm:$0xff]  }
 0x167   : > { %8362 = vmatprep.mubr.bf16.mxu0 %v7255_v23  ;;  %v5396_v62 = vrot.slane %v11418_v52, 5  ;;  %v3037_v11 = vrot.slane %v11404_v2, 5  ;;  %v3031_v35 = vsel %vm9734_vm5, %v7235_v30, %v3030_v5  ;;  %v3034_v27 = vsel %vm9734_vm5, %v3032_v4, %v3033_v17  ;;  %v12025_v2 = vld [vmem:[#allocation14_spill] sm:$0xff] }
 0x168   : > { %8647 = vmatmul.mubr.bf16.vlgmr.msra.gmra.mrb[0].mxu1 %v7487_v56  ;;  %v7258_v55 = vcombine.low %v3024_v58, %v3027_v25  ;;  %v5387_v53 = vsel %vm9734_vm5, %v7483_v59, %v5386_v38  ;;  %v5390_v23 = vsel %vm9734_vm5, %v5388_v46, %v5389_v34  ;;  %v5394_v52 = vsel %vm9734_vm5, %v7484_v63, %v5393_v61  ;;  %v7571_v38 = vld [vmem:[%s9345_s22 + $0x110] sm:$0x1]  ;;  %v7572_v34 = vld [vmem:[%s9345_s22 + $0x114] sm:$0xff]   ;;  %v7574_v25 = vld [vmem:[%s9345_s22 + $0x11c] sm:$0x1] }
 0x169   : > { %8650 = vmatprep.mubr.bf16.mxu1 %v7488_v10  ;;  %v7236_v40 = vrot.slane %v7228_v44, 9  ;;  %v5400_v51 = vrot.slane %v12025_v2, 5  ;;  %v7259_v9 = vcombine.low %v3031_v35, %v3034_v27  ;;  %v5397_v37 = vsel %vm9734_vm5, %v5395_v18, %v5396_v62 }
 0x16a   : > { %v3039_v43 = vrot.slane %v3037_v11, 4  ;;  %v3040_v3 = vrot.slane %v11452_v19, 5  ;;  %v7491_v54 = vcombine.low %v5387_v53, %v5390_v23  ;;  %v7492_v0 = vcombine.low %v5394_v52, %v5397_v37  ;;  %v11660_v53 = vld [vmem:[%s9340_s25 + $0x50] sm:$0x1]  ;;  %v7763_v23 = vld [vmem:[%s9345_s22 + $0x120] sm:$0xff]  }
 0x16b   : > { %v7485_v56 = vrot.slane %v7477_v22, 9  ;;  %v5402_v47 = vrot.slane %v5400_v51, 4  ;;  %v5403_v1 = vrot.slane %v11469_v39, 5  ;;  %v3038_v36 = vsel %vm9734_vm5, %v7236_v40, %v3037_v11  ;;  %v7577_v22 = vld [vmem:[%s9345_s22 + $0x128] sm:$0x1] }
 0x16c   : > { %v3041_v19 = vsel %vm9734_vm5, %v3039_v43, %v3040_v3  ;;  %v5817_v12 = vunpack.c.l.bf16 %v7542_v50  ;;  %v5818_v5 = vunpack.c.h.bf16 %v7542_v50  ;;  %v5819_v15 = vunpack.c.l.bf16 %v7544_v28 }
 0x16d   : > { %v7260_v24 = vcombine.low %v3038_v36, %v3041_v19  ;;  %v5401_v10 = vsel %vm9734_vm5, %v7485_v56, %v5400_v51  ;;  %v5404_v39 = vsel %vm9734_vm5, %v5402_v47, %v5403_v1  ;;  %v5865_v6 = vunpack.c.l.bf16 %v7566_v21 }
 0x16e   : > { %8363 = vmatmul.mubr.bf16.gmra.mrb[4].mxu0 %v7256_v26  ;;  %v7493_v14 = vcombine.low %v5401_v10, %v5404_v39  ;;  %v7762_v26 = vld [vmem:[%s9345_s22 + $0x108] sm:$0xff]   ;;  %v5866_v31 = vunpack.c.h.bf16 %v7566_v21  ;;  %v5867_v13 = vunpack.c.l.bf16 %v7568_v32  ;;  %v7713_v49 = vunpack.c.l.bf16 %v7758_v33  ;;  %v11674_v32 = vld [vmem:[%s9340_s25 + $0x5c] sm:$0x1] }
 0x16f   : > { %8366 = vmatprep.mubr.bf16.mxu0 %v7257_v8  ;;  %v7714_v45 = vunpack.c.h.bf16 %v7758_v33  ;;  %v11636_v8 = vld [vmem:[%s9340_s25 + $0x38] sm:$0x1]  ;;  %v5822_v41 = vunpack.c.l.bf16 %v7547_v60  ;;  %v5823_v61 = vunpack.c.l.bf16 %v7548_v16  ;;  %v7729_v30 = vunpack.c.l.bf16 %v7762_v26  ;;  %v7578_v39 = vld [vmem:[%s9345_s22 + $0x12c] sm:$0xff]  }
 0x170   : > { %8651 = vmatmul.mubr.bf16.gmra.mrb[4].mxu1 %v7489_v42  ;;  %v7730_v4 = vunpack.c.h.bf16 %v7762_v26  ;;  %v7717_v17 = vunpack.c.l.bf16 %v11632_v57  ;;  %v7718_v42 = vunpack.c.h.bf16 %v11632_v57  ;;  %v5824_v58 = vunpack.c.h.bf16 %v7548_v16  ;;  %v7580_v16 = vld [vmem:[%s9345_s22 + $0x134] sm:$0x1]  ;;  %v7764_v26 = vld [vmem:[%s9345_s22 + $0x138] sm:$0xff]  }
 0x171   : > { %8654 = vmatprep.mubr.bf16.mxu1 %v7490_v29  ;;  %v5825_v59 = vunpack.c.l.bf16 %v11629_v48  ;;  %v11649_v29 = vld [vmem:[%s9340_s25 + $0x60] sm:$0xff]   ;;  %v5870_v46 = vunpack.c.l.bf16 %v7571_v38  ;;  %v5889_v63 = vsub.f32 %v5817_v12, %v5865_v6  ;;  %v5890_v18 = vsub.f32 %v5818_v5, %v5866_v31 }
 0x172   : > { %v5891_v62 = vsub.f32 %v5819_v15, %v5867_v13  ;;  %v7721_v44 = vunpack.c.l.bf16 %v11642_v20  ;;  %v7722_v11 = vunpack.c.h.bf16 %v11642_v20  ;;  %v5828_v35 = vunpack.c.l.bf16 %v11636_v8 }
 0x173   : > { %v5829_v27 = vunpack.c.l.bf16 %v11639_v7  ;;  %v5871_v52 = vunpack.c.l.bf16 %v7572_v34  ;;  %v5872_v40 = vunpack.c.h.bf16 %v7572_v34  ;;  %v5892_v2 = vsub.f32 %v7713_v49, %v7729_v30  ;;  %v7584_v34 = vld [vmem:[%s9345_s22 + $0x144] sm:$0xff]  }
 0x174   : > { %v5893_v51 = vsub.f32 %v7714_v45, %v7730_v4  ;;  %v7725_v37 = vunpack.c.l.bf16 %v11649_v29  ;;  %v7726_v43 = vunpack.c.h.bf16 %v11649_v29  ;;  %v5830_v3 = vunpack.c.h.bf16 %v11639_v7 }
 0x175   : > { %v5914_v56 = vand.u32 2147483647, %v5889_v63  ;;  %v5915_v47 = vand.u32 2147483647, %v5890_v18  ;;  %v5916_v1 = vand.u32 2147483647, %v5891_v62  ;;  %v5834_v19 = vunpack.c.l.bf16 %v11660_v53 }
 0x176   : > { %8367 = vmatmul.mubr.bf16.gmra.mrb[8].mxu0 %v7258_v55  ;;  %v11657_v55 = vld [vmem:[%s9340_s25 + $0x44] sm:$0x1]  ;;  %v7734_v10 = vunpack.c.h.bf16 %v7763_v23  ;;  %v5896_v50 = vsub.f32 %v5824_v58, %v5872_v40  ;;  %v5917_v28 = vand.u32 2147483647, %v5892_v2  ;;  %v5918_v21 = vand.u32 2147483647, %v5893_v51 }
 0x177   : > { %8370 = vmatprep.mubr.bf16.mxu0 %v7259_v9  ;;  %v11664_v9 = vld [vmem:[%s9340_s25 + $0x54] sm:$0xff]   ;;  %v5831_v36 = vunpack.c.l.bf16 %v11657_v55  ;;  %v5876_v12 = vunpack.c.l.bf16 %v7577_v22  ;;  %v5963_v57 = vrot.slane %v5914_v56, 1  ;;  %v5964_v15 = vrot.slane %v5915_v47, 1 }
 0x178   : > { %8655 = vmatmul.mubr.bf16.gmra.mrb[8].mxu1 %v7491_v54  ;;  %v5873_v54 = vunpack.c.l.bf16 %v7574_v25  ;;  %v5835_v33 = vunpack.c.l.bf16 %v11664_v9  ;;  %v5836_v60 = vunpack.c.h.bf16 %v11664_v9  ;;  %v5966_v6 = vrot.slane %v5916_v1, 1  ;;  %v7765_v56 = vld [vmem:[%s9345_s22 + $0x150] sm:$0xff]  }
 0x179   : > { %8658 = vmatprep.mubr.bf16.mxu1 %v7492_v0  ;;  %v5894_v0 = vsub.f32 %v5822_v41, %v5870_v46  ;;  %v5877_v31 = vunpack.c.l.bf16 %v7578_v39  ;;  %v5878_v13 = vunpack.c.h.bf16 %v7578_v39  ;;  %v5899_v45 = vsub.f32 %v7718_v42, %v7734_v10 }
 0x17a   : > { %v5897_v5 = vsub.f32 %v5825_v59, %v5873_v54  ;;  %v5921_v8 = vand.u32 2147483647, %v5896_v50  ;;  %v5968_v7 = vrot.slane %v5917_v28, 1  ;;  %v5969_v41 = vrot.slane %v5918_v21, 1  ;;  %v7583_v59 = vld [vmem:[%s9345_s22 + $0x140] sm:$0x1] }
 0x17b   : > { %v5919_v48 = vand.u32 2147483647, %v5894_v0  ;;  %v7737_v30 = vunpack.c.l.bf16 %v7764_v26  ;;  %v5879_v4 = vunpack.c.l.bf16 %v7580_v16  ;;  %v5900_v58 = vsub.f32 %v5828_v35, %v5876_v12  ;;  %v7586_v0 = vld [vmem:[%s9345_s22 + $0x14c] sm:$0x1]  ;;  %v7565_v16 = vld [vmem:[%s9340_s25 + $0x68] sm:$0x1] }
 0x17c   : > { %v5922_v25 = vand.u32 2147483647, %v5897_v5  ;;  %v5965_v46 = vsel %vm5962_vm6, %v5963_v57, %v5964_v15  ;;  %v5967_v63 = vsel %vm5962_vm6, %v5964_v15, %v5966_v6  ;;  %v7738_v42 = vunpack.c.h.bf16 %v7764_v26 }
 0x17d   : > { %v5901_v18 = vsub.f32 %v5829_v27, %v5877_v31  ;;  %v5902_v62 = vsub.f32 %v5830_v3, %v5878_v13  ;;  %v5974_v2 = vrot.slane %v5921_v8, 1  ;;  %v5882_v35 = vunpack.c.l.bf16 %v7583_v59 }
 0x17e   : > { %8371 = vmatmul.mubr.bf16.gmra.mrb[12].mxu0 %v7260_v24  ;;  %v7733_v24 = vunpack.c.l.bf16 %v7763_v23  ;;  %v5924_v23 = vand.u32 2147483647, %v5899_v45  ;;  %v5883_v51 = vunpack.c.l.bf16 %v7584_v34  ;;  %v5884_v22 = vunpack.c.h.bf16 %v7584_v34 }
 0x17f   : > { %v6019_v54 = vadd.f32 %v5967_v63, %v5965_v46  ;;  %v5903_v47 = vsub.f32 %v5831_v36, %v5879_v4  ;;  %v5925_v1 = vand.u32 2147483647, %v5900_v58  ;;  %v5976_v27 = vrot.slane %v5922_v25, 1 }
 0x180   : > { %8659 = vmatmul.mubr.bf16.gmra.mrb[12].mxu1 %v7493_v14  ;;  %v5895_v14 = vsub.f32 %v5823_v61, %v5871_v52  ;;  %v5898_v49 = vsub.f32 %v7717_v17, %v7733_v24  ;;  %v5837_v61 = vunpack.c.l.bf16 %v11674_v32  ;;  %v5971_v17 = vrot.slane %v5919_v48, 1  ;;  %v7589_v48 = vld [vmem:[%s9345_s22 + $0x158] sm:$0x1] }
 0x181   : > { %v5970_v52 = vsel %vm5962_vm6, %v5968_v7, %v5969_v41  ;;  %v5904_v3 = vsub.f32 %v7721_v44, %v7737_v30  ;;  %v5905_v10 = vsub.f32 %v7722_v11, %v7738_v42  ;;  %v5926_v39 = vand.u32 2147483647, %v5901_v18 }
 0x182   : > { %v5920_v38 = vand.u32 2147483647, %v5895_v14  ;;  %v5923_v55 = vand.u32 2147483647, %v5898_v49  ;;  %v5972_v24 = vsel %vm5962_vm6, %v5969_v41, %v5971_v17  ;;  %v6020_v14 = vadd.f32 %v6019_v54, %v5970_v52 }
 0x183   : > { %v5927_v50 = vand.u32 2147483647, %v5902_v62  ;;  %v5979_v32 = vrot.slane %v5924_v23, 1  ;;  %v7741_v36 = vunpack.c.l.bf16 %v7765_v56  ;;  %v7742_v12 = vunpack.c.h.bf16 %v7765_v56 }
 0x184   : > { %v5973_v40 = vrot.slane %v5920_v38, 1  ;;  %v5978_v21 = vrot.slane %v5923_v55, 1  ;;  %v5885_v5 = vunpack.c.l.bf16 %v7586_v0  ;;  %v6021_v26 = vadd.f32 %v6020_v14, %v5972_v24 }
 0x185   : > { %v5906_v57 = vsub.f32 %v5834_v19, %v5882_v35  ;;  %v5928_v44 = vand.u32 2147483647, %v5903_v47  ;;  %v5977_v20 = vsel %vm5962_vm6, %v5974_v2, %v5976_v27  ;;  %v5981_v11 = vrot.slane %v5925_v1, 1 }
 0x186   : > { %v5975_v28 = vsel %vm5962_vm6, %v5973_v40, %v5974_v2  ;;  %v5907_v15 = vsub.f32 %v5835_v33, %v5883_v51  ;;  %v5908_v6 = vsub.f32 %v5836_v60, %v5884_v22  ;;  %v5929_v31 = vand.u32 2147483647, %v5904_v3 }
 0x187   : > { %v6022_v13 = vadd.f32 %v6021_v26, %v5975_v28  ;;  %v5930_v49 = vand.u32 2147483647, %v5905_v10  ;;  %v5980_v45 = vsel %vm5962_vm6, %v5978_v21, %v5979_v32  ;;  %v5983_v38 = vrot.slane %v5926_v39, 1 }
 0x188   : > { %v5984_v8 = vrot.slane %v5927_v50, 1  ;;  %v5840_v7 = vunpack.c.l.bf16 %v7565_v16  ;;  %v5888_v53 = vunpack.c.l.bf16 %v7589_v48  ;;  %v5909_v41 = vsub.f32 %v5837_v61, %v5885_v5  ;;  %v5913_v50 = vld [vmem:[#allocation2] sm:$0xff] }
 0x189   : > { %v6023_v19 = vadd.f32 %v6022_v13, %v5977_v20  ;;  %v5931_v30 = vand.u32 2147483647, %v5906_v57  ;;  %v5982_v4 = vsel %vm5962_vm6, %v5979_v32, %v5981_v11  ;;  %v5986_v58 = vrot.slane %v5928_v44, 1  ;;  %v11720_v32 = vld [vmem:[%s11833_s3] ss:$0 sm:$0xff] }
 0x18a   : > { %v5910_v33 = vsub.f32 %v7725_v37, %v7741_v36  ;;  %v5911_v9 = vsub.f32 %v7726_v43, %v7742_v12  ;;  %v5932_v60 = vand.u32 2147483647, %v5907_v15  ;;  %v5933_v34 = vand.u32 2147483647, %v5908_v6 }
 0x18b   : > { %v6024_v59 = vadd.f32 %v6023_v19, %v5980_v45  ;;  %v5985_v25 = vsel %vm5962_vm6, %v5983_v38, %v5984_v8  ;;  %v5988_v46 = vrot.slane %v5929_v31, 1  ;;  %v5989_v63 = vrot.slane %v5930_v49, 1 }
 0x18c   : > { %v5912_v42 = vsub.f32 %v5840_v7, %v5888_v53  ;;  %v5934_v61 = vand.u32 2147483647, %v5909_v41  ;;  %v5987_v18 = vsel %vm5962_vm6, %v5984_v8, %v5986_v58  ;;  %v5991_v62 = vrot.slane %v5931_v30, 1 }
 0x18d   : > { %v6025_v17 = vadd.f32 %v6024_v59, %v5982_v4  ;;  %v5935_v55 = vand.u32 2147483647, %v5910_v33  ;;  %v5936_v52 = vand.u32 2147483647, %v5911_v9  ;;  %v5990_v37 = vsel %vm5962_vm6, %v5988_v46, %v5989_v63 }
 0x18e   : > { %v5993_v29 = vrot.slane %v5932_v60, 1  ;;  %v5994_v43 = vrot.slane %v5933_v34, 1  ;;  %v5937_v2 = vand.u32 2147483647, %v5912_v42  ;;  %v5992_v35 = vsel %vm5962_vm6, %v5989_v63, %v5991_v62 }
 0x18f   : > { %v6026_v23 = vadd.f32 %v6025_v17, %v5985_v25  ;;  %v5996_v51 = vrot.slane %v5934_v61, 1  ;;  %v5998_v0 = vrot.slane %v5935_v55, 1  ;;  %v5999_v56 = vrot.slane %v5936_v52, 1 }
 0x190   : > { %v5995_v54 = vsel %vm5962_vm6, %v5993_v29, %v5994_v43  ;;  %v6001_v24 = vrot.slane %v5937_v2, 1 }
 0x191   : > { %v6027_v40 = vadd.f32 %v6026_v23, %v5987_v18  ;;  %v5997_v1 = vsel %vm5962_vm6, %v5994_v43, %v5996_v51  ;;  %v6000_v3 = vsel %vm5962_vm6, %v5998_v0, %v5999_v56 }
 0x192   : > { %v6002_v39 = vsel %vm5962_vm6, %v5999_v56, %v6001_v24 }
 0x193   : > { %v6028_v22 = vadd.f32 %v6027_v40, %v5990_v37 }
 0x195   : > { %v6029_v47 = vadd.f32 %v6028_v22, %v5992_v35 }
 0x197   : > { %v6030_v27 = vadd.f32 %v6029_v47, %v5995_v54 }
 0x199   : > { %v6031_v10 = vadd.f32 %v6030_v27, %v5997_v1 }
 0x19b   : > { %v6032_v14 = vadd.f32 %v6031_v10, %v6000_v3 }
 0x19d   : > { %v6033_v28 = vadd.f32 %v6032_v14, %v6002_v39 }
 0x19f   : > { %v6034_v21 = vadd.f32 %v6033_v28, %v5913_v50 }
 0x1a1   : > { %6035 = vst [vmem:[#allocation2] sm:$0xff] %v6034_v21 }
 0x239   : > { %v8360_v16 = vpop.f32.mrb[0].mxu0 }
 0x23a   : > { %v3261_v36 = vadd.f32 %v8360_v16, %v11720_v32  ;;  %v3173_v12 = vpop.f32.mrb[1].mxu0 }
 0x23b   : > { %v3259_v5 = vadd.f32 %v11720_v32, %v3173_v12  ;;  %v8361_v26 = vpop.f32.mrb[2].mxu0  ;;  %v8648_v48 = vpop.f32.mrb[0].mxu1 }
 0x23c   : > { %v3262_v57 = vadd.f32 %v8361_v26, %v11720_v32  ;;  %v3176_v44 = vpop.f32.mrb[3].mxu0  ;;  %v3277_v20 = vmax.f32 %v3261_v36, 0.0  ;;  %v5552_v11 = vadd.f32 %v8648_v48, %v11720_v32  ;;  %v5471_v15 = vpop.f32.mrb[1].mxu1 }
 0x23d   : > { %v3260_v6 = vadd.f32 %v11720_v32, %v3176_v44  ;;  %v3275_v31 = vmax.f32 %v3259_v5, 0.0  ;;  %v5550_v13 = vadd.f32 %v11720_v32, %v5471_v15  ;;  %v8649_v45 = vpop.f32.mrb[2].mxu1 }
 0x23e   : > { %v3278_v49 = vmax.f32 %v3262_v57, 0.0  ;;  %v5568_v38 = vmax.f32 %v5552_v11, 0.0  ;;  %v5553_v8 = vadd.f32 %v8649_v45, %v11720_v32  ;;  %v5474_v53 = vpop.f32.mrb[3].mxu1 }
 0x23f   : > { %v3276_v7 = vmax.f32 %v3260_v6, 0.0  ;;  %v5566_v19 = vmax.f32 %v5550_v13, 0.0  ;;  %v5551_v30 = vadd.f32 %v11720_v32, %v5474_v53 }
 0x240   : > { %v5583_v41 = vpack.c.bf16 %v3278_v49, %v3277_v20  ;;  %v5746_v4 = vsub.f32 %v3277_v20, %v5568_v38  ;;  %v5569_v58 = vmax.f32 %v5553_v8, 0.0 }
 0x241   : > { %v5582_v33 = vpack.c.bf16 %v3276_v7, %v3275_v31  ;;  %v8364_v9 = vpop.f32.mrb[4].mxu0  ;;  %v5744_v60 = vsub.f32 %v3275_v31, %v5566_v19  ;;  %v5567_v59 = vmax.f32 %v5551_v30, 0.0 }
 0x242   : > { %7743 = vst [vmem:[%s9347_s20 + $0x8] sm:$0xff] %v5583_v41   ;;  %v3265_v34 = vadd.f32 %v8364_v9, %v11720_v32  ;;  %v3189_v25 = vpop.f32.mrb[5].mxu0  ;;  %v5663_v46 = vpack.c.bf16 %v5569_v58, %v5568_v38  ;;  %v5747_v63 = vsub.f32 %v3278_v49, %v5569_v58  ;;  %v5762_v54 = vand.u32 2147483647, %v5746_v4 }
 0x243   : > { %7635 = vst [vmem:[%s9347_s20] sm:$0xff] %v5582_v33   ;;  %v3263_v17 = vadd.f32 %v11720_v32, %v3189_v25  ;;  %6052 = vxpose.xlu0.c.b16.start [1/8] %v5582_v33, 128  ;;  %v8365_v42 = vpop.f32.mrb[6].mxu0  ;;  %8662 = vmatprep.subr.bf16.mxu0 %v5582_v33  ;;  %v5662_v61 = vpack.c.bf16 %v5567_v59, %v5566_v19  ;;  %v8652_v62 = vpop.f32.mrb[4].mxu1  ;;  %v5760_v23 = vand.u32 2147483647, %v5744_v60 }
 0x244   : > { %v5745_v18 = vsub.f32 %v3276_v7, %v5567_v59  ;;  %v3192_v55 = vpop.f32.mrb[7].mxu0  ;;  %8663 = vmatpush3.bf16.msra.mxu0 %v5582_v33  ;;  %7751 = vst [vmem:[%s9347_s20 + $0x48] sm:$0xff] %v5663_v46   ;;  %v3281_v52 = vmax.f32 %v3265_v34, 0.0  ;;  %v5556_v37 = vadd.f32 %v8652_v62, %v11720_v32  ;;  %v5487_v29 = vpop.f32.mrb[5].mxu1  ;;  %v3266_v43 = vadd.f32 %v8365_v42, %v11720_v32 }
 0x245   : > { %8664 = vmatprep.subr.bf16.mxu0 %v5583_v41  ;;  %7750 = vst [vmem:[%s9347_s20 + $0x40] sm:$0xff] %v5662_v61   ;;  %v3279_v2 = vmax.f32 %v3263_v17, 0.0  ;;  %v5554_v35 = vadd.f32 %v11720_v32, %v5487_v29  ;;  %6213 = vxpose.xlu1.c.b16.start [1/8] %v5662_v61, 128  ;;  %v8653_v51 = vpop.f32.mrb[6].mxu1  ;;  %v3264_v22 = vadd.f32 %v11720_v32, %v3192_v55  ;;  %v5763_v39 = vand.u32 2147483647, %v5747_v63 }
 0x246   : > { %v5761_v40 = vand.u32 2147483647, %v5745_v18  ;;  %8694 = vmatprep.subr.bf16.mxu1 %v5662_v61  ;;  %v5572_v0 = vmax.f32 %v5556_v37, 0.0  ;;  %v5557_v56 = vadd.f32 %v8653_v51, %v11720_v32  ;;  %v3282_v47 = vmax.f32 %v3266_v43, 0.0  ;;  %v5490_v1 = vpop.f32.mrb[7].mxu1 }
 0x247   : > { %8695 = vmatpush3.bf16.msra.mxu1 %v5662_v61  ;;  %6053 = vxpose.xlu0.c.b16.cont [2/8] %v5583_v41, 128  ;;  %v5570_v27 = vmax.f32 %v5554_v35, 0.0  ;;  %v3280_v3 = vmax.f32 %v3264_v22, 0.0  ;;  %v5555_v10 = vadd.f32 %v11720_v32, %v5490_v1 }
 0x248   : > { %v5776_v24 = vadd.f32 %v5761_v40, %v5760_v23  ;;  %8696 = vmatprep.subr.bf16.mxu1 %v5663_v46  ;;  %8665 = vmatpush3.bf16.msra.mxu0 %v5583_v41  ;;  %v5750_v14 = vsub.f32 %v3281_v52, %v5572_v0  ;;  %v5573_v50 = vmax.f32 %v5557_v56, 0.0  ;;  %v5585_v28 = vpack.c.bf16 %v3282_v47, %v3281_v52 }
 0x249   : > { %v8368_v21 = vpop.f32.mrb[8].mxu0  ;;  %v5748_v36 = vsub.f32 %v3279_v2, %v5570_v27  ;;  %v5584_v12 = vpack.c.bf16 %v3280_v3, %v3279_v2  ;;  %v5571_v5 = vmax.f32 %v5555_v10, 0.0  ;;  %6214 = vxpose.xlu1.c.b16.cont [2/8] %v5663_v46, 128 }
 0x24a   : > { %v5777_v16 = vadd.f32 %v5776_v24, %v5762_v54  ;;  %v3205_v26 = vpop.f32.mrb[9].mxu0  ;;  %v5665_v48 = vpack.c.bf16 %v5573_v50, %v5572_v0  ;;  %7745 = vst [vmem:[%s9347_s20 + $0x18] sm:$0xff] %v5585_v28   ;;  %v5751_v57 = vsub.f32 %v3282_v47, %v5573_v50  ;;  %v3269_v44 = vadd.f32 %v8368_v21, %v11720_v32 }
 0x24b   : > { %8697 = vmatpush3.bf16.msra.mxu1 %v5663_v46  ;;  %v8369_v20 = vpop.f32.mrb[10].mxu0  ;;  %v5764_v11 = vand.u32 2147483647, %v5748_v36  ;;  %7744 = vst [vmem:[%s9347_s20 + $0x10] sm:$0xff] %v5584_v12   ;;  %v5664_v6 = vpack.c.bf16 %v5571_v5, %v5570_v27  ;;  %v5749_v31 = vsub.f32 %v3280_v3, %v5571_v5  ;;  %v8656_v13 = vpop.f32.mrb[8].mxu1  ;;  %6054 = vxpose.xlu0.c.b16.cont [3/8] %v5584_v12, 128 }
 0x24c   : > { %v5778_v15 = vadd.f32 %v5777_v16, %v5763_v39  ;;  %8666 = vmatprep.subr.bf16.mxu0 %v5584_v12  ;;  %v3208_v49 = vpop.f32.mrb[11].mxu0  ;;  %v5766_v45 = vand.u32 2147483647, %v5750_v14  ;;  %7753 = vst [vmem:[%s9347_s20 + $0x58] sm:$0xff] %v5665_v48   ;;  %v3285_v38 = vmax.f32 %v3269_v44, 0.0  ;;  %v5560_v8 = vadd.f32 %v8656_v13, %v11720_v32  ;;  %v5503_v53 = vpop.f32.mrb[9].mxu1 }
 0x24d   : > { %v3267_v7 = vadd.f32 %v11720_v32, %v3205_v26  ;;  %8667 = vmatpush3.bf16.msra.mxu0 %v5584_v12  ;;  %7752 = vst [vmem:[%s9347_s20 + $0x50] sm:$0xff] %v5664_v6   ;;  %v5765_v41 = vand.u32 2147483647, %v5749_v31  ;;  %v5558_v30 = vadd.f32 %v11720_v32, %v5503_v53  ;;  %6215 = vxpose.xlu1.c.b16.cont [3/8] %v5664_v6, 128  ;;  %v8657_v4 = vpop.f32.mrb[10].mxu1  ;;  %v5767_v42 = vand.u32 2147483647, %v5751_v57 }
 0x24e   : > { %v5779_v19 = vadd.f32 %v5778_v15, %v5764_v11  ;;  %8698 = vmatprep.subr.bf16.mxu1 %v5664_v6  ;;  %v3270_v58 = vadd.f32 %v8369_v20, %v11720_v32  ;;  %v5576_v33 = vmax.f32 %v5560_v8, 0.0  ;;  %v5561_v60 = vadd.f32 %v8657_v4, %v11720_v32  ;;  %v5506_v34 = vpop.f32.mrb[11].mxu1  ;;  %8668 = vmatprep.subr.bf16.mxu0 %v5585_v28 }
 0x24f   : > { %v3283_v9 = vmax.f32 %v3267_v7, 0.0  ;;  %v3268_v59 = vadd.f32 %v11720_v32, %v3208_v49  ;;  %8699 = vmatpush3.bf16.msra.mxu1 %v5664_v6  ;;  %v5574_v46 = vmax.f32 %v5558_v30, 0.0  ;;  %v5559_v17 = vadd.f32 %v11720_v32, %v5506_v34  ;;  %6055 = vxpose.xlu0.c.b16.cont [4/8] %v5585_v28, 128 }
 0x250   : > { %v5780_v25 = vadd.f32 %v5779_v19, %v5765_v41  ;;  %v3286_v63 = vmax.f32 %v3270_v58, 0.0  ;;  %8700 = vmatprep.subr.bf16.mxu1 %v5665_v48  ;;  %v5754_v61 = vsub.f32 %v3285_v38, %v5576_v33  ;;  %v5577_v18 = vmax.f32 %v5561_v60, 0.0 }
 0x251   : > { %v3284_v62 = vmax.f32 %v3268_v59, 0.0  ;;  %8669 = vmatpush3.bf16.msra.mxu0 %v5585_v28  ;;  %v8372_v55 = vpop.f32.mrb[12].mxu0  ;;  %v5752_v52 = vsub.f32 %v3283_v9, %v5574_v46  ;;  %v5575_v29 = vmax.f32 %v5559_v17, 0.0  ;;  %6216 = vxpose.xlu1.c.b16.cont [4/8] %v5665_v48, 128 }
 0x252   : > { %v5781_v23 = vadd.f32 %v5780_v25, %v5766_v45  ;;  %v5587_v37 = vpack.c.bf16 %v3286_v63, %v3285_v38  ;;  %v3221_v43 = vpop.f32.mrb[13].mxu0  ;;  %v5667_v40 = vpack.c.bf16 %v5577_v18, %v5576_v33  ;;  %v5755_v2 = vsub.f32 %v3286_v63, %v5577_v18 }
 0x253   : > { %v5586_v35 = vpack.c.bf16 %v3284_v62, %v3283_v9  ;;  %8701 = vmatpush3.bf16.msra.mxu1 %v5665_v48  ;;  %v8373_v51 = vpop.f32.mrb[14].mxu0  ;;  %v5768_v22 = vand.u32 2147483647, %v5752_v52  ;;  %v5666_v0 = vpack.c.bf16 %v5575_v29, %v5574_v46  ;;  %v5753_v56 = vsub.f32 %v3284_v62, %v5575_v29  ;;  %v8660_v47 = vpop.f32.mrb[12].mxu1  ;;  %v5743_v46 = vld [vmem:[#allocation3] sm:$0xff] }
 0x254   : > { %v5782_v54 = vadd.f32 %v5781_v23, %v5767_v42  ;;  %7747 = vst [vmem:[%s9347_s20 + $0x28] sm:$0xff] %v5587_v37   ;;  %v3224_v1 = vpop.f32.mrb[15].mxu0  ;;  %v5770_v24 = vand.u32 2147483647, %v5754_v61  ;;  %7755 = vst [vmem:[%s9347_s20 + $0x68] sm:$0xff] %v5667_v40   ;;  %v3273_v27 = vadd.f32 %v8372_v55, %v11720_v32  ;;  %v5564_v3 = vadd.f32 %v8660_v47, %v11720_v32  ;;  %v5519_v39 = vpop.f32.mrb[13].mxu1 }
 0x255   : > { %7746 = vst [vmem:[%s9347_s20 + $0x20] sm:$0xff] %v5586_v35   ;;  %v3271_v10 = vadd.f32 %v11720_v32, %v3221_v43  ;;  %6056 = vxpose.xlu0.c.b16.cont [5/8] %v5586_v35, 128  ;;  %8670 = vmatprep.subr.bf16.mxu0 %v5586_v35  ;;  %7754 = vst [vmem:[%s9347_s20 + $0x60] sm:$0xff] %v5666_v0   ;;  %v5769_v50 = vand.u32 2147483647, %v5753_v56  ;;  %v5562_v28 = vadd.f32 %v11720_v32, %v5519_v39  ;;  %v8661_v21 = vpop.f32.mrb[14].mxu1  ;;  %v6199_v56 = vld [vmem:[#allocation5 + $0x10] sm:$0xff] }
 0x256   : > { %v5783_v14 = vadd.f32 %v5782_v54, %v5768_v22  ;;  %6217 = vxpose.xlu1.c.b16.cont [5/8] %v5666_v0, 128  ;;  %8702 = vmatprep.subr.bf16.mxu1 %v5666_v0  ;;  %v3274_v16 = vadd.f32 %v8373_v51, %v11720_v32  ;;  %v3289_v36 = vmax.f32 %v3273_v27, 0.0  ;;  %v5580_v12 = vmax.f32 %v5564_v3, 0.0  ;;  %v5522_v48 = vpop.f32.mrb[15].mxu1  ;;  %v6036_v47 = vld [vmem:[#allocation4] sm:$0xff]  ;;  %v6039_v27 = vld [vmem:[#allocation4 + $0x18] sm:$0xff] }
 0x257   : > { %v3287_v5 = vmax.f32 %v3271_v10, 0.0  ;;  %v5565_v26 = vadd.f32 %v8661_v21, %v11720_v32  ;;  %8671 = vmatpush3.bf16.msra.mxu0 %v5586_v35  ;;  %8703 = vmatpush3.bf16.msra.mxu1 %v5666_v0  ;;  %v5578_v44 = vmax.f32 %v5562_v28, 0.0  ;;  %v3272_v11 = vadd.f32 %v11720_v32, %v3224_v1  ;;  %v6038_v0 = vld [vmem:[#allocation4 + $0x10] sm:$0xff] }
 0x258   : > { %v5784_v57 = vadd.f32 %v5783_v14, %v5769_v50  ;;  %v3290_v20 = vmax.f32 %v3274_v16, 0.0  ;;  %8672 = vmatprep.subr.bf16.mxu0 %v5587_v37  ;;  %8704 = vmatprep.subr.bf16.mxu1 %v5667_v40  ;;  %v5771_v15 = vand.u32 2147483647, %v5755_v2  ;;  %v5758_v6 = vsub.f32 %v3289_v36, %v5580_v12  ;;  %v6200_v14 = vld [vmem:[#allocation5 + $0x18] sm:$0xff]  ;;  %v6037_v50 = vld [vmem:[#allocation4 + $0x8] sm:$0xff] }
 0x259   : > { %v5581_v31 = vmax.f32 %v5565_v26, 0.0  ;;  %v5563_v13 = vadd.f32 %v11720_v32, %v5522_v48  ;;  %6057 = vxpose.xlu0.c.b16.cont [6/8] %v5587_v37, 128  ;;  %v5756_v45 = vsub.f32 %v3287_v5, %v5578_v44  ;;  %v3288_v8 = vmax.f32 %v3272_v11, 0.0 }
 0x25a   : > { %v5785_v49 = vadd.f32 %v5784_v57, %v5770_v24  ;;  %v5589_v38 = vpack.c.bf16 %v3290_v20, %v3289_v36  ;;  %6218 = vxpose.xlu1.c.b16.cont [6/8] %v5667_v40, 128  ;;  %v5774_v60 = vand.u32 2147483647, %v5758_v6  ;;  %v6197_v24 = vld [vmem:[#allocation5] sm:$0xff]  ;;  %v6042_v6 = vld [vmem:[#allocation4 + $0x30] sm:$0xff] }
 0x25b   : > { %v5669_v7 = vpack.c.bf16 %v5581_v31, %v5580_v12  ;;  %v5759_v53 = vsub.f32 %v3290_v20, %v5581_v31  ;;  %v5579_v19 = vmax.f32 %v5563_v13, 0.0  ;;  %8673 = vmatpush3.bf16.msra.mxu0 %v5587_v37  ;;  %8705 = vmatpush3.bf16.msra.mxu1 %v5667_v40  ;;  %v5772_v41 = vand.u32 2147483647, %v5756_v45  ;;  %v6198_v12 = vld [vmem:[#allocation5 + $0x8] sm:$0xff]  ;;  %v6203_v31 = vld [vmem:[#allocation5 + $0x30] sm:$0xff]  ;;  %v6040_v13 = vld [vmem:[#allocation4 + $0x20] sm:$0xff] }
 0x25c   : > { %v5786_v30 = vadd.f32 %v5785_v49, %v5771_v15  ;;  %7749 = vst [vmem:[%s9347_s20 + $0x38] sm:$0xff] %v5589_v38   ;;  %v5588_v4 = vpack.c.bf16 %v3288_v8, %v3287_v5  ;;  %v6201_v45 = vld [vmem:[#allocation5 + $0x20] sm:$0xff] }
 0x25d   : > { %7757 = vst [vmem:[%s9347_s20 + $0x78] sm:$0xff] %v5669_v7   ;;  %v5668_v32 = vpack.c.bf16 %v5579_v19, %v5578_v44  ;;  %v5757_v58 = vsub.f32 %v3288_v8, %v5579_v19  ;;  %v5775_v34 = vand.u32 2147483647, %v5759_v53  ;;  %v6204_v19 = vld [vmem:[#allocation5 + $0x38] sm:$0xff] }
 0x25e   : > { %v5787_v33 = vadd.f32 %v5786_v30, %v5772_v41  ;;  %7748 = vst [vmem:[%s9347_s20 + $0x30] sm:$0xff] %v5588_v4   ;;  %6058 = vxpose.xlu0.c.b16.cont [7/8] %v5588_v4, 128  ;;  %8674 = vmatprep.subr.bf16.mxu0 %v5588_v4  ;;  %v6041_v41 = vld [vmem:[#allocation4 + $0x28] sm:$0xff] }
 0x25f   : > { %7756 = vst [vmem:[%s9347_s20 + $0x70] sm:$0xff] %v5668_v32   ;;  %v5773_v9 = vand.u32 2147483647, %v5757_v58  ;;  %6219 = vxpose.xlu1.c.b16.cont [7/8] %v5668_v32, 128  ;;  %8706 = vmatprep.subr.bf16.mxu1 %v5668_v32 }
 0x260   : > { %8675 = vmatpush3.bf16.msra.mxu0 %v5588_v4  ;;  %8707 = vmatpush3.bf16.msra.mxu1 %v5668_v32 }
 0x261   : > { %v5788_v59 = vadd.f32 %v5787_v33, %v5773_v9  ;;  %8676 = vmatprep.subr.bf16.mxu0 %v5589_v38  ;;  %8708 = vmatprep.subr.bf16.mxu1 %v5669_v7  ;;  %v6202_v33 = vld [vmem:[#allocation5 + $0x28] sm:$0xff] }
 0x262   : > { %6059 = vxpose.xlu0.c.b16.end [8/8] %v5589_v38, 128 }
 0x263   : > { %v5789_v25 = vadd.f32 %v5788_v59, %v5774_v60  ;;  %6220 = vxpose.xlu1.c.b16.end [8/8] %v5669_v7, 128 }
 0x264   : > { %8677 = vmatpush3.bf16.msra.mxu0 %v5589_v38  ;;  %8709 = vmatpush3.bf16.msra.mxu1 %v5669_v7  ;;  %v6043_v38 = vld [vmem:[#allocation4 + $0x38] sm:$0xff] }
 0x265   : > { %v5790_v63 = vadd.f32 %v5789_v25, %v5775_v34 }
 0x267   : > { %v5791_v17 = vadd.f32 %v5790_v63, %v5743_v46 }
 0x269   : > { %5792 = vst [vmem:[#allocation3] sm:$0xff] %v5791_v17 }
 0x2ac   : > { %v6060_v42 = vpop.trf.xlu0 }
 0x2ad   : > { %v6221_v61 = vpop.trf.xlu1  ;;  %8678 = vmatprep.mubr.bf16.mxu0 %v6060_v42  ;;  %v6046_v42 = vld [vmem:[#allocation4 + $0x50] sm:$0xff] }
 0x2ae   : > { %8710 = vmatprep.mubr.bf16.mxu1 %v6221_v61  ;;  %v6207_v61 = vld [vmem:[#allocation5 + $0x50] sm:$0xff] }
 0x2b0   : > { %v6061_v18 = vpop.trf.xlu0 }
 0x2b1   : > { %v6222_v62 = vpop.trf.xlu1  ;;  %8679 = vmatmul.mubr.bf16.vlgmr.msra.gmra.mrb[16].mxu0 %v6061_v18  ;;  %v6044_v18 = vld [vmem:[#allocation4 + $0x40] sm:$0xff] }
 0x2b2   : > { %8711 = vmatmul.mubr.bf16.vlgmr.msra.gmra.mrb[16].mxu1 %v6222_v62 }
 0x2b4   : > { %v6062_v55 = vpop.trf.xlu0 }
 0x2b5   : > { %v6223_v23 = vpop.trf.xlu1  ;;  %8682 = vmatprep.mubr.bf16.mxu0 %v6062_v55  ;;  %v6205_v55 = vld [vmem:[#allocation5 + $0x40] sm:$0xff] }
 0x2b6   : > { %8714 = vmatprep.mubr.bf16.mxu1 %v6223_v23  ;;  %v6047_v23 = vld [vmem:[#allocation4 + $0x58] sm:$0xff] }
 0x2b8   : > { %v6063_v52 = vpop.trf.xlu0 }
 0x2b9   : > { %v6224_v37 = vpop.trf.xlu1  ;;  %8683 = vmatmul.mubr.bf16.gmra.mrb[20].mxu0 %v6063_v52 }
 0x2ba   : > { %8715 = vmatmul.mubr.bf16.gmra.mrb[20].mxu1 %v6224_v37 }
 0x2bc   : > { %v6064_v29 = vpop.trf.xlu0 }
 0x2bd   : > { %v6225_v43 = vpop.trf.xlu1  ;;  %8686 = vmatprep.mubr.bf16.mxu0 %v6064_v29 }
 0x2be   : > { %8718 = vmatprep.mubr.bf16.mxu1 %v6225_v43  ;;  %v6208_v43 = vld [vmem:[#allocation5 + $0x58] sm:$0xff] }
 0x2c0   : > { %v6065_v40 = vpop.trf.xlu0 }
 0x2c1   : > { %v6226_v2 = vpop.trf.xlu1  ;;  %8687 = vmatmul.mubr.bf16.gmra.mrb[24].mxu0 %v6065_v40  ;;  %v6045_v40 = vld [vmem:[#allocation4 + $0x48] sm:$0xff] }
 0x2c2   : > { %8719 = vmatmul.mubr.bf16.gmra.mrb[24].mxu1 %v6226_v2 }
 0x2c4   : > { %v6066_v35 = vpop.trf.xlu0 }
 0x2c5   : > { %v6227_v51 = vpop.trf.xlu1  ;;  %8690 = vmatprep.mubr.bf16.mxu0 %v6066_v35 }
 0x2c6   : > { %8722 = vmatprep.mubr.bf16.mxu1 %v6227_v51 }
 0x2c8   : > { %v6067_v22 = vpop.trf.xlu0 }
 0x2c9   : > { %v6228_v54 = vpop.trf.xlu1  ;;  %8691 = vmatmul.mubr.bf16.gmra.mrb[28].mxu0 %v6067_v22 }
 0x2ca   : > { %8723 = vmatmul.mubr.bf16.gmra.mrb[28].mxu1 %v6228_v54  ;;  %v6206_v54 = vld [vmem:[#allocation5 + $0x48] sm:$0xff] }
 0x384   : > { %v8680_v1 = vpop.f32.mrb[16].mxu0 }
 0x385   : > { %v6167_v3 = vadd.f32 %v8680_v1, %v6038_v0  ;;  %v8712_v10 = vpop.f32.mrb[16].mxu1  ;;  %v6102_v39 = vpop.f32.mrb[17].mxu0 }
 0x386   : > { %v6328_v28 = vadd.f32 %v8712_v10, %v6199_v56  ;;  %v6165_v21 = vadd.f32 %v6102_v39, %v6036_v47  ;;  %v6263_v16 = vpop.f32.mrb[17].mxu1  ;;  %v8681_v36 = vpop.f32.mrb[18].mxu0  ;;  %v6050_v39 = vld [vmem:[#allocation4 + $0x70] sm:$0xff] }
 0x387   : > { %6183 = vst [vmem:[#allocation4 + $0x10] sm:$0xff] %v6167_v3  ;;  %v6326_v5 = vadd.f32 %v6263_v16, %v6197_v24  ;;  %v6168_v26 = vadd.f32 %v8681_v36, %v6039_v27  ;;  %v8713_v48 = vpop.f32.mrb[18].mxu1  ;;  %v6105_v57 = vpop.f32.mrb[19].mxu0  ;;  %v6051_v16 = vld [vmem:[#allocation4 + $0x78] sm:$0xff] }
 0x388   : > { %6344 = vst [vmem:[#allocation5 + $0x10] sm:$0xff] %v6328_v28  ;;  %6181 = vst [vmem:[#allocation4] sm:$0xff] %v6165_v21  ;;  %v6329_v44 = vadd.f32 %v8713_v48, %v6200_v14  ;;  %v6166_v20 = vadd.f32 %v6105_v57, %v6037_v50  ;;  %v6266_v11 = vpop.f32.mrb[19].mxu1  ;;  %v6211_v14 = vld [vmem:[#allocation5 + $0x70] sm:$0xff]  ;;  %v6048_v50 = vld [vmem:[#allocation4 + $0x60] sm:$0xff] }
 0x389   : > { %6342 = vst [vmem:[#allocation5] sm:$0xff] %v6326_v5  ;;  %6184 = vst [vmem:[#allocation4 + $0x18] sm:$0xff] %v6168_v26  ;;  %v6327_v15 = vadd.f32 %v6266_v11, %v6198_v12  ;;  %v6209_v21 = vld [vmem:[#allocation5 + $0x60] sm:$0xff]  ;;  %v6212_v26 = vld [vmem:[#allocation5 + $0x78] sm:$0xff] }
 0x38a   : > { %6345 = vst [vmem:[#allocation5 + $0x18] sm:$0xff] %v6329_v44  ;;  %6182 = vst [vmem:[#allocation4 + $0x8] sm:$0xff] %v6166_v20  ;;  %v6049_v48 = vld [vmem:[#allocation4 + $0x68] sm:$0xff] }
 0x38b   : > { %6343 = vst [vmem:[#allocation5 + $0x8] sm:$0xff] %v6327_v15  ;;  %v6210_v15 = vld [vmem:[#allocation5 + $0x68] sm:$0xff] }
 0x38c   : > { %v8684_v49 = vpop.f32.mrb[20].mxu0 }
 0x38d   : > { %v6171_v8 = vadd.f32 %v8684_v49, %v6042_v6  ;;  %v8716_v7 = vpop.f32.mrb[20].mxu1  ;;  %v6118_v53 = vpop.f32.mrb[21].mxu0 }
 0x38e   : > { %v6332_v30 = vadd.f32 %v8716_v7, %v6203_v31  ;;  %v6169_v4 = vadd.f32 %v6118_v53, %v6040_v13  ;;  %v6279_v32 = vpop.f32.mrb[21].mxu1  ;;  %v8685_v58 = vpop.f32.mrb[22].mxu0  ;;  %v6385_v53 = vld [vmem:[#allocation4 + $0x10] sm:$0xff] (!%p7590_p12) }
 0x38f   : > { %6187 = vst [vmem:[#allocation4 + $0x30] sm:$0xff] %v6171_v8  ;;  %v6330_v9 = vadd.f32 %v6279_v32, %v6201_v45  ;;  %v6172_v60 = vadd.f32 %v8685_v58, %v6043_v38  ;;  %v8717_v59 = vpop.f32.mrb[22].mxu1  ;;  %v6121_v34 = vpop.f32.mrb[23].mxu0 }
 0x390   : > { %6348 = vst [vmem:[#allocation5 + $0x30] sm:$0xff] %v6332_v30  ;;  %6185 = vst [vmem:[#allocation4 + $0x20] sm:$0xff] %v6169_v4  ;;  %v6333_v25 = vadd.f32 %v8717_v59, %v6204_v19  ;;  %v6170_v46 = vadd.f32 %v6121_v34, %v6041_v41  ;;  %v6282_v63 = vpop.f32.mrb[23].mxu1  ;;  %v6401_v19 = vld [vmem:[#allocation5 + $0x10] sm:$0xff] (!%p7590_p12)  ;;  %v6383_v41 = vld [vmem:[#allocation4] sm:$0xff] (!%p7590_p12) }
 0x391   : > { %6346 = vst [vmem:[#allocation5 + $0x20] sm:$0xff] %v6330_v9  ;;  %6188 = vst [vmem:[#allocation4 + $0x38] sm:$0xff] %v6172_v60  ;;  %v6331_v17 = vadd.f32 %v6282_v63, %v6202_v33  ;;  %v6417_v30 = vsub.f32 (!%p7590_p12), %v6385_v53, %v6401_v19  ;;  %v6399_v4 = vld [vmem:[#allocation5] sm:$0xff] (!%p7590_p12)  ;;  %v6386_v32 = vld [vmem:[#allocation4 + $0x18] sm:$0xff] (!%p7590_p12) }
 0x392   : > { %6349 = vst [vmem:[#allocation5 + $0x38] sm:$0xff] %v6333_v25  ;;  %6186 = vst [vmem:[#allocation4 + $0x28] sm:$0xff] %v6170_v46  ;;  %v6402_v58 = vld [vmem:[#allocation5 + $0x18] sm:$0xff] (!%p7590_p12)  ;;  %v6415_v33 = vsub.f32 (!%p7590_p12), %v6383_v41, %v6399_v4  ;;  %v6384_v60 = vld [vmem:[#allocation4 + $0x8] sm:$0xff] (!%p7590_p12) }
 0x393   : > { %6347 = vst [vmem:[#allocation5 + $0x28] sm:$0xff] %v6331_v17  ;;  %v6418_v9 = vsub.f32 (!%p7590_p12), %v6386_v32, %v6402_v58  ;;  %v6400_v59 = vld [vmem:[#allocation5 + $0x8] sm:$0xff] (!%p7590_p12)  ;;  %v6433_v25 = vand.u32 (!%p7590_p12), 2147483647, %v6417_v30 }
 0x394   : > { %v8688_v62 = vpop.f32.mrb[24].mxu0  ;;  %v6416_v46 = vsub.f32 (!%p7590_p12), %v6384_v60, %v6400_v59 }
 0x395   : > { %v6175_v52 = vadd.f32 %v8688_v62, %v6046_v42  ;;  %v8720_v37 = vpop.f32.mrb[24].mxu1  ;;  %v6134_v29 = vpop.f32.mrb[25].mxu0 }
 0x396   : > { %v6336_v2 = vadd.f32 %v8720_v37, %v6207_v61  ;;  %v6173_v35 = vadd.f32 %v6134_v29, %v6044_v18  ;;  %v6295_v51 = vpop.f32.mrb[25].mxu1  ;;  %v8689_v22 = vpop.f32.mrb[26].mxu0  ;;  %v6431_v61 = vand.u32 (!%p7590_p12), 2147483647, %v6415_v33  ;;  %v6434_v18 = vand.u32 (!%p7590_p12), 2147483647, %v6418_v9 }
 0x397   : > { %6191 = vst [vmem:[#allocation4 + $0x50] sm:$0xff] %v6175_v52  ;;  %v6334_v0 = vadd.f32 %v6295_v51, %v6205_v55  ;;  %v6176_v56 = vadd.f32 %v8689_v22, %v6047_v23  ;;  %v8721_v47 = vpop.f32.mrb[26].mxu1  ;;  %v6137_v1 = vpop.f32.mrb[27].mxu0  ;;  %v6387_v17 = vld [vmem:[#allocation4 + $0x20] sm:$0xff] (!%p7590_p12)  ;;  %v6449_v37 = vmul.f32 (!%p7590_p12), 0.00048828125, %v6433_v25 }
 0x398   : > { %6352 = vst [vmem:[#allocation5 + $0x50] sm:$0xff] %v6336_v2  ;;  %6189 = vst [vmem:[#allocation4 + $0x40] sm:$0xff] %v6173_v35  ;;  %v6337_v24 = vadd.f32 %v8721_v47, %v6208_v43  ;;  %v6174_v27 = vadd.f32 %v6137_v1, %v6045_v40  ;;  %v6298_v3 = vpop.f32.mrb[27].mxu1  ;;  %v6403_v42 = vld [vmem:[#allocation5 + $0x20] sm:$0xff] (!%p7590_p12)  ;;  %v6390_v23 = vld [vmem:[#allocation4 + $0x38] sm:$0xff] (!%p7590_p12)  ;;  %v6447_v2 = vmul.f32 (!%p7590_p12), 0.00048828125, %v6431_v61 }
 0x399   : > { %6350 = vst [vmem:[#allocation5 + $0x40] sm:$0xff] %v6334_v0  ;;  %6192 = vst [vmem:[#allocation4 + $0x58] sm:$0xff] %v6176_v56  ;;  %v6335_v10 = vadd.f32 %v6298_v3, %v6206_v54  ;;  %v6388_v34 = vld [vmem:[#allocation4 + $0x28] sm:$0xff] (!%p7590_p12)  ;;  %v6419_v55 = vsub.f32 (!%p7590_p12), %v6387_v17, %v6403_v42  ;;  %v6406_v52 = vld [vmem:[#allocation5 + $0x38] sm:$0xff] (!%p7590_p12)  ;;  %v6432_v29 = vand.u32 (!%p7590_p12), 2147483647, %v6416_v46  ;;  %6467 = vadd.xlane.f32.xlu1 (!%p7590_p12), %v6449_v37 }
 0x39a   : > { %6353 = vst [vmem:[#allocation5 + $0x58] sm:$0xff] %v6337_v24  ;;  %6190 = vst [vmem:[#allocation4 + $0x48] sm:$0xff] %v6174_v27  ;;  %v6404_v63 = vld [vmem:[#allocation5 + $0x28] sm:$0xff] (!%p7590_p12)  ;;  %v6389_v43 = vld [vmem:[#allocation4 + $0x30] sm:$0xff] (!%p7590_p12)  ;;  %v6450_v35 = vmul.f32 (!%p7590_p12), 0.00048828125, %v6434_v18  ;;  %v6422_v22 = vsub.f32 (!%p7590_p12), %v6390_v23, %v6406_v52  ;;  %6463 = vadd.xlane.f32.xlu0 (!%p7590_p12), %v6447_v2 }
 0x39b   : > { %6351 = vst [vmem:[#allocation5 + $0x48] sm:$0xff] %v6335_v10  ;;  %v6420_v62 = vsub.f32 (!%p7590_p12), %v6388_v34, %v6404_v63  ;;  %v6405_v40 = vld [vmem:[#allocation5 + $0x30] sm:$0xff] (!%p7590_p12)  ;;  %v6448_v54 = vmul.f32 (!%p7590_p12), 0.00048828125, %v6432_v29  ;;  %v6435_v0 = vand.u32 (!%p7590_p12), 2147483647, %v6419_v55  ;;  %v6373_v42 = vld [vmem:[#allocation3] sm:$0xff] (!%p7590_p12) }
 0x39c   : > { %v8692_v28 = vpop.f32.mrb[28].mxu0  ;;  %v6421_v56 = vsub.f32 (!%p7590_p12), %v6389_v43, %v6405_v40  ;;  %v6438_v10 = vand.u32 (!%p7590_p12), 2147483647, %v6422_v22  ;;  %v6362_v61 = vld [vmem:[#allocation2] sm:$0xff] (!%p7590_p12) }
 0x39d   : > { %v6179_v36 = vadd.f32 %v8692_v28, %v6050_v39  ;;  %v8724_v12 = vpop.f32.mrb[28].mxu1  ;;  %v6150_v5 = vpop.f32.mrb[29].mxu0  ;;  %6361 = sbr.rel (%p7590_p12) target bundleno = 1111 (0x457), region = 44  ;;  %v6436_v51 = vand.u32 (!%p7590_p12), 2147483647, %v6420_v62  ;;  %6469 = vadd.xlane.f32.xlu1 (!%p7590_p12), %v6450_v35 }
 0x39e   : > { %v6340_v57 = vadd.f32 %v8724_v12, %v6211_v14  ;;  %v6177_v44 = vadd.f32 %v6150_v5, %v6048_v50  ;;  %v6311_v20 = vpop.f32.mrb[29].mxu1  ;;  %v8693_v11 = vpop.f32.mrb[30].mxu0  ;;  %6465 = vadd.xlane.f32.xlu0 (!%p7590_p12), %v6448_v54  ;;  %v6451_v14 = vmul.f32 (!%p7590_p12), 0.00048828125, %v6435_v0  ;;  %v6437_v50 = vand.u32 (!%p7590_p12), 2147483647, %v6421_v56 }
 0x39f   : > { %6195 = vst [vmem:[#allocation4 + $0x70] sm:$0xff] %v6179_v36  ;;  %v6338_v6 = vadd.f32 %v6311_v20, %v6209_v21  ;;  %v6180_v31 = vadd.f32 %v8693_v11, %v6051_v16  ;;  %v8725_v13 = vpop.f32.mrb[30].mxu1  ;;  %v6153_v49 = vpop.f32.mrb[31].mxu0  ;;  %v6391_v24 = vld [vmem:[#allocation4 + $0x40] sm:$0xff] (!%p7590_p12)  ;;  %v6452_v3 = vmul.f32 (!%p7590_p12), 0.00048828125, %v6436_v51  ;;  %v6393_v36 = vld [vmem:[#allocation4 + $0x50] sm:$0xff] (!%p7590_p12) }
 0x3a0   : > { %6356 = vst [vmem:[#allocation5 + $0x70] sm:$0xff] %v6340_v57  ;;  %6193 = vst [vmem:[#allocation4 + $0x60] sm:$0xff] %v6177_v44  ;;  %v6341_v45 = vadd.f32 %v8725_v13, %v6212_v26  ;;  %v6178_v38 = vadd.f32 %v6153_v49, %v6049_v48  ;;  %v6314_v8 = vpop.f32.mrb[31].mxu1  ;;  %v6407_v27 = vld [vmem:[#allocation5 + $0x40] sm:$0xff] (!%p7590_p12)  ;;  %v6394_v21 = vld [vmem:[#allocation4 + $0x58] sm:$0xff] (!%p7590_p12)  ;;  %v6454_v5 = vmul.f32 (!%p7590_p12), 0.00048828125, %v6438_v10 }
 0x3a1   : > { %6354 = vst [vmem:[#allocation5 + $0x60] sm:$0xff] %v6338_v6  ;;  %6196 = vst [vmem:[#allocation4 + $0x78] sm:$0xff] %v6180_v31  ;;  %v6339_v7 = vadd.f32 %v6314_v8, %v6210_v15  ;;  %v6392_v47 = vld [vmem:[#allocation4 + $0x48] sm:$0xff] (!%p7590_p12)  ;;  %v6423_v28 = vsub.f32 (!%p7590_p12), %v6391_v24, %v6407_v27  ;;  %v6410_v16 = vld [vmem:[#allocation5 + $0x58] sm:$0xff] (!%p7590_p12)  ;;  %6473 = vadd.xlane.f32.xlu1 (!%p7590_p12), %v6452_v3  ;;  %v6453_v57 = vmul.f32 (!%p7590_p12), 0.00048828125, %v6437_v50 }
 0x3a2   : > { %6357 = vst [vmem:[#allocation5 + $0x78] sm:$0xff] %v6341_v45  ;;  %6194 = vst [vmem:[#allocation4 + $0x68] sm:$0xff] %v6178_v38  ;;  %v6408_v1 = vld [vmem:[#allocation5 + $0x48] sm:$0xff] (!%p7590_p12)  ;;  %v6409_v12 = vld [vmem:[#allocation5 + $0x50] sm:$0xff] (!%p7590_p12)  ;;  %v6426_v48 = vsub.f32 (!%p7590_p12), %v6394_v21, %v6410_v16  ;;  %6471 = vadd.xlane.f32.xlu0 (!%p7590_p12), %v6451_v14 }
 0x3a3   : > { %6355 = vst [vmem:[#allocation5 + $0x68] sm:$0xff] %v6339_v7  ;;  %v6424_v39 = vsub.f32 (!%p7590_p12), %v6392_v47, %v6408_v1  ;;  %v6439_v44 = vand.u32 (!%p7590_p12), 2147483647, %v6423_v28  ;;  %v6425_v20 = vsub.f32 (!%p7590_p12), %v6393_v36, %v6409_v12 }
 0x3a4   : > { %v6442_v49 = vand.u32 2147483647, %v6426_v48 }
 0x3a5   : > { %v6440_v26 = vand.u32 2147483647, %v6424_v39  ;;  %6477 = vadd.xlane.f32.xlu1 %v6454_v5  ;;  %v6455_v38 = vmul.f32 0.00048828125, %v6439_v44  ;;  %v6441_v8 = vand.u32 2147483647, %v6425_v20 }
 0x3a6   : > { %6475 = vadd.xlane.f32.xlu0 %v6453_v57  ;;  %v6397_v41 = vld [vmem:[#allocation4 + $0x70] sm:$0xff]  ;;  %v6458_v4 = vmul.f32 0.00048828125, %v6442_v49 }
 0x3a7   : > { %v6395_v6 = vld [vmem:[#allocation4 + $0x60] sm:$0xff]  ;;  %v6456_v13 = vmul.f32 0.00048828125, %v6440_v26  ;;  %v6413_v30 = vld [vmem:[#allocation5 + $0x70] sm:$0xff]  ;;  %v6457_v33 = vmul.f32 0.00048828125, %v6441_v8 }
 0x3a8   : > { %v6411_v31 = vld [vmem:[#allocation5 + $0x60] sm:$0xff]  ;;  %v6398_v53 = vld [vmem:[#allocation4 + $0x78] sm:$0xff]  ;;  %v6429_v60 = vsub.f32 %v6397_v41, %v6413_v30 }
 0x3a9   : > { %v6396_v11 = vld [vmem:[#allocation4 + $0x68] sm:$0xff]  ;;  %v6427_v7 = vsub.f32 %v6395_v6, %v6411_v31  ;;  %v6414_v19 = vld [vmem:[#allocation5 + $0x78] sm:$0xff]  ;;  %6481 = vadd.xlane.f32.xlu1 %v6456_v13 }
 0x3aa   : > { %v6412_v15 = vld [vmem:[#allocation5 + $0x68] sm:$0xff]  ;;  %v6430_v58 = vsub.f32 %v6398_v53, %v6414_v19  ;;  %6479 = vadd.xlane.f32.xlu0 %v6455_v38  ;;  %v6445_v46 = vand.u32 2147483647, %v6429_v60 }
 0x3ab   : > { %v6428_v45 = vsub.f32 %v6396_v11, %v6412_v15  ;;  %v6443_v9 = vand.u32 2147483647, %v6427_v7 }
 0x3ac   : > { %v6446_v34 = vand.u32 2147483647, %v6430_v58  ;;  %v6461_v17 = vmul.f32 0.00048828125, %v6445_v46 }
 0x3ad   : > { %v6444_v32 = vand.u32 2147483647, %v6428_v45  ;;  %6485 = vadd.xlane.f32.xlu1 %v6458_v4  ;;  %v6459_v25 = vmul.f32 0.00048828125, %v6443_v9 }
 0x3ae   : > { %6483 = vadd.xlane.f32.xlu0 %v6457_v33  ;;  %v6462_v63 = vmul.f32 0.00048828125, %v6446_v34 }
 0x3af   : > { %v6460_v59 = vmul.f32 0.00048828125, %v6444_v32 }
 0x3b1   : > { %6489 = vadd.xlane.f32.xlu1 %v6460_v59 }
 0x3b2   : > { %6487 = vadd.xlane.f32.xlu0 %v6459_v25 }
 0x3b5   : > { %6493 = vadd.xlane.f32.xlu1 %v6462_v63 }
 0x3b6   : > { %6491 = vadd.xlane.f32.xlu0 %v6461_v17 }
 0x3b9   : > { %6374 = vadd.xlane.f32.xlu1 %v6373_v42 }
 0x3ba   : > { %6363 = vadd.xlane.f32.xlu0 %v6362_v61 }
 0x426   : > { %v6468_v18 = vpop.xlane.xlu1 %6467 }
 0x427   : > { %v6464_v62 = vpop.xlane.xlu0 %6463 }
 0x42a   : > { %v6470_v55 = vpop.xlane.xlu1 %6469 }
 0x42b   : > { %v6466_v23 = vpop.xlane.xlu0 %6465 }
 0x42c   : > { %v6495_v52 = vadd.f32 %v6466_v23, %v6464_v62 }
 0x42e   : > { %v6496_v37 = vadd.f32 %v6495_v52, %v6468_v18  ;;  %v6474_v29 = vpop.xlane.xlu1 %6473 }
 0x42f   : > { %v6472_v43 = vpop.xlane.xlu0 %6471 }
 0x430   : > { %v6497_v40 = vadd.f32 %v6496_v37, %v6470_v55 }
 0x432   : > { %v6498_v2 = vadd.f32 %v6497_v40, %v6472_v43  ;;  %v6478_v35 = vpop.xlane.xlu1 %6477 }
 0x433   : > { %v6476_v51 = vpop.xlane.xlu0 %6475 }
 0x434   : > { %v6499_v22 = vadd.f32 %v6498_v2, %v6474_v29 }
 0x436   : > { %v6500_v54 = vadd.f32 %v6499_v22, %v6476_v51  ;;  %v6482_v0 = vpop.xlane.xlu1 %6481 }
 0x437   : > { %v6480_v56 = vpop.xlane.xlu0 %6479 }
 0x438   : > { %v6501_v47 = vadd.f32 %v6500_v54, %v6478_v35 }
 0x43a   : > { %v6502_v1 = vadd.f32 %v6501_v47, %v6480_v56  ;;  %v6486_v24 = vpop.xlane.xlu1 %6485 }
 0x43b   : > { %v6484_v27 = vpop.xlane.xlu0 %6483 }
 0x43c   : > { %v6503_v3 = vadd.f32 %v6502_v1, %v6482_v0 }
 0x43e   : > { %v6504_v10 = vadd.f32 %v6503_v3, %v6484_v27  ;;  %v6490_v39 = vpop.xlane.xlu1 %6489 }
 0x43f   : > { %v6488_v14 = vpop.xlane.xlu0 %6487 }
 0x440   : > { %v6505_v50 = vadd.f32 %v6504_v10, %v6486_v24 }
 0x442   : > { %v6506_v28 = vadd.f32 %v6505_v50, %v6488_v14  ;;  %v6494_v21 = vpop.xlane.xlu1 %6493 }
 0x443   : > { %v6492_v16 = vpop.xlane.xlu0 %6491 }
 0x444   : > { %v6507_v36 = vadd.f32 %v6506_v28, %v6490_v39 }
 0x446   : > { %v6508_v12 = vadd.f32 %v6507_v36, %v6492_v16  ;;  %v6375_v5 = vpop.xlane.xlu1 %6374 }
 0x447   : > { %v6376_v26 = vrot.slane %v6375_v5, 4  ;;  %v6364_v48 = vpop.xlane.xlu0 %6363 }
 0x448   : > { %v6509_v57 = vadd.f32 %v6508_v12, %v6494_v21  ;;  %v6365_v44 = vrot.slane %v6364_v48, 4 }
 0x449   : > { %v6377_v20 = vadd.f32 %v6376_v26, %v6375_v5 }
 0x44a   : > { %v6510_v11 = vrot.slane %v6509_v57, 4  ;;  %v6366_v15 = vadd.f32 %v6365_v44, %v6364_v48 }
 0x44b   : > { %v6378_v6 = vrot.slane %v6377_v20, 2 }
 0x44c   : > { %v6511_v31 = vadd.f32 %v6510_v11, %v6509_v57  ;;  %v6367_v13 = vrot.slane %v6366_v15, 2 }
 0x44d   : > { %v6379_v49 = vadd.f32 %v6378_v6, %v6377_v20 }
 0x44e   : > { %v6512_v45 = vrot.slane %v6511_v31, 2  ;;  %v6368_v38 = vadd.f32 %v6367_v13, %v6366_v15 }
 0x44f   : > { %v6380_v8 = vrot.slane %v6379_v49, 1 }
 0x450   : > { %v6513_v7 = vadd.f32 %v6512_v45, %v6511_v31  ;;  %v6369_v53 = vrot.slane %v6368_v38, 1 }
 0x451   : > { %v6381_v19 = vadd.f32 %v6380_v8, %v6379_v49 }
 0x452   : > { %v6514_v41 = vrot.slane %v6513_v7, 1  ;;  %v6370_v30 = vadd.f32 %v6369_v53, %v6368_v38 }
 0x453   : > { %6382 = vst.msk [vmem:[%s360_s24] sm:$0x1] %vm6371_vm7, %v6381_v19 }
 0x454   : > { %v6515_v4 = vadd.f32 %v6514_v41, %v6513_v7  ;;  %6372 = vst.msk [vmem:[%s357_s10] sm:$0x1] %vm6371_vm7, %v6370_v30 }
 0x456   : > { %6516 = vst.msk [vmem:[%s363_s9] sm:$0x1] %vm6371_vm7, %v6515_v4 }
 0x457 PF: > { %6532 = sbr.rel (!%p9304_p5) target bundleno = 1127 (0x467), region = 48  ;;  %s7630_s10 = sshll.u32 (%p9304_p5), %s9199_s26, 4  ;;  %v6554_v32 = vld [vmem:[%s9347_s20] sm:$0xff] (%p9304_p5)   ;;  %v6558_v58 = vld [vmem:[%s9347_s20 + $0x8] sm:$0xff] (%p9304_p5)   ;;  %v6562_v33 = vld [vmem:[%s9347_s20 + $0x10] sm:$0xff] (%p9304_p5)  }
 0x458   : > { %s7594_s9 = sshll.u32 (%p9304_p5), %s9203_s27, 6  ;;  %v6566_v9 = vld [vmem:[%s9347_s20 + $0x18] sm:$0xff] (%p9304_p5)   ;;  %v6570_v60 = vld [vmem:[%s9347_s20 + $0x20] sm:$0xff] (%p9304_p5)   ;;  %v6574_v59 = vld [vmem:[%s9347_s20 + $0x28] sm:$0xff] (%p9304_p5)   ;;  %s12026_s14 = sld [smem:[#allocation35_spill]] (%p9304_p5) }
 0x459   : > { %s6536_s12 = sadd.s32 (%p9304_p5), %s7630_s10, %s7594_s9  ;;  %v6578_v34 = vld [vmem:[%s9347_s20 + $0x30] sm:$0xff] (%p9304_p5)   ;;  %v6582_v25 = vld [vmem:[%s9347_s20 + $0x38] sm:$0xff] (%p9304_p5)   ;;  %v6586_v46 = vld [vmem:[%s9347_s20 + $0x40] sm:$0xff] (%p9304_p5)  }
 0x45a   : > { %s7595_s19 = sshll.u32 (%p9304_p5), %s6536_s12, 2  ;;  %v6590_v63 = vld [vmem:[%s9347_s20 + $0x48] sm:$0xff] (%p9304_p5)   ;;  %v6594_v17 = vld [vmem:[%s9347_s20 + $0x50] sm:$0xff] (%p9304_p5)   ;;  %v6598_v42 = vld [vmem:[%s9347_s20 + $0x58] sm:$0xff] (%p9304_p5)  }
 0x45b   : > { %v6602_v61 = vld [vmem:[%s9347_s20 + $0x60] sm:$0xff] (%p9304_p5)   ;;  %v6606_v18 = vld [vmem:[%s9347_s20 + $0x68] sm:$0xff] (%p9304_p5)   ;;  %v6610_v62 = vld [vmem:[%s9347_s20 + $0x70] sm:$0xff] (%p9304_p5)  }
 0x45c   : > { %v6614_v55 = vld [vmem:[%s9347_s20 + $0x78] sm:$0xff] (%p9304_p5)  }
 0x45e   : > { %s6538_s15 = scalar_lea.vmem %s12026_s14, %s7595_s19 }
 0x45f   : > { %6555 = vst [vmem:[%s6538_s15] sm:$0xff] %v6554_v32   ;;  %6559 = vst [vmem:[%s6538_s15 + $0x8] sm:$0xff] %v6558_v58  }
 0x460   : > { %6563 = vst [vmem:[%s6538_s15 + $0x10] sm:$0xff] %v6562_v33   ;;  %6567 = vst [vmem:[%s6538_s15 + $0x18] sm:$0xff] %v6566_v9  }
 0x461   : > { %6571 = vst [vmem:[%s6538_s15 + $0x20] sm:$0xff] %v6570_v60   ;;  %6575 = vst [vmem:[%s6538_s15 + $0x28] sm:$0xff] %v6574_v59  }
 0x462   : > { %6579 = vst [vmem:[%s6538_s15 + $0x30] sm:$0xff] %v6578_v34   ;;  %6583 = vst [vmem:[%s6538_s15 + $0x38] sm:$0xff] %v6582_v25  }
 0x463   : > { %6587 = vst [vmem:[%s6538_s15 + $0x80] sm:$0xff] %v6586_v46   ;;  %6591 = vst [vmem:[%s6538_s15 + $0x88] sm:$0xff] %v6590_v63  }
 0x464   : > { %6595 = vst [vmem:[%s6538_s15 + $0x90] sm:$0xff] %v6594_v17   ;;  %6599 = vst [vmem:[%s6538_s15 + $0x98] sm:$0xff] %v6598_v42  }
 0x465   : > { %6603 = vst [vmem:[%s6538_s15 + $0xa0] sm:$0xff] %v6602_v61   ;;  %6607 = vst [vmem:[%s6538_s15 + $0xa8] sm:$0xff] %v6606_v18  }
 0x466   : > { %6611 = vst [vmem:[%s6538_s15 + $0xb0] sm:$0xff] %v6610_v62   ;;  %6615 = vst [vmem:[%s6538_s15 + $0xb8] sm:$0xff] %v6614_v55  }
 0x467 PF: > { %s12027_s26 = sld [smem:[#allocation10_spill]]  ;;  %s12028_s24 = sld [smem:[#allocation7_spill]] }
 0x468   : > { %s12029_s25 = sld [smem:[#allocation13_spill]]  ;;  %s12031_s27 = sld [smem:[#allocation9_spill]] }
 0x469   : > { %s12032_s28 = sld [smem:[#allocation11_spill]]  ;;  %s12033_s29 = sld [smem:[#allocation12_spill]] }
 0x46d   : > { %s18_s30 = sadd.s32 1, %s12027_s26   ;;  %s12030_s26 = sld [smem:[#allocation8_spill]] }
 0x46e   : > { %p15_p13 = scmp.ge.s32.totalorder %s18_s30, 6  }
 0x470   :  { %17 = sbr.rel (!%p15_p13) target bundleno = 6 (0x6), region = 167 }

// kernel: forward.3
= control target key start
LH: loop header
LB: loop body
LE: loop exit
PB: predicated region body
PF: predicated region fallthrough
CT: control target
= control target key end

     0   :  { %s11536_s0 = inlined_call_operand.vmem [shape: bf16[2,2,2,10,18,128], index: 0, kind: input, shape index: {}, may-alias: {0,1}]   ;;  %s11537_s1 = inlined_call_operand.vmem [shape: bf16[2,2,2,10,18,128], index: 1, kind: input, shape index: {}, may-alias: {0,1}]   ;;  %s11538_s2 = inlined_call_operand.vmem [shape: bf16[9,128,128], index: 2, kind: input, shape index: {}]   ;;  %s11539_s3 = inlined_call_operand.vmem [shape: f32[1,128], index: 3, kind: input, shape index: {}]   ;;  %s11540_s4 = inlined_call_operand.hbm [shape: bf16[2,2,16,16,128], index: 4, kind: output, shape index: {0}]   ;;  %s11541_s5 = inlined_call_operand.hbm [shape: f32[2,1,1], index: 5, kind: output, shape index: {1}]   ;;  %s11542_s6 = inlined_call_operand.vmem [shape: f32[2,1,1], index: 6, kind: output, shape index: {2}]   ;;  %s11543_s7 = inlined_call_operand.vmem [shape: f32[2,1,1], index: 7, kind: output, shape index: {3}]  }
   0x1   :  { %11607 = sst [smem:[#allocation49_spill]] %s11540_s4 }
   0x2   :  { %11608 = sst [smem:[#allocation50_spill]] %s11541_s5 }
   0x3   :  { %13 = vsyncpa [#allocation7], 0 }
   0x4   :  { %15 = vsyncpa [#allocation7 + $0x1], 0 }
   0x5   :  { %16 = vsyncpa [#allocation9], 0 }
   0x6   :  { %18 = vsyncpa [#allocation9 + $0x1], 0  ;;  %s8960_s24 = smov 0   ;;  %s8962_s25 = smov 0  }
   0x7   :  { %s8964_s26 = smov 0   ;;  %s8966_s27 = smov 0  }
   0x8   :  { %s8968_s28 = smov 0   ;;  %s8970_s29 = smov 0  }
   0x9   :  { %s8972_s30 = smov 0   ;;  %s8974_s8 = smov 0  }
   0xa   :  { %s8976_s9 = smov 0   ;;  %s8978_s10 = smov 0  }
   0xb   :  { %s8980_s11 = smov 0  }
   0xc LB: > { %11609 = sst [smem:[#allocation14_spill]] %s8868_s24  ;;  %s6522_s12 = sadd.s32 4294967295, %s8908_s11   ;;  %s8908_s11 = sphi %s8980_s11, %s24_s11   ;;  %s8904_s10 = sphi %s8978_s10, %s11780_s10   ;;  %s8900_s9 = sphi %s8976_s9, %s11779_s9   ;;  %s8896_s8 = sphi %s8974_s8, %s11772_s8   ;;  %s8892_s30 = sphi %s8972_s30, %s11771_s30   ;;  %s8888_s29 = sphi %s8970_s29, %s11770_s29   ;;  %s8884_s28 = sphi %s8968_s28, %s11778_s28   ;;  %s8880_s27 = sphi %s8966_s27, %s11777_s27   ;;  %s8876_s26 = sphi %s8964_s26, %s11768_s26   ;;  %s8872_s25 = sphi %s8962_s25, %s11776_s25   ;;  %s8868_s24 = sphi %s8960_s24, %s11775_s24  }
   0xd   : > { %11610 = sst [smem:[#allocation15_spill]] %s8876_s26  ;;  %s6523_s13 = sadd.s32 4294967294, %s8908_s11  }
   0xe   : > { %11611 = sst [smem:[#allocation16_spill]] %s8880_s27  ;;  %s33_s14 = sadd.s32 1, %s8900_s9 }
   0xf   : > { %11612 = sst [smem:[#allocation17_spill]] %s8888_s29  ;;  %s36_s15 = sadd.s32 1, %s8904_s10 }
  0x10   : > { %11613 = sst [smem:[#allocation18_spill]] %s8900_s9  ;;  %p34_p0 = scmp.ge.s32.totalorder %s33_s14, 2 }
  0x11   : > { %11614 = sst [smem:[#allocation19_spill]] %s8904_s10  ;;  %s143_s16 = sadd.s32 1, %s8888_s29 }
  0x12   : > { %11615 = sst [smem:[#allocation20_spill]] %s8908_s11  ;;  %p153_p1 = scmp.ne.s32.totalorder %s8888_s29, %s8884_s28 }
  0x13   : > { %p9022_p2 = scmp.eq.s32.totalorder %s6522_s12, 3  ;;  %s11782_s14 = smov (%p34_p0, %s33_s14), 0 }
  0x14   : > { %11617 = sst [smem:[#allocation21_spill]] %s11782_s14  ;;  %s11784_s15 = smov (!%p34_p0, %s36_s15), %s8904_s10 }
  0x15   : > { %s139_s18 = ssub.s32 %s8900_s9, %s11782_s14  ;;  %p9033_p3 = por %p9022_p2, %p153_p1 }
  0x16   : > { %p38_p4 = scmp.ge.s32.totalorder %s11784_s15, 2  ;;  %p159_p5 = scmp.ne.s32.totalorder %s8884_s28, %s8880_s27 }
  0x17   : > { %p9039_p6 = scmp.eq.s32.totalorder %s6523_s13, 3  ;;  %s169_s21 = sadd.s32 1, %s8876_s26 }
  0x18   : > { %s11786_s15 = smov (%p38_p4, %s11784_s15), 0  ;;  %p179_p8 = scmp.ne.s32.totalorder %s8876_s26, %s8872_s25 }
  0x19   : > { %11620 = sst [smem:[#allocation22_spill]] %s11786_s15  ;;  %p9048_p7 = por %p9039_p6, %p159_p5 }
  0x1a   : > { %s138_s23 = ssub.s32 %s8904_s10, %s11786_s15  ;;  %p185_p9 = scmp.ne.s32.totalorder %s8872_s25, %s8868_s24 }
  0x1b   : > { %s11621_s22 = scalar_select %p9048_p7, 1, 0 }
  0x1c   : > { %s140_s12 = sor.u32 %s139_s18, %s138_s23  ;;  %p167_p10 = scmp.eq.s32.totalorder %s138_s23, 0 }
  0x1d   : > { %11622 = sst [smem:[#allocation23_spill]] %s11621_s22  ;;  %p141_p11 = scmp.eq.s32.totalorder %s140_s12, 0 }
  0x1e   : > { %p9060_p12 = por %p179_p8, %p9022_p2  ;;  %p9072_p13 = por %p185_p9, %p9039_p6 }
  0x1f   : > { %s9065_s14 = scalar_select %p167_p10, %s8876_s26, %s169_s21  }
  0x20   : > { %s11623_s13 = scalar_select %p9060_p12, 1, 0 }
  0x21   : > { %11625 = sst [smem:[#allocation25_spill]] %s9065_s14  ;;  %p6526_p0 = scmp.ge.s32.totalorder %s8908_s11, 1 }
  0x22   : > { %11624 = sst [smem:[#allocation24_spill]] %s11623_s13  ;;  %p287_p1 = scmp.lt.s32.totalorder %s8908_s11, 5 }
  0x23   : > { %s9068_s9 = scalar_select %p141_p11, %s8888_s29, %s143_s16  }
  0x24   : > { %s11627_s27 = scalar_select %p9072_p13, 1, 0 }
  0x25   : > { %11626 = sst [smem:[#allocation26_spill]] %s9068_s9  ;;  %p288_p4 = pnand %p6526_p0, %p287_p1 }
  0x26   : > { %11628 = sst [smem:[#allocation27_spill]] %s11627_s27 }
  0x27   : > { %291 = sbr.rel (%p288_p4) target bundleno = 1169 (0x491), region = 36 }
  0x2e   : > { %s11551_s17 = sand.u32 1, %s8884_s28   ;;  %p343_p2 = scmp.lt.s32.totalorder %s8896_s8, 1 }
  0x2f   : > { %s6527_s18 = sshll.u32 %s11551_s17, 7  ;;  %p345_p5 = scmp.lt.s32.totalorder %s8892_s30, 1 }
  0x30   : > { %s9085_s20 = scalar_select %p343_p2, %s8896_s8, 1 }
  0x31   : > { %s346_s21 = scalar_select %p345_p5, %s8892_s30, 1 }
  0x32   : > { %s8550_s23 = smul.u32 120, %s9085_s20  ;;  %s365_s10 = scalar_lea.vmem %s11542_s6, %s9085_s20 }
  0x33   : > { %s8549_s9 = smul.u32 30, %s346_s21  ;;  %s368_s16 = scalar_lea.vmem %s11543_s7, %s9085_s20 }
  0x34   : > { %s9107_s4 = scalar_lea.vmem [#allocation6], %s6527_s18  ;;  %s11629_s15 = sand.u32 1, %s8872_s25  }
  0x35   : > { %s349_s26 = sadd.s32 %s8550_s23, %s8549_s9  ;;  %s9111_s21 = scalar_lea.vmem [#allocation8], %s11629_s15 }
  0x36   : > { %s6528_s17 = sshll.u32 %s349_s26, 2  ;;  %p6530_p6 = scmp.ne.s32.totalorder %s8892_s30, 0 }
  0x37   : > { %s9100_s22 = scalar_lea.vmem %s11536_s0, %s6528_s17  ;;  %s9105_s13 = scalar_lea.vmem %s11537_s1, %s6528_s17  ;;  %v8910_v0 = vmov (!%p6530_p6), 0.0  }
  0x38   : > { %373 = sbr.rel (%p6530_p6) target bundleno = 73 (0x49), region = 40  ;;  %375 = vst [vmem:[#allocation3] sm:$0xff] (!%p6530_p6), %v8910_v0  ;;  %376 = vst [vmem:[#allocation4] sm:$0xff] (!%p6530_p6), %v8910_v0 }
  0x39   : > { %377 = vst [vmem:[#allocation4 + $0x8] sm:$0xff] (!%p6530_p6), %v8910_v0  ;;  %378 = vst [vmem:[#allocation4 + $0x10] sm:$0xff] (!%p6530_p6), %v8910_v0 }
  0x3a   : > { %379 = vst [vmem:[#allocation4 + $0x18] sm:$0xff] (!%p6530_p6), %v8910_v0  ;;  %380 = vst [vmem:[#allocation4 + $0x20] sm:$0xff] (!%p6530_p6), %v8910_v0 }
  0x3b   : > { %381 = vst [vmem:[#allocation4 + $0x28] sm:$0xff] (!%p6530_p6), %v8910_v0  ;;  %382 = vst [vmem:[#allocation4 + $0x30] sm:$0xff] (!%p6530_p6), %v8910_v0 }
  0x3c   : > { %383 = vst [vmem:[#allocation4 + $0x38] sm:$0xff] (!%p6530_p6), %v8910_v0  ;;  %384 = vst [vmem:[#allocation4 + $0x40] sm:$0xff] (!%p6530_p6), %v8910_v0 }
  0x3d   : > { %385 = vst [vmem:[#allocation4 + $0x48] sm:$0xff] (!%p6530_p6), %v8910_v0  ;;  %386 = vst [vmem:[#allocation4 + $0x50] sm:$0xff] (!%p6530_p6), %v8910_v0 }
  0x3e   : > { %387 = vst [vmem:[#allocation4 + $0x58] sm:$0xff] (!%p6530_p6), %v8910_v0  ;;  %388 = vst [vmem:[#allocation4 + $0x60] sm:$0xff] (!%p6530_p6), %v8910_v0 }
  0x3f   : > { %389 = vst [vmem:[#allocation4 + $0x68] sm:$0xff] %v8910_v0  ;;  %390 = vst [vmem:[#allocation4 + $0x70] sm:$0xff] %v8910_v0 }
  0x40   : > { %391 = vst [vmem:[#allocation4 + $0x78] sm:$0xff] %v8910_v0  ;;  %392 = vst [vmem:[#allocation5] sm:$0xff] %v8910_v0 }
  0x41   : > { %393 = vst [vmem:[#allocation5 + $0x8] sm:$0xff] %v8910_v0  ;;  %394 = vst [vmem:[#allocation5 + $0x10] sm:$0xff] %v8910_v0 }
  0x42   : > { %395 = vst [vmem:[#allocation5 + $0x18] sm:$0xff] %v8910_v0  ;;  %396 = vst [vmem:[#allocation5 + $0x20] sm:$0xff] %v8910_v0 }
  0x43   : > { %397 = vst [vmem:[#allocation5 + $0x28] sm:$0xff] %v8910_v0  ;;  %398 = vst [vmem:[#allocation5 + $0x30] sm:$0xff] %v8910_v0 }
  0x44   : > { %399 = vst [vmem:[#allocation5 + $0x38] sm:$0xff] %v8910_v0  ;;  %400 = vst [vmem:[#allocation5 + $0x40] sm:$0xff] %v8910_v0 }
  0x45   : > { %401 = vst [vmem:[#allocation5 + $0x48] sm:$0xff] %v8910_v0  ;;  %402 = vst [vmem:[#allocation5 + $0x50] sm:$0xff] %v8910_v0 }
  0x46   : > { %403 = vst [vmem:[#allocation5 + $0x58] sm:$0xff] %v8910_v0  ;;  %404 = vst [vmem:[#allocation5 + $0x60] sm:$0xff] %v8910_v0 }
  0x47   : > { %405 = vst [vmem:[#allocation5 + $0x68] sm:$0xff] %v8910_v0  ;;  %406 = vst [vmem:[#allocation5 + $0x70] sm:$0xff] %v8910_v0 }
  0x48   : > { %407 = vst [vmem:[#allocation5 + $0x78] sm:$0xff] %v8910_v0 }
  0x49 PF: > { %v8666_v1 = vld [vmem:[%s11538_s2 + $0x40] sm:$0xff]   ;;  %v8667_v2 = vld [vmem:[%s11538_s2 + $0x48] sm:$0xff]   ;;  %v8668_v3 = vld [vmem:[%s11538_s2 + $0x50] sm:$0xff]   ;;  %vm448_vm0 = vsmask.f32 3328  ;;  %v11630_v28 = vmov 0 }
  0x4a   : > { %7653 = vmatprep.subr.bf16.mxu0 %v8666_v1  ;;  %7941 = vmatprep.subr.bf16.mxu1 %v8666_v1  ;;  %v8669_v4 = vld [vmem:[%s11538_s2 + $0x58] sm:$0xff]   ;;  %v9127_v5 = vld [vmem:[%s9100_s22] sm:$0xf]  ;;  %v9130_v6 = vld [vmem:[%s9100_s22 + $0x4] sm:$0xf]  ;;  %vm1054_vm3 = vcmask 1042432  }
  0x4b   : > { %7654 = vmatpush3.bf16.msra.mxu0 %v8666_v1  ;;  %7942 = vmatpush3.bf16.msra.mxu1 %v8666_v1  ;;  %v9133_v7 = vld [vmem:[%s9100_s22 + $0x8] sm:$0x1]  ;;  %vm449_vm1 = vsmask.f32 7440  ;;  %v452_v8 = vshrl.u32 %v9127_v5, 16  ;;  %v455_v9 = vshll.u32 %v9127_v5, 16 }
  0x4c   : > { %7655 = vmatprep.subr.bf16.mxu0 %v8667_v2  ;;  %7943 = vmatprep.subr.bf16.mxu1 %v8667_v2  ;;  %v461_v10 = vshll.u32 %v9130_v6, 16  ;;  %v465_v11 = vshrl.u32 %v9130_v6, 16  ;;  %v471_v12 = vshll.u32 %v9133_v7, 16  ;;  %v9141_v13 = vld [vmem:[%s9105_s13 + $0xf0] sm:$0xf]  ;;  %v8670_v18 = vld [vmem:[%s11538_s2 + $0x60] sm:$0xff]   ;;  %vm9164_vm2 = vmor %vm448_vm0, %vm449_vm1 }
  0x4d   : > { %v454_v14 = vrot.slane %v452_v8, 4  ;;  %v457_v15 = vrot.slane %v455_v9, 5  ;;  %v9144_v16 = vld [vmem:[%s9105_s13 + $0xf4] sm:$0xf]  ;;  %v9147_v17 = vld [vmem:[%s9105_s13 + $0xf8] sm:$0x1] }
  0x4e   : > { %v463_v19 = vrot.slane %v461_v10, 5  ;;  %v467_v20 = vrot.slane %v465_v11, 4  ;;  %v3321_v21 = vshrl.u32 %v9141_v13, 16  ;;  %v3324_v23 = vshll.u32 %v9141_v13, 16  ;;  %v9157_v26 = vld [vmem:[%s9100_s22 + $0xc] sm:$0xf] }
  0x4f   : > { %7656 = vmatpush3.bf16.msra.mxu0 %v8667_v2  ;;  %7944 = vmatpush3.bf16.msra.mxu1 %v8667_v2  ;;  %v458_v22 = vor.u32 %v457_v15, %v454_v14  ;;  %v3330_v24 = vshll.u32 %v9144_v16, 16  ;;  %v3334_v25 = vshrl.u32 %v9144_v16, 16  ;;  %v8671_v27 = vld [vmem:[%s11538_s2 + $0x68] sm:$0xff]   ;;  %v11631_v28 = vsel %vm9164_vm2, 4294967295, %v11630_v28  ;;  %v9170_v33 = vld [vmem:[%s9100_s22 + $0x10] sm:$0xf] }
  0x50   : > { %7657 = vmatprep.subr.bf16.mxu0 %v8668_v3  ;;  %7945 = vmatprep.subr.bf16.mxu1 %v8668_v3  ;;  %11632 = vst [vmem:[#allocation28_spill] sm:$0xff] %v11631_v28  ;;  %v468_v29 = vor.u32 %v467_v20, %v463_v19  ;;  %v473_v30 = vrot.slane %v471_v12, 5  ;;  %v3323_v31 = vrot.slane %v3321_v21, 4  ;;  %v3340_v32 = vshll.u32 %v9147_v17, 16  ;;  %v9177_v45 = vld [vmem:[%s9100_s22 + $0x14] sm:$0x1] }
  0x51   : > { %v459_v34 = vrot.slane %v458_v22, 4  ;;  %v3326_v35 = vrot.slane %v3324_v23, 5  ;;  %v3332_v36 = vrot.slane %v3330_v24, 5  ;;  %v3336_v37 = vrot.slane %v3334_v25, 4  ;;  %v9184_v51 = vld [vmem:[%s9105_s13 + $0xfc] sm:$0xf] }
  0x52   : > { %v469_v38 = vrot.slane %v468_v29, 4  ;;  %v3342_v39 = vrot.slane %v3340_v32, 5  ;;  %v476_v40 = vshrl.u32 %v9157_v26, 16  ;;  %v479_v41 = vshll.u32 %v9157_v26, 16  ;;  %v8672_v52 = vld [vmem:[%s11538_s2 + $0x70] sm:$0xff]   ;;  %p7196_p8 = scmp.ne.s32.totalorder %s8892_s30, 1 }
  0x53   : > { %7658 = vmatpush3.bf16.msra.mxu0 %v8668_v3  ;;  %7946 = vmatpush3.bf16.msra.mxu1 %v8668_v3  ;;  %v464_v42 = vsel %vm9164_vm2, %v459_v34, %v463_v19  ;;  %v3327_v43 = vor.u32 %v3326_v35, %v3323_v31  ;;  %v3337_v44 = vor.u32 %v3336_v37, %v3332_v36  ;;  %v485_v46 = vshll.u32 %v9170_v33, 16  ;;  %v9191_v60 = vld [vmem:[%s9105_s13 + $0x100] sm:$0xf]  ;;  %v9198_v63 = vld [vmem:[%s9105_s13 + $0x104] sm:$0x1] }
  0x54   : > { %7659 = vmatprep.subr.bf16.mxu0 %v8669_v4  ;;  %7947 = vmatprep.subr.bf16.mxu1 %v8669_v4  ;;  %v474_v47 = vsel %vm9164_vm2, %v469_v38, %v473_v30  ;;  %v478_v48 = vrot.slane %v476_v40, 4  ;;  %v481_v49 = vrot.slane %v479_v41, 5  ;;  %v489_v50 = vshrl.u32 %v9170_v33, 16  ;;  %v9203_v9 = vld [vmem:[%s9100_s22 + $0x18] sm:$0xf]  ;;  %v8674_v30 = vld [vmem:[%s11538_s2] sm:$0xff]  }
  0x55   : > { %v6547_v53 = vcombine.low %v464_v42, %v474_v47  ;;  %v3328_v54 = vrot.slane %v3327_v43, 4  ;;  %v3338_v55 = vrot.slane %v3337_v44, 4  ;;  %v487_v56 = vrot.slane %v485_v46, 5  ;;  %v9208_v15 = vld [vmem:[%s9100_s22 + $0x1c] sm:$0xf] }
  0x56   : > { %v482_v57 = vor.u32 %v481_v49, %v478_v48  ;;  %v491_v58 = vrot.slane %v489_v50, 4  ;;  %v495_v59 = vshll.u32 %v9177_v45, 16  ;;  %v3345_v0 = vshrl.u32 %v9184_v51, 16  ;;  %v9217_v25 = vld [vmem:[%s9100_s22 + $0x20] sm:$0x1] }
  0x57   : > { %7660 = vmatpush3.bf16.msra.mxu0 %v8669_v4  ;;  %7948 = vmatpush3.bf16.msra.mxu1 %v8669_v4  ;;  %v3333_v61 = vsel %vm9164_vm2, %v3328_v54, %v3332_v36  ;;  %v3343_v62 = vsel %vm9164_vm2, %v3338_v55, %v3342_v39  ;;  %v3348_v1 = vshll.u32 %v9184_v51, 16  ;;  %v3354_v12 = vshll.u32 %v9191_v60, 16  ;;  %v9228_v35 = vld [vmem:[%s9105_s13 + $0x108] sm:$0xf]  ;;  %v9231_v40 = vld [vmem:[%s9105_s13 + $0x10c] sm:$0xf] }
  0x58   : > { %7661 = vmatprep.subr.bf16.mxu0 %v8670_v18  ;;  %7949 = vmatprep.subr.bf16.mxu1 %v8670_v18  ;;  %v6948_v2 = vcombine.low %v3333_v61, %v3343_v62  ;;  %v483_v3 = vrot.slane %v482_v57, 4  ;;  %v492_v4 = vor.u32 %v491_v58, %v487_v56  ;;  %v497_v8 = vrot.slane %v495_v59, 5  ;;  %v9238_v48 = vld [vmem:[%s9105_s13 + $0x110] sm:$0x1]  ;;  %v8675_v58 = vld [vmem:[%s11538_s2 + $0x8] sm:$0xff]  }
  0x59   : > { %7669 = vmatprep.mubr.bf16.mxu0 %v6547_v53  ;;  %v3347_v10 = vrot.slane %v3345_v0, 4  ;;  %v3350_v11 = vrot.slane %v3348_v1, 5  ;;  %v3358_v14 = vshrl.u32 %v9191_v60, 16  ;;  %v3364_v21 = vshll.u32 %v9198_v63, 16  ;;  %11633 = vst [vmem:[#allocation29_spill] sm:$0xff] %v9238_v48 }
  0x5a   : > { %v488_v19 = vsel %vm9164_vm2, %v483_v3, %v487_v56  ;;  %v493_v20 = vrot.slane %v492_v4, 4  ;;  %7957 = vmatprep.mubr.bf16.mxu1 %v6948_v2  ;;  %v3356_v23 = vrot.slane %v3354_v12, 5  ;;  %v503_v32 = vshll.u32 %v9203_v9, 16  ;;  %v9244_v56 = vld [vmem:[%s9100_s22 + $0x24] sm:$0xf] }
  0x5b   : > { %7662 = vmatpush3.bf16.msra.mxu0 %v8670_v18  ;;  %7950 = vmatpush3.bf16.msra.mxu1 %v8670_v18  ;;  %v8673_v18 = vld [vmem:[%s11538_s2 + $0x78] sm:$0xff]   ;;  %v3351_v22 = vor.u32 %v3350_v11, %v3347_v10  ;;  %v3360_v24 = vrot.slane %v3358_v14, 4  ;;  %v3366_v31 = vrot.slane %v3364_v21, 5  ;;  %v509_v34 = vshll.u32 %v9208_v15, 16  ;;  %v9253_v0 = vld [vmem:[%s9100_s22 + $0x28] sm:$0xf] }
  0x5c   : > { %7663 = vmatprep.subr.bf16.mxu0 %v8671_v27  ;;  %7951 = vmatprep.subr.bf16.mxu1 %v8671_v27  ;;  %v498_v29 = vsel %vm9164_vm2, %v493_v20, %v497_v8  ;;  %v505_v41 = vrot.slane %v503_v32, 5  ;;  %v513_v43 = vshrl.u32 %v9208_v15, 16  ;;  %v519_v44 = vshll.u32 %v9217_v25, 16 }
  0x5d   : > { %v6548_v36 = vcombine.low %v488_v19, %v498_v29  ;;  %v3352_v37 = vrot.slane %v3351_v22, 4  ;;  %v3361_v38 = vor.u32 %v3360_v24, %v3356_v23  ;;  %v511_v42 = vrot.slane %v509_v34, 5  ;;  %v9260_v19 = vld [vmem:[%s9100_s22 + $0x2c] sm:$0x1]  ;;  %v9265_v29 = vld [vmem:[%s9105_s13 + $0x114] sm:$0xf] }
  0x5e   : > { %v3369_v49 = vshrl.u32 %v9228_v35, 16  ;;  %v3372_v50 = vshll.u32 %v9228_v35, 16  ;;  %v515_v53 = vrot.slane %v513_v43, 4  ;;  %v521_v54 = vrot.slane %v519_v44, 5  ;;  %11634 = vst [vmem:[#allocation30_spill] sm:$0xff] %v9260_v19 }
  0x5f   : > { %7664 = vmatpush3.bf16.msra.mxu0 %v8671_v27  ;;  %7952 = vmatpush3.bf16.msra.mxu1 %v8671_v27  ;;  %v500_v27 = vshrl.u32 %v9203_v9, 16  ;;  %v3357_v46 = vsel %vm9164_vm2, %v3352_v37, %v3356_v23  ;;  %v3362_v47 = vrot.slane %v3361_v38, 4  ;;  %v3378_v55 = vshll.u32 %v9231_v40, 16  ;;  %v9274_v37 = vld [vmem:[%s9105_s13 + $0x118] sm:$0xf] }
  0x60   : > { %7665 = vmatprep.subr.bf16.mxu0 %v8672_v52  ;;  %7953 = vmatprep.subr.bf16.mxu1 %v8672_v52  ;;  %v3371_v59 = vrot.slane %v3369_v49, 4  ;;  %v3374_v61 = vrot.slane %v3372_v50, 5  ;;  %v3382_v62 = vshrl.u32 %v9231_v40, 16  ;;  %v516_v3 = vor.u32 %v515_v53, %v511_v42 }
  0x61   : > { %v502_v39 = vrot.slane %v500_v27, 4  ;;  %v3367_v57 = vsel %vm9164_vm2, %v3362_v47, %v3366_v31  ;;  %v3380_v4 = vrot.slane %v3378_v55, 5  ;;  %v3388_v11 = vshll.u32 %v9238_v48, 16  ;;  %v8677_v55 = vld [vmem:[%s11538_s2 + $0x18] sm:$0xff]  }
  0x62   : > { %v6949_v1 = vcombine.low %v3357_v46, %v3367_v57  ;;  %v3375_v8 = vor.u32 %v3374_v61, %v3371_v59  ;;  %v3384_v10 = vrot.slane %v3382_v62, 4  ;;  %v524_v12 = vshrl.u32 %v9244_v56, 16  ;;  %v9280_v46 = vld [vmem:[%s9105_s13 + $0x11c] sm:$0x1]  ;;  %v9292_v57 = vld [vmem:[%s9100_s22 + $0x30] sm:$0xf] }
  0x63   : > { %7666 = vmatpush3.bf16.msra.mxu0 %v8672_v52  ;;  %7954 = vmatpush3.bf16.msra.mxu1 %v8672_v52  ;;  %v506_v52 = vor.u32 %v505_v41, %v502_v39  ;;  %v527_v20 = vshll.u32 %v9244_v56, 16  ;;  %v533_v21 = vshll.u32 %v9253_v0, 16  ;;  %v3390_v24 = vrot.slane %v3388_v11, 5  ;;  %11635 = vst [vmem:[#allocation31_spill] sm:$0xff] %v9280_v46 }
  0x64   : > { %7667 = vmatprep.subr.bf16.mxu0 %v8673_v18  ;;  %7955 = vmatprep.subr.bf16.mxu1 %v8673_v18  ;;  %v3376_v22 = vrot.slane %v3375_v8, 4  ;;  %v3385_v23 = vor.u32 %v3384_v10, %v3380_v4  ;;  %v526_v27 = vrot.slane %v524_v12, 4  ;;  %v3393_v47 = vshrl.u32 %v9265_v29, 16  ;;  %v9301_v12 = vld [vmem:[%s9100_s22 + $0x38] sm:$0x1] }
  0x65   : > { %v507_v2 = vrot.slane %v506_v52, 4  ;;  %v529_v32 = vrot.slane %v527_v20, 5  ;;  %v535_v34 = vrot.slane %v533_v21, 5  ;;  %v3396_v49 = vshll.u32 %v9265_v29, 16  ;;  %11636 = vst [vmem:[#allocation32_spill] sm:$0xff] %v9301_v12 }
  0x66   : > { %v3381_v39 = vsel %vm9164_vm2, %v3376_v22, %v3380_v4  ;;  %v3386_v41 = vrot.slane %v3385_v23, 4  ;;  %v3402_v53 = vshll.u32 %v9274_v37, 16  ;;  %v3412_v8 = vshll.u32 %v9280_v46, 16 }
  0x67   : > { %7668 = vmatpush3.bf16.msra.mxu0 %v8673_v18  ;;  %7956 = vmatpush3.bf16.msra.mxu1 %v8673_v18  ;;  %v512_v14 = vsel %vm9164_vm2, %v507_v2, %v511_v42  ;;  %v517_v18 = vrot.slane %v516_v3, 4  ;;  %v543_v42 = vshll.u32 %v9260_v19, 16  ;;  %v530_v43 = vor.u32 %v529_v32, %v526_v27  ;;  %v9310_v27 = vld [vmem:[%s9105_s13 + $0x124] sm:$0xf] }
  0x68   : > { %7685 = vmatprep.subr.bf16.mxu0 %v8674_v30  ;;  %7973 = vmatprep.subr.bf16.mxu1 %v8674_v30  ;;  %v3391_v50 = vsel %vm9164_vm2, %v3386_v41, %v3390_v24  ;;  %v3398_v2 = vrot.slane %v3396_v49, 5  ;;  %v3404_v3 = vrot.slane %v3402_v53, 5  ;;  %v3414_v22 = vrot.slane %v3412_v8, 5  ;;  %v9307_v24 = vld [vmem:[%s9105_s13 + $0x120] sm:$0xf] }
  0x69   : > { %v522_v31 = vsel %vm9164_vm2, %v517_v18, %v521_v54  ;;  %v545_v52 = vrot.slane %v543_v42, 5  ;;  %v3406_v54 = vshrl.u32 %v9274_v37, 16  ;;  %v6950_v59 = vcombine.low %v3381_v39, %v3391_v50  ;;  %v9325_v53 = vld [vmem:[%s9105_s13 + $0x128] sm:$0x1]  ;;  %v9333_v8 = vld [vmem:[%s9100_s22 + $0x40] sm:$0xf] }
  0x6a   : > { %7670 = vmatmul.mubr.bf16.vlgmr.msra.gmra.mrb[0].mxu0 %v6548_v36  ;;  %7958 = vmatmul.mubr.bf16.vlgmr.msra.gmra.mrb[0].mxu1 %v6949_v1  ;;  %v537_v36 = vshrl.u32 %v9253_v0, 16  ;;  %v6549_v38 = vcombine.low %v512_v14, %v522_v31  ;;  %v531_v61 = vrot.slane %v530_v43, 4  ;;  %v9295_v1 = vld [vmem:[%s9100_s22 + $0x34] sm:$0xf]  ;;  %v548_v14 = vshrl.u32 %v9292_v57, 16  ;;  %11637 = vst [vmem:[#allocation33_spill] sm:$0xff] %v9325_v53 }
  0x6b   : > { %7686 = vmatpush3.bf16.msra.mxu0 %v8674_v30  ;;  %7974 = vmatpush3.bf16.msra.mxu1 %v8674_v30  ;;  %v8676_v30 = vld [vmem:[%s11538_s2 + $0x10] sm:$0xff]   ;;  %v3408_v4 = vrot.slane %v3406_v54, 4  ;;  %v551_v18 = vshll.u32 %v9292_v57, 16  ;;  %v557_v23 = vshll.u32 %v9295_v1, 16  ;;  %v3417_v49 = vshrl.u32 %v9307_v24, 16 }
  0x6c   : > { %7687 = vmatprep.subr.bf16.mxu0 %v8675_v58  ;;  %7975 = vmatprep.subr.bf16.mxu1 %v8675_v58  ;;  %v539_v44 = vrot.slane %v537_v36, 4  ;;  %v536_v10 = vsel %vm9164_vm2, %v531_v61, %v535_v34  ;;  %v550_v32 = vrot.slane %v548_v14, 4  ;;  %v561_v36 = vshrl.u32 %v9295_v1, 16  ;;  %v9330_v61 = vld [vmem:[%s9100_s22 + $0x3c] sm:$0xf] }
  0x6d   : > { %7673 = vmatprep.mubr.bf16.mxu0 %v6549_v38  ;;  %7961 = vmatprep.mubr.bf16.mxu1 %v6950_v59  ;;  %v3409_v21 = vor.u32 %v3408_v4, %v3404_v3  ;;  %v559_v42 = vrot.slane %v557_v23, 5  ;;  %v3420_v54 = vshll.u32 %v9307_v24, 16  ;;  %v3426_v59 = vshll.u32 %v9310_v27, 16 }
  0x6e   : > { %v540_v62 = vor.u32 %v539_v44, %v535_v34  ;;  %v553_v34 = vrot.slane %v551_v18, 5  ;;  %v563_v44 = vrot.slane %v561_v36, 4  ;;  %v3430_v18 = vshrl.u32 %v9310_v27, 16 }
  0x6f   : > { %7688 = vmatpush3.bf16.msra.mxu0 %v8675_v58  ;;  %7976 = vmatpush3.bf16.msra.mxu1 %v8675_v58  ;;  %v3395_v58 = vrot.slane %v3393_v47, 4  ;;  %v3410_v41 = vrot.slane %v3409_v21, 4  ;;  %v567_v47 = vshll.u32 %v9301_v12, 16  ;;  %v3428_v14 = vrot.slane %v3426_v59, 5 }
  0x70   : > { %7689 = vmatprep.subr.bf16.mxu0 %v8676_v30  ;;  %7977 = vmatprep.subr.bf16.mxu1 %v8676_v30  ;;  %v541_v11 = vrot.slane %v540_v62, 4  ;;  %v554_v43 = vor.u32 %v553_v34, %v550_v32  ;;  %v3436_v21 = vshll.u32 %v9325_v53, 16  ;;  %v572_v23 = vshrl.u32 %v9330_v61, 16 }
  0x71   : > { %v3399_v20 = vor.u32 %v3398_v2, %v3395_v58  ;;  %v564_v2 = vor.u32 %v563_v44, %v559_v42  ;;  %v569_v4 = vrot.slane %v567_v47, 5  ;;  %v3432_v32 = vrot.slane %v3430_v18, 4  ;;  %v9355_v44 = vld [vmem:[%s9105_s13 + $0x130] sm:$0xf] }
  0x72   : > { %v546_v31 = vsel %vm9164_vm2, %v541_v11, %v545_v52  ;;  %v3415_v52 = vsel %vm9164_vm2, %v3410_v41, %v3414_v22  ;;  %v555_v58 = vrot.slane %v554_v43, 4  ;;  %v3422_v11 = vrot.slane %v3420_v54, 5  ;;  %v9343_v22 = vld [vmem:[%s9100_s22 + $0x44] sm:$0x1]  ;;  %v8680_v47 = vld [vmem:[%s11538_s2 + $0x30] sm:$0xff]  }
  0x73   : > { %7690 = vmatpush3.bf16.msra.mxu0 %v8676_v30  ;;  %7978 = vmatpush3.bf16.msra.mxu1 %v8676_v30  ;;  %v8678_v30 = vld [vmem:[%s11538_s2 + $0x20] sm:$0xff]   ;;  %v6550_v38 = vcombine.low %v536_v10, %v546_v31  ;;  %v3400_v39 = vrot.slane %v3399_v20, 4  ;;  %v3419_v10 = vrot.slane %v3417_v49, 4  ;;  %v565_v20 = vrot.slane %v564_v2, 4  ;;  %11638 = vst [vmem:[#allocation34_spill] sm:$0xff] %v9343_v22 }
  0x74   : > { %7691 = vmatprep.subr.bf16.mxu0 %v8677_v55  ;;  %7979 = vmatprep.subr.bf16.mxu1 %v8677_v55  ;;  %v575_v34 = vshll.u32 %v9330_v61, 16  ;;  %v581_v36 = vshll.u32 %v9333_v8, 16  ;;  %v3438_v41 = vrot.slane %v3436_v21, 5  ;;  %v585_v43 = vshrl.u32 %v9333_v8, 16  ;;  %v9362_v2 = vld [vmem:[%s9105_s13 + $0x134] sm:$0x1] }
  0x75   : > { %7674 = vmatmul.mubr.bf16.gmra.mrb[4].mxu0 %v6550_v38  ;;  %v3405_v50 = vsel %vm9164_vm2, %v3400_v39, %v3404_v3  ;;  %v8679_v3 = vld [vmem:[%s11538_s2 + $0x28] sm:$0xff]   ;;  %v3423_v31 = vor.u32 %v3422_v11, %v3419_v10  ;;  %v570_v39 = vsel %vm9164_vm2, %v565_v20, %v569_v4  ;;  %11639 = vst [vmem:[#allocation35_spill] sm:$0xff] %v9362_v2  ;;  %vm1055_vm4 = vcmask 1046532  }
  0x76   : > { %v6951_v62 = vcombine.low %v3405_v50, %v3415_v52  ;;  %v9349_v38 = vld [vmem:[%s9105_s13 + $0x12c] sm:$0xf]  ;;  %v3433_v52 = vor.u32 %v3432_v32, %v3428_v14  ;;  %v577_v54 = vrot.slane %v575_v34, 5  ;;  %v583_v59 = vrot.slane %v581_v36, 5  ;;  %vm9498_vm5 = vmor %vm1054_vm3, %vm1055_vm4 }
  0x77   : > { %7980 = vmatpush3.bf16.msra.mxu1 %v8677_v55  ;;  %7692 = vmatpush3.bf16.msra.mxu0 %v8677_v55  ;;  %v560_v55 = vsel %vm9164_vm2, %v555_v58, %v559_v42  ;;  %v574_v42 = vrot.slane %v572_v23, 4  ;;  %v3424_v50 = vrot.slane %v3423_v31, 4  ;;  %v591_v58 = vshll.u32 %v9343_v22, 16  ;;  %v9372_v20 = vld [vmem:[%s9100_s22 + $0x4c] sm:$0xf] }
  0x78   : > { %7981 = vmatprep.subr.bf16.mxu1 %v8678_v30  ;;  %7693 = vmatprep.subr.bf16.mxu0 %v8678_v30  ;;  %v6551_v49 = vcombine.low %v560_v55, %v570_v39  ;;  %v3434_v10 = vrot.slane %v3433_v52, 4  ;;  %v3444_v18 = vshll.u32 %v9349_v38, 16  ;;  %v9369_v55 = vld [vmem:[%s9100_s22 + $0x48] sm:$0xf]  ;;  %v3450_v32 = vshll.u32 %v9355_v44, 16 }
  0x79   : > { %7962 = vmatmul.mubr.bf16.gmra.mrb[4].mxu1 %v6951_v62  ;;  %v587_v62 = vrot.slane %v585_v43, 4  ;;  %v3429_v4 = vsel %vm9164_vm2, %v3424_v50, %v3428_v14  ;;  %v578_v11 = vor.u32 %v577_v54, %v574_v42  ;;  %v593_v23 = vrot.slane %v591_v58, 5  ;;  %v9379_v42 = vld [vmem:[%s9100_s22 + $0x50] sm:$0x1]  ;;  %v8681_v43 = vld [vmem:[%s11538_s2 + $0x38] sm:$0xff]  }
  0x7a   : > { %7677 = vmatprep.mubr.bf16.mxu0 %v6551_v49  ;;  %v3439_v14 = vsel %vm9164_vm2, %v3434_v10, %v3438_v41  ;;  %v3446_v36 = vrot.slane %v3444_v18, 5  ;;  %v3454_v39 = vshrl.u32 %v9355_v44, 16  ;;  %11640 = vst [vmem:[#allocation36_spill] sm:$0xff] %v9379_v42  ;;  %v3452_v52 = vrot.slane %v3450_v32, 5  ;;  %v9386_v54 = vld [vmem:[%s9105_s13 + $0x138] sm:$0xf] }
  0x7b   : > { %7982 = vmatpush3.bf16.msra.mxu1 %v8678_v30  ;;  %7694 = vmatpush3.bf16.msra.mxu0 %v8678_v30  ;;  %v3441_v30 = vshrl.u32 %v9349_v38, 16  ;;  %v588_v21 = vor.u32 %v587_v62, %v583_v59  ;;  %v579_v34 = vrot.slane %v578_v11, 4  ;;  %v6952_v49 = vcombine.low %v3429_v4, %v3439_v14  ;;  %v9392_v10 = vld [vmem:[%s9105_s13 + $0x13c] sm:$0xf] }
  0x7c   : > { %7983 = vmatprep.subr.bf16.mxu1 %v8679_v3  ;;  %7695 = vmatprep.subr.bf16.mxu0 %v8679_v3  ;;  %v3456_v58 = vrot.slane %v3454_v39, 4  ;;  %v599_v18 = vshll.u32 %v9369_v55, 16  ;;  %v609_v39 = vshrl.u32 %v9372_v20, 16  ;;  %vm6124_vm6 = vcmask (!%p7196_p8), 0  }
  0x7d   : > { %v3443_v31 = vrot.slane %v3441_v30, 4  ;;  %v589_v50 = vrot.slane %v588_v21, 4  ;;  %v584_v41 = vsel %vm9164_vm2, %v579_v34, %v583_v59  ;;  %v596_v30 = vshrl.u32 %v9369_v55, 16  ;;  %7965 = vmatprep.mubr.bf16.mxu1 %v6952_v49  ;;  %v9401_v59 = vld [vmem:[%s11538_s2 + $0x80] sm:$0xff]  }
  0x7e   : > { %v605_v21 = vshll.u32 %v9372_v20, 16  ;;  %v3457_v14 = vor.u32 %v3456_v58, %v3452_v52  ;;  %v615_v49 = vshll.u32 %v9379_v42, 16  ;;  %v3468_v58 = vshll.u32 %v9386_v54, 16 }
  0x7f   : > { %7984 = vmatpush3.bf16.msra.mxu1 %v8679_v3  ;;  %7696 = vmatpush3.bf16.msra.mxu0 %v8679_v3  ;;  %v3460_v3 = vshll.u32 %v9362_v2, 16  ;;  %v3447_v62 = vor.u32 %v3446_v36, %v3443_v31  ;;  %v594_v4 = vsel %vm9164_vm2, %v589_v50, %v593_v23  ;;  %v598_v34 = vrot.slane %v596_v30, 4  ;;  %v9406_v50 = vld [vmem:[%s9105_s13 + $0x140] sm:$0x1]  ;;  %v9416_v30 = vld [vmem:[%s9100_s22 + $0x58] sm:$0xf] }
  0x80   : > { %7985 = vmatprep.subr.bf16.mxu1 %v8680_v47  ;;  %7697 = vmatprep.subr.bf16.mxu0 %v8680_v47  ;;  %v6552_v31 = vcombine.low %v584_v41, %v594_v4  ;;  %v601_v23 = vrot.slane %v599_v18, 5  ;;  %v607_v36 = vrot.slane %v605_v21, 5  ;;  %11641 = vst [vmem:[#allocation37_spill] sm:$0xff] %v9406_v50  ;;  %v3458_v41 = vrot.slane %v3457_v14, 4 }
  0x81   : > { %v3462_v11 = vrot.slane %v3460_v3, 5  ;;  %v3448_v32 = vrot.slane %v3447_v62, 4  ;;  %v3465_v62 = vshrl.u32 %v9386_v54, 16  ;;  %v611_v18 = vrot.slane %v609_v39, 4 }
  0x82   : > { %7678 = vmatmul.mubr.bf16.gmra.mrb[8].mxu0 %v6552_v31  ;;  %v602_v4 = vor.u32 %v601_v23, %v598_v34  ;;  %v617_v21 = vrot.slane %v615_v49, 5  ;;  %v3474_v42 = vshll.u32 %v9392_v10, 16  ;;  %v3478_v14 = vshrl.u32 %v9392_v10, 16  ;;  %v9425_v49 = vld [vmem:[%s9100_s22 + $0x5c] sm:$0x1] }
  0x83   : > { %7986 = vmatpush3.bf16.msra.mxu1 %v8680_v47  ;;  %7698 = vmatpush3.bf16.msra.mxu0 %v8680_v47  ;;  %v9409_v47 = vld [vmem:[%s9100_s22 + $0x54] sm:$0xf]  ;;  %v3453_v3 = vsel %vm9164_vm2, %v3448_v32, %v3452_v52  ;;  %v3463_v52 = vsel %vm9164_vm2, %v3458_v41, %v3462_v11  ;;  %v3467_v31 = vrot.slane %v3465_v62, 4  ;;  %v3470_v32 = vrot.slane %v3468_v58, 5  ;;  %v9430_v11 = vld [vmem:[%s9105_s13 + $0x144] sm:$0xf] }
  0x84   : > { %7699 = vmatprep.subr.bf16.mxu0 %v8681_v43  ;;  %7987 = vmatprep.subr.bf16.mxu1 %v8681_v43  ;;  %v6953_v2 = vcombine.low %v3453_v3, %v3463_v52  ;;  %v603_v34 = vrot.slane %v602_v4, 4  ;;  %v612_v23 = vor.u32 %v611_v18, %v607_v36  ;;  %v3476_v39 = vrot.slane %v3474_v42, 5  ;;  %v9437_v42 = vld [vmem:[%s9105_s13 + $0x148] sm:$0xf] }
  0x85   : > { %v3480_v22 = vrot.slane %v3478_v14, 4  ;;  %v3484_v53 = vshll.u32 %v9406_v50, 16  ;;  %v620_v12 = vshrl.u32 %v9409_v47, 16  ;;  %v623_v3 = vshll.u32 %v9409_v47, 16 }
  0x86   : > { %7966 = vmatmul.mubr.bf16.gmra.mrb[8].mxu1 %v6953_v2  ;;  %v608_v41 = vsel %vm9164_vm2, %v603_v34, %v607_v36  ;;  %v613_v62 = vrot.slane %v612_v23, 4  ;;  %v629_v58 = vshll.u32 %v9416_v30, 16  ;;  %v633_v50 = vshrl.u32 %v9416_v30, 16 }
  0x87   : > { %7988 = vmatpush3.bf16.msra.mxu1 %v8681_v43  ;;  %7700 = vmatpush3.bf16.msra.mxu0 %v8681_v43  ;;  %v3471_v43 = vor.u32 %v3470_v32, %v3467_v31  ;;  %v3481_v18 = vor.u32 %v3480_v22, %v3476_v39  ;;  %v3486_v52 = vrot.slane %v3484_v53, 5  ;;  %v622_v31 = vrot.slane %v620_v12, 4 }
  0x88   : > { %8005 = vmatprep.subr.bf16.mxu1 %v9401_v59  ;;  %7717 = vmatprep.subr.bf16.mxu0 %v9401_v59  ;;  %v618_v32 = vsel %vm9164_vm2, %v613_v62, %v617_v21  ;;  %v625_v14 = vrot.slane %v623_v3, 5  ;;  %v631_v2 = vrot.slane %v629_v58, 5  ;;  %v639_v46 = vshll.u32 %v9425_v49, 16 }
  0x89   : > { %v3472_v4 = vrot.slane %v3471_v43, 4  ;;  %v6553_v36 = vcombine.low %v608_v41, %v618_v32  ;;  %v3482_v23 = vrot.slane %v3481_v18, 4  ;;  %v635_v48 = vrot.slane %v633_v50, 4  ;;  %v9446_v43 = vld [vmem:[%s9105_s13 + $0x14c] sm:$0x1] }
  0x8a   : > { %v626_v19 = vor.u32 %v625_v14, %v622_v31  ;;  %v3489_v12 = vshrl.u32 %v9430_v11, 16  ;;  %v3492_v53 = vshll.u32 %v9430_v11, 16  ;;  %v641_v21 = vrot.slane %v639_v46, 5 }
  0x8b   : > { %v3477_v34 = vsel %vm9164_vm2, %v3472_v4, %v3476_v39  ;;  %7681 = vmatprep.mubr.bf16.mxu0 %v6553_v36  ;;  %v3487_v22 = vsel %vm9164_vm2, %v3482_v23, %v3486_v52  ;;  %v3498_v39 = vshll.u32 %v9437_v42, 16  ;;  %v3502_v41 = vshrl.u32 %v9437_v42, 16  ;;  %v9516_v36 = vld [vmem:[%s11538_s2 + $0x88] sm:$0xff]  }
  0x8c   : > { %v6954_v62 = vcombine.low %v3477_v34, %v3487_v22  ;;  %v627_v3 = vrot.slane %v626_v19, 4  ;;  %v636_v50 = vor.u32 %v635_v48, %v631_v2  ;;  %v3491_v58 = vrot.slane %v3489_v12, 4  ;;  %v6966_v12 = vld [vmem:[%s9105_s13 + $0x108] sm:$0xe] }
  0x8d   : > { %v3494_v4 = vrot.slane %v3492_v53, 5  ;;  %v3500_v18 = vrot.slane %v3498_v39, 5  ;;  %v3504_v31 = vrot.slane %v3502_v41, 4  ;;  %v3508_v32 = vshll.u32 %v9446_v43, 16 }
  0x8e   : > { %7969 = vmatprep.mubr.bf16.mxu1 %v6954_v62  ;;  %v632_v46 = vsel %vm9164_vm2, %v627_v3, %v631_v2  ;;  %v637_v52 = vrot.slane %v636_v50, 4  ;;  %v6957_v23 = vcombine.low %v9184_v51, %v9191_v60  ;;  %v3822_v53 = vrot.slane %v9198_v63, 5  ;;  %v9468_v3 = vld [vmem:[%s9100_s22] sm:$0xe]  ;;  %v9471_v50 = vld [vmem:[%s9105_s13 + $0xf0] sm:$0xe] }
  0x8f   : > { %v3495_v19 = vor.u32 %v3494_v4, %v3491_v58  ;;  %v3505_v48 = vor.u32 %v3504_v31, %v3500_v18  ;;  %v3510_v34 = vrot.slane %v3508_v32, 5  ;;  %v6563_v39 = vcombine.low %v9127_v5, %v9130_v6  ;;  %v9474_v58 = vld [vmem:[%s9100_s22 + $0xc] sm:$0xe]  ;;  %v6965_v31 = vld [vmem:[%s9105_s13 + $0xfc] sm:$0xe] }
  0x90   : > { %v642_v22 = vsel %vm9164_vm2, %v637_v52, %v641_v21  ;;  %v6956_v5 = vcombine.low %v9141_v13, %v9144_v16  ;;  %v6564_v4 = vcombine.low %v9157_v26, %v9170_v33  ;;  %v6958_v52 = vcombine.low %v9228_v35, %v9231_v40  ;;  %v1034_v13 = vld [vmem:[%s9100_s22 + $0x30] sm:$0xe] }
  0x91   : > { %v6554_v41 = vcombine.low %v632_v46, %v642_v22  ;;  %v3496_v2 = vrot.slane %v3495_v19, 4  ;;  %v3506_v62 = vrot.slane %v3505_v48, 4  ;;  %v6565_v46 = vcombine.low %v9203_v9, %v9208_v15  ;;  %v1032_v19 = vld [vmem:[%s9100_s22 + $0x18] sm:$0xe] }
  0x92   : > { %v11569_v9 = vrot.slane %v9130_v6, 5  ;;  %v11570_v35 = vrot.slane %v9144_v16, 5 }
  0x93   : > { %7682 = vmatmul.mubr.bf16.gmra.mrb[12].mxu0 %v6554_v41  ;;  %v3501_v63 = vsel %vm9164_vm2, %v3496_v2, %v3500_v18  ;;  %v3511_v21 = vsel %vm9164_vm2, %v3506_v62, %v3510_v34  ;;  %v3819_v41 = vrot.slane %v9191_v60, 5  ;;  %v6967_v2 = vld [vmem:[%s9105_s13 + $0x114] sm:$0xe]  ;;  %v1073_v34 = vrot.slane %v9208_v15, 5 }
  0x94   : > { %v6955_v32 = vcombine.low %v3501_v63, %v3511_v21  ;;  %7701 = vmatprep.mubr.bf16.mxu0 %v6563_v39  ;;  %v6973_v39 = vrot.slane %v6965_v31, 9  ;;  %v11571_v63 = vrot.slane %v9170_v33, 5  ;;  %v6581_v21 = vrot.slane %v1032_v19, 9 }
  0x95   : > { %v9520_v31 = vrot.slane %v11569_v9, 4  ;;  %v3821_v19 = vrot.slane %v3819_v41, 4  ;;  %v1076_v9 = vrot.slane %v9217_v25, 5  ;;  %v8691_v25 = vld [vmem:[%s11538_s2 + $0x90] sm:$0xff]  }
  0x96   : > { %7970 = vmatmul.mubr.bf16.gmra.mrb[12].mxu1 %v6955_v32  ;;  %v1033_v32 = vld [vmem:[%s9100_s22 + $0x24] sm:$0xe]  ;;  %v9528_v62 = vsel %vm9498_vm5, %v6973_v39, %v3819_v41  ;;  %v9550_v15 = vrot.slane %v11571_v63, 4  ;;  %v9556_v22 = vsel %vm9498_vm5, %v6581_v21, %v1073_v34  ;;  %v1075_v39 = vrot.slane %v1073_v34, 4  ;;  %v6968_v63 = vld [vmem:[%s9105_s13 + $0x120] sm:$0xe] }
  0x97   : > { %7989 = vmatprep.mubr.bf16.mxu1 %v6956_v5  ;;  %v9524_v5 = vrot.slane %v11570_v35, 4  ;;  %v9545_v14 = vsel %vm9498_vm5, %v3821_v19, %v3822_v53  ;;  %v6974_v41 = vrot.slane %v6966_v12, 9  ;;  %v3826_v53 = vrot.slane %v9231_v40, 5  ;;  %v11645_v12 = vld [vmem:[#allocation30_spill] sm:$0xff] }
  0x98   : > { %v6582_v35 = vrot.slane %v1033_v32, 9  ;;  %v9568_v34 = vsel %vm9498_vm5, %v1075_v39, %v1076_v9  ;;  %v1083_v21 = vrot.slane %v11645_v12, 5  ;;  %v6975_v40 = vrot.slane %v6967_v2, 9  ;;  %v1035_v39 = vld [vmem:[%s9100_s22 + $0x3c] sm:$0xe] }
  0x99   : > { %v3828_v26 = vrot.slane %v3826_v53, 4  ;;  %v3833_v9 = vrot.slane %v9274_v37, 5  ;;  %v9587_v2 = vld [vmem:[%s11538_s2 + $0x98] sm:$0xff]   ;;  %v6969_v12 = vld [vmem:[%s9105_s13 + $0x12c] sm:$0xe]  ;;  %v1087_v32 = vrot.slane %v9295_v1, 5 }
  0x9b   : > { %7702 = vmatmul.mubr.bf16.vlgmr.msra.gmra.mrb[0].mxu0 %v6564_v4  ;;  %v11644_v4 = vld [vmem:[#allocation29_spill] sm:$0xff] }
  0x9c   : > { %7718 = vmatpush3.bf16.msra.mxu0 %v9401_v59  ;;  %7705 = vmatprep.mubr.bf16.mxu0 %v6565_v46  ;;  %v3829_v19 = vrot.slane %v11644_v4, 5  ;;  %v1080_v46 = vrot.slane %v9253_v0, 5  ;;  %v9579_v4 = vsel %vm9498_vm5, %v6974_v41, %v3826_v53  ;;  %v6583_v53 = vrot.slane %v1034_v13, 9 }
  0x9d   : > { %7719 = vmatprep.subr.bf16.mxu0 %v9516_v36  ;;  %v1089_v13 = vrot.slane %v1087_v32, 4 }
  0x9e   : > { %7990 = vmatmul.mubr.bf16.vlgmr.msra.gmra.mrb[0].mxu1 %v6957_v23  ;;  %v9591_v51 = vsel %vm9498_vm5, %v6582_v35, %v1080_v46  ;;  %v1082_v60 = vrot.slane %v1080_v46, 4  ;;  %v11646_v23 = vld [vmem:[#allocation31_spill] sm:$0xff]  ;;  %v3835_v35 = vrot.slane %v3833_v9, 4  ;;  %v9622_v28 = vsel %vm9498_vm5, %v6583_v53, %v1087_v32  ;;  %v11652_v32 = vld [vmem:[#allocation34_spill] sm:$0xff] }
  0x9f   : > { %8006 = vmatpush3.bf16.msra.mxu1 %v9401_v59  ;;  %7993 = vmatprep.mubr.bf16.mxu1 %v6958_v52  ;;  %v3836_v41 = vrot.slane %v11646_v23, 5  ;;  %v9599_v59 = vsel %vm9498_vm5, %v3828_v26, %v3829_v19  ;;  %v9603_v52 = vsel %vm9498_vm5, %v6975_v40, %v3833_v9  ;;  %v11648_v23 = vld [vmem:[#allocation32_spill] sm:$0xff]  ;;  %v6976_v26 = vrot.slane %v6968_v63, 9 }
  0xa0   : > { %8007 = vmatprep.subr.bf16.mxu1 %v9516_v36  ;;  %7720 = vmatpush3.bf16.msra.mxu0 %v9516_v36  ;;  %11647 = vst [vmem:[#allocation29_spill] sm:$0xff] %v9603_v52  ;;  %v9610_v46 = vsel %vm9498_vm5, %v1082_v60, %v1083_v21  ;;  %v1090_v18 = vrot.slane %v11648_v23, 5  ;;  %v1036_v19 = vld [vmem:[%s9100_s22 + $0x48] sm:$0xe]  ;;  %v11650_v21 = vcombine.low %v9244_v56, %v9253_v0  ;;  %v3840_v60 = vrot.slane %v9310_v27, 5  ;;  %v11651_v23 = vld [vmem:[#allocation33_spill] sm:$0xff] }
  0xa1   : > { %7721 = vmatprep.subr.bf16.mxu0 %v8691_v25  ;;  %v9618_v9 = vsel %vm9498_vm5, %v3835_v35, %v3836_v41  ;;  %v3843_v40 = vrot.slane %v11651_v23, 5  ;;  %v6584_v41 = vrot.slane %v1035_v39, 9  ;;  %v6970_v35 = vld [vmem:[%s9105_s13 + $0x138] sm:$0xe]  ;;  %v1094_v0 = vrot.slane %v9333_v8, 5 }
  0xa2   : > { %11649 = vst [vmem:[#allocation30_spill] sm:$0xff] %v9618_v9  ;;  %v9640_v56 = vsel %vm9498_vm5, %v1089_v13, %v1090_v18  ;;  %v1097_v53 = vrot.slane %v11652_v32, 5  ;;  %v11653_v39 = vcombine.low %v9292_v57, %v9295_v1  ;;  %v9652_v63 = vsel %vm9498_vm5, %v6976_v26, %v3840_v60  ;;  %v1037_v9 = vld [vmem:[%s9100_s22 + $0x54] sm:$0xe]  ;;  %v11655_v1 = vld [vmem:[#allocation35_spill] sm:$0xff] }
  0xa3   : > { %8008 = vmatpush3.bf16.msra.mxu1 %v9516_v36  ;;  %7706 = vmatmul.mubr.bf16.gmra.mrb[4].mxu0 %v11650_v21  ;;  %v9636_v36 = vld [vmem:[%s11538_s2 + $0xa0] sm:$0xff]   ;;  %v6977_v21 = vrot.slane %v6969_v12, 9  ;;  %v3842_v18 = vrot.slane %v3840_v60, 4  ;;  %v3847_v13 = vrot.slane %v9355_v44, 5  ;;  %v11654_v12 = vcombine.low %v9265_v29, %v9274_v37 }
  0xa4   : > { %8009 = vmatprep.subr.bf16.mxu1 %v8691_v25  ;;  %7722 = vmatpush3.bf16.msra.mxu0 %v8691_v25  ;;  %v9661_v32 = vsel %vm9498_vm5, %v6584_v41, %v1094_v0  ;;  %v1096_v57 = vrot.slane %v1094_v0, 4  ;;  %v6585_v23 = vrot.slane %v1036_v19, 9  ;;  %v6971_v52 = vld [vmem:[%s9105_s13 + $0x144] sm:$0xe]  ;;  %v11656_v26 = vcombine.low %v9307_v24, %v9310_v27  ;;  %v11657_v27 = vld [vmem:[#allocation36_spill] sm:$0xff] }
  0xa5   : > { %7723 = vmatprep.subr.bf16.mxu0 %v9587_v2  ;;  %7709 = vmatprep.mubr.bf16.mxu0 %v11653_v39  ;;  %v3850_v39 = vrot.slane %v11655_v1, 5  ;;  %v9670_v60 = vsel %vm9498_vm5, %v3842_v18, %v3843_v40  ;;  %v9674_v29 = vsel %vm9498_vm5, %v6977_v21, %v3847_v13  ;;  %v3849_v37 = vrot.slane %v3847_v13, 4  ;;  %v8699_v0 = vld [vmem:[%s11538_s2 + $0xa8] sm:$0xff]  }
  0xa6   : > { %7994 = vmatmul.mubr.bf16.gmra.mrb[4].mxu1 %v11654_v12  ;;  %v1101_v41 = vrot.slane %v9372_v20, 5  ;;  %v9683_v24 = vsel %vm9498_vm5, %v1096_v57, %v1097_v53  ;;  %v1104_v19 = vrot.slane %v11657_v27, 5  ;;  %v6978_v40 = vrot.slane %v6970_v35, 9  ;;  %v11658_v57 = vld [vmem:[#allocation37_spill] sm:$0xff] }
  0xa7   : > { %8010 = vmatpush3.bf16.msra.mxu1 %v8691_v25  ;;  %7997 = vmatprep.mubr.bf16.mxu1 %v11656_v26  ;;  %v6984_v25 = vcombine.low %v9652_v63, %v9670_v60  ;;  %v6608_v21 = vcombine.low %v9661_v32, %v9683_v24  ;;  %v9694_v18 = vsel %vm9498_vm5, %v3849_v37, %v3850_v39  ;;  %v3854_v12 = vrot.slane %v9392_v10, 5  ;;  %v8712_v32 = vld [vmem:[%s11538_s2 + $0xf0] sm:$0xff]  }
  0xa8   : > { %8011 = vmatprep.subr.bf16.mxu1 %v9587_v2  ;;  %7724 = vmatpush3.bf16.msra.mxu0 %v9587_v2  ;;  %v9698_v53 = vsel %vm9498_vm5, %v6585_v23, %v1101_v41  ;;  %v1103_v13 = vrot.slane %v1101_v41, 4  ;;  %v3857_v1 = vrot.slane %v11658_v57, 5  ;;  %v6586_v26 = vrot.slane %v1037_v9, 9  ;;  %v8703_v23 = vld [vmem:[%s11538_s2 + $0xb0] sm:$0xff]  }
  0xa9   : > { %7725 = vmatprep.subr.bf16.mxu0 %v9636_v36  ;;  %v11659_v27 = vcombine.low %v9330_v61, %v9333_v8  ;;  %v1108_v37 = vrot.slane %v9416_v30, 5  ;;  %v1111_v41 = vrot.slane %v9425_v49, 5  ;;  %v6979_v57 = vrot.slane %v6971_v52, 9 }
  0xaa   : > { %v9713_v39 = vsel %vm9498_vm5, %v1103_v13, %v1104_v19  ;;  %v9723_v8 = vsel %vm9498_vm5, %v6978_v40, %v3854_v12  ;;  %v3861_v9 = vrot.slane %v9437_v42, 5  ;;  %v11660_v19 = vcombine.low %v9369_v55, %v9372_v20 }
  0xab   : > { %8012 = vmatpush3.bf16.msra.mxu1 %v9587_v2  ;;  %7710 = vmatmul.mubr.bf16.gmra.mrb[8].mxu0 %v11659_v27  ;;  %v6609_v61 = vcombine.low %v9698_v53, %v9713_v39  ;;  %v3856_v2 = vrot.slane %v3854_v12, 4  ;;  %v11661_v49 = vrot.slane %v9130_v6, 5  ;;  %v11662_v52 = vrot.slane %v9468_v3, 9 }
  0xac   : > { %8013 = vmatprep.subr.bf16.mxu1 %v9636_v36  ;;  %7726 = vmatpush3.bf16.msra.mxu0 %v9636_v36  ;;  %v9737_v27 = vsel %vm9498_vm5, %v6586_v26, %v1108_v37  ;;  %v1110_v40 = vrot.slane %v1108_v37, 4  ;;  %v3864_v12 = vrot.slane %v9446_v43, 5  ;;  %v11663_v35 = vcombine.low %v9349_v38, %v9355_v44 }
  0xad   : > { %7727 = vmatprep.subr.bf16.mxu0 %v8699_v0  ;;  %7713 = vmatprep.mubr.bf16.mxu0 %v11660_v19  ;;  %v1060_v13 = vsel %vm9498_vm5, %v11662_v52, %v11661_v49  ;;  %v11664_v55 = vrot.slane %v9133_v7, 5  ;;  %v9750_v20 = vsel %vm9498_vm5, %v3856_v2, %v3857_v1  ;;  %v9754_v3 = vsel %vm9498_vm5, %v6979_v57, %v3861_v9  ;;  %v8705_v7 = vld [vmem:[%s11538_s2 + $0xb8] sm:$0xff]   ;;  %v8708_v52 = vld [vmem:[%s11538_s2 + $0xd0] sm:$0xff]  }
  0xae   : > { %7998 = vmatmul.mubr.bf16.gmra.mrb[8].mxu1 %v11663_v35  ;;  %v3863_v26 = vrot.slane %v3861_v9, 4  ;;  %v11665_v38 = vcombine.low %v9386_v54, %v9392_v10  ;;  %v11666_v44 = vrot.slane %v9144_v16, 5  ;;  %v11667_v43 = vrot.slane %v9471_v50, 9 }
  0xaf   : > { %v1063_v6 = vsel %vm9498_vm5, %v9520_v31, %v11664_v55  ;;  %8014 = vmatpush3.bf16.msra.mxu1 %v9636_v36  ;;  %v6986_v35 = vcombine.low %v9723_v8, %v9750_v20  ;;  %v9773_v36 = vsel %vm9498_vm5, %v1110_v40, %v1111_v41  ;;  %v11668_v54 = vrot.slane %v9147_v17, 5  ;;  %v9824_v40 = vld [vmem:[%s9100_s22 + $0x14] sm:$0x1] }
  0xb0   : > { %8001 = vmatprep.mubr.bf16.mxu1 %v11665_v38  ;;  %v3813_v31 = vsel %vm9498_vm5, %v11667_v43, %v11666_v44  ;;  %8015 = vmatprep.subr.bf16.mxu1 %v8699_v0  ;;  %v6610_v10 = vcombine.low %v9737_v27, %v9773_v36  ;;  %v9784_v50 = vsel %vm9498_vm5, %v3863_v26, %v3864_v12  ;;  %v11670_v57 = vrot.slane %v9170_v33, 5  ;;  %v6667_v33 = vld [vmem:[%s9100_s22 + $0xc] sm:$0xf] }
  0xb1   : > { %7728 = vmatpush3.bf16.msra.mxu0 %v8699_v0  ;;  %v3816_v16 = vsel %vm9498_vm5, %v9524_v5, %v11668_v54  ;;  %v6603_v1 = vcombine.low %v1060_v13, %v1063_v6  ;;  %v6987_v37 = vcombine.low %v9754_v3, %v9784_v50  ;;  %v6963_v17 = vcombine.low %v9430_v11, %v9437_v42  ;;  %v9809_v42 = vld [vmem:[%s9100_s22 + $0x10] sm:$0xf]  ;;  %v8718_v50 = vld [vmem:[%s9105_s13 + $0x108] sm:$0xff]  }
  0xb2   : > { %7729 = vmatprep.subr.bf16.mxu0 %v8703_v23  ;;  %v11669_v5 = vcombine.low %v9409_v47, %v9416_v30  ;;  %v6980_v41 = vcombine.low %v3813_v31, %v3816_v16  ;;  %v11671_v2 = vrot.slane %v9474_v58, 9  ;;  %v11672_v19 = vrot.slane %v9177_v45, 5  ;;  %v8706_v47 = vld [vmem:[%s11538_s2 + $0xc0] sm:$0xff]   ;;  %v8707_v45 = vld [vmem:[%s11538_s2 + $0xc8] sm:$0xff]   ;;  %v9841_v31 = vld [vmem:[%s9100_s22 + $0x18] sm:$0xf] }
  0xb3   : > { %8016 = vmatpush3.bf16.msra.mxu1 %v8699_v0  ;;  %v1591_v58 = vshrl.u32 %v6667_v33, 16  ;;  %v1600_v0 = vshll.u32 %v9809_v42, 16  ;;  %v1604_v49 = vshrl.u32 %v9809_v42, 16  ;;  %v11673_v13 = vcombine.low %v9556_v22, %v9568_v34  ;;  %v9835_v22 = vld [vmem:[%s9105_s13 + $0x100] sm:$0xf] }
  0xb4   : > { %7714 = vmatmul.mubr.bf16.gmra.mrb[12].mxu0 %v11669_v5  ;;  %8017 = vmatprep.subr.bf16.mxu1 %v8703_v23  ;;  %v1067_v9 = vsel %vm9498_vm5, %v11671_v2, %v11670_v57  ;;  %v1070_v11 = vsel %vm9498_vm5, %v9550_v15, %v11672_v19  ;;  %v1594_v15 = vshll.u32 %v6667_v33, 16  ;;  %v11674_v6 = vcombine.low %v9528_v62, %v9545_v14  ;;  %v9838_v34 = vld [vmem:[%s9105_s13 + $0x104] sm:$0x1]  ;;  %v8709_v14 = vld [vmem:[%s11538_s2 + $0xd8] sm:$0xff]  }
  0xb5   : > { %7730 = vmatpush3.bf16.msra.mxu0 %v8703_v23  ;;  %7733 = vmatprep.mubr.bf16.mxu0 %v6603_v1  ;;  %v6604_v30 = vcombine.low %v1067_v9, %v1070_v11  ;;  %v1593_v12 = vrot.slane %v1591_v58, 4  ;;  %v9829_v26 = vrot.slane %v1600_v0, 5  ;;  %v1606_v38 = vrot.slane %v1604_v49, 4  ;;  %v11678_v9 = vld [vmem:[#allocation29_spill] sm:$0xff]  ;;  %v11679_v19 = vld [vmem:[#allocation30_spill] sm:$0xff] }
  0xb6   : > { %7731 = vmatprep.subr.bf16.mxu0 %v8705_v7  ;;  %8002 = vmatmul.mubr.bf16.gmra.mrb[12].mxu1 %v6963_v17  ;;  %v1596_v55 = vrot.slane %v1594_v15, 5  ;;  %v11675_v43 = vcombine.low %v9579_v4, %v9599_v59  ;;  %v1610_v62 = vshll.u32 %v9824_v40, 16  ;;  %v11676_v1 = vcombine.low %v9591_v51, %v9610_v46  ;;  %v8710_v51 = vld [vmem:[%s11538_s2 + $0xe0] sm:$0xff]   ;;  %v9862_v46 = vld [vmem:[%s9100_s22 + $0x1c] sm:$0xf] }
  0xb7   : > { %8018 = vmatpush3.bf16.msra.mxu1 %v8703_v23  ;;  %8021 = vmatprep.mubr.bf16.mxu1 %v6980_v41  ;;  %v7012_v23 = vld [vmem:[%s9105_s13 + $0xfc] sm:$0xf]  ;;  %v1607_v4 = vor.u32 %v1606_v38, %v9829_v26  ;;  %v4223_v17 = vshll.u32 %v9835_v22, 16  ;;  %v4227_v5 = vshrl.u32 %v9835_v22, 16  ;;  %v4233_v41 = vshll.u32 %v9838_v34, 16 }
  0xb8   : > { %8019 = vmatprep.subr.bf16.mxu1 %v8705_v7  ;;  %v4217_v44 = vshll.u32 %v7012_v23, 16  ;;  %v1597_v54 = vor.u32 %v1596_v55, %v1593_v12  ;;  %v1615_v57 = vshrl.u32 %v9841_v31, 16  ;;  %v11677_v2 = vcombine.low %v9622_v28, %v9640_v56  ;;  %v9879_v56 = vld [vmem:[%s11538_s2 + $0xe8] sm:$0xff]   ;;  %v8785_v12 = vld [vmem:[%s11538_s2 + $0x238] sm:$0xff]  }
  0xb9   : > { %7732 = vmatpush3.bf16.msra.mxu0 %v8705_v7  ;;  %v11680_v11 = vcombine.low %v11678_v9, %v11679_v19  ;;  %v9869_v33 = vrot.slane %v1607_v4, 4  ;;  %v9883_v58 = vrot.slane %v4227_v5, 4  ;;  %v9885_v15 = vrot.slane %v4233_v41, 5  ;;  %v9893_v49 = vld [vmem:[%s9105_s13 + $0x10c] sm:$0xf] }
  0xba   : > { %7749 = vmatprep.subr.bf16.mxu0 %v8706_v47  ;;  %v4219_v16 = vrot.slane %v4217_v44, 5  ;;  %v9887_v0 = vrot.slane %v1615_v57, 4  ;;  %v1618_v63 = vshll.u32 %v9841_v31, 16  ;;  %v1624_v60 = vshll.u32 %v9862_v46, 16  ;;  %v7018_v44 = vld [vmem:[%s9105_s13 + $0x114] sm:$0xf] }
  0xbb   : > { %8020 = vmatpush3.bf16.msra.mxu1 %v8705_v7  ;;  %v4214_v7 = vshrl.u32 %v7012_v23, 16  ;;  %v9896_v23 = vld [vmem:[%s9100_s22 + $0x20] sm:$0x1]  ;;  %v11684_v5 = vcombine.low %v9674_v29, %v9694_v18  ;;  %v8714_v29 = vld [vmem:[%s9100_s22 + $0xc] sm:$0xff]  }
  0xbc   : > { %7734 = vmatmul.mubr.bf16.vlgmr.msra.gmra.mrb[0].mxu0 %v6604_v30  ;;  %8037 = vmatprep.subr.bf16.mxu1 %v8706_v47  ;;  %v9871_v30 = vrot.slane %v1610_v62, 5  ;;  %11681 = vst [vmem:[#allocation31_spill] sm:$0xff] %v9896_v23  ;;  %v4247_v62 = vshll.u32 %v9893_v49, 16  ;;  %v9931_v24 = vrot.slane %v1618_v63, 5  ;;  %v1634_v57 = vshll.u32 %v9896_v23, 16 }
  0xbd   : > { %7750 = vmatpush3.bf16.msra.mxu0 %v8706_v47  ;;  %7737 = vmatprep.mubr.bf16.mxu0 %v11673_v13  ;;  %v4216_v59 = vrot.slane %v4214_v7, 4  ;;  %v9900_v13 = vld [vmem:[%s9100_s22 + $0x28] sm:$0xf]  ;;  %v1628_v7 = vshrl.u32 %v9862_v46, 16 }
  0xbe   : > { %7751 = vmatprep.subr.bf16.mxu0 %v8707_v45  ;;  %8022 = vmatmul.mubr.bf16.vlgmr.msra.gmra.mrb[0].mxu1 %v11674_v6  ;;  %v1613_v6 = vsel %vm9164_vm2, %v9869_v33, %v9871_v30  ;;  %v9950_v9 = vrot.slane %v4247_v62, 5  ;;  %v9962_v33 = vld [vmem:[%s9100_s22 + $0x2c] sm:$0x1]  ;;  %v10310_v23 = vld [vmem:[%s9100_s22 + $0x68] sm:$0x1] }
  0xbf   : > { %8038 = vmatpush3.bf16.msra.mxu1 %v8706_v47  ;;  %8025 = vmatprep.mubr.bf16.mxu1 %v11675_v43  ;;  %v9867_v47 = vrot.slane %v1597_v54, 4  ;;  %v4220_v28 = vor.u32 %v4219_v16, %v4216_v59  ;;  %v9920_v54 = vld [vmem:[%s9105_s13 + $0x118] sm:$0xf]  ;;  %v1648_v16 = vshll.u32 %v9900_v13, 16  ;;  %v1630_v41 = vrot.slane %v1628_v7, 4  ;;  %11686 = vst [vmem:[#allocation34_spill] sm:$0xff] %v9962_v33 }
  0xc0   : > { %8039 = vmatprep.subr.bf16.mxu1 %v8707_v45  ;;  %11683 = vst [vmem:[#allocation32_spill] sm:$0xff] %v9920_v54  ;;  %v4271_v53 = vshll.u32 %v9920_v54, 16  ;;  %v4275_v39 = vshrl.u32 %v9920_v54, 16  ;;  %v8715_v7 = vld [vmem:[%s9105_s13 + $0xfc] sm:$0xff]  }
  0xc1   : > { %7752 = vmatpush3.bf16.msra.mxu0 %v8707_v45  ;;  %v1603_v55 = vsel %vm9164_vm2, %v9867_v47, %v9829_v26  ;;  %v9910_v38 = vrot.slane %v4220_v28, 4  ;;  %v4251_v26 = vshrl.u32 %v9893_v49, 16 }
  0xc2   : > { %7753 = vmatprep.subr.bf16.mxu0 %v8708_v52  ;;  %v9964_v63 = vcombine.low %v1603_v55, %v1613_v6  ;;  %v6676_v6 = vld [vmem:[%s9100_s22 + $0x30] sm:$0xf] }
  0xc3   : > { %8040 = vmatpush3.bf16.msra.mxu1 %v8707_v45  ;;  %v9881_v45 = vrot.slane %v4223_v17, 5  ;;  %v4265_v17 = vshll.u32 %v7018_v44, 16  ;;  %v4253_v19 = vrot.slane %v4251_v26, 4 }
  0xc4   : > { %7738 = vmatmul.mubr.bf16.gmra.mrb[4].mxu0 %v11676_v1  ;;  %8041 = vmatprep.subr.bf16.mxu1 %v8708_v52  ;;  %v4262_v1 = vshrl.u32 %v7018_v44, 16 }
  0xc5   : > { %7754 = vmatpush3.bf16.msra.mxu0 %v8708_v52  ;;  %7741 = vmatprep.mubr.bf16.mxu0 %v11677_v2  ;;  %v4230_v47 = vor.u32 %v9883_v58, %v9881_v45  ;;  %v4267_v28 = vrot.slane %v4265_v17, 5  ;;  %v1621_v58 = vor.u32 %v9931_v24, %v9887_v0  ;;  %v4254_v27 = vor.u32 %v4253_v19, %v9950_v9  ;;  %v8716_v17 = vld [vmem:[%s9100_s22 + $0x18] sm:$0xff]  }
  0xc6   : > { %7755 = vmatprep.subr.bf16.mxu0 %v8709_v14  ;;  %8026 = vmatmul.mubr.bf16.gmra.mrb[4].mxu1 %v11680_v11  ;;  %v4264_v30 = vrot.slane %v4262_v1, 4  ;;  %v1658_v0 = vshll.u32 %v9962_v33, 16  ;;  %v1663_v24 = vshrl.u32 %v6676_v6, 16  ;;  %v1666_v1 = vshll.u32 %v6676_v6, 16  ;;  %v10051_v6 = vld [vmem:[%s9105_s13 + $0x124] sm:$0xf] }
  0xc7   : > { %8042 = vmatpush3.bf16.msra.mxu1 %v8708_v52  ;;  %8029 = vmatprep.mubr.bf16.mxu1 %v6984_v25  ;;  %v7015_v25 = vld [vmem:[%s9105_s13 + $0x108] sm:$0xf]  ;;  %v6673_v52 = vld [vmem:[%s9100_s22 + $0x24] sm:$0xf]  ;;  %v9994_v62 = vrot.slane %v4230_v47, 4  ;;  %11690 = vst [vmem:[#allocation29_spill] sm:$0xff] %v10051_v6 }
  0xc8   : > { %8043 = vmatprep.subr.bf16.mxu1 %v8709_v14  ;;  %v4238_v43 = vshrl.u32 %v7015_v25, 16  ;;  %v4241_v31 = vshll.u32 %v7015_v25, 16  ;;  %v1639_v4 = vshrl.u32 %v6673_v52, 16  ;;  %v1642_v59 = vshll.u32 %v6673_v52, 16 }
  0xc9   : > { %7756 = vmatpush3.bf16.msra.mxu0 %v8709_v14  ;;  %v9969_v25 = vrot.slane %v4271_v53, 5  ;;  %v4277_v52 = vrot.slane %v4275_v39, 4  ;;  %v4268_v26 = vor.u32 %v4267_v28, %v4264_v30  ;;  %v1665_v30 = vrot.slane %v1663_v24, 4  ;;  %v8726_v24 = vld [vmem:[%s9100_s22 + $0x3c] sm:$0xff]  }
  0xca   : > { %7757 = vmatprep.subr.bf16.mxu0 %v8710_v51  ;;  %v4240_v18 = vrot.slane %v4238_v43, 4  ;;  %v4243_v2 = vrot.slane %v4241_v31, 5  ;;  %v1641_v8 = vrot.slane %v1639_v4, 4  ;;  %v1644_v20 = vrot.slane %v1642_v59, 5 }
  0xcb   : > { %8044 = vmatpush3.bf16.msra.mxu1 %v8709_v14  ;;  %v1652_v14 = vshrl.u32 %v9900_v13, 16  ;;  %v4226_v31 = vsel %vm9164_vm2, %v9910_v38, %v9881_v45  ;;  %v10000_v59 = vrot.slane %v1634_v57, 5  ;;  %v4269_v19 = vrot.slane %v4268_v26, 4  ;;  %v6682_v38 = vld [vmem:[%s9100_s22 + $0x48] sm:$0xf] }
  0xcc   : > { %7742 = vmatmul.mubr.bf16.gmra.mrb[8].mxu0 %v6608_v21  ;;  %8045 = vmatprep.subr.bf16.mxu1 %v8710_v51  ;;  %v9933_v21 = vrot.slane %v1624_v60, 5  ;;  %v9967_v60 = vld [vmem:[%s9105_s13 + $0x11c] sm:$0x1]  ;;  %v4244_v43 = vor.u32 %v4243_v2, %v4240_v18  ;;  %v1645_v36 = vor.u32 %v1644_v20, %v1641_v8  ;;  %v8720_v18 = vld [vmem:[%s9100_s22 + $0x24] sm:$0xff]   ;;  %v4236_v2 = vsel %vm9164_vm2, %v9994_v62, %v9885_v15  ;;  %v10024_v20 = vld [vmem:[%s9100_s22 + $0x38] sm:$0x1] }
  0xcd   : > { %7758 = vmatpush3.bf16.msra.mxu0 %v8710_v51  ;;  %7745 = vmatprep.mubr.bf16.mxu0 %v6609_v61  ;;  %v9947_v61 = vld [vmem:[%s11538_s2 + $0xf8] sm:$0xff]   ;;  %v1654_v11 = vrot.slane %v1652_v14, 4  ;;  %11687 = vst [vmem:[#allocation35_spill] sm:$0xff] %v9967_v60  ;;  %v4281_v4 = vshll.u32 %v9967_v60, 16  ;;  %v10004_v14 = vld [vmem:[%s9100_s22 + $0x34] sm:$0xf] }
  0xce   : > { %7759 = vmatprep.subr.bf16.mxu0 %v9879_v56  ;;  %8030 = vmatmul.mubr.bf16.gmra.mrb[8].mxu1 %v11684_v5  ;;  %v1631_v44 = vor.u32 %v1630_v41, %v9933_v21  ;;  %11688 = vst [vmem:[#allocation36_spill] sm:$0xff] %v10004_v14  ;;  %v10007_v5 = vrot.slane %v1621_v58, 4  ;;  %v4245_v53 = vrot.slane %v4244_v43, 4  ;;  %v1646_v57 = vrot.slane %v1645_v36, 4  ;;  %11689 = vst [vmem:[#allocation37_spill] sm:$0xff] %v10024_v20  ;;  %v8721_v58 = vld [vmem:[%s9105_s13 + $0x114] sm:$0xff]  }
  0xcf   : > { %8046 = vmatpush3.bf16.msra.mxu1 %v8710_v51  ;;  %8033 = vmatprep.mubr.bf16.mxu1 %v6986_v35  ;;  %v9955_v51 = vld [vmem:[%s9105_s13 + $0x110] sm:$0x1]  ;;  %v9957_v35 = vrot.slane %v1648_v16, 5  ;;  %v4278_v16 = vor.u32 %v4277_v52, %v9969_v25  ;;  %v4283_v8 = vrot.slane %v4281_v4, 5  ;;  %v1668_v28 = vrot.slane %v1666_v1, 5 }
  0xd0   : > { %8047 = vmatprep.subr.bf16.mxu1 %v9879_v56  ;;  %11685 = vst [vmem:[#allocation33_spill] sm:$0xff] %v9955_v51  ;;  %v4257_v55 = vshll.u32 %v9955_v51, 16  ;;  %v1632_v41 = vrot.slane %v1631_v44, 4  ;;  %v1676_v52 = vshrl.u32 %v10004_v14, 16  ;;  %v1627_v15 = vsel %vm9164_vm2, %v10007_v5, %v9933_v21  ;;  %v8722_v62 = vld [vmem:[%s9100_s22 + $0x30] sm:$0xff]  }
  0xd1   : > { %7760 = vmatpush3.bf16.msra.mxu0 %v9879_v56  ;;  %v4279_v47 = vrot.slane %v4278_v16, 4  ;;  %v4250_v43 = vsel %vm9164_vm2, %v4245_v53, %v9950_v9  ;;  %v1651_v21 = vsel %vm9164_vm2, %v1646_v57, %v9957_v35  ;;  %v10058_v9 = vld [vmem:[%s11538_s2 + $0x110] sm:$0xff]   ;;  %v1669_v4 = vor.u32 %v1668_v28, %v1665_v30  ;;  %v10077_v1 = vld [vmem:[%s9105_s13 + $0x128] sm:$0x1]  ;;  %v7024_v57 = vld [vmem:[%s9105_s13 + $0x12c] sm:$0xf] }
  0xd2   : > { %7761 = vmatprep.subr.bf16.mxu0 %v8712_v32  ;;  %v4259_v3 = vrot.slane %v4257_v55, 5  ;;  %v1637_v44 = vsel %vm9164_vm2, %v1632_v41, %v10000_v59  ;;  %v1678_v59 = vrot.slane %v1676_v52, 4  ;;  %11691 = vst [vmem:[#allocation30_spill] sm:$0xff] %v10077_v1  ;;  %v4299_v5 = vshrl.u32 %v10051_v6, 16  ;;  %v8727_v30 = vld [vmem:[%s9105_s13 + $0x12c] sm:$0xff]   ;;  %v10119_v28 = vld [vmem:[%s11538_s2 + $0x120] sm:$0xff]  }
  0xd3   : > { %8048 = vmatpush3.bf16.msra.mxu1 %v9879_v56  ;;  %v9984_v56 = vld [vmem:[%s11538_s2 + $0x100] sm:$0xff]   ;;  %v4284_v26 = vsel %vm9164_vm2, %v4279_v47, %v4283_v8  ;;  %v4305_v47 = vshll.u32 %v10077_v1, 16  ;;  %v10175_v1 = vld [vmem:[%s9100_s22 + $0x50] sm:$0x1] }
  0xd4   : > { %7746 = vmatmul.mubr.bf16.gmra.mrb[12].mxu0 %v6610_v10  ;;  %8049 = vmatprep.subr.bf16.mxu1 %v8712_v32  ;;  %v1655_v10 = vor.u32 %v1654_v11, %v9957_v35  ;;  %v1672_v11 = vshll.u32 %v10004_v14, 16  ;;  %v4274_v35 = vsel %vm9164_vm2, %v4269_v19, %v9969_v25  ;;  %v10073_v25 = vld [vmem:[%s11538_s2 + $0x118] sm:$0xff]   ;;  %11698 = vst [vmem:[#allocation43_spill] sm:$0xff] %v10175_v1  ;;  %v10265_v51 = vld [vmem:[%s9100_s22 + $0x64] sm:$0xf] }
  0xd5   : > { %7762 = vmatpush3.bf16.msra.mxu0 %v8712_v32  ;;  %7765 = vmatprep.mubr.bf16.mxu0 %v8714_v29  ;;  %v1660_v29 = vrot.slane %v1658_v0, 5  ;;  %11703 = vst [vmem:[#allocation48_spill] sm:$0xff] %v10265_v51 }
  0xd6   : > { %7763 = vmatprep.subr.bf16.mxu0 %v9947_v61  ;;  %8034 = vmatmul.mubr.bf16.gmra.mrb[12].mxu1 %v6987_v37  ;;  %v10015_v37 = vld [vmem:[%s11538_s2 + $0x108] sm:$0xff]   ;;  %v1656_v39 = vrot.slane %v1655_v10, 4  ;;  %v10063_v36 = vrot.slane %v1672_v11, 5  ;;  %v1682_v10 = vshll.u32 %v10024_v20, 16 }
  0xd7   : > { %8050 = vmatpush3.bf16.msra.mxu1 %v8712_v32  ;;  %8053 = vmatprep.mubr.bf16.mxu1 %v8715_v7  ;;  %v4255_v32 = vrot.slane %v4254_v27, 4  ;;  %v7021_v7 = vld [vmem:[%s9105_s13 + $0x120] sm:$0xf]  ;;  %v6679_v27 = vld [vmem:[%s9100_s22 + $0x3c] sm:$0xf] }
  0xd8   : > { %8051 = vmatprep.subr.bf16.mxu1 %v9947_v61  ;;  %v1661_v55 = vsel %vm9164_vm2, %v1656_v39, %v1660_v29  ;;  %v4286_v0 = vshrl.u32 %v7021_v7, 16  ;;  %v4289_v16 = vshll.u32 %v7021_v7, 16  ;;  %v1687_v41 = vshrl.u32 %v6679_v27, 16  ;;  %v10099_v39 = vld [vmem:[%s9105_s13 + $0x130] sm:$0xf] }
  0xd9   : > { %7764 = vmatpush3.bf16.msra.mxu0 %v9947_v61  ;;  %v1690_v53 = vshll.u32 %v6679_v27, 16  ;;  %11693 = vst [vmem:[#allocation38_spill] sm:$0xff] %v10099_v39  ;;  %v10102_v29 = vcombine.low %v1651_v21, %v1661_v55  ;;  %v10106_v19 = vrot.slane %v1682_v10, 5  ;;  %v1679_v8 = vor.u32 %v1678_v59, %v10063_v36  ;;  %v10128_v21 = vld [vmem:[%s9100_s22 + $0x4c] sm:$0xf] }
  0xda   : > { %7781 = vmatprep.subr.bf16.mxu0 %v9984_v56  ;;  %v4288_v45 = vrot.slane %v4286_v0, 4  ;;  %v4291_v11 = vrot.slane %v4289_v16, 5  ;;  %v4301_v7 = vrot.slane %v4299_v5, 4  ;;  %11694 = vst [vmem:[#allocation39_spill] sm:$0xff] %v10128_v21  ;;  %v8728_v55 = vld [vmem:[%s9100_s22 + $0x48] sm:$0xff]   ;;  %v4319_v27 = vshll.u32 %v10099_v39, 16 }
  0xdb   : > { %8052 = vmatpush3.bf16.msra.mxu1 %v9947_v61  ;;  %v4260_v61 = vsel %vm9164_vm2, %v4255_v32, %v4259_v3  ;;  %v10090_v3 = vcombine.low %v1627_v15, %v1637_v44  ;;  %v10095_v32 = vld [vmem:[%s9100_s22 + $0x40] sm:$0xf]  ;;  %v1692_v15 = vrot.slane %v1690_v53, 5  ;;  %v1711_v10 = vshrl.u32 %v6682_v38, 16  ;;  %v10143_v16 = vld [vmem:[%s9100_s22 + $0x44] sm:$0x1] }
  0xdc   : > { %7766 = vmatmul.mubr.bf16.vlgmr.msra.gmra.mrb[0].mxu0 %v8716_v17  ;;  %8069 = vmatprep.subr.bf16.mxu1 %v9984_v56  ;;  %v4295_v17 = vshll.u32 %v10051_v6, 16  ;;  %11692 = vst [vmem:[#allocation28_spill] sm:$0xff] %v10095_v32  ;;  %v1696_v44 = vshll.u32 %v10095_v32, 16  ;;  %v1714_v0 = vshll.u32 %v6682_v38, 16  ;;  %v10140_v59 = vrot.slane %v4305_v47, 5  ;;  %11695 = vst [vmem:[#allocation40_spill] sm:$0xff] %v10143_v16 }
  0xdd   : > { %7782 = vmatpush3.bf16.msra.mxu0 %v9984_v56  ;;  %7769 = vmatprep.mubr.bf16.mxu0 %v8720_v18  ;;  %v10104_v18 = vcombine.low %v4274_v35, %v4284_v26  ;;  %v4323_v35 = vshrl.u32 %v10099_v39, 16  ;;  %v10138_v26 = vrot.slane %v1679_v8, 4  ;;  %v10154_v53 = vld [vmem:[%s9105_s13 + $0x134] sm:$0x1]  ;;  %v7027_v38 = vld [vmem:[%s9105_s13 + $0x138] sm:$0xf] }
  0xde   : > { %7783 = vmatprep.subr.bf16.mxu0 %v10015_v37  ;;  %8054 = vmatmul.mubr.bf16.vlgmr.msra.gmra.mrb[0].mxu1 %v8718_v50  ;;  %v10092_v50 = vcombine.low %v4250_v43, %v4260_v61  ;;  %v10121_v52 = vrot.slane %v4295_v17, 5  ;;  %v4310_v43 = vshrl.u32 %v7024_v57, 16  ;;  %v4313_v61 = vshll.u32 %v7024_v57, 16  ;;  %v8732_v17 = vld [vmem:[%s9100_s22 + $0x54] sm:$0xff]   ;;  %11696 = vst [vmem:[#allocation41_spill] sm:$0xff] %v10154_v53 }
  0xdf   : > { %8070 = vmatpush3.bf16.msra.mxu1 %v9984_v56  ;;  %8057 = vmatprep.mubr.bf16.mxu1 %v8721_v58  ;;  %v10088_v56 = vcombine.low %v4226_v31, %v4236_v2  ;;  %v8724_v31 = vld [vmem:[%s9105_s13 + $0x120] sm:$0xff]   ;;  %v10110_v2 = vrot.slane %v1669_v4, 4  ;;  %v1689_v58 = vrot.slane %v1687_v41, 4  ;;  %v4292_v4 = vor.u32 %v4291_v11, %v4288_v45 }
  0xe0   : > { %8071 = vmatprep.subr.bf16.mxu1 %v10015_v37  ;;  %v4302_v5 = vor.u32 %v4301_v7, %v10121_v52  ;;  %v1720_v57 = vshll.u32 %v10128_v21, 16  ;;  %v1724_v45 = vshrl.u32 %v10128_v21, 16  ;;  %v4312_v11 = vrot.slane %v4310_v43, 4  ;;  %v10169_v21 = vld [vmem:[%s9105_s13 + $0x13c] sm:$0xf] }
  0xe1   : > { %7784 = vmatpush3.bf16.msra.mxu0 %v10015_v37  ;;  %v1693_v41 = vor.u32 %v1692_v15, %v1689_v58  ;;  %v4315_v47 = vrot.slane %v4313_v61, 5  ;;  %v10166_v7 = vrot.slane %v4319_v27, 5  ;;  %v4325_v58 = vrot.slane %v4323_v35, 4  ;;  %11697 = vst [vmem:[#allocation42_spill] sm:$0xff] %v10169_v21 }
  0xe2   : > { %7785 = vmatprep.subr.bf16.mxu0 %v10058_v9  ;;  %v1713_v15 = vrot.slane %v1711_v10, 4  ;;  %v10171_v39 = vrot.slane %v4292_v4, 4  ;;  %v10178_v43 = vrot.slane %v4302_v5, 4  ;;  %v10182_v27 = vrot.slane %v1720_v57, 5  ;;  %v8734_v4 = vld [vmem:[%s9100_s22 + $0x60] sm:$0xff]   ;;  %v10195_v5 = vld [vmem:[%s11538_s2 + $0x130] sm:$0xff]  }
  0xe3   : > { %8072 = vmatpush3.bf16.msra.mxu1 %v10015_v37  ;;  %v1700_v37 = vshrl.u32 %v10095_v32, 16  ;;  %v1706_v32 = vshll.u32 %v10143_v16, 16  ;;  %v10180_v61 = vrot.slane %v1693_v41, 4  ;;  %v1726_v35 = vrot.slane %v1724_v45, 4 }
  0xe4   : > { %7770 = vmatmul.mubr.bf16.gmra.mrb[4].mxu0 %v8722_v62  ;;  %8073 = vmatprep.subr.bf16.mxu1 %v10058_v9  ;;  %v1716_v62 = vrot.slane %v1714_v0, 5  ;;  %v4329_v0 = vshll.u32 %v10154_v53, 16  ;;  %v4316_v41 = vor.u32 %v4315_v47, %v4312_v11  ;;  %v4326_v57 = vor.u32 %v4325_v58, %v10166_v7  ;;  %v6685_v53 = vld [vmem:[%s9100_s22 + $0x54] sm:$0xf]  ;;  %v10212_v58 = vld [vmem:[%s9100_s22 + $0x58] sm:$0xf] }
  0xe5   : > { %7786 = vmatpush3.bf16.msra.mxu0 %v10058_v9  ;;  %7773 = vmatprep.mubr.bf16.mxu0 %v8726_v24  ;;  %v10149_v24 = vld [vmem:[%s11538_s2 + $0x128] sm:$0xff]   ;;  %v1702_v8 = vrot.slane %v1700_v37, 4  ;;  %v4337_v37 = vshll.u32 %v7027_v38, 16  ;;  %11700 = vst [vmem:[#allocation45_spill] sm:$0xff] %v10212_v58  ;;  %v7030_v11 = vld [vmem:[%s9105_s13 + $0x144] sm:$0xf] }
  0xe6   : > { %7787 = vmatprep.subr.bf16.mxu0 %v10073_v25  ;;  %8058 = vmatmul.mubr.bf16.gmra.mrb[4].mxu1 %v8724_v31  ;;  %v10162_v31 = vrot.slane %v1696_v44, 5  ;;  %v4334_v44 = vshrl.u32 %v7027_v38, 16  ;;  %v1717_v45 = vor.u32 %v1716_v62, %v1713_v15  ;;  %v1730_v38 = vshll.u32 %v10175_v1, 16 }
  0xe7   : > { %8074 = vmatpush3.bf16.msra.mxu1 %v10058_v9  ;;  %8061 = vmatprep.mubr.bf16.mxu1 %v8727_v30  ;;  %v8730_v9 = vld [vmem:[%s9105_s13 + $0x138] sm:$0xff]   ;;  %v8733_v30 = vld [vmem:[%s9105_s13 + $0x144] sm:$0xff]   ;;  %v4339_v62 = vrot.slane %v4337_v37, 5  ;;  %v10228_v37 = vrot.slane %v1706_v32, 5  ;;  %v10239_v15 = vrot.slane %v4329_v0, 5  ;;  %v1735_v60 = vshrl.u32 %v6685_v53, 16 }
  0xe8   : > { %8075 = vmatprep.subr.bf16.mxu1 %v10073_v25  ;;  %v1703_v10 = vor.u32 %v1702_v8, %v10162_v31  ;;  %v10200_v8 = vld [vmem:[%s9105_s13 + $0x140] sm:$0x1]  ;;  %v4336_v47 = vrot.slane %v4334_v44, 4  ;;  %v10244_v44 = vld [vmem:[%s9105_s13 + $0x148] sm:$0xf]  ;;  %v10252_v6 = vrot.slane %v1717_v45, 4 }
  0xe9   : > { %7788 = vmatpush3.bf16.msra.mxu0 %v10073_v25  ;;  %11699 = vst [vmem:[#allocation44_spill] sm:$0xff] %v10200_v8  ;;  %11702 = vst [vmem:[#allocation47_spill] sm:$0xff] %v10244_v44  ;;  %v6688_v32 = vld [vmem:[%s9100_s22 + $0x60] sm:$0xf]  ;;  %v10254_v20 = vrot.slane %v1730_v38, 5  ;;  %v4361_v38 = vshll.u32 %v7030_v11, 16 }
  0xea   : > { %7789 = vmatprep.subr.bf16.mxu0 %v10119_v28  ;;  %v4340_v0 = vor.u32 %v4339_v62, %v4336_v47  ;;  %v8738_v47 = vld [vmem:[%s11538_s2 + $0x140] sm:$0xff]   ;;  %v4367_v62 = vshll.u32 %v10244_v44, 16 }
  0xeb   : > { %8076 = vmatpush3.bf16.msra.mxu1 %v10073_v25  ;;  %v4343_v25 = vshll.u32 %v10169_v21, 16 }
  0xec   : > { %7774 = vmatmul.mubr.bf16.gmra.mrb[8].mxu0 %v8728_v55  ;;  %8077 = vmatprep.subr.bf16.mxu1 %v10119_v28  ;;  %v4347_v55 = vshrl.u32 %v10169_v21, 16  ;;  %v10250_v21 = vrot.slane %v4326_v57, 4  ;;  %v1748_v57 = vshrl.u32 %v10212_v58, 16 }
  0xed   : > { %7790 = vmatpush3.bf16.msra.mxu0 %v10119_v28  ;;  %7777 = vmatprep.mubr.bf16.mxu0 %v8732_v17  ;;  %v10237_v17 = vrot.slane %v1703_v10, 4  ;;  %v10241_v1 = vrot.slane %v4343_v25, 5  ;;  %v8736_v10 = vld [vmem:[%s9105_s13 + $0x150] sm:$0xff]   ;;  %v4353_v25 = vshll.u32 %v10200_v8, 16 }
  0xee   : > { %7791 = vmatprep.subr.bf16.mxu0 %v10149_v24  ;;  %8062 = vmatmul.mubr.bf16.gmra.mrb[8].mxu1 %v8730_v9  ;;  %v10218_v9 = vld [vmem:[%s11538_s2 + $0x138] sm:$0xff]   ;;  %v4349_v16 = vrot.slane %v4347_v55, 4  ;;  %v1738_v55 = vshll.u32 %v6685_v53, 16 }
  0xef   : > { %8078 = vmatpush3.bf16.msra.mxu1 %v10119_v28  ;;  %8065 = vmatprep.mubr.bf16.mxu1 %v8733_v30  ;;  %v1727_v28 = vor.u32 %v1726_v35, %v10182_v27  ;;  %v10232_v30 = vld [vmem:[%s9100_s22 + $0x5c] sm:$0x1]  ;;  %v10248_v35 = vrot.slane %v4316_v41, 4  ;;  %v1744_v41 = vshll.u32 %v10212_v58, 16 }
  0xf0   : > { %11701 = vst [vmem:[#allocation46_spill] sm:$0xff] %v10232_v30  ;;  %8079 = vmatprep.subr.bf16.mxu1 %v10149_v24  ;;  %v1754_v45 = vshll.u32 %v10232_v30, 16  ;;  %v4350_v53 = vor.u32 %v4349_v16, %v10241_v1  ;;  %v1759_v30 = vshrl.u32 %v6688_v32, 16  ;;  %v10283_v16 = vrot.slane %v4353_v25, 5 }
  0xf1   : > { %7792 = vmatpush3.bf16.msra.mxu0 %v10149_v24  ;;  %v10259_v33 = vrot.slane %v1727_v28, 4  ;;  %v4371_v28 = vshrl.u32 %v10244_v44, 16  ;;  %v1740_v8 = vrot.slane %v1738_v55, 5  ;;  %v10291_v44 = vld [vmem:[%s11538_s2 + $0x148] sm:$0xff]   ;;  %v1772_v25 = vshrl.u32 %v10265_v51, 16 }
  0xf2   : > { %7793 = vmatprep.subr.bf16.mxu0 %v10195_v5  ;;  %v10307_v55 = vld [vmem:[%s9105_s13 + $0x14c] sm:$0x1]  ;;  %v1761_v14 = vrot.slane %v1759_v30, 4 }
  0xf3   : > { %8080 = vmatpush3.bf16.msra.mxu1 %v10149_v24  ;;  %v1709_v24 = vsel %vm9164_vm2, %v10237_v17, %v10228_v37  ;;  %v1762_v17 = vshll.u32 %v6688_v32, 16  ;;  %v10281_v37 = vrot.slane %v4340_v0, 4  ;;  %v10293_v32 = vrot.slane %v1744_v41, 5 }
  0xf4   : > { %7778 = vmatmul.mubr.bf16.gmra.mrb[12].mxu0 %v8734_v4  ;;  %8081 = vmatprep.subr.bf16.mxu1 %v10195_v5  ;;  %v4358_v4 = vshrl.u32 %v7030_v11, 16  ;;  %v1737_v11 = vrot.slane %v1735_v60, 4  ;;  %v1768_v0 = vshll.u32 %v10265_v51, 16  ;;  %v10298_v60 = vld [vmem:[%s9105_s13 + $0x154] sm:$0xf]  ;;  %v4363_v41 = vrot.slane %v4361_v38, 5 }
  0xf5   : > { %7794 = vmatpush3.bf16.msra.mxu0 %v10195_v5  ;;  %7797 = vmatprep.mubr.bf16.mxu0 %v9964_v63  ;;  %v7033_v63 = vld [vmem:[%s9105_s13 + $0x150] sm:$0xf]  ;;  %v4373_v51 = vrot.slane %v4371_v28, 4  ;;  %v1764_v54 = vrot.slane %v1762_v17, 5  ;;  %v1774_v17 = vrot.slane %v1772_v25, 4 }
  0xf6   : > { %7795 = vmatprep.subr.bf16.mxu0 %v10218_v9  ;;  %8066 = vmatmul.mubr.bf16.gmra.mrb[12].mxu1 %v8736_v10  ;;  %v1750_v10 = vrot.slane %v1748_v57, 4  ;;  %v4360_v58 = vrot.slane %v4358_v4, 4  ;;  %v10312_v57 = vrot.slane %v4367_v62, 5  ;;  %v4382_v4 = vshrl.u32 %v7033_v63, 16  ;;  %v10371_v25 = vld [vmem:[%s9105_s13 + $0x158] sm:$0x1] }
  0xf7   : > { %8082 = vmatpush3.bf16.msra.mxu1 %v10195_v5  ;;  %8085 = vmatprep.mubr.bf16.mxu1 %v10088_v56  ;;  %v10302_v5 = vrot.slane %v4350_v53, 4  ;;  %v10304_v56 = vrot.slane %v1754_v45, 5  ;;  %v4322_v53 = vsel %vm9164_vm2, %v10248_v35, %v10166_v7  ;;  %v4332_v45 = vsel %vm9164_vm2, %v10250_v21, %v10239_v15 }
  0xf8   : > { %8083 = vmatprep.subr.bf16.mxu1 %v10218_v9  ;;  %v4385_v38 = vshll.u32 %v7033_v63, 16  ;;  %v1741_v62 = vor.u32 %v1740_v8, %v1737_v11  ;;  %v1751_v30 = vor.u32 %v1750_v10, %v10293_v32  ;;  %v10325_v28 = vrot.slane %v1768_v0, 5 }
  0xf9   : > { %7796 = vmatpush3.bf16.msra.mxu0 %v10218_v9  ;;  %v11704_v7 = vsel %vm9164_vm2, %v10138_v26, %v10106_v19  ;;  %v11705_v21 = vsel %vm9164_vm2, %v10110_v2, %v10063_v36  ;;  %v11707_v8 = vsel %vm9164_vm2, %v10171_v39, %v10121_v52  ;;  %v4391_v35 = vshll.u32 %v10298_v60, 16  ;;  %v8740_v36 = vld [vmem:[%s11538_s2 + $0x150] sm:$0xff]  }
  0xfa   : > { %7813 = vmatprep.subr.bf16.mxu0 %v8738_v47  ;;  %v4395_v19 = vshrl.u32 %v10298_v60, 16  ;;  %v4364_v2 = vor.u32 %v4363_v41, %v4360_v58  ;;  %v4374_v26 = vor.u32 %v4373_v51, %v10312_v57  ;;  %v1778_v39 = vshll.u32 %v10310_v23, 16  ;;  %v10367_v51 = vld [vmem:[%s11538_s2 + $0x158] sm:$0xff]  }
  0xfb   : > { %8084 = vmatpush3.bf16.msra.mxu1 %v10218_v9  ;;  %v6710_v9 = vcombine.low %v11705_v21, %v11704_v7  ;;  %v11708_v52 = vsel %vm9164_vm2, %v10180_v61, %v10162_v31  ;;  %v4384_v11 = vrot.slane %v4382_v4, 4  ;;  %v4387_v63 = vrot.slane %v4385_v38, 5 }
  0xfc   : > { %7798 = vmatmul.mubr.bf16.vlgmr.msra.gmra.mrb[0].mxu0 %v10090_v3  ;;  %8101 = vmatprep.subr.bf16.mxu1 %v8738_v47  ;;  %v11706_v3 = vsel %vm9164_vm2, %v10178_v43, %v10140_v59  ;;  %v4377_v59 = vshll.u32 %v10307_v55, 16  ;;  %v7040_v43 = vcombine.low %v4322_v53, %v4332_v45  ;;  %v1742_v58 = vrot.slane %v1741_v62, 4 }
  0xfd   : > { %7814 = vmatpush3.bf16.msra.mxu0 %v8738_v47  ;;  %v7039_v15 = vcombine.low %v11707_v8, %v11706_v3  ;;  %7801 = vmatprep.mubr.bf16.mxu0 %v10102_v29  ;;  %v6711_v29 = vcombine.low %v11708_v52, %v1709_v24  ;;  %v1765_v10 = vor.u32 %v1764_v54, %v1761_v14  ;;  %v10383_v61 = vrot.slane %v4391_v35, 5  ;;  %v6723_v14 = vld [vmem:[%s9100_s22 + $0xc] sm:$0xe] }
  0xfe   : > { %7815 = vmatprep.subr.bf16.mxu0 %v10291_v44  ;;  %8086 = vmatmul.mubr.bf16.vlgmr.msra.gmra.mrb[0].mxu1 %v10092_v50  ;;  %v1752_v50 = vrot.slane %v1751_v30, 4  ;;  %v1775_v0 = vor.u32 %v1774_v17, %v10325_v28  ;;  %v1733_v31 = vsel %vm9164_vm2, %v10259_v33, %v10254_v20  ;;  %v4397_v54 = vrot.slane %v4395_v19, 4  ;;  %v10437_v35 = vld [vmem:[%s11538_s2 + $0x168] sm:$0xff]  }
  0xff   : > { %8102 = vmatpush3.bf16.msra.mxu1 %v8738_v47  ;;  %8089 = vmatprep.mubr.bf16.mxu1 %v10104_v18  ;;  %v1723_v18 = vsel %vm9164_vm2, %v10252_v6, %v10182_v27  ;;  %v4365_v24 = vrot.slane %v4364_v2, 4  ;;  %v4375_v47 = vrot.slane %v4374_v26, 4  ;;  %v4379_v41 = vrot.slane %v4377_v59, 5  ;;  %v6725_v26 = vld [vmem:[%s9100_s22 + $0x24] sm:$0xe] }
 0x100   : > { %8103 = vmatprep.subr.bf16.mxu1 %v10291_v44  ;;  %v2026_v53 = vrot.slane %v9809_v42, 5  ;;  %v4346_v6 = vsel %vm9164_vm2, %v10281_v37, %v10241_v1  ;;  %v4356_v33 = vsel %vm9164_vm2, %v10302_v5, %v10283_v16  ;;  %v1780_v20 = vrot.slane %v1778_v39, 5  ;;  %v7044_v37 = vld [vmem:[%s9105_s13 + $0xfc] sm:$0xe]  ;;  %v10406_v16 = vld [vmem:[%s11538_s2 + $0x160] sm:$0xff]  }
 0x101   : > { %7816 = vmatpush3.bf16.msra.mxu0 %v10291_v44  ;;  %v4388_v27 = vor.u32 %v4387_v63, %v4384_v11  ;;  %v1747_v45 = vsel %vm9164_vm2, %v1742_v58, %v10293_v32  ;;  %v1757_v42 = vsel %vm9164_vm2, %v1752_v50, %v10304_v56  ;;  %v1766_v4 = vrot.slane %v1765_v10, 4  ;;  %v6726_v50 = vld [vmem:[%s9100_s22 + $0x30] sm:$0xe] }
 0x102   : > { %7817 = vmatprep.subr.bf16.mxu0 %v8740_v36  ;;  %v1776_v1 = vrot.slane %v1775_v0, 4  ;;  %v4401_v5 = vshll.u32 %v10371_v25, 16  ;;  %v6731_v32 = vrot.slane %v6723_v14, 9  ;;  %v2029_v38 = vrot.slane %v9824_v40, 5  ;;  %v10421_v40 = vld [vmem:[%s9100_s22 + $0x18] sm:$0xe] }
 0x103   : > { %8104 = vmatpush3.bf16.msra.mxu1 %v10291_v44  ;;  %v4398_v44 = vor.u32 %v4397_v54, %v10383_v61  ;;  %v4370_v56 = vsel %vm9164_vm2, %v4365_v24, %v10312_v57  ;;  %v4380_v62 = vsel %vm9164_vm2, %v4375_v47, %v4379_v41  ;;  %v2028_v30 = vrot.slane %v2026_v53, 4  ;;  %v10462_v10 = vld [vmem:[%s11538_s2 + $0x170] sm:$0xff]  }
 0x104   : > { %7802 = vmatmul.mubr.bf16.gmra.mrb[4].mxu0 %v6710_v9  ;;  %8105 = vmatprep.subr.bf16.mxu1 %v8740_v36  ;;  %v4584_v17 = vrot.slane %v9835_v22, 5  ;;  %v6712_v7 = vcombine.low %v1723_v18, %v1733_v31  ;;  %v7041_v21 = vcombine.low %v4346_v6, %v4356_v33  ;;  %v10418_v9 = vrot.slane %v4388_v27, 4  ;;  %v11709_v18 = vld [vmem:[#allocation32_spill] sm:$0xff] }
 0x105   : > { %7818 = vmatpush3.bf16.msra.mxu0 %v8740_v36  ;;  %7805 = vmatprep.mubr.bf16.mxu0 %v6711_v29  ;;  %v6713_v3 = vcombine.low %v1747_v45, %v1757_v42  ;;  %v1771_v57 = vsel %vm9164_vm2, %v1766_v4, %v10325_v28  ;;  %v1781_v8 = vsel %vm9164_vm2, %v1776_v1, %v1780_v20  ;;  %v2033_v22 = vrot.slane %v9862_v46, 5  ;;  %v7046_v29 = vld [vmem:[%s9105_s13 + $0x114] sm:$0xe]  ;;  %v7047_v20 = vld [vmem:[%s9105_s13 + $0x120] sm:$0xe] }
 0x106   : > { %7819 = vmatprep.subr.bf16.mxu0 %v10367_v51  ;;  %8090 = vmatmul.mubr.bf16.gmra.mrb[4].mxu1 %v7039_v15  ;;  %v10430_v15 = vld [vmem:[%s9105_s13 + $0x108] sm:$0xe]  ;;  %v7042_v19 = vcombine.low %v4370_v56, %v4380_v62  ;;  %v4399_v28 = vrot.slane %v4398_v44, 4  ;;  %v7052_v2 = vrot.slane %v7044_v37, 9  ;;  %v10443_v46 = vsel %vm9498_vm5, %v6731_v32, %v2026_v53  ;;  %v11712_v53 = vld [vmem:[#allocation33_spill] sm:$0xff]  ;;  %v11713_v42 = vld [vmem:[#allocation34_spill] sm:$0xff] }
 0x107   : > { %8106 = vmatpush3.bf16.msra.mxu1 %v8740_v36  ;;  %8093 = vmatprep.mubr.bf16.mxu1 %v7040_v43  ;;  %v4403_v36 = vrot.slane %v4401_v5, 5  ;;  %v10447_v59 = vsel %vm9498_vm5, %v2028_v30, %v2029_v38  ;;  %v4586_v39 = vrot.slane %v4584_v17, 4  ;;  %v4587_v52 = vrot.slane %v9838_v34, 5  ;;  %v10487_v37 = vld [vmem:[%s11538_s2 + $0x178] sm:$0xff]   ;;  %v11714_v5 = vld [vmem:[#allocation35_spill] sm:$0xff] }
 0x108   : > { %8107 = vmatprep.subr.bf16.mxu1 %v10367_v51  ;;  %v6714_v43 = vcombine.low %v1771_v57, %v1781_v8  ;;  %v4394_v11 = vsel %vm9164_vm2, %v10418_v9, %v10383_v61  ;;  %v4591_v63 = vrot.slane %v9893_v49, 5  ;;  %v2040_v58 = vrot.slane %v9900_v13, 5  ;;  %v11710_v61 = vld [vmem:[#allocation36_spill] sm:$0xff]  ;;  %v11715_v30 = vld [vmem:[#allocation37_spill] sm:$0xff]  ;;  %v6727_v8 = vld [vmem:[%s9100_s22 + $0x3c] sm:$0xe] }
 0x109   : > { %7820 = vmatpush3.bf16.msra.mxu0 %v10367_v51  ;;  %v6732_v34 = vrot.slane %v10421_v40, 9  ;;  %v2035_v0 = vrot.slane %v2033_v22, 4  ;;  %v4598_v31 = vrot.slane %v11709_v18, 5  ;;  %v2047_v54 = vrot.slane %v11710_v61, 5  ;;  %v6728_v18 = vld [vmem:[%s9100_s22 + $0x48] sm:$0xe] }
 0x10a   : > { %7821 = vmatprep.subr.bf16.mxu0 %v10406_v16  ;;  %v4404_v49 = vsel %vm9164_vm2, %v4399_v28, %v4403_v36  ;;  %v6755_v13 = vcombine.low %v10443_v46, %v10447_v59  ;;  %v7053_v24 = vrot.slane %v10430_v15, 9  ;;  %v4585_v47 = vsel %vm9498_vm5, %v7052_v2, %v4584_v17  ;;  %v11718_v36 = vld [vmem:[#allocation28_spill] sm:$0xff] }
 0x10b   : > { %8108 = vmatpush3.bf16.msra.mxu1 %v10367_v51  ;;  %v11711_v51 = vld [vmem:[#allocation31_spill] sm:$0xff]  ;;  %v4588_v41 = vsel %vm9498_vm5, %v4586_v39, %v4587_v52  ;;  %v4594_v6 = vrot.slane %v11712_v53, 5  ;;  %v6733_v33 = vrot.slane %v6725_v26, 9  ;;  %v4593_v27 = vrot.slane %v4591_v63, 4  ;;  %v7048_v52 = vld [vmem:[%s9105_s13 + $0x12c] sm:$0xe] }
 0x10c   : > { %7806 = vmatmul.mubr.bf16.gmra.mrb[8].mxu0 %v6712_v7  ;;  %8109 = vmatprep.subr.bf16.mxu1 %v10406_v16  ;;  %v2036_v14 = vrot.slane %v11711_v51, 5  ;;  %v2042_v45 = vrot.slane %v2040_v58, 4  ;;  %v2043_v4 = vrot.slane %v11713_v42, 5  ;;  %v7054_v1 = vrot.slane %v7046_v29, 9  ;;  %v11716_v7 = vld [vmem:[#allocation29_spill] sm:$0xff]  ;;  %v10518_v26 = vld [vmem:[%s11538_s2 + $0x180] sm:$0xff]  }
 0x10d   : > { %7822 = vmatpush3.bf16.msra.mxu0 %v10406_v16  ;;  %7809 = vmatprep.mubr.bf16.mxu0 %v6713_v3  ;;  %v4600_v44 = vrot.slane %v4598_v31, 4  ;;  %v4601_v32 = vrot.slane %v11714_v5, 5  ;;  %v6734_v38 = vrot.slane %v6726_v50, 9  ;;  %v2049_v56 = vrot.slane %v2047_v54, 4  ;;  %v7049_v51 = vld [vmem:[%s9105_s13 + $0x138] sm:$0xe] }
 0x10e   : > { %7823 = vmatprep.subr.bf16.mxu0 %v10437_v35  ;;  %8094 = vmatmul.mubr.bf16.gmra.mrb[8].mxu1 %v7041_v21  ;;  %v7043_v62 = vcombine.low %v4394_v11, %v4404_v49  ;;  %v2050_v17 = vrot.slane %v11715_v30, 5  ;;  %v4605_v21 = vrot.slane %v11716_v7, 5  ;;  %v7060_v9 = vcombine.low %v4585_v47, %v4588_v41  ;;  %v11719_v11 = vld [vmem:[#allocation38_spill] sm:$0xff]  ;;  %v11722_v53 = vld [vmem:[#allocation40_spill] sm:$0xff] }
 0x10f   : > { %8110 = vmatpush3.bf16.msra.mxu1 %v10406_v16  ;;  %8097 = vmatprep.mubr.bf16.mxu1 %v7042_v19  ;;  %v2034_v16 = vsel %vm9498_vm5, %v6732_v34, %v2033_v22  ;;  %v2037_v40 = vsel %vm9498_vm5, %v2035_v0, %v2036_v14  ;;  %v10501_v3 = vsel %vm9498_vm5, %v7053_v24, %v4591_v63  ;;  %v7055_v15 = vrot.slane %v7047_v20, 9  ;;  %v11717_v19 = vld [vmem:[#allocation30_spill] sm:$0xff]  ;;  %v11726_v7 = vld [vmem:[#allocation44_spill] sm:$0xff] }
 0x110   : > { %8111 = vmatprep.subr.bf16.mxu1 %v10437_v35  ;;  %v10505_v57 = vsel %vm9498_vm5, %v6733_v33, %v2040_v58  ;;  %v10510_v22 = vsel %vm9498_vm5, %v4593_v27, %v4594_v6  ;;  %v4608_v28 = vrot.slane %v11717_v19, 5  ;;  %v2054_v2 = vrot.slane %v11718_v36, 5  ;;  %v11721_v14 = vld [vmem:[#allocation42_spill] sm:$0xff]  ;;  %v11723_v27 = vld [vmem:[#allocation41_spill] sm:$0xff] }
 0x111   : > { %7824 = vmatpush3.bf16.msra.mxu0 %v10437_v35  ;;  %v2044_v46 = vsel %vm9498_vm5, %v2042_v45, %v2043_v4  ;;  %v10524_v59 = vsel %vm9498_vm5, %v7054_v1, %v4598_v31  ;;  %v10528_v39 = vsel %vm9498_vm5, %v6734_v38, %v2047_v54  ;;  %v10539_v29 = vsel %vm9498_vm5, %v2049_v56, %v2050_v17  ;;  %v11720_v31 = vld [vmem:[#allocation39_spill] sm:$0xff]  ;;  %v6729_v4 = vld [vmem:[%s9100_s22 + $0x54] sm:$0xe] }
 0x112   : > { %7825 = vmatprep.subr.bf16.mxu0 %v10462_v10  ;;  %v4612_v63 = vrot.slane %v11719_v11, 5  ;;  %v6756_v58 = vcombine.low %v2034_v16, %v2037_v40  ;;  %v7061_v50 = vcombine.low %v10501_v3, %v10510_v22  ;;  %v6757_v34 = vcombine.low %v10505_v57, %v2044_v46  ;;  %v11724_v1 = vld [vmem:[#allocation45_spill] sm:$0xff]  ;;  %v11725_v38 = vld [vmem:[#allocation43_spill] sm:$0xff] }
 0x113   : > { %8112 = vmatpush3.bf16.msra.mxu1 %v10437_v35  ;;  %v10535_v35 = vsel %vm9498_vm5, %v4600_v44, %v4601_v32  ;;  %v6735_v0 = vrot.slane %v6727_v8, 9  ;;  %v2061_v61 = vrot.slane %v11720_v31, 5  ;;  %v6758_v49 = vcombine.low %v10528_v39, %v10539_v29  ;;  %v10584_v16 = vld [vmem:[%s11538_s2 + $0x190] sm:$0xff]   ;;  %v11727_v40 = vld [vmem:[#allocation47_spill] sm:$0xff]  ;;  %v10676_v29 = vld [vmem:[%s9105_s13 + $0x10c] sm:$0xf] }
 0x114   : > { %7810 = vmatmul.mubr.bf16.gmra.mrb[12].mxu0 %v6714_v43  ;;  %8113 = vmatprep.subr.bf16.mxu1 %v10462_v10  ;;  %v4607_v43 = vrot.slane %v4605_v21, 4  ;;  %v7062_v54 = vcombine.low %v10524_v59, %v10535_v35  ;;  %v4619_v24 = vrot.slane %v11721_v14, 5  ;;  %v2056_v41 = vrot.slane %v2054_v2, 4  ;;  %v6730_v22 = vld [vmem:[%s9100_s22 + $0x60] sm:$0xe] }
 0x115   : > { %7826 = vmatpush3.bf16.msra.mxu0 %v10462_v10  ;;  %7829 = vmatprep.mubr.bf16.mxu0 %v6755_v13  ;;  %v10555_v13 = vsel %vm9498_vm5, %v7055_v15, %v4605_v21  ;;  %v2057_v6 = vrot.slane %v11722_v53, 5  ;;  %v7056_v33 = vrot.slane %v7048_v52, 9  ;;  %v4614_v20 = vrot.slane %v4612_v63, 4  ;;  %v11728_v15 = vld [vmem:[#allocation48_spill] sm:$0xff]  ;;  %v11729_v59 = vld [vmem:[#allocation46_spill] sm:$0xff] }
 0x116   : > { %7827 = vmatprep.subr.bf16.mxu0 %v10487_v37  ;;  %8098 = vmatmul.mubr.bf16.gmra.mrb[12].mxu1 %v7043_v62  ;;  %v10568_v47 = vsel %vm9498_vm5, %v4607_v43, %v4608_v28  ;;  %v4615_v45 = vrot.slane %v11723_v27, 5  ;;  %v6736_v42 = vrot.slane %v6728_v18, 9  ;;  %v2068_v44 = vrot.slane %v11724_v1, 5  ;;  %v7051_v28 = vld [vmem:[%s9105_s13 + $0x150] sm:$0xe] }
 0x117   : > { %8114 = vmatpush3.bf16.msra.mxu1 %v10462_v10  ;;  %8117 = vmatprep.mubr.bf16.mxu1 %v7060_v9  ;;  %v10564_v10 = vld [vmem:[%s11538_s2 + $0x188] sm:$0xff]   ;;  %v10577_v5 = vsel %vm9498_vm5, %v6735_v0, %v2054_v2  ;;  %v2063_v32 = vrot.slane %v2061_v61, 4  ;;  %v2064_v56 = vrot.slane %v11725_v38, 5  ;;  %v7057_v62 = vrot.slane %v7049_v51, 9  ;;  %v7050_v9 = vld [vmem:[%s9105_s13 + $0x144] sm:$0xe] }
 0x118   : > { %8115 = vmatprep.subr.bf16.mxu1 %v10487_v37  ;;  %v7063_v30 = vcombine.low %v10555_v13, %v10568_v47  ;;  %v4621_v17 = vrot.slane %v4619_v24, 4  ;;  %v4622_v21 = vrot.slane %v11726_v7, 5  ;;  %v4626_v3 = vrot.slane %v11727_v40, 5  ;;  %v6819_v35 = vld [vmem:[%s9100_s22 + $0x18] sm:$0xf]  ;;  %v10722_v13 = vld [vmem:[%s11538_s2 + $0x1a8] sm:$0xff]  }
 0x119   : > { %7828 = vmatpush3.bf16.msra.mxu0 %v10487_v37  ;;  %v10597_v57 = vsel %vm9498_vm5, %v7056_v33, %v4612_v63  ;;  %v6737_v8 = vrot.slane %v6729_v4, 9  ;;  %v2075_v19 = vrot.slane %v11728_v15, 5  ;;  %v10605_v36 = vsel %vm9498_vm5, %v4614_v20, %v4615_v45  ;;  %v10640_v51 = vld [vmem:[%s9100_s22 + $0x20] sm:$0x1]  ;;  %v10715_v40 = vld [vmem:[%s9100_s22 + $0x28] sm:$0xf] }
 0x11a   : > { %7845 = vmatprep.subr.bf16.mxu0 %v10518_v26  ;;  %v10609_v2 = vsel %vm9498_vm5, %v6736_v42, %v2061_v61  ;;  %v2070_v46 = vrot.slane %v2068_v44, 4  ;;  %v2071_v52 = vrot.slane %v11729_v59, 5  ;;  %v10615_v43 = vsel %vm9498_vm5, %v2063_v32, %v2064_v56  ;;  %v10634_v61 = vld [vmem:[%s9100_s22 + $0x1c] sm:$0xf] }
 0x11b   : > { %8116 = vmatpush3.bf16.msra.mxu1 %v10487_v37  ;;  %v2058_v37 = vsel %vm9498_vm5, %v2056_v41, %v2057_v6  ;;  %v10619_v11 = vsel %vm9498_vm5, %v7057_v62, %v4619_v24  ;;  %v7058_v63 = vrot.slane %v7050_v9, 9  ;;  %v4628_v0 = vrot.slane %v4626_v3, 4  ;;  %v6822_v62 = vld [vmem:[%s9100_s22 + $0x24] sm:$0xf] }
 0x11c   : > { %7830 = vmatmul.mubr.bf16.vlgmr.msra.gmra.mrb[0].mxu0 %v6756_v58  ;;  %8133 = vmatprep.subr.bf16.mxu1 %v10518_v26  ;;  %v4633_v58 = vrot.slane %v10298_v60, 5  ;;  %v4629_v18 = vrot.slane %v10307_v55, 5  ;;  %v6738_v31 = vrot.slane %v6730_v22, 9  ;;  %v2077_v60 = vrot.slane %v2075_v19, 4 }
 0x11d   : > { %7846 = vmatpush3.bf16.msra.mxu0 %v10518_v26  ;;  %7833 = vmatprep.mubr.bf16.mxu0 %v6757_v34  ;;  %v10626_v34 = vld [vmem:[%s11538_s2 + $0x198] sm:$0xff]   ;;  %v2558_v14 = vshrl.u32 %v6819_v35, 16  ;;  %v6759_v24 = vcombine.low %v10577_v5, %v2058_v37  ;;  %v7064_v55 = vcombine.low %v10597_v57, %v10605_v36  ;;  %v10648_v41 = vsel %vm9498_vm5, %v6737_v8, %v2068_v44  ;;  %v10682_v44 = vld [vmem:[%s11538_s2 + $0x1a0] sm:$0xff]   ;;  %v10727_v37 = vld [vmem:[%s9105_s13 + $0x110] sm:$0x1] }
 0x11e   : > { %7847 = vmatprep.subr.bf16.mxu0 %v10564_v10  ;;  %8118 = vmatmul.mubr.bf16.vlgmr.msra.gmra.mrb[0].mxu1 %v7061_v50  ;;  %v10630_v50 = vsel %vm9498_vm5, %v4621_v17, %v4622_v21  ;;  %v10652_v53 = vsel %vm9498_vm5, %v2070_v46, %v2071_v52  ;;  %v4635_v6 = vrot.slane %v4633_v58, 4  ;;  %v4636_v33 = vrot.slane %v10371_v25, 5 }
 0x11f   : > { %8134 = vmatpush3.bf16.msra.mxu1 %v10518_v26  ;;  %8121 = vmatprep.mubr.bf16.mxu1 %v7062_v54  ;;  %v2078_v26 = vrot.slane %v10310_v23, 5  ;;  %v7059_v54 = vrot.slane %v7051_v28, 9  ;;  %v7092_v23 = vld [vmem:[%s9105_s13 + $0x108] sm:$0xf]  ;;  %v2561_v20 = vshll.u32 %v6819_v35, 16  ;;  %v2567_v27 = vshll.u32 %v10634_v61, 16 }
 0x120   : > { %8135 = vmatprep.subr.bf16.mxu1 %v10564_v10  ;;  %v6760_v45 = vcombine.low %v10609_v2, %v10615_v43  ;;  %v7065_v42 = vcombine.low %v10619_v11, %v10630_v50  ;;  %v2571_v4 = vshrl.u32 %v10634_v61, 16  ;;  %v2577_v25 = vshll.u32 %v10640_v51, 16  ;;  %v10738_v28 = vld [vmem:[%s9105_s13 + $0x118] sm:$0xf]  ;;  %v10791_v50 = vld [vmem:[%s9105_s13 + $0x11c] sm:$0x1] }
 0x121   : > { %7848 = vmatpush3.bf16.msra.mxu0 %v10564_v10  ;;  %v10673_v39 = vsel %vm9498_vm5, %v7058_v63, %v4626_v3  ;;  %v4989_v1 = vshll.u32 %v7092_v23, 16  ;;  %v10686_v5 = vsel %vm9498_vm5, %v4628_v0, %v4629_v18  ;;  %v10690_v32 = vsel %vm9498_vm5, %v6738_v31, %v2075_v19  ;;  %v7095_v3 = vld [vmem:[%s9105_s13 + $0x114] sm:$0xf]  ;;  %11730 = vst [vmem:[#allocation32_spill] sm:$0xff] %v10791_v50 }
 0x122   : > { %7849 = vmatprep.subr.bf16.mxu0 %v10584_v16  ;;  %v10694_v38 = vsel %vm9498_vm5, %v2077_v60, %v2078_v26  ;;  %v10696_v56 = vrot.slane %v2558_v14, 4  ;;  %v10704_v17 = vsel %vm9498_vm5, %v7059_v54, %v4633_v58  ;;  %v10708_v7 = vsel %vm9498_vm5, %v4635_v6, %v4636_v33  ;;  %v6825_v58 = vld [vmem:[%s9100_s22 + $0x30] sm:$0xf]  ;;  %v10753_v0 = vld [vmem:[%s9100_s22 + $0x34] sm:$0xf] }
 0x123   : > { %8136 = vmatpush3.bf16.msra.mxu1 %v10564_v10  ;;  %v6761_v10 = vcombine.low %v10648_v41, %v10652_v53  ;;  %v10710_v21 = vrot.slane %v2561_v20, 5  ;;  %v10712_v9 = vrot.slane %v2567_v27, 5  ;;  %v2573_v47 = vrot.slane %v2571_v4, 4  ;;  %v10765_v54 = vld [vmem:[%s11538_s2 + $0x1b0] sm:$0xff]  }
 0x124   : > { %7834 = vmatmul.mubr.bf16.gmra.mrb[4].mxu0 %v6758_v49  ;;  %8137 = vmatprep.subr.bf16.mxu1 %v10584_v16  ;;  %v4986_v49 = vshrl.u32 %v7092_v23, 16  ;;  %v4995_v57 = vshll.u32 %v10676_v29, 16  ;;  %v4999_v8 = vshrl.u32 %v10676_v29, 16  ;;  %v10735_v22 = vrot.slane %v4989_v1, 5 }
 0x125   : > { %7850 = vmatpush3.bf16.msra.mxu0 %v10584_v16  ;;  %7837 = vmatprep.mubr.bf16.mxu0 %v6759_v24  ;;  %v2582_v15 = vshrl.u32 %v6822_v62, 16  ;;  %v2585_v19 = vshll.u32 %v6822_v62, 16  ;;  %v2591_v36 = vshll.u32 %v10715_v40, 16  ;;  %v2595_v2 = vshrl.u32 %v10715_v40, 16  ;;  %v10770_v24 = vld [vmem:[%s9100_s22 + $0x2c] sm:$0x1] }
 0x126   : > { %7851 = vmatprep.subr.bf16.mxu0 %v10626_v34  ;;  %8122 = vmatmul.mubr.bf16.gmra.mrb[4].mxu1 %v7063_v30  ;;  %v10724_v30 = vrot.slane %v2577_v25, 5  ;;  %v5010_v46 = vshrl.u32 %v7095_v3, 16  ;;  %v5013_v59 = vshll.u32 %v7095_v3, 16  ;;  %v7066_v52 = vcombine.low %v10673_v39, %v10686_v5  ;;  %v10784_v25 = vld [vmem:[%s11538_s2 + $0x1b8] sm:$0xff]  }
 0x127   : > { %8138 = vmatpush3.bf16.msra.mxu1 %v10584_v16  ;;  %8125 = vmatprep.mubr.bf16.mxu1 %v7064_v55  ;;  %v10733_v16 = vrot.slane %v4986_v49, 4  ;;  %v6762_v35 = vcombine.low %v10690_v32, %v10694_v38  ;;  %v7067_v43 = vcombine.low %v10704_v17, %v10708_v7  ;;  %v2564_v63 = vor.u32 %v10710_v21, %v10696_v56  ;;  %v10801_v38 = vld [vmem:[%s9100_s22 + $0x38] sm:$0x1]  ;;  %v8760_v17 = vld [vmem:[%s9100_s22 + $0x30] sm:$0xff]  }
 0x128   : > { %8139 = vmatprep.subr.bf16.mxu1 %v10626_v34  ;;  %v10756_v18 = vrot.slane %v4995_v57, 5  ;;  %v5001_v31 = vrot.slane %v4999_v8, 4  ;;  %v5019_v60 = vshll.u32 %v10738_v28, 16  ;;  %v5023_v26 = vshrl.u32 %v10738_v28, 16 }
 0x129   : > { %7852 = vmatpush3.bf16.msra.mxu0 %v10626_v34  ;;  %v2574_v14 = vor.u32 %v2573_v47, %v10712_v9  ;;  %v2584_v55 = vrot.slane %v2582_v15, 4  ;;  %v2587_v41 = vrot.slane %v2585_v19, 5  ;;  %v2606_v53 = vshrl.u32 %v6825_v58, 16  ;;  %v7098_v47 = vld [vmem:[%s9105_s13 + $0x120] sm:$0xf]  ;;  %v8755_v15 = vld [vmem:[%s9105_s13 + $0x108] sm:$0xff]  }
 0x12a   : > { %7853 = vmatprep.subr.bf16.mxu0 %v10682_v44  ;;  %v2609_v23 = vshll.u32 %v6825_v58, 16  ;;  %v2615_v6 = vshll.u32 %v10753_v0, 16  ;;  %v2619_v33 = vshrl.u32 %v10753_v0, 16  ;;  %v10778_v20 = vrot.slane %v2591_v36, 5 }
 0x12b   : > { %8140 = vmatpush3.bf16.msra.mxu1 %v10626_v34  ;;  %v5005_v34 = vshll.u32 %v10727_v37, 16  ;;  %v2597_v27 = vrot.slane %v2595_v2, 4  ;;  %v5015_v4 = vrot.slane %v5013_v59, 5  ;;  %v4992_v39 = vor.u32 %v10735_v22, %v10733_v16  ;;  %v10818_v59 = vld [vmem:[%s11538_s2 + $0x1c0] sm:$0xff]  }
 0x12c   : > { %7838 = vmatmul.mubr.bf16.gmra.mrb[8].mxu0 %v6760_v45  ;;  %8141 = vmatprep.subr.bf16.mxu1 %v10682_v44  ;;  %v5012_v45 = vrot.slane %v5010_v46, 4  ;;  %v5002_v11 = vor.u32 %v5001_v31, %v10756_v18  ;;  %v5025_v49 = vrot.slane %v5023_v26, 4  ;;  %v2565_v1 = vrot.slane %v2564_v63, 4  ;;  %v8756_v63 = vld [vmem:[%s9100_s22 + $0x24] sm:$0xff]  }
 0x12d   : > { %7854 = vmatpush3.bf16.msra.mxu0 %v10682_v44  ;;  %7841 = vmatprep.mubr.bf16.mxu0 %v6761_v10  ;;  %v8754_v10 = vld [vmem:[%s9100_s22 + $0x18] sm:$0xff]   ;;  %v10797_v5 = vrot.slane %v5005_v34, 5  ;;  %v2601_v32 = vshll.u32 %v10770_v24, 16  ;;  %v2608_v56 = vrot.slane %v2606_v53, 4  ;;  %v2611_v62 = vrot.slane %v2609_v23, 5 }
 0x12e   : > { %7855 = vmatprep.subr.bf16.mxu0 %v10722_v13  ;;  %8126 = vmatmul.mubr.bf16.gmra.mrb[8].mxu1 %v7065_v42  ;;  %v10793_v42 = vrot.slane %v5019_v60, 5  ;;  %v10804_v21 = vrot.slane %v2615_v6, 5  ;;  %v2621_v3 = vrot.slane %v2619_v33, 4  ;;  %v2588_v57 = vor.u32 %v2587_v41, %v2584_v55  ;;  %v10832_v26 = vld [vmem:[%s9105_s13 + $0x124] sm:$0xf]  ;;  %v10849_v41 = vld [vmem:[%s11538_s2 + $0x1c8] sm:$0xff]  }
 0x12f   : > { %8142 = vmatpush3.bf16.msra.mxu1 %v10682_v44  ;;  %8129 = vmatprep.mubr.bf16.mxu1 %v7066_v52  ;;  %v2575_v44 = vrot.slane %v2574_v14, 4  ;;  %v2598_v8 = vor.u32 %v2597_v27, %v10778_v20  ;;  %v5016_v16 = vor.u32 %v5015_v4, %v5012_v45  ;;  %v5029_v22 = vshll.u32 %v10791_v50, 16  ;;  %v6828_v23 = vld [vmem:[%s9100_s22 + $0x3c] sm:$0xf]  ;;  %v10864_v6 = vld [vmem:[%s9100_s22 + $0x40] sm:$0xf] }
 0x130   : > { %8143 = vmatprep.subr.bf16.mxu1 %v10722_v13  ;;  %v4993_v19 = vrot.slane %v4992_v39, 4  ;;  %v5003_v36 = vrot.slane %v5002_v11, 4  ;;  %v5026_v2 = vor.u32 %v5025_v49, %v10793_v42  ;;  %v2625_v46 = vshll.u32 %v10801_v38, 16  ;;  %11731 = vst [vmem:[#allocation36_spill] sm:$0xff] %v10864_v6  ;;  %v8758_v33 = vld [vmem:[%s9105_s13 + $0x114] sm:$0xff]   ;;  %v8761_v39 = vld [vmem:[%s9105_s13 + $0x120] sm:$0xff]  }
 0x131   : > { %7856 = vmatpush3.bf16.msra.mxu0 %v10722_v13  ;;  %v2580_v52 = vsel %vm9164_vm2, %v2575_v44, %v10724_v30  ;;  %v10828_v58 = vrot.slane %v2601_v32, 5  ;;  %v2612_v31 = vor.u32 %v2611_v62, %v2608_v56  ;;  %v2622_v60 = vor.u32 %v2621_v3, %v10804_v21  ;;  %v7101_v4 = vld [vmem:[%s9105_s13 + $0x12c] sm:$0xf]  ;;  %v6831_v3 = vld [vmem:[%s9100_s22 + $0x48] sm:$0xf]  ;;  %v8773_v50 = vld [vmem:[%s9105_s13 + $0x150] sm:$0xff]  }
 0x132   : > { %7857 = vmatprep.subr.bf16.mxu0 %v10765_v54  ;;  %v10837_v30 = vrot.slane %v2588_v57, 4  ;;  %v10839_v14 = vrot.slane %v2598_v8, 4  ;;  %v10841_v34 = vrot.slane %v5016_v16, 4  ;;  %v10843_v55 = vrot.slane %v5029_v22, 5  ;;  %v10907_v57 = vld [vmem:[%s9105_s13 + $0x128] sm:$0x1] }
 0x133   : > { %8144 = vmatpush3.bf16.msra.mxu1 %v10722_v13  ;;  %v2570_v13 = vsel %vm9164_vm2, %v2565_v1, %v10712_v9  ;;  %v5037_v9 = vshll.u32 %v7098_v47, 16  ;;  %v4998_v7 = vsel %vm9164_vm2, %v4993_v19, %v10756_v18  ;;  %v10858_v53 = vrot.slane %v5026_v2, 4  ;;  %11734 = vst [vmem:[#allocation34_spill] sm:$0xff] %v10907_v57 }
 0x134   : > { %7842 = vmatmul.mubr.bf16.gmra.mrb[12].mxu0 %v6762_v35  ;;  %8145 = vmatprep.subr.bf16.mxu1 %v10765_v54  ;;  %v5034_v35 = vshrl.u32 %v7098_v47, 16  ;;  %v10869_v27 = vcombine.low %v2570_v13, %v2580_v52  ;;  %v5043_v45 = vshll.u32 %v10832_v26, 16  ;;  %v10880_v11 = vrot.slane %v2612_v31, 4  ;;  %v10903_v47 = vld [vmem:[%s9100_s22 + $0x4c] sm:$0xf]  ;;  %v8762_v31 = vld [vmem:[%s9100_s22 + $0x3c] sm:$0xff]  }
 0x135   : > { %7858 = vmatpush3.bf16.msra.mxu0 %v10765_v54  ;;  %7861 = vmatprep.mubr.bf16.mxu0 %v8754_v10  ;;  %v10876_v10 = vld [vmem:[%s9105_s13 + $0x130] sm:$0xf]  ;;  %v10882_v49 = vrot.slane %v2622_v60, 4  ;;  %v10884_v1 = vrot.slane %v5037_v9, 5  ;;  %v5047_v44 = vshrl.u32 %v10832_v26, 16  ;;  %11733 = vst [vmem:[#allocation33_spill] sm:$0xff] %v10903_v47 }
 0x136   : > { %7859 = vmatprep.subr.bf16.mxu0 %v10784_v25  ;;  %8130 = vmatmul.mubr.bf16.gmra.mrb[12].mxu1 %v7067_v43  ;;  %v5008_v43 = vsel %vm9164_vm2, %v5003_v36, %v10797_v5  ;;  %v10871_v18 = vrot.slane %v5034_v35, 4  ;;  %11732 = vst [vmem:[#allocation31_spill] sm:$0xff] %v10876_v10  ;;  %v2630_v8 = vshrl.u32 %v6828_v23, 16  ;;  %v2633_v16 = vshll.u32 %v6828_v23, 16  ;;  %v10936_v23 = vld [vmem:[%s11538_s2 + $0x1d8] sm:$0xff]  }
 0x137   : > { %8146 = vmatpush3.bf16.msra.mxu1 %v10765_v54  ;;  %8149 = vmatprep.mubr.bf16.mxu1 %v8755_v15  ;;  %v10860_v54 = vrot.slane %v2625_v46, 5  ;;  %v10887_v5 = vcombine.low %v4998_v7, %v5008_v43  ;;  %v2639_v22 = vshll.u32 %v10864_v6, 16  ;;  %v2643_v15 = vshrl.u32 %v10864_v6, 16  ;;  %v10919_v46 = vld [vmem:[%s11538_s2 + $0x1d0] sm:$0xff]   ;;  %v10930_v43 = vld [vmem:[%s9100_s22 + $0x44] sm:$0x1] }
 0x138   : > { %8147 = vmatprep.subr.bf16.mxu1 %v10784_v25  ;;  %v5058_v19 = vshrl.u32 %v7101_v4, 16  ;;  %v5061_v36 = vshll.u32 %v7101_v4, 16  ;;  %v5067_v2 = vshll.u32 %v10876_v10, 16  ;;  %v2654_v13 = vshrl.u32 %v6831_v3, 16  ;;  %11735 = vst [vmem:[#allocation35_spill] sm:$0xff] %v10930_v43 }
 0x139   : > { %7860 = vmatpush3.bf16.msra.mxu0 %v10784_v25  ;;  %v2657_v52 = vshll.u32 %v6831_v3, 16  ;;  %v2663_v35 = vshll.u32 %v10903_v47, 16  ;;  %v5040_v60 = vor.u32 %v10884_v1, %v10871_v18  ;;  %v10926_v9 = vrot.slane %v5043_v45, 5  ;;  %v7104_v3 = vld [vmem:[%s9105_s13 + $0x138] sm:$0xf] }
 0x13a   : > { %7877 = vmatprep.subr.bf16.mxu0 %v10818_v59  ;;  %v5053_v7 = vshll.u32 %v10907_v57, 16  ;;  %v2632_v4 = vrot.slane %v2630_v8, 4  ;;  %v2635_v18 = vrot.slane %v2633_v16, 5  ;;  %v10939_v45 = vrot.slane %v2639_v22, 5  ;;  %v10951_v8 = vld [vmem:[%s9100_s22 + $0x50] sm:$0x1] }
 0x13b   : > { %8148 = vmatpush3.bf16.msra.mxu1 %v10784_v25  ;;  %v5071_v25 = vshrl.u32 %v10876_v10, 16  ;;  %v2645_v1 = vrot.slane %v2643_v15, 4  ;;  %v5063_v62 = vrot.slane %v5061_v36, 5  ;;  %v10948_v32 = vrot.slane %v5067_v2, 5  ;;  %11737 = vst [vmem:[#allocation29_spill] sm:$0xff] %v10951_v8 }
 0x13c   : > { %7862 = vmatmul.mubr.bf16.vlgmr.msra.gmra.mrb[0].mxu0 %v8756_v63  ;;  %8165 = vmatprep.subr.bf16.mxu1 %v10818_v59  ;;  %v2667_v63 = vshrl.u32 %v10903_v47, 16  ;;  %v2656_v16 = vrot.slane %v2654_v13, 4  ;;  %v2659_v22 = vrot.slane %v2657_v52, 5  ;;  %v10954_v15 = vrot.slane %v2663_v35, 5  ;;  %v10957_v47 = vld [vmem:[%s9105_s13 + $0x13c] sm:$0xf] }
 0x13d   : > { %7878 = vmatpush3.bf16.msra.mxu0 %v10818_v59  ;;  %7865 = vmatprep.mubr.bf16.mxu0 %v8760_v17  ;;  %v5049_v17 = vrot.slane %v5047_v44, 4  ;;  %v10942_v44 = vld [vmem:[%s9105_s13 + $0x134] sm:$0x1]  ;;  %v5073_v56 = vrot.slane %v5071_v25, 4  ;;  %11738 = vst [vmem:[#allocation30_spill] sm:$0xff] %v10957_v47  ;;  %v5082_v2 = vshrl.u32 %v7104_v3, 16 }
 0x13e   : > { %7879 = vmatprep.subr.bf16.mxu0 %v10849_v41  ;;  %8150 = vmatmul.mubr.bf16.vlgmr.msra.gmra.mrb[0].mxu1 %v8758_v33  ;;  %v8766_v33 = vld [vmem:[%s9100_s22 + $0x48] sm:$0xff]   ;;  %11736 = vst [vmem:[#allocation37_spill] sm:$0xff] %v10942_v44  ;;  %v2669_v10 = vrot.slane %v2667_v63, 4  ;;  %v5085_v25 = vshll.u32 %v7104_v3, 16  ;;  %v8767_v13 = vld [vmem:[%s9105_s13 + $0x138] sm:$0xff]   ;;  %v2636_v63 = vor.u32 %v2635_v18, %v2632_v4  ;;  %v5077_v36 = vshll.u32 %v10942_v44, 16 }
 0x13f   : > { %8166 = vmatpush3.bf16.msra.mxu1 %v10818_v59  ;;  %8153 = vmatprep.mubr.bf16.mxu1 %v8761_v39  ;;  %v8764_v59 = vld [vmem:[%s9105_s13 + $0x12c] sm:$0xff]   ;;  %v5060_v39 = vrot.slane %v5058_v19, 4  ;;  %v5050_v35 = vor.u32 %v5049_v17, %v10926_v9  ;;  %v2649_v19 = vshll.u32 %v10930_v43, 16  ;;  %v5074_v3 = vor.u32 %v5073_v56, %v10948_v32  ;;  %v10984_v17 = vld [vmem:[%s11538_s2 + $0x1e0] sm:$0xff]   ;;  %v8768_v56 = vld [vmem:[%s9100_s22 + $0x54] sm:$0xff]  }
 0x140   : > { %8167 = vmatprep.subr.bf16.mxu1 %v10849_v41  ;;  %v10986_v4 = vrot.slane %v5040_v60, 4  ;;  %v2660_v18 = vor.u32 %v2659_v22, %v2656_v16  ;;  %v2673_v52 = vshll.u32 %v10951_v8, 16  ;;  %v5084_v44 = vrot.slane %v5082_v2, 4  ;;  %v10998_v57 = vld [vmem:[%s9100_s22 + $0x58] sm:$0xf] }
 0x141   : > { %7880 = vmatpush3.bf16.msra.mxu0 %v10849_v41  ;;  %v5095_v43 = vshrl.u32 %v10957_v47, 16  ;;  %v5051_v60 = vrot.slane %v5050_v35, 4  ;;  %v5055_v16 = vrot.slane %v5053_v7, 5  ;;  %v2637_v22 = vrot.slane %v2636_v63, 4  ;;  %v8772_v7 = vld [vmem:[%s9100_s22 + $0x60] sm:$0xff]  }
 0x142   : > { %7881 = vmatprep.subr.bf16.mxu0 %v10919_v46  ;;  %v2651_v8 = vrot.slane %v2649_v19, 5  ;;  %v5075_v2 = vrot.slane %v5074_v3, 4  ;;  %v2661_v19 = vrot.slane %v2660_v18, 4  ;;  %v5046_v18 = vsel %vm9164_vm2, %v10986_v4, %v10926_v9  ;;  %v11037_v4 = vld [vmem:[%s11538_s2 + $0x1f0] sm:$0xff]  }
 0x143   : > { %8168 = vmatpush3.bf16.msra.mxu1 %v10849_v41  ;;  %v2646_v41 = vor.u32 %v2645_v1, %v10939_v45  ;;  %v5091_v1 = vshll.u32 %v10957_v47, 16  ;;  %v8770_v47 = vld [vmem:[%s9105_s13 + $0x144] sm:$0xff]   ;;  %v5097_v6 = vrot.slane %v5095_v43, 4  ;;  %v2642_v43 = vsel %vm9164_vm2, %v2637_v22, %v10939_v45 }
 0x144   : > { %7866 = vmatmul.mubr.bf16.gmra.mrb[4].mxu0 %v8762_v31  ;;  %8169 = vmatprep.subr.bf16.mxu1 %v10919_v46  ;;  %v5064_v31 = vor.u32 %v5063_v62, %v5060_v39  ;;  %v6834_v62 = vld [vmem:[%s9100_s22 + $0x54] sm:$0xf]  ;;  %v2670_v39 = vor.u32 %v2669_v10, %v10954_v15 }
 0x145   : > { %7882 = vmatpush3.bf16.msra.mxu0 %v10919_v46  ;;  %7869 = vmatprep.mubr.bf16.mxu0 %v8766_v33  ;;  %v5087_v33 = vrot.slane %v5085_v25, 5  ;;  %v2647_v10 = vrot.slane %v2646_v41, 4  ;;  %v5079_v25 = vrot.slane %v5077_v36, 5  ;;  %v2678_v35 = vshrl.u32 %v6834_v62, 16 }
 0x146   : > { %7883 = vmatprep.subr.bf16.mxu0 %v10936_v23  ;;  %8154 = vmatmul.mubr.bf16.gmra.mrb[4].mxu1 %v8764_v59  ;;  %v5065_v59 = vrot.slane %v5064_v31, 4  ;;  %v2681_v63 = vshll.u32 %v6834_v62, 16  ;;  %v2671_v41 = vrot.slane %v2670_v39, 4  ;;  %v11009_v31 = vld [vmem:[%s9105_s13 + $0x140] sm:$0x1]  ;;  %v11011_v3 = vrot.slane %v5091_v1, 5 }
 0x147   : > { %8170 = vmatpush3.bf16.msra.mxu1 %v10919_v46  ;;  %8157 = vmatprep.mubr.bf16.mxu1 %v8767_v13  ;;  %v11004_v46 = vld [vmem:[%s11538_s2 + $0x1e8] sm:$0xff]   ;;  %v2675_v13 = vrot.slane %v2673_v52, 5  ;;  %v5088_v36 = vor.u32 %v5087_v33, %v5084_v44  ;;  %v5056_v52 = vsel %vm9164_vm2, %v5051_v60, %v5055_v16  ;;  %v2687_v62 = vshll.u32 %v10998_v57, 16 }
 0x148   : > { %8171 = vmatprep.subr.bf16.mxu1 %v10936_v23  ;;  %v2691_v44 = vshrl.u32 %v10998_v57, 16  ;;  %v5070_v9 = vsel %vm9164_vm2, %v5065_v59, %v10948_v32  ;;  %v5080_v1 = vsel %vm9164_vm2, %v5075_v2, %v5079_v25  ;;  %v5101_v45 = vshll.u32 %v11009_v31, 16  ;;  %v8774_v39 = vld [vmem:[%s9100_s22 + $0x6c] sm:$0xff]   ;;  %v11101_v59 = vld [vmem:[%s9105_s13 + $0x148] sm:$0xf] }
 0x149   : > { %7884 = vmatpush3.bf16.msra.mxu0 %v10936_v23  ;;  %v2666_v32 = vsel %vm9164_vm2, %v2661_v19, %v10954_v15  ;;  %v2676_v33 = vsel %vm9164_vm2, %v2671_v41, %v2675_v13  ;;  %v11048_v60 = vrot.slane %v5088_v36, 4  ;;  %v5098_v16 = vor.u32 %v5097_v6, %v11011_v3  ;;  %v6837_v2 = vld [vmem:[%s9100_s22 + $0x60] sm:$0xf]  ;;  %v7110_v19 = vld [vmem:[%s9105_s13 + $0x150] sm:$0xf] }
 0x14a   : > { %7885 = vmatprep.subr.bf16.mxu0 %v10984_v17  ;;  %v11740_v15 = vsel %vm9164_vm2, %v10837_v30, %v10778_v20  ;;  %v11741_v6 = vsel %vm9164_vm2, %v10858_v53, %v10843_v55  ;;  %v2693_v20 = vrot.slane %v2691_v44, 4  ;;  %v7107_v30 = vld [vmem:[%s9105_s13 + $0x144] sm:$0xf]  ;;  %v11096_v53 = vcombine.low %v5046_v18, %v5056_v52  ;;  %v8776_v13 = vld [vmem:[%s9105_s13 + $0x15c] sm:$0xff]   ;;  %v11125_v18 = vld [vmem:[%s9105_s13 + $0x154] sm:$0xf] }
 0x14b   : > { %8172 = vmatpush3.bf16.msra.mxu1 %v10936_v23  ;;  %v2652_v23 = vsel %vm9164_vm2, %v2647_v10, %v2651_v8  ;;  %v2680_v8 = vrot.slane %v2678_v35, 4  ;;  %v5094_v35 = vsel %vm9164_vm2, %v11048_v60, %v11011_v3  ;;  %v5106_v36 = vshrl.u32 %v7107_v30, 16 }
 0x14c   : > { %7870 = vmatmul.mubr.bf16.gmra.mrb[8].mxu0 %v8768_v56  ;;  %8173 = vmatprep.subr.bf16.mxu1 %v10984_v17  ;;  %v2683_v56 = vrot.slane %v2681_v63, 5  ;;  %v11098_v10 = vcombine.low %v2642_v43, %v2652_v23  ;;  %v5099_v63 = vrot.slane %v5098_v16, 4  ;;  %v5115_v44 = vshll.u32 %v11101_v59, 16 }
 0x14d   : > { %7886 = vmatpush3.bf16.msra.mxu0 %v10984_v17  ;;  %7873 = vmatprep.mubr.bf16.mxu0 %v8772_v7  ;;  %v11115_v7 = vld [vmem:[%s9100_s22 + $0x64] sm:$0xf]  ;;  %v5119_v43 = vshrl.u32 %v11101_v59, 16  ;;  %v2702_v3 = vshrl.u32 %v6837_v2, 16  ;;  %v2705_v23 = vshll.u32 %v6837_v2, 16  ;;  %v5108_v16 = vrot.slane %v5106_v36, 4 }
 0x14e   : > { %7887 = vmatprep.subr.bf16.mxu0 %v11004_v46  ;;  %8158 = vmatmul.mubr.bf16.gmra.mrb[8].mxu1 %v8770_v47  ;;  %v11739_v47 = vsel %vm9164_vm2, %v10839_v14, %v10828_v58  ;;  %v11077_v58 = vld [vmem:[%s9100_s22 + $0x5c] sm:$0x1]  ;;  %v11079_v14 = vrot.slane %v2687_v62, 5  ;;  %v2684_v25 = vor.u32 %v2683_v56, %v2680_v8  ;;  %v5109_v62 = vshll.u32 %v7107_v30, 16  ;;  %v6840_v30 = vld [vmem:[%s9100_s22 + $0x6c] sm:$0xf] }
 0x14f   : > { %8174 = vmatpush3.bf16.msra.mxu1 %v10984_v17  ;;  %8161 = vmatprep.mubr.bf16.mxu1 %v8773_v50  ;;  %v11062_v22 = vcombine.low %v11740_v15, %v11739_v47  ;;  %v11742_v50 = vsel %vm9164_vm2, %v10841_v34, %v10793_v42  ;;  %v11743_v42 = vsel %vm9164_vm2, %v10882_v49, %v10860_v54  ;;  %v11108_v54 = vld [vmem:[%s11538_s2 + $0x1f8] sm:$0xff]   ;;  %v2697_v41 = vshll.u32 %v11077_v58, 16  ;;  %v11156_v47 = vld [vmem:[%s11538_s2 + $0x208] sm:$0xff]   ;;  %v11168_v2 = vld [vmem:[%s9100_s22 + $0x70] sm:$0xf] }
 0x150   : > { %v11074_v17 = vcombine.low %v11742_v50, %v11741_v6  ;;  %8175 = vmatprep.subr.bf16.mxu1 %v11004_v46  ;;  %v11744_v34 = vsel %vm9164_vm2, %v10880_v11, %v10804_v21  ;;  %v11110_v49 = vcombine.low %v5070_v9, %v5080_v1  ;;  %v11112_v21 = vcombine.low %v2666_v32, %v2676_v33 }
 0x151   : > { %7888 = vmatpush3.bf16.msra.mxu0 %v11004_v46  ;;  %v11094_v55 = vcombine.low %v11744_v34, %v11743_v42  ;;  %v5103_v11 = vrot.slane %v5101_v45, 5  ;;  %v2694_v52 = vor.u32 %v2693_v20, %v11079_v14  ;;  %v2711_v9 = vshll.u32 %v11115_v7, 16 }
 0x152   : > { %7889 = vmatprep.subr.bf16.mxu0 %v11037_v4  ;;  %v2715_v1 = vshrl.u32 %v11115_v7, 16  ;;  %v5130_v45 = vshrl.u32 %v7110_v19, 16  ;;  %v5133_v8 = vshll.u32 %v7110_v19, 16  ;;  %v5139_v56 = vshll.u32 %v11125_v18, 16 }
 0x153   : > { %8176 = vmatpush3.bf16.msra.mxu1 %v11004_v46  ;;  %v8778_v46 = vld [vmem:[%s11538_s2 + $0x200] sm:$0xff]   ;;  %v5104_v32 = vsel %vm9164_vm2, %v5099_v63, %v5103_v11  ;;  %v11144_v33 = vrot.slane %v2684_v25, 4  ;;  %v11146_v60 = vrot.slane %v2697_v41, 5  ;;  %v11158_v15 = vrot.slane %v2694_v52, 4  ;;  %v11171_v11 = vld [vmem:[%s9100_s22 + $0x68] sm:$0x1] }
 0x154   : > { %7874 = vmatmul.mubr.bf16.gmra.mrb[12].mxu0 %v8774_v39  ;;  %8177 = vmatprep.subr.bf16.mxu1 %v11037_v4  ;;  %v5143_v39 = vshrl.u32 %v11125_v18, 16  ;;  %v5111_v6 = vrot.slane %v5109_v62, 5  ;;  %v11160_v50 = vrot.slane %v5115_v44, 5  ;;  %v5121_v20 = vrot.slane %v5119_v43, 4  ;;  %v11182_v52 = vld [vmem:[%s9105_s13 + $0x158] sm:$0x1] }
 0x155   : > { %7890 = vmatpush3.bf16.msra.mxu0 %v11037_v4  ;;  %7893 = vmatprep.mubr.bf16.mxu0 %v10869_v27  ;;  %v11149_v27 = vld [vmem:[%s9105_s13 + $0x14c] sm:$0x1]  ;;  %v2707_v42 = vrot.slane %v2705_v23, 5  ;;  %v2717_v34 = vrot.slane %v2715_v1, 4  ;;  %v5132_v25 = vrot.slane %v5130_v45, 4  ;;  %v5135_v19 = vrot.slane %v5133_v8, 5 }
 0x156   : > { %7891 = vmatprep.subr.bf16.mxu0 %v11108_v54  ;;  %8162 = vmatmul.mubr.bf16.gmra.mrb[12].mxu1 %v8776_v13  ;;  %v11173_v13 = vrot.slane %v5139_v56, 5  ;;  %v5145_v63 = vrot.slane %v5143_v39, 4  ;;  %v11175_v41 = vcombine.low %v5094_v35, %v5104_v32  ;;  %v2690_v36 = vsel %vm9164_vm2, %v11144_v33, %v11079_v14  ;;  %v11197_v45 = vld [vmem:[%s9105_s13 + $0x160] sm:$0xf]  ;;  %v8780_v8 = vld [vmem:[%s11538_s2 + $0x210] sm:$0xff]  }
 0x157   : > { %8178 = vmatpush3.bf16.msra.mxu1 %v11037_v4  ;;  %8181 = vmatprep.mubr.bf16.mxu1 %v10887_v5  ;;  %v2704_v4 = vrot.slane %v2702_v3, 4  ;;  %v11165_v5 = vrot.slane %v2711_v9, 5  ;;  %v2726_v62 = vshrl.u32 %v6840_v30, 16  ;;  %v2729_v44 = vshll.u32 %v6840_v30, 16  ;;  %v7113_v9 = vld [vmem:[%s9105_s13 + $0x15c] sm:$0xf] }
 0x158   : > { %8179 = vmatprep.subr.bf16.mxu1 %v11108_v54  ;;  %v5112_v43 = vor.u32 %v5111_v6, %v5108_v16  ;;  %v5125_v3 = vshll.u32 %v11149_v27, 16  ;;  %v2735_v35 = vshll.u32 %v11168_v2, 16  ;;  %v2739_v23 = vshrl.u32 %v11168_v2, 16  ;;  %11745 = vst [vmem:[#allocation28_spill] sm:$0xff] %v11197_v45 }
 0x159   : > { %7892 = vmatpush3.bf16.msra.mxu0 %v11108_v54  ;;  %v2700_v14 = vsel %vm9164_vm2, %v11158_v15, %v11146_v60  ;;  %v5122_v1 = vor.u32 %v5121_v20, %v11160_v50  ;;  %v2718_v56 = vor.u32 %v2717_v34, %v11165_v5  ;;  %v5136_v39 = vor.u32 %v5135_v19, %v5132_v25  ;;  %v11216_v19 = vld [vmem:[%s9100_s22 + $0x74] sm:$0x1] }
 0x15a   : > { %7909 = vmatprep.subr.bf16.mxu0 %v8778_v46  ;;  %v5146_v32 = vor.u32 %v5145_v63, %v11173_v13  ;;  %v5149_v33 = vshll.u32 %v11182_v52, 16  ;;  %v2728_v60 = vrot.slane %v2726_v62, 4  ;;  %v2731_v16 = vrot.slane %v2729_v44, 5 }
 0x15b   : > { %8180 = vmatpush3.bf16.msra.mxu1 %v11108_v54  ;;  %v2708_v54 = vor.u32 %v2707_v42, %v2704_v4  ;;  %v5154_v15 = vshrl.u32 %v7113_v9, 16  ;;  %v5157_v6 = vshll.u32 %v7113_v9, 16  ;;  %v2741_v20 = vrot.slane %v2739_v23, 4 }
 0x15c   : > { %7894 = vmatmul.mubr.bf16.vlgmr.msra.gmra.mrb[0].mxu0 %v11062_v22  ;;  %8197 = vmatprep.subr.bf16.mxu1 %v8778_v46  ;;  %v2721_v22 = vshll.u32 %v11171_v11, 16  ;;  %v5163_v30 = vshll.u32 %v11197_v45, 16  ;;  %v5167_v4 = vshrl.u32 %v11197_v45, 16  ;;  %v5123_v42 = vrot.slane %v5122_v1, 4 }
 0x15d   : > { %7910 = vmatpush3.bf16.msra.mxu0 %v8778_v46  ;;  %7897 = vmatprep.mubr.bf16.mxu0 %v11094_v55  ;;  %v11209_v55 = vrot.slane %v2735_v35, 5  ;;  %v5127_v34 = vrot.slane %v5125_v3, 5  ;;  %v2719_v63 = vrot.slane %v2718_v56, 4  ;;  %v5137_v62 = vrot.slane %v5136_v39, 4  ;;  %v11233_v39 = vld [vmem:[%s9105_s13 + $0x164] sm:$0x1] }
 0x15e   : > { %7911 = vmatprep.subr.bf16.mxu0 %v11156_v47  ;;  %8182 = vmatmul.mubr.bf16.vlgmr.msra.gmra.mrb[0].mxu1 %v11074_v17  ;;  %v5113_v17 = vrot.slane %v5112_v43, 4  ;;  %v2723_v25 = vrot.slane %v2721_v22, 5  ;;  %v5151_v44 = vrot.slane %v5149_v33, 5  ;;  %v5147_v35 = vrot.slane %v5146_v32, 4 }
 0x15f   : > { %8198 = vmatpush3.bf16.msra.mxu1 %v8778_v46  ;;  %8185 = vmatprep.mubr.bf16.mxu1 %v11096_v53  ;;  %v8781_v53 = vld [vmem:[%s11538_s2 + $0x218] sm:$0xff]   ;;  %v2709_v46 = vrot.slane %v2708_v54, 4  ;;  %v2732_v23 = vor.u32 %v2731_v16, %v2728_v60  ;;  %v5156_v9 = vrot.slane %v5154_v15, 4  ;;  %v5159_v45 = vrot.slane %v5157_v6, 5 }
 0x160   : > { %8199 = vmatprep.subr.bf16.mxu1 %v11156_v47  ;;  %v2742_v43 = vor.u32 %v2741_v20, %v11209_v55  ;;  %v2745_v3 = vshll.u32 %v11216_v19, 16  ;;  %v11225_v1 = vrot.slane %v5163_v30, 5  ;;  %v5169_v22 = vrot.slane %v5167_v4, 4  ;;  %v6875_v60 = vld [vmem:[%s9100_s22 + $0x18] sm:$0xe] }
 0x161   : > { %7912 = vmatpush3.bf16.msra.mxu0 %v11156_v47  ;;  %v6864_v54 = vcombine.low %v2690_v36, %v2700_v14  ;;  %v5118_v56 = vsel %vm9164_vm2, %v5113_v17, %v11160_v50  ;;  %v2714_v36 = vsel %vm9164_vm2, %v2709_v46, %v11165_v5  ;;  %v2724_v14 = vsel %vm9164_vm2, %v2719_v63, %v2723_v25  ;;  %v7124_v30 = vld [vmem:[%s9105_s13 + $0x108] sm:$0xe]  ;;  %v6876_v63 = vld [vmem:[%s9100_s22 + $0x24] sm:$0xe] }
 0x162   : > { %7913 = vmatprep.subr.bf16.mxu0 %v8780_v8  ;;  %v5142_v50 = vsel %vm9164_vm2, %v5137_v62, %v11173_v13  ;;  %v2733_v32 = vrot.slane %v2732_v23, 4  ;;  %v5160_v33 = vor.u32 %v5159_v45, %v5156_v9  ;;  %v2993_v16 = vrot.slane %v10634_v61, 5  ;;  %v8783_v61 = vld [vmem:[%s11538_s2 + $0x228] sm:$0xff]  }
 0x163   : > { %8200 = vmatpush3.bf16.msra.mxu1 %v11156_v47  ;;  %v5128_v47 = vsel %vm9164_vm2, %v5123_v42, %v5127_v34  ;;  %v2743_v5 = vrot.slane %v2742_v43, 4  ;;  %v2747_v15 = vrot.slane %v2745_v3, 5  ;;  %v5170_v6 = vor.u32 %v5169_v22, %v11225_v1  ;;  %v6877_v3 = vld [vmem:[%s9100_s22 + $0x30] sm:$0xe] }
 0x164   : > { %7898 = vmatmul.mubr.bf16.gmra.mrb[4].mxu0 %v11098_v10  ;;  %8201 = vmatprep.subr.bf16.mxu1 %v8780_v8  ;;  %v8782_v10 = vld [vmem:[%s11538_s2 + $0x220] sm:$0xff]   ;;  %v5173_v13 = vshll.u32 %v11233_v39, 16  ;;  %v7121_v45 = vcombine.low %v5118_v56, %v5128_v47  ;;  %v2738_v4 = vsel %vm9164_vm2, %v2733_v32, %v11209_v55  ;;  %v5161_v17 = vrot.slane %v5160_v33, 4  ;;  %v7125_v56 = vld [vmem:[%s9105_s13 + $0x114] sm:$0xe] }
 0x165   : > { %7914 = vmatpush3.bf16.msra.mxu0 %v8780_v8  ;;  %7901 = vmatprep.mubr.bf16.mxu0 %v11112_v21  ;;  %v5152_v21 = vsel %vm9164_vm2, %v5147_v35, %v5151_v44  ;;  %v2995_v42 = vrot.slane %v2993_v16, 4  ;;  %v2996_v34 = vrot.slane %v10640_v51, 5  ;;  %v5171_v25 = vrot.slane %v5170_v6, 4  ;;  %v8784_v51 = vld [vmem:[%s11538_s2 + $0x230] sm:$0xff]  }
 0x166   : > { %7915 = vmatprep.subr.bf16.mxu0 %v8781_v53  ;;  %8186 = vmatmul.mubr.bf16.gmra.mrb[4].mxu1 %v11110_v49  ;;  %v5356_v49 = vrot.slane %v10676_v29, 5  ;;  %v7122_v20 = vcombine.low %v5142_v50, %v5152_v21  ;;  %v2748_v29 = vsel %vm9164_vm2, %v2743_v5, %v2747_v15  ;;  %v5175_v46 = vrot.slane %v5173_v13, 5  ;;  %v7126_v21 = vld [vmem:[%s9105_s13 + $0x120] sm:$0xe]  ;;  %v6878_v13 = vld [vmem:[%s9100_s22 + $0x3c] sm:$0xe] }
 0x167   : > { %8202 = vmatpush3.bf16.msra.mxu1 %v8780_v8  ;;  %8189 = vmatprep.mubr.bf16.mxu1 %v11175_v41  ;;  %v6865_v8 = vcombine.low %v2714_v36, %v2724_v14  ;;  %v6883_v41 = vrot.slane %v6875_v60, 9  ;;  %v3000_v62 = vrot.slane %v10715_v40, 5  ;;  %v7132_v44 = vrot.slane %v7124_v30, 9 }
 0x168   : > { %8203 = vmatprep.subr.bf16.mxu1 %v8781_v53  ;;  %v5358_v35 = vrot.slane %v5356_v49, 4  ;;  %v5359_v55 = vrot.slane %v10727_v37, 5  ;;  %v3007_v23 = vrot.slane %v10753_v0, 5  ;;  %v6866_v40 = vcombine.low %v2738_v4, %v2748_v29  ;;  %v11749_v4 = vld [vmem:[#allocation33_spill] sm:$0xff] }
 0x169   : > { %7916 = vmatpush3.bf16.msra.mxu0 %v8781_v53  ;;  %v5166_v9 = vsel %vm9164_vm2, %v5161_v17, %v11225_v1  ;;  %v2997_v37 = vsel %vm9498_vm5, %v2995_v42, %v2996_v34  ;;  %v6884_v43 = vrot.slane %v6876_v63, 9  ;;  %v5176_v22 = vsel %vm9164_vm2, %v5171_v25, %v5175_v46  ;;  %v6879_v25 = vld [vmem:[%s9100_s22 + $0x48] sm:$0xe] }
 0x16a   : > { %7917 = vmatprep.subr.bf16.mxu0 %v8782_v10  ;;  %v3003_v0 = vrot.slane %v10770_v24, 5  ;;  %v5363_v47 = vrot.slane %v10738_v28, 5  ;;  %v5357_v1 = vsel %vm9498_vm5, %v7132_v44, %v5356_v49  ;;  %v5360_v36 = vsel %vm9498_vm5, %v5358_v35, %v5359_v55  ;;  %v11747_v49 = vld [vmem:[#allocation36_spill] sm:$0xff]  ;;  %v11751_v55 = vld [vmem:[#allocation31_spill] sm:$0xff] }
 0x16b   : > { %8204 = vmatpush3.bf16.msra.mxu1 %v8781_v53  ;;  %v2994_v53 = vsel %vm9498_vm5, %v6883_v41, %v2993_v16  ;;  %v6885_v14 = vrot.slane %v6877_v3, 9  ;;  %v3009_v50 = vrot.slane %v3007_v23, 4  ;;  %v3010_v28 = vrot.slane %v10801_v38, 5  ;;  %v11746_v16 = vld [vmem:[#allocation32_spill] sm:$0xff] }
 0x16c   : > { %7902 = vmatmul.mubr.bf16.gmra.mrb[8].mxu0 %v6864_v54  ;;  %8205 = vmatprep.subr.bf16.mxu1 %v8782_v10  ;;  %v3002_v54 = vrot.slane %v3000_v62, 4  ;;  %v6907_v24 = vcombine.low %v2994_v53, %v2997_v37  ;;  %v7123_v32 = vcombine.low %v5166_v9, %v5176_v22  ;;  %v3001_v33 = vsel %vm9498_vm5, %v6884_v43, %v3000_v62  ;;  %v11750_v62 = vld [vmem:[#allocation35_spill] sm:$0xff]  ;;  %v7127_v35 = vld [vmem:[%s9105_s13 + $0x12c] sm:$0xe]  ;;  %v11752_v9 = vld [vmem:[#allocation30_spill] sm:$0xff] }
 0x16d   : > { %7918 = vmatpush3.bf16.msra.mxu0 %v8782_v10  ;;  %7905 = vmatprep.mubr.bf16.mxu0 %v6865_v8  ;;  %v7133_v60 = vrot.slane %v7125_v56, 9  ;;  %v5366_v5 = vrot.slane %v11746_v16, 5  ;;  %v5365_v6 = vrot.slane %v5363_v47, 4  ;;  %v7134_v38 = vrot.slane %v7126_v21, 9  ;;  %v11753_v22 = vld [vmem:[#allocation29_spill] sm:$0xff] }
 0x16e   : > { %7919 = vmatprep.subr.bf16.mxu0 %v8783_v61  ;;  %8190 = vmatmul.mubr.bf16.gmra.mrb[8].mxu1 %v7121_v45  ;;  %v3004_v15 = vsel %vm9498_vm5, %v3002_v54, %v3003_v0  ;;  %v3014_v45 = vrot.slane %v11747_v49, 5  ;;  %v3011_v30 = vsel %vm9498_vm5, %v3009_v50, %v3010_v28  ;;  %v3021_v17 = vrot.slane %v11749_v4, 5  ;;  %v7128_v0 = vld [vmem:[%s9105_s13 + $0x138] sm:$0xe]  ;;  %v6880_v28 = vld [vmem:[%s9100_s22 + $0x54] sm:$0xe] }
 0x16f   : > { %8206 = vmatpush3.bf16.msra.mxu1 %v8782_v10  ;;  %8193 = vmatprep.mubr.bf16.mxu1 %v7122_v20  ;;  %v5370_v10 = vrot.slane %v10832_v26, 5  ;;  %v7140_v26 = vcombine.low %v5357_v1, %v5360_v36  ;;  %v11748_v20 = vld [vmem:[#allocation34_spill] sm:$0xff]  ;;  %v6908_v42 = vcombine.low %v3001_v33, %v3004_v15  ;;  %v5364_v34 = vsel %vm9498_vm5, %v7133_v60, %v5363_v47  ;;  %v11754_v36 = vld [vmem:[#allocation37_spill] sm:$0xff] }
 0x170   : > { %8207 = vmatprep.subr.bf16.mxu1 %v8783_v61  ;;  %v5373_v41 = vrot.slane %v11748_v20, 5  ;;  %v6886_v29 = vrot.slane %v6878_v13, 9  ;;  %v5367_v46 = vsel %vm9498_vm5, %v5365_v6, %v5366_v5  ;;  %v3016_v63 = vrot.slane %v3014_v45, 4  ;;  %v6881_v6 = vld [vmem:[%s9100_s22 + $0x60] sm:$0xe] }
 0x171   : > { %7920 = vmatpush3.bf16.msra.mxu0 %v8783_v61  ;;  %v5372_v8 = vrot.slane %v5370_v10, 4  ;;  %v3017_v44 = vrot.slane %v11750_v62, 5  ;;  %v5377_v53 = vrot.slane %v11751_v55, 5  ;;  %v5384_v37 = vrot.slane %v11752_v9, 5 }
 0x172   : > { %7921 = vmatprep.subr.bf16.mxu0 %v8784_v51  ;;  %v6887_v43 = vrot.slane %v6879_v25, 9  ;;  %v3023_v3 = vrot.slane %v3021_v17, 4  ;;  %v3024_v54 = vrot.slane %v11753_v22, 5  ;;  %v7141_v56 = vcombine.low %v5364_v34, %v5367_v46  ;;  %v7131_v22 = vld [vmem:[%s9105_s13 + $0x15c] sm:$0xe] }
 0x173   : > { %8208 = vmatpush3.bf16.msra.mxu1 %v8783_v61  ;;  %v3008_v61 = vsel %vm9498_vm5, %v6885_v14, %v3007_v23  ;;  %v3015_v47 = vsel %vm9498_vm5, %v6886_v29, %v3014_v45  ;;  %v7135_v1 = vrot.slane %v7127_v35, 9  ;;  %v3018_v14 = vsel %vm9498_vm5, %v3016_v63, %v3017_v44  ;;  %v7129_v45 = vld [vmem:[%s9105_s13 + $0x144] sm:$0xe]  ;;  %v6882_v44 = vld [vmem:[%s9100_s22 + $0x6c] sm:$0xe] }
 0x174   : > { %7906 = vmatmul.mubr.bf16.gmra.mrb[12].mxu0 %v6866_v40  ;;  %8209 = vmatprep.subr.bf16.mxu1 %v8784_v51  ;;  %v6909_v23 = vcombine.low %v3008_v61, %v3011_v30  ;;  %v5371_v40 = vsel %vm9498_vm5, %v7134_v38, %v5370_v10  ;;  %v5379_v50 = vrot.slane %v5377_v53, 4  ;;  %v3028_v21 = vrot.slane %v10998_v57, 5 }
 0x175   : > { %7922 = vmatpush3.bf16.msra.mxu0 %v8784_v51  ;;  %7925 = vmatprep.mubr.bf16.mxu0 %v6907_v24  ;;  %v5380_v24 = vrot.slane %v11754_v36, 5  ;;  %v5386_v33 = vrot.slane %v5384_v37, 4  ;;  %v5387_v60 = vrot.slane %v11009_v31, 5  ;;  %v3022_v16 = vsel %vm9498_vm5, %v6887_v43, %v3021_v17 }
 0x176   : > { %7923 = vmatprep.subr.bf16.mxu0 %v8785_v12  ;;  %8194 = vmatmul.mubr.bf16.gmra.mrb[12].mxu1 %v7123_v32  ;;  %v7136_v32 = vrot.slane %v7128_v0, 9  ;;  %v3035_v5 = vrot.slane %v11115_v7, 5  ;;  %v5378_v57 = vsel %vm9498_vm5, %v7135_v1, %v5377_v53  ;;  %v6888_v15 = vrot.slane %v6880_v28, 9 }
 0x177   : > { %8210 = vmatpush3.bf16.msra.mxu1 %v8784_v51  ;;  %8213 = vmatprep.mubr.bf16.mxu1 %v7140_v26  ;;  %v5374_v51 = vsel %vm9498_vm5, %v5372_v8, %v5373_v41  ;;  %v6910_v26 = vcombine.low %v3015_v47, %v3018_v14  ;;  %v5381_v31 = vsel %vm9498_vm5, %v5379_v50, %v5380_v24  ;;  %v3030_v13 = vrot.slane %v3028_v21, 4  ;;  %v7130_v41 = vld [vmem:[%s9105_s13 + $0x150] sm:$0xe] }
 0x178   : > { %8211 = vmatprep.subr.bf16.mxu1 %v8785_v12  ;;  %v7142_v10 = vcombine.low %v5371_v40, %v5374_v51  ;;  %v3031_v49 = vrot.slane %v11077_v58, 5  ;;  %v5391_v38 = vrot.slane %v11101_v59, 5  ;;  %v5385_v7 = vsel %vm9498_vm5, %v7136_v32, %v5384_v37 }
 0x179   : > { %7924 = vmatpush3.bf16.msra.mxu0 %v8785_v12  ;;  %v5388_v20 = vsel %vm9498_vm5, %v5386_v33, %v5387_v60  ;;  %v5398_v61 = vrot.slane %v11125_v18, 5  ;;  %v6889_v30 = vrot.slane %v6881_v6, 9  ;;  %v3037_v4 = vrot.slane %v3035_v5, 4 }
 0x17a   : > { %v3038_v17 = vrot.slane %v11171_v11, 5  ;;  %v3029_v58 = vsel %vm9498_vm5, %v6888_v15, %v3028_v21  ;;  %v7137_v59 = vrot.slane %v7129_v45, 9  ;;  %v5394_v34 = vrot.slane %v11149_v27, 5 }
 0x17b   : > { %8212 = vmatpush3.bf16.msra.mxu1 %v8785_v12  ;;  %v3025_v12 = vsel %vm9498_vm5, %v3023_v3, %v3024_v54  ;;  %v7144_v29 = vcombine.low %v5385_v7, %v5388_v20  ;;  %v3032_v25 = vsel %vm9498_vm5, %v3030_v13, %v3031_v49  ;;  %v5393_v46 = vrot.slane %v5391_v38, 4 }
 0x17c   : > { %7926 = vmatmul.mubr.bf16.vlgmr.msra.gmra.mrb[0].mxu0 %v6908_v42  ;;  %v6911_v8 = vcombine.low %v3022_v16, %v3025_v12  ;;  %v7143_v42 = vcombine.low %v5378_v57, %v5381_v31  ;;  %v7138_v63 = vrot.slane %v7130_v41, 9  ;;  %v5400_v18 = vrot.slane %v5398_v61, 4 }
 0x17d   : > { %7929 = vmatprep.mubr.bf16.mxu0 %v6909_v23  ;;  %v5401_v62 = vrot.slane %v11182_v52, 5  ;;  %v3042_v11 = vrot.slane %v11168_v2, 5  ;;  %v3036_v35 = vsel %vm9498_vm5, %v6889_v30, %v3035_v5  ;;  %v3039_v27 = vsel %vm9498_vm5, %v3037_v4, %v3038_v17  ;;  %v11755_v2 = vld [vmem:[#allocation28_spill] sm:$0xff] }
 0x17e   : > { %8214 = vmatmul.mubr.bf16.vlgmr.msra.gmra.mrb[0].mxu1 %v7141_v56  ;;  %v6912_v55 = vcombine.low %v3029_v58, %v3032_v25  ;;  %v5392_v53 = vsel %vm9498_vm5, %v7137_v59, %v5391_v38  ;;  %v5395_v23 = vsel %vm9498_vm5, %v5393_v46, %v5394_v34  ;;  %v5399_v52 = vsel %vm9498_vm5, %v7138_v63, %v5398_v61 }
 0x17f   : > { %8217 = vmatprep.mubr.bf16.mxu1 %v7142_v10  ;;  %v6890_v40 = vrot.slane %v6882_v44, 9  ;;  %v5405_v51 = vrot.slane %v11755_v2, 5  ;;  %v6913_v9 = vcombine.low %v3036_v35, %v3039_v27  ;;  %v5402_v37 = vsel %vm9498_vm5, %v5400_v18, %v5401_v62 }
 0x180   : > { %v3044_v43 = vrot.slane %v3042_v11, 4  ;;  %v3045_v3 = vrot.slane %v11216_v19, 5  ;;  %v7145_v54 = vcombine.low %v5392_v53, %v5395_v23  ;;  %v7146_v0 = vcombine.low %v5399_v52, %v5402_v37 }
 0x181   : > { %v7139_v56 = vrot.slane %v7131_v22, 9  ;;  %v5407_v47 = vrot.slane %v5405_v51, 4  ;;  %v5408_v1 = vrot.slane %v11233_v39, 5  ;;  %v3043_v36 = vsel %vm9498_vm5, %v6890_v40, %v3042_v11  ;;  %v11387_v39 = vld [vmem:[%s11539_s3] ss:$0 sm:$0xff] }
 0x182   : > { %v3046_v24 = vsel %vm9498_vm5, %v3044_v43, %v3045_v3 }
 0x183   : > { %v6914_v10 = vcombine.low %v3043_v36, %v3046_v24  ;;  %v5406_v19 = vsel %vm9498_vm5, %v7139_v56, %v5405_v51  ;;  %v5409_v14 = vsel %vm9498_vm5, %v5407_v47, %v5408_v1 }
 0x184   : > { %7930 = vmatmul.mubr.bf16.gmra.mrb[4].mxu0 %v6910_v26  ;;  %v7147_v50 = vcombine.low %v5406_v19, %v5409_v14 }
 0x185   : > { %7933 = vmatprep.mubr.bf16.mxu0 %v6911_v8 }
 0x186   : > { %8218 = vmatmul.mubr.bf16.gmra.mrb[4].mxu1 %v7143_v42 }
 0x187   : > { %8221 = vmatprep.mubr.bf16.mxu1 %v7144_v29 }
 0x18c   : > { %7934 = vmatmul.mubr.bf16.gmra.mrb[8].mxu0 %v6912_v55 }
 0x18d   : > { %7937 = vmatprep.mubr.bf16.mxu0 %v6913_v9 }
 0x18e   : > { %8222 = vmatmul.mubr.bf16.gmra.mrb[8].mxu1 %v7145_v54 }
 0x18f   : > { %8225 = vmatprep.mubr.bf16.mxu1 %v7146_v0 }
 0x194   : > { %7938 = vmatmul.mubr.bf16.gmra.mrb[12].mxu0 %v6914_v10 }
 0x196   : > { %8226 = vmatmul.mubr.bf16.gmra.mrb[12].mxu1 %v7147_v50 }
 0x24f   : > { %v7927_v28 = vpop.f32.mrb[0].mxu0 }
 0x250   : > { %v3266_v21 = vadd.f32 %v7927_v28, %v11387_v39  ;;  %v3178_v32 = vpop.f32.mrb[1].mxu0 }
 0x251   : > { %v3264_v33 = vadd.f32 %v11387_v39, %v3178_v32  ;;  %v7928_v60 = vpop.f32.mrb[2].mxu0  ;;  %v8215_v16 = vpop.f32.mrb[0].mxu1 }
 0x252   : > { %v3267_v12 = vadd.f32 %v7928_v60, %v11387_v39  ;;  %v3181_v48 = vpop.f32.mrb[3].mxu0  ;;  %v3282_v5 = vmax.f32 %v3266_v21, 0.0  ;;  %v5557_v26 = vadd.f32 %v8215_v16, %v11387_v39  ;;  %v5476_v57 = vpop.f32.mrb[1].mxu1 }
 0x253   : > { %v3265_v15 = vadd.f32 %v11387_v39, %v3181_v48  ;;  %v3280_v6 = vmax.f32 %v3264_v33, 0.0  ;;  %v5555_v31 = vadd.f32 %v11387_v39, %v5476_v57  ;;  %v8216_v49 = vpop.f32.mrb[2].mxu1 }
 0x254   : > { %v3283_v13 = vmax.f32 %v3267_v12, 0.0  ;;  %v5573_v45 = vmax.f32 %v5557_v26, 0.0  ;;  %v5558_v38 = vadd.f32 %v8216_v49, %v11387_v39  ;;  %v5479_v7 = vpop.f32.mrb[3].mxu1 }
 0x255   : > { %v3281_v8 = vmax.f32 %v3265_v15, 0.0  ;;  %v5571_v20 = vmax.f32 %v5555_v31, 0.0  ;;  %v5556_v61 = vadd.f32 %v11387_v39, %v5479_v7 }
 0x256   : > { %v5588_v41 = vpack.c.bf16 %v3283_v13, %v3282_v5  ;;  %v5751_v30 = vsub.f32 %v3282_v5, %v5573_v45  ;;  %v5574_v4 = vmax.f32 %v5558_v38, 0.0 }
 0x257   : > { %v5587_v17 = vpack.c.bf16 %v3281_v8, %v3280_v6  ;;  %v7931_v42 = vpop.f32.mrb[4].mxu0  ;;  %v5749_v58 = vsub.f32 %v3280_v6, %v5571_v20  ;;  %v5572_v59 = vmax.f32 %v5556_v61, 0.0 }
 0x258   : > { %7318 = vst [vmem:[%s9107_s4 + $0x8] sm:$0xff] %v5588_v41   ;;  %v3270_v34 = vadd.f32 %v7931_v42, %v11387_v39  ;;  %v3194_v29 = vpop.f32.mrb[5].mxu0  ;;  %v5668_v25 = vpack.c.bf16 %v5574_v4, %v5573_v45  ;;  %v5752_v46 = vsub.f32 %v3283_v13, %v5574_v4  ;;  %v5767_v43 = vand.u32 2147483647, %v5751_v30 }
 0x259   : > { %7242 = vst [vmem:[%s9107_s4] sm:$0xff] %v5587_v17   ;;  %v3268_v63 = vadd.f32 %v11387_v39, %v3194_v29  ;;  %5814 = vxpose.xlu0.c.b16.start [1/8] %v5587_v17, 128  ;;  %v7932_v18 = vpop.f32.mrb[6].mxu0  ;;  %8229 = vmatprep.subr.bf16.mxu0 %v5587_v17  ;;  %v5667_v62 = vpack.c.bf16 %v5572_v59, %v5571_v20  ;;  %v8219_v11 = vpop.f32.mrb[4].mxu1  ;;  %v5765_v27 = vand.u32 2147483647, %v5749_v58 }
 0x25a   : > { %v5750_v44 = vsub.f32 %v3281_v8, %v5572_v59  ;;  %v3197_v35 = vpop.f32.mrb[7].mxu0  ;;  %8230 = vmatpush3.bf16.msra.mxu0 %v5587_v17  ;;  %7326 = vst [vmem:[%s9107_s4 + $0x48] sm:$0xff] %v5668_v25   ;;  %v3286_v55 = vmax.f32 %v3270_v34, 0.0  ;;  %v5561_v53 = vadd.f32 %v8219_v11, %v11387_v39  ;;  %v5492_v23 = vpop.f32.mrb[5].mxu1  ;;  %v3271_v52 = vadd.f32 %v7932_v18, %v11387_v39 }
 0x25b   : > { %8231 = vmatprep.subr.bf16.mxu0 %v5588_v41  ;;  %7325 = vst [vmem:[%s9107_s4 + $0x40] sm:$0xff] %v5667_v62   ;;  %v3284_v2 = vmax.f32 %v3268_v63, 0.0  ;;  %v5559_v51 = vadd.f32 %v11387_v39, %v5492_v23  ;;  %5975 = vxpose.xlu1.c.b16.start [1/8] %v5667_v62, 128  ;;  %v8220_v9 = vpop.f32.mrb[6].mxu1  ;;  %v3269_v37 = vadd.f32 %v11387_v39, %v3197_v35  ;;  %v5768_v24 = vand.u32 2147483647, %v5752_v46 }
 0x25c   : > { %v5766_v40 = vand.u32 2147483647, %v5750_v44  ;;  %8261 = vmatprep.subr.bf16.mxu1 %v5667_v62  ;;  %v5577_v3 = vmax.f32 %v5561_v53, 0.0  ;;  %v5562_v22 = vadd.f32 %v8220_v9, %v11387_v39  ;;  %v3287_v54 = vmax.f32 %v3271_v52, 0.0  ;;  %v5495_v0 = vpop.f32.mrb[7].mxu1 }
 0x25d   : > { %8262 = vmatpush3.bf16.msra.mxu1 %v5667_v62  ;;  %5815 = vxpose.xlu0.c.b16.cont [2/8] %v5588_v41, 128  ;;  %v5575_v47 = vmax.f32 %v5559_v51, 0.0  ;;  %v3285_v1 = vmax.f32 %v3269_v37, 0.0  ;;  %v5560_v36 = vadd.f32 %v11387_v39, %v5495_v0 }
 0x25e   : > { %v5781_v56 = vadd.f32 %v5766_v40, %v5765_v27  ;;  %8263 = vmatprep.subr.bf16.mxu1 %v5668_v25  ;;  %8232 = vmatpush3.bf16.msra.mxu0 %v5588_v41  ;;  %v5755_v10 = vsub.f32 %v3286_v55, %v5577_v3  ;;  %v5578_v19 = vmax.f32 %v5562_v22, 0.0  ;;  %v5590_v14 = vpack.c.bf16 %v3287_v54, %v3286_v55 }
 0x25f   : > { %v7935_v50 = vpop.f32.mrb[8].mxu0  ;;  %v5753_v21 = vsub.f32 %v3284_v2, %v5575_v47  ;;  %v5589_v32 = vpack.c.bf16 %v3285_v1, %v3284_v2  ;;  %v5576_v33 = vmax.f32 %v5560_v36, 0.0  ;;  %5976 = vxpose.xlu1.c.b16.cont [2/8] %v5668_v25, 128 }
 0x260   : > { %v5782_v28 = vadd.f32 %v5781_v56, %v5767_v43  ;;  %v3210_v60 = vpop.f32.mrb[9].mxu0  ;;  %v5670_v16 = vpack.c.bf16 %v5578_v19, %v5577_v3  ;;  %7320 = vst [vmem:[%s9107_s4 + $0x18] sm:$0xff] %v5590_v14   ;;  %v5756_v12 = vsub.f32 %v3287_v54, %v5578_v19  ;;  %v3274_v48 = vadd.f32 %v7935_v50, %v11387_v39 }
 0x261   : > { %8264 = vmatpush3.bf16.msra.mxu1 %v5668_v25  ;;  %v7936_v5 = vpop.f32.mrb[10].mxu0  ;;  %v5769_v26 = vand.u32 2147483647, %v5753_v21  ;;  %7319 = vst [vmem:[%s9107_s4 + $0x10] sm:$0xff] %v5589_v32   ;;  %v5669_v15 = vpack.c.bf16 %v5576_v33, %v5575_v47  ;;  %v5754_v6 = vsub.f32 %v3285_v1, %v5576_v33  ;;  %v8223_v31 = vpop.f32.mrb[8].mxu1  ;;  %5816 = vxpose.xlu0.c.b16.cont [3/8] %v5589_v32, 128 }
 0x262   : > { %v5783_v57 = vadd.f32 %v5782_v28, %v5768_v24  ;;  %8233 = vmatprep.subr.bf16.mxu0 %v5589_v32  ;;  %v3213_v13 = vpop.f32.mrb[11].mxu0  ;;  %v5771_v49 = vand.u32 2147483647, %v5755_v10  ;;  %7328 = vst [vmem:[%s9107_s4 + $0x58] sm:$0xff] %v5670_v16   ;;  %v3290_v45 = vmax.f32 %v3274_v48, 0.0  ;;  %v5565_v38 = vadd.f32 %v8223_v31, %v11387_v39  ;;  %v5508_v7 = vpop.f32.mrb[9].mxu1 }
 0x263   : > { %v3272_v8 = vadd.f32 %v11387_v39, %v3210_v60  ;;  %8234 = vmatpush3.bf16.msra.mxu0 %v5589_v32  ;;  %7327 = vst [vmem:[%s9107_s4 + $0x50] sm:$0xff] %v5669_v15   ;;  %v5770_v41 = vand.u32 2147483647, %v5754_v6  ;;  %v5563_v61 = vadd.f32 %v11387_v39, %v5508_v7  ;;  %5977 = vxpose.xlu1.c.b16.cont [3/8] %v5669_v15, 128  ;;  %v8224_v30 = vpop.f32.mrb[10].mxu1  ;;  %v5772_v18 = vand.u32 2147483647, %v5756_v12 }
 0x264   : > { %v5784_v20 = vadd.f32 %v5783_v57, %v5769_v26  ;;  %8265 = vmatprep.subr.bf16.mxu1 %v5669_v15  ;;  %v3275_v4 = vadd.f32 %v7936_v5, %v11387_v39  ;;  %v5581_v17 = vmax.f32 %v5565_v38, 0.0  ;;  %v5566_v58 = vadd.f32 %v8224_v30, %v11387_v39  ;;  %v5511_v34 = vpop.f32.mrb[11].mxu1  ;;  %8235 = vmatprep.subr.bf16.mxu0 %v5590_v14 }
 0x265   : > { %v3288_v42 = vmax.f32 %v3272_v8, 0.0  ;;  %v3273_v59 = vadd.f32 %v11387_v39, %v3213_v13  ;;  %8266 = vmatpush3.bf16.msra.mxu1 %v5669_v15  ;;  %v5579_v25 = vmax.f32 %v5563_v61, 0.0  ;;  %v5564_v63 = vadd.f32 %v11387_v39, %v5511_v34  ;;  %5817 = vxpose.xlu0.c.b16.cont [4/8] %v5590_v14, 128 }
 0x266   : > { %v5785_v29 = vadd.f32 %v5784_v20, %v5770_v41  ;;  %v3291_v46 = vmax.f32 %v3275_v4, 0.0  ;;  %8267 = vmatprep.subr.bf16.mxu1 %v5670_v16  ;;  %v5759_v62 = vsub.f32 %v3290_v45, %v5581_v17  ;;  %v5582_v44 = vmax.f32 %v5566_v58, 0.0 }
 0x267   : > { %v3289_v11 = vmax.f32 %v3273_v59, 0.0  ;;  %8236 = vmatpush3.bf16.msra.mxu0 %v5590_v14  ;;  %v7939_v35 = vpop.f32.mrb[12].mxu0  ;;  %v5757_v55 = vsub.f32 %v3288_v42, %v5579_v25  ;;  %v5580_v23 = vmax.f32 %v5564_v63, 0.0  ;;  %5978 = vxpose.xlu1.c.b16.cont [4/8] %v5670_v16, 128 }
 0x268   : > { %v5786_v27 = vadd.f32 %v5785_v29, %v5771_v49  ;;  %v5592_v53 = vpack.c.bf16 %v3291_v46, %v3290_v45  ;;  %v3226_v52 = vpop.f32.mrb[13].mxu0  ;;  %v5672_v40 = vpack.c.bf16 %v5582_v44, %v5581_v17  ;;  %v5760_v2 = vsub.f32 %v3291_v46, %v5582_v44 }
 0x269   : > { %v5591_v51 = vpack.c.bf16 %v3289_v11, %v3288_v42  ;;  %8268 = vmatpush3.bf16.msra.mxu1 %v5670_v16  ;;  %v7940_v9 = vpop.f32.mrb[14].mxu0  ;;  %v5773_v37 = vand.u32 2147483647, %v5757_v55  ;;  %v5671_v3 = vpack.c.bf16 %v5580_v23, %v5579_v25  ;;  %v5758_v22 = vsub.f32 %v3289_v11, %v5580_v23  ;;  %v8227_v54 = vpop.f32.mrb[12].mxu1  ;;  %v5748_v25 = vld [vmem:[#allocation3] sm:$0xff] }
 0x26a   : > { %v5787_v43 = vadd.f32 %v5786_v27, %v5772_v18  ;;  %7322 = vst [vmem:[%s9107_s4 + $0x28] sm:$0xff] %v5592_v53   ;;  %v3229_v0 = vpop.f32.mrb[15].mxu0  ;;  %v5775_v56 = vand.u32 2147483647, %v5759_v62  ;;  %7330 = vst [vmem:[%s9107_s4 + $0x68] sm:$0xff] %v5672_v40   ;;  %v3278_v47 = vadd.f32 %v7939_v35, %v11387_v39  ;;  %v5569_v1 = vadd.f32 %v8227_v54, %v11387_v39  ;;  %v5524_v24 = vpop.f32.mrb[13].mxu1 }
 0x26b   : > { %7321 = vst [vmem:[%s9107_s4 + $0x20] sm:$0xff] %v5591_v51   ;;  %v3276_v36 = vadd.f32 %v11387_v39, %v3226_v52  ;;  %5818 = vxpose.xlu0.c.b16.cont [5/8] %v5591_v51, 128  ;;  %8237 = vmatprep.subr.bf16.mxu0 %v5591_v51  ;;  %7329 = vst [vmem:[%s9107_s4 + $0x60] sm:$0xff] %v5671_v3   ;;  %v5774_v19 = vand.u32 2147483647, %v5758_v22  ;;  %v5567_v14 = vadd.f32 %v11387_v39, %v5524_v24  ;;  %v8228_v50 = vpop.f32.mrb[14].mxu1  ;;  %v5961_v22 = vld [vmem:[#allocation5 + $0x10] sm:$0xff] }
 0x26c   : > { %v5788_v10 = vadd.f32 %v5787_v43, %v5773_v37  ;;  %5979 = vxpose.xlu1.c.b16.cont [5/8] %v5671_v3, 128  ;;  %8269 = vmatprep.subr.bf16.mxu1 %v5671_v3  ;;  %v3279_v28 = vadd.f32 %v7940_v9, %v11387_v39  ;;  %v3294_v21 = vmax.f32 %v3278_v47, 0.0  ;;  %v5585_v32 = vmax.f32 %v5569_v1, 0.0  ;;  %v5527_v16 = vpop.f32.mrb[15].mxu1  ;;  %v5798_v54 = vld [vmem:[#allocation4] sm:$0xff]  ;;  %v5801_v47 = vld [vmem:[#allocation4 + $0x18] sm:$0xff] }
 0x26d   : > { %v3292_v33 = vmax.f32 %v3276_v36, 0.0  ;;  %v5570_v60 = vadd.f32 %v8228_v50, %v11387_v39  ;;  %8238 = vmatpush3.bf16.msra.mxu0 %v5591_v51  ;;  %8270 = vmatpush3.bf16.msra.mxu1 %v5671_v3  ;;  %v5583_v48 = vmax.f32 %v5567_v14, 0.0  ;;  %v3277_v26 = vadd.f32 %v11387_v39, %v3229_v0  ;;  %v5800_v3 = vld [vmem:[#allocation4 + $0x10] sm:$0xff] }
 0x26e   : > { %v5789_v12 = vadd.f32 %v5788_v10, %v5774_v19  ;;  %v3295_v5 = vmax.f32 %v3279_v28, 0.0  ;;  %8239 = vmatprep.subr.bf16.mxu0 %v5592_v53  ;;  %8271 = vmatprep.subr.bf16.mxu1 %v5672_v40  ;;  %v5776_v57 = vand.u32 2147483647, %v5760_v2  ;;  %v5763_v15 = vsub.f32 %v3294_v21, %v5585_v32  ;;  %v5962_v10 = vld [vmem:[#allocation5 + $0x18] sm:$0xff]  ;;  %v5799_v19 = vld [vmem:[#allocation4 + $0x8] sm:$0xff] }
 0x26f   : > { %v5586_v6 = vmax.f32 %v5570_v60, 0.0  ;;  %v5568_v31 = vadd.f32 %v11387_v39, %v5527_v16  ;;  %5819 = vxpose.xlu0.c.b16.cont [6/8] %v5592_v53, 128  ;;  %v5761_v49 = vsub.f32 %v3292_v33, %v5583_v48  ;;  %v3293_v38 = vmax.f32 %v3277_v26, 0.0 }
 0x270   : > { %v5790_v13 = vadd.f32 %v5789_v12, %v5775_v56  ;;  %v5594_v45 = vpack.c.bf16 %v3295_v5, %v3294_v21  ;;  %5980 = vxpose.xlu1.c.b16.cont [6/8] %v5672_v40, 128  ;;  %v5779_v58 = vand.u32 2147483647, %v5763_v15  ;;  %v5959_v56 = vld [vmem:[#allocation5] sm:$0xff]  ;;  %v5804_v15 = vld [vmem:[#allocation4 + $0x30] sm:$0xff] }
 0x271   : > { %v5674_v8 = vpack.c.bf16 %v5586_v6, %v5585_v32  ;;  %v5764_v7 = vsub.f32 %v3295_v5, %v5586_v6  ;;  %v5584_v20 = vmax.f32 %v5568_v31, 0.0  ;;  %8240 = vmatpush3.bf16.msra.mxu0 %v5592_v53  ;;  %8272 = vmatpush3.bf16.msra.mxu1 %v5672_v40  ;;  %v5777_v41 = vand.u32 2147483647, %v5761_v49  ;;  %v5960_v32 = vld [vmem:[#allocation5 + $0x8] sm:$0xff]  ;;  %v5965_v6 = vld [vmem:[#allocation5 + $0x30] sm:$0xff]  ;;  %v5802_v31 = vld [vmem:[#allocation4 + $0x20] sm:$0xff] }
 0x272   : > { %v5791_v61 = vadd.f32 %v5790_v13, %v5776_v57  ;;  %7324 = vst [vmem:[%s9107_s4 + $0x38] sm:$0xff] %v5594_v45   ;;  %v5593_v30 = vpack.c.bf16 %v3293_v38, %v3292_v33  ;;  %v5963_v49 = vld [vmem:[#allocation5 + $0x20] sm:$0xff] }
 0x273   : > { %7332 = vst [vmem:[%s9107_s4 + $0x78] sm:$0xff] %v5674_v8   ;;  %v5673_v39 = vpack.c.bf16 %v5584_v20, %v5583_v48  ;;  %v5762_v4 = vsub.f32 %v3293_v38, %v5584_v20  ;;  %v5780_v34 = vand.u32 2147483647, %v5764_v7  ;;  %v5966_v20 = vld [vmem:[#allocation5 + $0x38] sm:$0xff] }
 0x274   : > { %v5792_v17 = vadd.f32 %v5791_v61, %v5777_v41  ;;  %7323 = vst [vmem:[%s9107_s4 + $0x30] sm:$0xff] %v5593_v30   ;;  %5820 = vxpose.xlu0.c.b16.cont [7/8] %v5593_v30, 128  ;;  %8241 = vmatprep.subr.bf16.mxu0 %v5593_v30  ;;  %v5803_v41 = vld [vmem:[#allocation4 + $0x28] sm:$0xff] }
 0x275   : > { %7331 = vst [vmem:[%s9107_s4 + $0x70] sm:$0xff] %v5673_v39   ;;  %v5778_v42 = vand.u32 2147483647, %v5762_v4  ;;  %5981 = vxpose.xlu1.c.b16.cont [7/8] %v5673_v39, 128  ;;  %8273 = vmatprep.subr.bf16.mxu1 %v5673_v39 }
 0x276   : > { %8242 = vmatpush3.bf16.msra.mxu0 %v5593_v30  ;;  %8274 = vmatpush3.bf16.msra.mxu1 %v5673_v39 }
 0x277   : > { %v5793_v59 = vadd.f32 %v5792_v17, %v5778_v42  ;;  %8243 = vmatprep.subr.bf16.mxu0 %v5594_v45  ;;  %8275 = vmatprep.subr.bf16.mxu1 %v5674_v8  ;;  %v5964_v17 = vld [vmem:[#allocation5 + $0x28] sm:$0xff] }
 0x278   : > { %5821 = vxpose.xlu0.c.b16.end [8/8] %v5594_v45, 128 }
 0x279   : > { %v5794_v29 = vadd.f32 %v5793_v59, %v5779_v58  ;;  %5982 = vxpose.xlu1.c.b16.end [8/8] %v5674_v8, 128 }
 0x27a   : > { %8244 = vmatpush3.bf16.msra.mxu0 %v5594_v45  ;;  %8276 = vmatpush3.bf16.msra.mxu1 %v5674_v8  ;;  %v5805_v45 = vld [vmem:[#allocation4 + $0x38] sm:$0xff] }
 0x27b   : > { %v5795_v46 = vadd.f32 %v5794_v29, %v5780_v34 }
 0x27d   : > { %v5796_v63 = vadd.f32 %v5795_v46, %v5748_v25 }
 0x27f   : > { %5797 = vst [vmem:[#allocation3] sm:$0xff] %v5796_v63 }
 0x2c2   : > { %v5822_v18 = vpop.trf.xlu0 }
 0x2c3   : > { %v5983_v62 = vpop.trf.xlu1  ;;  %8245 = vmatprep.mubr.bf16.mxu0 %v5822_v18  ;;  %v5808_v18 = vld [vmem:[#allocation4 + $0x50] sm:$0xff] }
 0x2c4   : > { %8277 = vmatprep.mubr.bf16.mxu1 %v5983_v62  ;;  %v5969_v62 = vld [vmem:[#allocation5 + $0x50] sm:$0xff] }
 0x2c6   : > { %v5823_v44 = vpop.trf.xlu0 }
 0x2c7   : > { %v5984_v11 = vpop.trf.xlu1  ;;  %8246 = vmatmul.mubr.bf16.vlgmr.msra.gmra.mrb[16].mxu0 %v5823_v44  ;;  %v5806_v44 = vld [vmem:[#allocation4 + $0x40] sm:$0xff] }
 0x2c8   : > { %8278 = vmatmul.mubr.bf16.vlgmr.msra.gmra.mrb[16].mxu1 %v5984_v11 }
 0x2ca   : > { %v5824_v35 = vpop.trf.xlu0 }
 0x2cb   : > { %v5985_v27 = vpop.trf.xlu1  ;;  %8249 = vmatprep.mubr.bf16.mxu0 %v5824_v35  ;;  %v5967_v35 = vld [vmem:[#allocation5 + $0x40] sm:$0xff] }
 0x2cc   : > { %8281 = vmatprep.mubr.bf16.mxu1 %v5985_v27  ;;  %v5809_v27 = vld [vmem:[#allocation4 + $0x58] sm:$0xff] }
 0x2ce   : > { %v5825_v55 = vpop.trf.xlu0 }
 0x2cf   : > { %v5986_v53 = vpop.trf.xlu1  ;;  %8250 = vmatmul.mubr.bf16.gmra.mrb[20].mxu0 %v5825_v55 }
 0x2d0   : > { %8282 = vmatmul.mubr.bf16.gmra.mrb[20].mxu1 %v5986_v53 }
 0x2d2   : > { %v5826_v23 = vpop.trf.xlu0 }
 0x2d3   : > { %v5987_v52 = vpop.trf.xlu1  ;;  %8253 = vmatprep.mubr.bf16.mxu0 %v5826_v23 }
 0x2d4   : > { %8285 = vmatprep.mubr.bf16.mxu1 %v5987_v52  ;;  %v5970_v52 = vld [vmem:[#allocation5 + $0x58] sm:$0xff] }
 0x2d6   : > { %v5827_v40 = vpop.trf.xlu0 }
 0x2d7   : > { %v5988_v2 = vpop.trf.xlu1  ;;  %8254 = vmatmul.mubr.bf16.gmra.mrb[24].mxu0 %v5827_v40  ;;  %v5807_v40 = vld [vmem:[#allocation4 + $0x48] sm:$0xff] }
 0x2d8   : > { %8286 = vmatmul.mubr.bf16.gmra.mrb[24].mxu1 %v5988_v2 }
 0x2da   : > { %v5828_v51 = vpop.trf.xlu0 }
 0x2db   : > { %v5989_v9 = vpop.trf.xlu1  ;;  %8257 = vmatprep.mubr.bf16.mxu0 %v5828_v51 }
 0x2dc   : > { %8289 = vmatprep.mubr.bf16.mxu1 %v5989_v9 }
 0x2de   : > { %v5829_v37 = vpop.trf.xlu0 }
 0x2df   : > { %v5990_v43 = vpop.trf.xlu1  ;;  %8258 = vmatmul.mubr.bf16.gmra.mrb[28].mxu0 %v5829_v37 }
 0x2e0   : > { %8290 = vmatmul.mubr.bf16.gmra.mrb[28].mxu1 %v5990_v43  ;;  %v5968_v43 = vld [vmem:[#allocation5 + $0x48] sm:$0xff] }
 0x39a   : > { %v8247_v0 = vpop.f32.mrb[16].mxu0 }
 0x39b   : > { %v5929_v1 = vadd.f32 %v8247_v0, %v5800_v3  ;;  %v8279_v36 = vpop.f32.mrb[16].mxu1  ;;  %v5864_v24 = vpop.f32.mrb[17].mxu0 }
 0x39c   : > { %v6090_v14 = vadd.f32 %v8279_v36, %v5961_v22  ;;  %v5927_v50 = vadd.f32 %v5864_v24, %v5798_v54  ;;  %v6025_v28 = vpop.f32.mrb[17].mxu1  ;;  %v8248_v21 = vpop.f32.mrb[18].mxu0  ;;  %v5812_v24 = vld [vmem:[#allocation4 + $0x70] sm:$0xff] }
 0x39d   : > { %5945 = vst [vmem:[#allocation4 + $0x10] sm:$0xff] %v5929_v1  ;;  %v6088_v33 = vadd.f32 %v6025_v28, %v5959_v56  ;;  %v5930_v60 = vadd.f32 %v8248_v21, %v5801_v47  ;;  %v8280_v16 = vpop.f32.mrb[18].mxu1  ;;  %v5867_v12 = vpop.f32.mrb[19].mxu0  ;;  %v5813_v28 = vld [vmem:[#allocation4 + $0x78] sm:$0xff] }
 0x39e   : > { %6106 = vst [vmem:[#allocation5 + $0x10] sm:$0xff] %v6090_v14  ;;  %5943 = vst [vmem:[#allocation4] sm:$0xff] %v5927_v50  ;;  %v6091_v48 = vadd.f32 %v8280_v16, %v5962_v10  ;;  %v5928_v5 = vadd.f32 %v5867_v12, %v5799_v19  ;;  %v6028_v26 = vpop.f32.mrb[19].mxu1  ;;  %v5973_v10 = vld [vmem:[#allocation5 + $0x70] sm:$0xff]  ;;  %v5810_v19 = vld [vmem:[#allocation4 + $0x60] sm:$0xff] }
 0x39f   : > { %6104 = vst [vmem:[#allocation5] sm:$0xff] %v6088_v33  ;;  %5946 = vst [vmem:[#allocation4 + $0x18] sm:$0xff] %v5930_v60  ;;  %v6089_v57 = vadd.f32 %v6028_v26, %v5960_v32  ;;  %v5971_v50 = vld [vmem:[#allocation5 + $0x60] sm:$0xff]  ;;  %v5974_v60 = vld [vmem:[#allocation5 + $0x78] sm:$0xff] }
 0x3a0   : > { %6107 = vst [vmem:[#allocation5 + $0x18] sm:$0xff] %v6091_v48  ;;  %5944 = vst [vmem:[#allocation4 + $0x8] sm:$0xff] %v5928_v5  ;;  %v5811_v16 = vld [vmem:[#allocation4 + $0x68] sm:$0xff] }
 0x3a1   : > { %6105 = vst [vmem:[#allocation5 + $0x8] sm:$0xff] %v6089_v57  ;;  %v5972_v57 = vld [vmem:[#allocation5 + $0x68] sm:$0xff] }
 0x3a2   : > { %v8251_v13 = vpop.f32.mrb[20].mxu0 }
 0x3a3   : > { %v5933_v38 = vadd.f32 %v8251_v13, %v5804_v15  ;;  %v8283_v8 = vpop.f32.mrb[20].mxu1  ;;  %v5880_v7 = vpop.f32.mrb[21].mxu0 }
 0x3a4   : > { %v6094_v61 = vadd.f32 %v8283_v8, %v5965_v6  ;;  %v5931_v30 = vadd.f32 %v5880_v7, %v5802_v31  ;;  %v6041_v39 = vpop.f32.mrb[21].mxu1  ;;  %v8252_v4 = vpop.f32.mrb[22].mxu0 }
 0x3a5   : > { %5949 = vst [vmem:[#allocation4 + $0x30] sm:$0xff] %v5933_v38  ;;  %v6092_v42 = vadd.f32 %v6041_v39, %v5963_v49  ;;  %v5934_v58 = vadd.f32 %v8252_v4, %v5805_v45  ;;  %v8284_v59 = vpop.f32.mrb[22].mxu1  ;;  %v5883_v34 = vpop.f32.mrb[23].mxu0  ;;  %v6136_v7 = vld [vmem:[#allocation4] sm:$0xff] (!%p7196_p8) }
 0x3a6   : > { %6110 = vst [vmem:[#allocation5 + $0x30] sm:$0xff] %v6094_v61  ;;  %5947 = vst [vmem:[#allocation4 + $0x20] sm:$0xff] %v5931_v30  ;;  %v6095_v29 = vadd.f32 %v8284_v59, %v5966_v20  ;;  %v5932_v25 = vadd.f32 %v5883_v34, %v5803_v41  ;;  %v6044_v46 = vpop.f32.mrb[23].mxu1  ;;  %v6152_v20 = vld [vmem:[#allocation5] sm:$0xff] (!%p7196_p8)  ;;  %v6138_v41 = vld [vmem:[#allocation4 + $0x10] sm:$0xff] (!%p7196_p8) }
 0x3a7   : > { %6108 = vst [vmem:[#allocation5 + $0x20] sm:$0xff] %v6092_v42  ;;  %5950 = vst [vmem:[#allocation4 + $0x38] sm:$0xff] %v5934_v58  ;;  %v6093_v63 = vadd.f32 %v6044_v46, %v5964_v17  ;;  %v6168_v61 = vsub.f32 (!%p7196_p8), %v6136_v7, %v6152_v20  ;;  %v6154_v30 = vld [vmem:[#allocation5 + $0x10] sm:$0xff] (!%p7196_p8)  ;;  %v6137_v39 = vld [vmem:[#allocation4 + $0x8] sm:$0xff] (!%p7196_p8) }
 0x3a8   : > { %6111 = vst [vmem:[#allocation5 + $0x38] sm:$0xff] %v6095_v29  ;;  %5948 = vst [vmem:[#allocation4 + $0x28] sm:$0xff] %v5932_v25  ;;  %v6153_v4 = vld [vmem:[#allocation5 + $0x8] sm:$0xff] (!%p7196_p8)  ;;  %v6170_v17 = vsub.f32 (!%p7196_p8), %v6138_v41, %v6154_v30  ;;  %v6139_v58 = vld [vmem:[#allocation4 + $0x18] sm:$0xff] (!%p7196_p8) }
 0x3a9   : > { %6109 = vst [vmem:[#allocation5 + $0x28] sm:$0xff] %v6093_v63  ;;  %v6169_v42 = vsub.f32 (!%p7196_p8), %v6137_v39, %v6153_v4  ;;  %v6155_v59 = vld [vmem:[#allocation5 + $0x18] sm:$0xff] (!%p7196_p8)  ;;  %v6184_v29 = vand.u32 (!%p7196_p8), 2147483647, %v6168_v61 }
 0x3aa   : > { %v8255_v11 = vpop.f32.mrb[24].mxu0  ;;  %v6171_v25 = vsub.f32 (!%p7196_p8), %v6139_v58, %v6155_v59 }
 0x3ab   : > { %v5937_v55 = vadd.f32 %v8255_v11, %v5808_v18  ;;  %v8287_v53 = vpop.f32.mrb[24].mxu1  ;;  %v5896_v23 = vpop.f32.mrb[25].mxu0 }
 0x3ac   : > { %v6098_v2 = vadd.f32 %v8287_v53, %v5969_v62  ;;  %v5935_v51 = vadd.f32 %v5896_v23, %v5806_v44  ;;  %v6057_v9 = vpop.f32.mrb[25].mxu1  ;;  %v8256_v37 = vpop.f32.mrb[26].mxu0  ;;  %v6186_v62 = vand.u32 (!%p7196_p8), 2147483647, %v6170_v17  ;;  %v6185_v44 = vand.u32 (!%p7196_p8), 2147483647, %v6169_v42 }
 0x3ad   : > { %5953 = vst [vmem:[#allocation4 + $0x50] sm:$0xff] %v5937_v55  ;;  %v6096_v3 = vadd.f32 %v6057_v9, %v5967_v35  ;;  %v5938_v22 = vadd.f32 %v8256_v37, %v5809_v27  ;;  %v8288_v54 = vpop.f32.mrb[26].mxu1  ;;  %v5899_v0 = vpop.f32.mrb[27].mxu0  ;;  %v6140_v34 = vld [vmem:[#allocation4 + $0x20] sm:$0xff] (!%p7196_p8)  ;;  %v6142_v27 = vld [vmem:[#allocation4 + $0x30] sm:$0xff] (!%p7196_p8)  ;;  %v6200_v53 = vmul.f32 (!%p7196_p8), 0.00024414063, %v6184_v29 }
 0x3ae   : > { %6114 = vst [vmem:[#allocation5 + $0x50] sm:$0xff] %v6098_v2  ;;  %5951 = vst [vmem:[#allocation4 + $0x40] sm:$0xff] %v5935_v51  ;;  %v6099_v56 = vadd.f32 %v8288_v54, %v5970_v52  ;;  %v5936_v47 = vadd.f32 %v5899_v0, %v5807_v40  ;;  %v6060_v1 = vpop.f32.mrb[27].mxu1  ;;  %v6156_v46 = vld [vmem:[#allocation5 + $0x20] sm:$0xff] (!%p7196_p8)  ;;  %v6158_v55 = vld [vmem:[#allocation5 + $0x30] sm:$0xff] (!%p7196_p8)  ;;  %v6202_v2 = vmul.f32 (!%p7196_p8), 0.00024414063, %v6186_v62 }
 0x3af   : > { %6112 = vst [vmem:[#allocation5 + $0x40] sm:$0xff] %v6096_v3  ;;  %5954 = vst [vmem:[#allocation4 + $0x58] sm:$0xff] %v5938_v22  ;;  %v6097_v36 = vadd.f32 %v6060_v1, %v5968_v43  ;;  %v6141_v63 = vld [vmem:[#allocation4 + $0x28] sm:$0xff] (!%p7196_p8)  ;;  %v6172_v11 = vsub.f32 (!%p7196_p8), %v6140_v34, %v6156_v46  ;;  %v6187_v23 = vand.u32 (!%p7196_p8), 2147483647, %v6171_v25  ;;  %v6143_v52 = vld [vmem:[#allocation4 + $0x38] sm:$0xff] (!%p7196_p8)  ;;  %6216 = vadd.xlane.f32.xlu0 (!%p7196_p8), %v6200_v53 }
 0x3b0   : > { %6115 = vst [vmem:[#allocation5 + $0x58] sm:$0xff] %v6099_v56  ;;  %5952 = vst [vmem:[#allocation4 + $0x48] sm:$0xff] %v5936_v47  ;;  %v6157_v18 = vld [vmem:[#allocation5 + $0x28] sm:$0xff] (!%p7196_p8)  ;;  %v6159_v40 = vld [vmem:[#allocation5 + $0x38] sm:$0xff] (!%p7196_p8)  ;;  %v6201_v51 = vmul.f32 (!%p7196_p8), 0.00024414063, %v6185_v44  ;;  %v6174_v37 = vsub.f32 (!%p7196_p8), %v6142_v27, %v6158_v55  ;;  %6220 = vadd.xlane.f32.xlu1 (!%p7196_p8), %v6202_v2  ;;  %v8911_v62 = vmov (!%p7196_p8), 0.0  }
 0x3b1   : > { %6113 = vst [vmem:[#allocation5 + $0x48] sm:$0xff] %v6097_v36  ;;  %v6173_v35 = vsub.f32 (!%p7196_p8), %v6141_v63, %v6157_v18  ;;  %v6188_v9 = vand.u32 (!%p7196_p8), 2147483647, %v6172_v11  ;;  %v6203_v43 = vmul.f32 (!%p7196_p8), 0.00024414063, %v6187_v23  ;;  %v6175_v22 = vsub.f32 (!%p7196_p8), %v6143_v52, %v6159_v40  ;;  %v6126_v18 = vld [vmem:[#allocation3] sm:$0xff] (!%p7196_p8) }
 0x3b2   : > { %v8259_v14 = vpop.f32.mrb[28].mxu0  ;;  %v6190_v36 = vand.u32 (!%p7196_p8), 2147483647, %v6174_v37  ;;  %6125 = vst.msk [vmem:[%s9111_s21] sm:$0x1] (!%p7196_p8), %vm6124_vm6, %v8911_v62 }
 0x3b3   : > { %v5941_v21 = vadd.f32 %v8259_v14, %v5812_v24  ;;  %v8291_v32 = vpop.f32.mrb[28].mxu1  ;;  %v5912_v33 = vpop.f32.mrb[29].mxu0  ;;  %6123 = sbr.rel (%p7196_p8) target bundleno = 1132 (0x46c), region = 44  ;;  %v6189_v3 = vand.u32 (!%p7196_p8), 2147483647, %v6173_v35  ;;  %6218 = vadd.xlane.f32.xlu0 (!%p7196_p8), %v6201_v51  ;;  %v6204_v1 = vmul.f32 (!%p7196_p8), 0.00024414063, %v6188_v9 }
 0x3b4   : > { %v6102_v12 = vadd.f32 %v8291_v32, %v5973_v10  ;;  %v5939_v48 = vadd.f32 %v5912_v33, %v5810_v19  ;;  %v6073_v5 = vpop.f32.mrb[29].mxu1  ;;  %v8260_v26 = vpop.f32.mrb[30].mxu0  ;;  %6222 = vadd.xlane.f32.xlu1 (!%p7196_p8), %v6203_v43  ;;  %v6191_v19 = vand.u32 (!%p7196_p8), 2147483647, %v6175_v22  ;;  %v6206_v33 = vmul.f32 (!%p7196_p8), 0.00024414063, %v6190_v36 }
 0x3b5   : > { %5957 = vst [vmem:[#allocation4 + $0x70] sm:$0xff] %v5941_v21  ;;  %v6100_v15 = vadd.f32 %v6073_v5, %v5971_v50  ;;  %v5942_v6 = vadd.f32 %v8260_v26, %v5813_v28  ;;  %v8292_v31 = vpop.f32.mrb[30].mxu1  ;;  %v5915_v13 = vpop.f32.mrb[31].mxu0  ;;  %v6144_v54 = vld [vmem:[#allocation4 + $0x40] sm:$0xff] (!%p7196_p8)  ;;  %v6205_v10 = vmul.f32 (!%p7196_p8), 0.00024414063, %v6189_v3  ;;  %v6146_v50 = vld [vmem:[#allocation4 + $0x50] sm:$0xff] (!%p7196_p8) }
 0x3b6   : > { %6118 = vst [vmem:[#allocation5 + $0x70] sm:$0xff] %v6102_v12  ;;  %5955 = vst [vmem:[#allocation4 + $0x60] sm:$0xff] %v5939_v48  ;;  %v6103_v49 = vadd.f32 %v8292_v31, %v5974_v60  ;;  %v5940_v45 = vadd.f32 %v5915_v13, %v5811_v16  ;;  %v6076_v38 = vpop.f32.mrb[31].mxu1  ;;  %v6160_v0 = vld [vmem:[#allocation5 + $0x40] sm:$0xff] (!%p7196_p8)  ;;  %v6162_v28 = vld [vmem:[#allocation5 + $0x50] sm:$0xff] (!%p7196_p8)  ;;  %v6207_v12 = vmul.f32 (!%p7196_p8), 0.00024414063, %v6191_v19 }
 0x3b7   : > { %6116 = vst [vmem:[#allocation5 + $0x60] sm:$0xff] %v6100_v15  ;;  %5958 = vst [vmem:[#allocation4 + $0x78] sm:$0xff] %v5942_v6  ;;  %v6101_v8 = vadd.f32 %v6076_v38, %v5972_v57  ;;  %v6145_v56 = vld [vmem:[#allocation4 + $0x48] sm:$0xff] (!%p7196_p8)  ;;  %v6176_v24 = vsub.f32 (!%p7196_p8), %v6144_v54, %v6160_v0  ;;  %v6147_v21 = vld [vmem:[#allocation4 + $0x58] sm:$0xff] (!%p7196_p8)  ;;  %6224 = vadd.xlane.f32.xlu0 (!%p7196_p8), %v6204_v1  ;;  %v6178_v16 = vsub.f32 (!%p7196_p8), %v6146_v50, %v6162_v28 }
 0x3b8   : > { %6119 = vst [vmem:[#allocation5 + $0x78] sm:$0xff] %v6103_v49  ;;  %5956 = vst [vmem:[#allocation4 + $0x68] sm:$0xff] %v5940_v45  ;;  %v6161_v47 = vld [vmem:[#allocation5 + $0x48] sm:$0xff] (!%p7196_p8)  ;;  %v6163_v32 = vld [vmem:[#allocation5 + $0x58] sm:$0xff] (!%p7196_p8)  ;;  %6226 = vadd.xlane.f32.xlu1 (!%p7196_p8), %v6205_v10 }
 0x3b9   : > { %6117 = vst [vmem:[#allocation5 + $0x68] sm:$0xff] %v6101_v8  ;;  %v6177_v14 = vsub.f32 (!%p7196_p8), %v6145_v56, %v6161_v47  ;;  %v6192_v60 = vand.u32 (!%p7196_p8), 2147483647, %v6176_v24  ;;  %v6179_v5 = vsub.f32 (!%p7196_p8), %v6147_v21, %v6163_v32  ;;  %v6194_v13 = vand.u32 (!%p7196_p8), 2147483647, %v6178_v16 }
 0x3bb   : > { %v6193_v48 = vand.u32 2147483647, %v6177_v14  ;;  %6228 = vadd.xlane.f32.xlu0 %v6206_v33  ;;  %v6208_v31 = vmul.f32 0.00024414063, %v6192_v60  ;;  %v6195_v38 = vand.u32 2147483647, %v6179_v5  ;;  %v6210_v30 = vmul.f32 0.00024414063, %v6194_v13 }
 0x3bc   : > { %6230 = vadd.xlane.f32.xlu1 %v6207_v12  ;;  %v6150_v7 = vld [vmem:[#allocation4 + $0x70] sm:$0xff] }
 0x3bd   : > { %v6148_v26 = vld [vmem:[#allocation4 + $0x60] sm:$0xff]  ;;  %v6209_v45 = vmul.f32 0.00024414063, %v6193_v48  ;;  %v6166_v20 = vld [vmem:[#allocation5 + $0x70] sm:$0xff]  ;;  %v6211_v17 = vmul.f32 0.00024414063, %v6195_v38 }
 0x3be   : > { %v6164_v57 = vld [vmem:[#allocation5 + $0x60] sm:$0xff]  ;;  %v6151_v41 = vld [vmem:[#allocation4 + $0x78] sm:$0xff]  ;;  %v6182_v4 = vsub.f32 %v6150_v7, %v6166_v20 }
 0x3bf   : > { %v6149_v15 = vld [vmem:[#allocation4 + $0x68] sm:$0xff]  ;;  %v6180_v49 = vsub.f32 %v6148_v26, %v6164_v57  ;;  %v6167_v61 = vld [vmem:[#allocation5 + $0x78] sm:$0xff]  ;;  %6232 = vadd.xlane.f32.xlu0 %v6208_v31 }
 0x3c0   : > { %v6165_v6 = vld [vmem:[#allocation5 + $0x68] sm:$0xff]  ;;  %6234 = vadd.xlane.f32.xlu1 %v6209_v45  ;;  %v6183_v58 = vsub.f32 %v6151_v41, %v6167_v61  ;;  %v6198_v34 = vand.u32 2147483647, %v6182_v4 }
 0x3c1   : > { %v6181_v8 = vsub.f32 %v6149_v15, %v6165_v6  ;;  %v6196_v39 = vand.u32 2147483647, %v6180_v49 }
 0x3c2   : > { %v6199_v25 = vand.u32 2147483647, %v6183_v58  ;;  %v6214_v46 = vmul.f32 0.00024414063, %v6198_v34 }
 0x3c3   : > { %v6197_v42 = vand.u32 2147483647, %v6181_v8  ;;  %6236 = vadd.xlane.f32.xlu0 %v6210_v30  ;;  %v6212_v59 = vmul.f32 0.00024414063, %v6196_v39 }
 0x3c4   : > { %6238 = vadd.xlane.f32.xlu1 %v6211_v17  ;;  %v6215_v63 = vmul.f32 0.00024414063, %v6199_v25 }
 0x3c5   : > { %v6213_v29 = vmul.f32 0.00024414063, %v6197_v42 }
 0x3c7   : > { %6240 = vadd.xlane.f32.xlu0 %v6212_v59 }
 0x3c8   : > { %6242 = vadd.xlane.f32.xlu1 %v6213_v29 }
 0x3cb   : > { %6244 = vadd.xlane.f32.xlu0 %v6214_v46 }
 0x3cc   : > { %6246 = vadd.xlane.f32.xlu1 %v6215_v63 }
 0x3cf   : > { %6127 = vadd.xlane.f32.xlu0 %v6126_v18 }
 0x43c   : > { %v6217_v44 = vpop.xlane.xlu0 %6216 }
 0x43d   : > { %v6221_v11 = vpop.xlane.xlu1 %6220 }
 0x440   : > { %v6219_v35 = vpop.xlane.xlu0 %6218 }
 0x441   : > { %v6248_v27 = vadd.f32 %v6219_v35, %v6217_v44  ;;  %v6223_v55 = vpop.xlane.xlu1 %6222 }
 0x443   : > { %v6249_v53 = vadd.f32 %v6248_v27, %v6221_v11 }
 0x444   : > { %v6225_v23 = vpop.xlane.xlu0 %6224 }
 0x445   : > { %v6250_v52 = vadd.f32 %v6249_v53, %v6223_v55  ;;  %v6227_v40 = vpop.xlane.xlu1 %6226 }
 0x447   : > { %v6251_v2 = vadd.f32 %v6250_v52, %v6225_v23 }
 0x448   : > { %v6229_v51 = vpop.xlane.xlu0 %6228 }
 0x449   : > { %v6252_v9 = vadd.f32 %v6251_v2, %v6227_v40  ;;  %v6231_v37 = vpop.xlane.xlu1 %6230 }
 0x44b   : > { %v6253_v43 = vadd.f32 %v6252_v9, %v6229_v51 }
 0x44c   : > { %v6233_v3 = vpop.xlane.xlu0 %6232 }
 0x44d   : > { %v6254_v22 = vadd.f32 %v6253_v43, %v6231_v37  ;;  %v6235_v54 = vpop.xlane.xlu1 %6234 }
 0x44f   : > { %v6255_v0 = vadd.f32 %v6254_v22, %v6233_v3 }
 0x450   : > { %v6237_v56 = vpop.xlane.xlu0 %6236 }
 0x451   : > { %v6256_v47 = vadd.f32 %v6255_v0, %v6235_v54  ;;  %v6239_v1 = vpop.xlane.xlu1 %6238 }
 0x453   : > { %v6257_v36 = vadd.f32 %v6256_v47, %v6237_v56 }
 0x454   : > { %v6241_v24 = vpop.xlane.xlu0 %6240 }
 0x455   : > { %v6258_v10 = vadd.f32 %v6257_v36, %v6239_v1  ;;  %v6243_v19 = vpop.xlane.xlu1 %6242 }
 0x457   : > { %v6259_v14 = vadd.f32 %v6258_v10, %v6241_v24 }
 0x458   : > { %v6245_v50 = vpop.xlane.xlu0 %6244 }
 0x459   : > { %v6260_v28 = vadd.f32 %v6259_v14, %v6243_v19  ;;  %v6247_v21 = vpop.xlane.xlu1 %6246 }
 0x45b   : > { %v6261_v32 = vadd.f32 %v6260_v28, %v6245_v50 }
 0x45c   : > { %v6128_v33 = vpop.xlane.xlu0 %6127 }
 0x45d   : > { %v6262_v60 = vadd.f32 %v6261_v32, %v6247_v21  ;;  %v6129_v16 = vrot.slane %v6128_v33, 4 }
 0x45f   : > { %v6263_v12 = vrot.slane %v6262_v60, 4  ;;  %v6130_v48 = vadd.f32 %v6129_v16, %v6128_v33 }
 0x461   : > { %v6264_v5 = vadd.f32 %v6263_v12, %v6262_v60  ;;  %v6131_v26 = vrot.slane %v6130_v48, 2 }
 0x463   : > { %v6265_v57 = vrot.slane %v6264_v5, 2  ;;  %v6132_v15 = vadd.f32 %v6131_v26, %v6130_v48 }
 0x465   : > { %v6266_v6 = vadd.f32 %v6265_v57, %v6264_v5  ;;  %v6133_v31 = vrot.slane %v6132_v15, 1 }
 0x467   : > { %v6267_v13 = vrot.slane %v6266_v6, 1  ;;  %v6134_v49 = vadd.f32 %v6133_v31, %v6132_v15 }
 0x469   : > { %v6268_v45 = vadd.f32 %v6267_v13, %v6266_v6  ;;  %6135 = vst.msk [vmem:[%s365_s10] sm:$0x1] %vm6124_vm6, %v6134_v49 }
 0x46b   : > { %6269 = vst.msk [vmem:[%s368_s16] sm:$0x1] %vm6124_vm6, %v6268_v45 }
 0x46c PF: > { %s11756_s9 = sand.u32 1, %s8884_s28   ;;  %s11757_s14 = sand.u32 1, %s8872_s25  }
 0x46d   : > { %s6271_s11 = scalar_lea.sflag [#allocation7], %s11756_s9  ;;  %s11456_s17 = scalar_lea.sflag [#allocation9], %s11757_s14 }
 0x46e   : > { %s7237_s10 = sshll.u32 %s8892_s30, 4  ;;  %s7200_s18 = sshll.u32 %s8896_s8, 6 }
 0x46f   : > { %s6294_s16 = sadd.s32 %s7237_s10, %s7200_s18  ;;  %s6313_s20 = sshll.u32 %s9107_s4, 4  ;;  %s6314_s20 = int_to_ptr.vmem [resolvable:$true] %s6313_s20 }
 0x470   : > { %s7201_s23 = sshll.u32 %s6294_s16, 6  ;;  %s11758_s5 = sld [smem:[#allocation49_spill]] }
 0x471   : > { %s8912_s13 = smov 1024   ;;  %s8913_s24 = smov 2048  }
 0x472   : > { %8551 = sst [smem:[#allocation11]] (%p9033_p3), %s8912_s13  ;;  %s8914_s26 = smov 16  }
 0x473   : > { %8552 = sst [smem:[#allocation11 + $0x1]] (%p9033_p3), %s8913_s24  ;;  %s8915_s30 = smov 64  }
 0x474   : > { %8553 = sst [smem:[#allocation11 + $0x2]] (%p9033_p3), %s8914_s26  ;;  %s8916_s4 = smov 4  }
 0x475   : > { %8554 = sst [smem:[#allocation11 + $0x3]] (%p9033_p3), %s8915_s30  ;;  %s8917_s27 = smov [#allocation10]  }
 0x476   : > { %s6296_s22 = scalar_lea.hbm %s11758_s5, %s7201_s23  ;;  %8555 = sst [smem:[#allocation11 + $0x4]] (%p9033_p3), %s8915_s30 }
 0x477   : > { %8556 = sst [smem:[#allocation11 + $0x5]] (%p9033_p3), %s8916_s4  ;;  %s8918_s29 = smov 0  }
 0x478   : > { %8557 = dma.general (%p9033_p3), %s6314_s20, 2048, %s6296_s22, %s6271_s11, %s8917_s27, [#allocation11], %s8918_s29, 0  }
 0x479   : > { %s7202_s14 = sshll.u32 %s8896_s8, 4  ;;  %s6342_s10 = sshll.u32 %s9111_s21, 4  ;;  %s6343_s10 = int_to_ptr.vmem [resolvable:$true] %s6342_s10 }
 0x47a   : > { %s11760_s23 = sld [smem:[#allocation50_spill]]  ;;  %s8786_s15 = scalar_lea.vmem %s6343_s10, 16 }
 0x47b   : > { %p8787_p9 = scmp.ne.s32.totalorder %s6343_s10, %s8786_s15  ;;  %s8919_s5 = smov [#allocation8]  }
 0x47c   : > { %s8790_s13 = sshll.u32 %s8919_s5, 4  ;;  %s8791_s13 = int_to_ptr.vmem [resolvable:$false] %s8790_s13 }
 0x47d   : > { %p8788_p10 = pnand %p8787_p9, %p9060_p12  ;;  %s8792_s19 = scalar_lea.vmem %s8791_s13, 32 }
 0x47e   : > { %p8793_p3 = scmp.lt.s32.totalorder %s6343_s10, %s8791_s13  ;;  %p8794_p0 = scmp.lt.s32.totalorder %s8792_s19, %s8786_s15 }
 0x47f   : > { %p8789_p11 = pneg %p8788_p10 }
 0x480   : > { %s6340_s12 = scalar_lea.hbm %s11760_s23, %s7202_s14  ;;  %p8795_p1 = por %p8794_p0, %p8793_p3 }
 0x482   : > { %p8796_p4 = pnand %p8795_p1, %p8789_p11 }
 0x484   : > { %8799 = shalt.err (!%p8796_p4)
}
 0x485   : > { %s8800_s8 = scalar_lea.hbm %s6340_s12, 16  ;;  %s8804_s20 = scalar_lea.hbm %s11760_s23, 32 }
 0x486   : > { %p8801_p2 = scmp.ne.s32.totalorder %s6340_s12, %s8800_s8  ;;  %p8805_p8 = scmp.lt.u32.totalorder %s6340_s12, %s11760_s23 }
 0x487   : > { %p8806_p9 = scmp.lt.u32.totalorder %s8804_s20, %s8800_s8  ;;  %p8808_p13 = scmp.lt.u32.totalorder %s8800_s8, %s6340_s12 }
 0x488   : > { %p8802_p5 = pnand %p8801_p2, %p9060_p12 }
 0x489   : > { %p8807_p10 = por %p8806_p9, %p8805_p8 }
 0x48a   : > { %p8803_p6 = pneg %p8802_p5 }
 0x48b   : > { %p8809_p3 = por %p8808_p13, %p8807_p10 }
 0x48d   : > { %p8810_p11 = pnand %p8809_p3, %p8803_p6 }
 0x48f   : > { %8813 = shalt.err (!%p8810_p11)
}
 0x490   : > { %8558 = dma.vmem_to_hbm [thread:$0]  (%p9060_p12), %s6343_s10, 16, %s6340_s12, %s11456_s17  }
 0x491 PF: > { %s11761_s26 = sld [smem:[#allocation20_spill]]  ;;  %s11762_s30 = sld [smem:[#allocation16_spill]] }
 0x497   : > { %p8568_p0 = scmp.ge.s32.totalorder %s11761_s26, 2  ;;  %s6360_s27 = sand.u32 1, %s11762_s30  }
 0x498   : > { %s6361_s29 = scalar_lea.sflag [#allocation7], %s6360_s27 }
 0x499   : > { %p8562_p1 = pnand %p8568_p0, %p9048_p7 }
 0x49b   : > { %8859 = dma.done.wait (!%p8562_p1), %s6361_s29, 2048  }
 0x49c   : > { %8861 = vsyncadd (!%p8562_p1), %s6361_s29, 4294965248  ;;  %s11764_s14 = sld [smem:[#allocation14_spill]]  ;;  %s11765_s18 = sld [smem:[#allocation27_spill]] }
 0x4a2   : > { %s6369_s16 = sand.u32 1, %s11764_s14   ;;  %p11766_p13 = scmp.ne.s32.totalorder %s11765_s18, 0 }
 0x4a3   : > { %s6370_s15 = scalar_lea.sflag [#allocation9], %s6369_s16 }
 0x4a4   : > { %p8565_p4 = pnand %p8568_p0, %p11766_p13 }
 0x4a6   : > { %8863 = dma.done.wait (!%p8565_p4), %s6370_s15, 16  }
 0x4a7   : > { %8865 = vsyncadd (!%p8565_p4), %s6370_s15, 4294967280  ;;  %s24_s11 = sadd.s32 1, %s11761_s26   ;;  %s11767_s17 = sld [smem:[#allocation15_spill]] }
 0x4a8   : > { %p21_p12 = scmp.ge.s32.totalorder %s24_s11, 6   ;;  %s11768_s26 = sld [smem:[#allocation25_spill]] }
 0x4a9   : > { %s11769_s9 = sld [smem:[#allocation17_spill]]  ;;  %s11770_s29 = sld [smem:[#allocation26_spill]] }
 0x4aa   : > { %s11771_s30 = sld [smem:[#allocation18_spill]]  ;;  %s11772_s8 = sld [smem:[#allocation19_spill]] }
 0x4ab   : > { %s11773_s10 = sld [smem:[#allocation21_spill]]  ;;  %s11774_s12 = sld [smem:[#allocation22_spill]] }
 0x4ac   : > { %s11775_s24 = smov %s8872_s25  ;;  %s11777_s27 = smov %s8884_s28 }
 0x4ad   : > { %s11776_s25 = smov %s11767_s17  ;;  %23 = sbr.rel (!%p21_p12) target bundleno = 12 (0xc), region = 141 }
 0x4af   : > { %s11778_s28 = smov %s11769_s9 }
 0x4b1   : > { %s11779_s9 = smov %s11773_s10  ;;  %s11780_s10 = smov %s11774_s12 }
 0x4b4   :  { %6386 = vsyncpa [#allocation7], 1 }
 0x4b5   :  { %6388 = vsyncpa [#allocation7 + $0x1], 1 }
 0x4b6   :  { %6389 = vsyncpa [#allocation9], 1 }
 0x4b7   :  { %6391 = vsyncpa [#allocation9 + $0x1], 1 }

</bundles_post_ra>
